<compile_context>
chip_gen: v7x
topology: tpu7x:2x2x1
jax: 0.10.0
libtpu: 0.0.40
codegen_flags: <defaults>
</compile_context>

<pallas_src>
import math
from functools import partial

import jax
import jax.numpy as jnp
from jax import lax
from jax.experimental import pallas as pl
from jax.experimental.pallas import tpu as pltpu

SLOPE = 0.01          # nn.LeakyReLU / F.leaky_relu default negative_slope
_CIN_PAD = 8          # stem input channels padded 3 -> 8 (aligned MXU contraction)
_BN_EPS = 1e-5


# --------------------------------------------------------------------------- helpers

def _round_up(x, m):
    return (x + m - 1) // m * m


def _lrelu(x):
    return jnp.where(x >= 0, x, SLOPE * x)


def _vmem_limit_bytes():
    # Generation-aware scoped-VMEM request (review): v5e/v6e have 128 MiB, v7x only 64 MiB.
    try:
        kind = jax.devices()[0].device_kind.lower()
    except Exception:
        kind = ""
    if "v7" in kind:
        return 40 * 1024 * 1024
    if "v5" in kind or "v6" in kind:
        return 96 * 1024 * 1024
    return 32 * 1024 * 1024


_VMEM_LIMIT = [None]


def _cparams(*sem):
    if _VMEM_LIMIT[0] is None:
        _VMEM_LIMIT[0] = _vmem_limit_bytes()
    return pltpu.CompilerParams(dimension_semantics=sem,
                                vmem_limit_bytes=_VMEM_LIMIT[0])


def _fold_bn(bn):
    scale = bn['gamma'] / jnp.sqrt(bn['var'] + _BN_EPS)
    shift = bn['beta'] - bn['mean'] * scale
    return scale, shift


def _interior_mask(h, w):
    """(1, L) f32 mask: 1 on real pixels, 0 on the zero ring / dead lane padding."""
    hp, wp = h + 2, w + 2
    l = _round_up(hp * wp, 128)
    q = jnp.arange(l)
    y, x = q // wp, q % wp
    m = (q < hp * wp) & (y >= 1) & (y <= h) & (x >= 1) & (x <= w)
    return m.astype(jnp.float32).reshape(1, l)


def _slab_layout(arr, axis, lay, total):
    """Scatter logically-ordered channel params [block_input, new_0, new_1, ...] onto the
    slab channel layout [input, 0-pad to c_pad, (new_j, 0-pad to group) per layer, 0-tail]."""
    c_in, c_pad = lay['c_in'], lay['c_pad']
    growth, group = lay['growth'], lay['group']

    def zeros(k):
        zshape = list(arr.shape)
        zshape[axis] = k
        return jnp.zeros(zshape, arr.dtype)

    pieces = [lax.slice_in_dim(arr, 0, c_in, axis=axis)]
    if c_pad > c_in:
        pieces.append(zeros(c_pad - c_in))
    nlay = (arr.shape[axis] - c_in) // growth
    for j in range(nlay):
        pieces.append(lax.slice_in_dim(arr, c_in + j * growth,
                                       c_in + (j + 1) * growth, axis=axis))
        if group > growth:
            pieces.append(zeros(group - growth))
    tail = total - (c_pad + nlay * group)
    if tail > 0:
        pieces.append(zeros(tail))
    return jnp.concatenate(pieces, axis=axis)


def _tap_stack(a, wp, l):
    """Stack the nine 3x3-tap shifts of `a` (channels x padded-pixels) along channels.

    Row block k = 3*dy + dx holds a[:, q + (dy-1)*wp + (dx-1)] (np.roll semantics of
    pltpu.roll); out-of-image taps are zero because the padding ring is zero / masked."""
    taps = []
    for dy in range(3):
        for dx in range(3):
            s = (dy - 1) * wp + (dx - 1)
            taps.append(a if s == 0 else pltpu.roll(a, shift=(-s) % l, axis=1))
    return jnp.concatenate(taps, axis=0)


# ------------------------------------------------------------------ kernel 1: stem 3x3 conv

def _stem_kernel(x_ref, mask_ref, w_ref, o_ref, *, wp, l):
    x = x_ref[...]                                               # (Cin_pad, L) f32, zero ring
    stack = _tap_stack(x, wp, l).astype(jnp.bfloat16)            # single bf16 cast of the stack
    y = jnp.dot(w_ref[...], stack, preferred_element_type=jnp.float32)  # ONE K=9*Cin matmul
    o_ref[...] = (y * mask_ref[...]).astype(o_ref.dtype)         # lane-dense bf16 store


def stem_conv(x_cf, mask, w, *, n, l, wp):
    cin = x_cf.shape[0]
    c0 = w.shape[0]
    return pl.pallas_call(
        partial(_stem_kernel, wp=wp, l=l),
        out_shape=jax.ShapeDtypeStruct((c0, n * l), jnp.bfloat16),
        grid=(n,),
        in_specs=[pl.BlockSpec((cin, l), lambda i: (0, i)),
                  pl.BlockSpec((1, l), lambda i: (0, 0)),
                  pl.BlockSpec((c0, 9 * cin), lambda i: (0, 0))],
        out_specs=pl.BlockSpec((c0, l), lambda i: (0, i)),
        compiler_params=_cparams("parallel"),
    )(x_cf, mask, w)


# ---------------------------------------------- kernel 2: fused BottleNeck dense layer

def _dense_layer_kernel(slab_ref, mask_ref, s1_ref, t1_ref, w1_ref,
                        s2_ref, t2_ref, w2_ref, o_ref, *, wp, l):
    x = slab_ref[...].astype(jnp.float32)                        # (Cslab, L) bf16 -> f32
    h = _lrelu(x * s1_ref[...] + t1_ref[...])                    # BN1 + LeakyReLU (VPU)
    m = jnp.dot(w1_ref[...], h.astype(jnp.bfloat16),             # 1x1 conv (MXU, bf16)
                preferred_element_type=jnp.float32)              # (mid, L)
    a = _lrelu(m * s2_ref[...] + t2_ref[...]) * mask_ref[...]    # BN2+LReLU, zero conv padding
    stack = _tap_stack(a, wp, l).astype(jnp.bfloat16)            # (9*mid, L), single cast
    new = jnp.dot(w2_ref[...], stack,                            # 3x3 conv: ONE K=9*mid push
                  preferred_element_type=jnp.float32)            # (growth, L)
    new = new * mask_ref[...]
    pad_rows = o_ref.shape[0] - new.shape[0]                     # fill the 16-row channel group
    if pad_rows:
        new = jnp.concatenate(
            [new, jnp.zeros((pad_rows, new.shape[1]), new.dtype)], axis=0)
    o_ref[...] = new.astype(o_ref.dtype)                         # lane-dense bf16 store


def dense_layer(slab, mask, p, *, lay, c_off, n, l, wp):
    c_slab = slab.shape[0]
    mid = p['conv1'].shape[0]
    group = lay['group']
    s1, t1 = _fold_bn(p['bn1'])
    s1 = _slab_layout(s1, 0, lay, c_slab).reshape(c_slab, 1)
    t1 = _slab_layout(t1, 0, lay, c_slab).reshape(c_slab, 1)
    w1 = _slab_layout(p['conv1'], 1, lay, c_slab)                # (mid, c_slab) bf16
    s2, t2 = _fold_bn(p['bn2'])
    s2, t2 = s2.reshape(mid, 1), t2.reshape(mid, 1)
    growth = p['conv2'].shape[0]
    return pl.pallas_call(
        partial(_dense_layer_kernel, wp=wp, l=l),
        out_shape=jax.ShapeDtypeStruct(slab.shape, slab.dtype),
        grid=(n,),
        in_specs=[pl.BlockSpec((c_slab, l), lambda i: (0, i)),
                  pl.BlockSpec((1, l), lambda i: (0, 0)),
                  pl.BlockSpec((c_slab, 1), lambda i: (0, 0)),
                  pl.BlockSpec((c_slab, 1), lambda i: (0, 0)),
                  pl.BlockSpec((mid, c_slab), lambda i: (0, 0)),
                  pl.BlockSpec((mid, 1), lambda i: (0, 0)),
                  pl.BlockSpec((mid, 1), lambda i: (0, 0)),
                  pl.BlockSpec((growth, 9 * mid), lambda i: (0, 0))],
        # Write ONLY this layer's channel group; the aliased slab keeps everything else
        # (P8 "write into existing buffer" pattern) -> the concat costs zero extra HBM passes.
        out_specs=pl.BlockSpec((group, l), lambda i, cb=c_off // group: (cb, i)),
        input_output_aliases={0: 0},
        compiler_params=_cparams("parallel"),
    )(slab, mask, s1, t1, w1, s2, t2, p['conv2'])


def _dense_block(feat, c_in, mask, layers, *, n, l, wp):
    """Run all BottleNecks of one dense block in place on a preallocated channel slab."""
    growth = layers[0]['conv2'].shape[0]
    group = _round_up(growth, 16)          # 16-row groups keep bf16 stores tile-aligned
    c_pad = _round_up(c_in, group)
    c_slab = c_pad + len(layers) * group
    lay = dict(c_in=c_in, c_pad=c_pad, growth=growth, group=group)
    slab = jnp.pad(feat, ((0, c_slab - feat.shape[0]), (0, 0)))  # zero gap + new-feature rows
    for li, lp in enumerate(layers):
        slab = dense_layer(slab, mask, lp, lay=lay, c_off=c_pad + li * group,
                           n=n, l=l, wp=wp)
    return slab, lay


# --------------------------------------------- kernel 3: transition BN+LReLU+1x1 conv

def _transition_kernel(x_ref, s_ref, t_ref, w_ref, o_ref):
    x = x_ref[...].astype(jnp.float32)
    h = _lrelu(x * s_ref[...] + t_ref[...])
    y = jnp.dot(w_ref[...], h.astype(jnp.bfloat16), preferred_element_type=jnp.float32)
    o_ref[...] = y.astype(o_ref.dtype)


def transition(slab, p, *, lay, n, l):
    c_slab = slab.shape[0]
    c_out = p['conv1'].shape[0]
    s, t = _fold_bn(p['bn1'])
    s = _slab_layout(s, 0, lay, c_slab).reshape(c_slab, 1)
    t = _slab_layout(t, 0, lay, c_slab).reshape(c_slab, 1)
    w = _slab_layout(p['conv1'], 1, lay, c_slab)                 # (c_out, c_slab) bf16
    return pl.pallas_call(
        _transition_kernel,
        out_shape=jax.ShapeDtypeStruct((c_out, n * l), jnp.bfloat16),
        grid=(n,),
        in_specs=[pl.BlockSpec((c_slab, l), lambda i: (0, i)),
                  pl.BlockSpec((c_slab, 1), lambda i: (0, 0)),
                  pl.BlockSpec((c_slab, 1), lambda i: (0, 0)),
                  pl.BlockSpec((c_out, c_slab), lambda i: (0, 0))],
        out_specs=pl.BlockSpec((c_out, l), lambda i: (0, i)),
        compiler_params=_cparams("parallel"),
    )(slab, s, t, w)


def _pool_and_repad(y, n, h, w):
    """2x2 avg-pool (stride 2) + re-embed on the next resolution's padded lane grid.

    Stays in XLA on purpose: operands here are tiny (<100 KB); the heavy BN/matmul work
    already ran inside the Pallas transition kernel (avg_pool2d commutes with the bias-free
    1x1 conv, so the pool only touches c_out channels)."""
    c = y.shape[0]
    hp, wp = h + 2, w + 2
    l = _round_up(hp * wp, 128)
    t = y.reshape(c, n, l)[:, :, :hp * wp].reshape(c, n, hp, wp)
    t = t[:, :, 1:h + 1, 1:w + 1].astype(jnp.float32)
    t = t.reshape(c, n, h // 2, 2, w // 2, 2).mean(axis=(3, 5))
    h2, w2 = h // 2, w // 2
    hp2, wp2 = h2 + 2, w2 + 2
    l2 = _round_up(hp2 * wp2, 128)
    t = jnp.pad(t, ((0, 0), (0, 0), (1, 1), (1, 1))).reshape(c, n, hp2 * wp2)
    t = jnp.pad(t, ((0, 0), (0, 0), (0, l2 - hp2 * wp2)))
    return t.reshape(c, n * l2).astype(jnp.bfloat16), h2, w2


# ------------------- kernel 4: final BN+LReLU + global 8x8 avg-pool + classifier head

def _head_kernel(x_ref, mask_ref, sf_ref, tf_ref,
                 w1_ref, b1_ref, s1_ref, t1_ref,
                 w2_ref, b2_ref, s2_ref, t2_ref,
                 w3_ref, b3_ref, o_ref, *, inv_area):
    x = x_ref[...].astype(jnp.float32)                           # (Cslab, N, L)
    y = _lrelu(x * sf_ref[...] + tf_ref[...]) * mask_ref[...]    # final BN + LeakyReLU
    p = jnp.sum(y, axis=-1) * inv_area                           # AvgPool2d(8) == per-image mean
    # [Linear -> LeakyReLU -> BatchNorm1d -> Dropout(identity)] x 2 -> Linear (bf16 MXU path)
    h1 = _lrelu(jnp.dot(w1_ref[...], p.astype(jnp.bfloat16),
                        preferred_element_type=jnp.float32) + b1_ref[...])
    h1 = h1 * s1_ref[...] + t1_ref[...]
    h2 = _lrelu(jnp.dot(w2_ref[...], h1.astype(jnp.bfloat16),
                        preferred_element_type=jnp.float32) + b2_ref[...])
    h2 = h2 * s2_ref[...] + t2_ref[...]
    o_ref[...] = jnp.dot(w3_ref[...], h2.astype(jnp.bfloat16),
                         preferred_element_type=jnp.float32) + b3_ref[...]


def head_forward(slab, params, *, lay, n, h, w, l):
    assert h == 8 and w == 8, "DenseNet forward implies 32x32 inputs (8x8 map before AvgPool2d(8))"
    c_slab = slab.shape[0]
    x3 = slab.reshape(c_slab, n, l)
    mask = _interior_mask(h, w).reshape(1, 1, l)
    sf, tf = _fold_bn(params['bn_final'])
    sf = _slab_layout(sf, 0, lay, c_slab).reshape(c_slab, 1, 1)
    tf = _slab_layout(tf, 0, lay, c_slab).reshape(c_slab, 1, 1)
    l1, l2 = params['head']
    f1, f2 = l1['w'].shape[0], l2['w'].shape[0]
    w1 = _slab_layout(l1['w'], 1, lay, c_slab)                   # (f1, c_slab) bf16
    s1, t1 = _fold_bn(l1['bn'])
    s2, t2 = _fold_bn(l2['bn'])
    fin = params['head_final']
    ncls = fin['w'].shape[0]
    args = (x3, mask, sf, tf,
            w1, l1['b'].reshape(f1, 1), s1.reshape(f1, 1), t1.reshape(f1, 1),
            l2['w'], l2['b'].reshape(f2, 1), s2.reshape(f2, 1), t2.reshape(f2, 1),
            fin['w'], fin['b'].reshape(ncls, 1))
    in_specs = [pl.BlockSpec(a.shape, lambda i, nd=a.ndim: (0,) * nd) for a in args]
    out = pl.pallas_call(
        partial(_head_kernel, inv_area=1.0 / (h * w)),
        out_shape=jax.ShapeDtypeStruct((ncls, n), jnp.float32),
        grid=(1,),   # TODO(synk): split the batch axis across parallel steps for batches >=128 (v7x)
        in_specs=in_specs,
        out_specs=pl.BlockSpec((ncls, n), lambda i: (0, 0)),
        compiler_params=_cparams("arbitrary"),
    )(*args)
    return out.T                                                 # (N, num_classes) f32


# ---------------------------------------------------------------------------
# Parameter initialization (deterministic, synthetic) — logical PyTorch-shaped params
# ---------------------------------------------------------------------------

def _bn_params(key, c):
    k1, k2, k3, k4 = jax.random.split(key, 4)
    return dict(
        gamma=jax.random.uniform(k1, (c,), jnp.float32, 0.5, 1.5),
        beta=0.1 * jax.random.normal(k2, (c,), jnp.float32),
        mean=0.1 * jax.random.normal(k3, (c,), jnp.float32),
        var=jax.random.uniform(k4, (c,), jnp.float32, 0.5, 1.5),
    )


def _conv3_w(key, cin, cout, cin_pad=None):
    """3x3 conv weight laid out (cout, 9*cin_pad), column = (3*ky+kx)*cin_pad + cin."""
    cin_pad = cin if cin_pad is None else cin_pad
    w = jax.random.normal(key, (cout, 9, cin), jnp.float32) / math.sqrt(9 * cin)
    w = jnp.pad(w, ((0, 0), (0, 0), (0, cin_pad - cin)))
    return w.reshape(cout, 9 * cin_pad).astype(jnp.bfloat16)


def _mat_w(key, cin, cout):
    """1x1 conv / nn.Linear weight, (cout, cin) — PyTorch's native layout."""
    return (jax.random.normal(key, (cout, cin), jnp.float32)
            / math.sqrt(cin)).astype(jnp.bfloat16)


def init_densenet(key, growth_rate, depth, reduction, num_classes, bn_size=4):
    nblocks = (depth - 4) // 6
    keys = iter(jax.random.split(key, 512))
    nxt = lambda: next(keys)
    params = {}

    c = 2 * growth_rate
    params['conv1'] = _conv3_w(nxt(), 3, c, cin_pad=_CIN_PAD)

    def dense_block(cin):
        blocks, cc = [], cin
        for _ in range(nblocks):
            mid = int(bn_size * growth_rate)
            blocks.append(dict(
                bn1=_bn_params(nxt(), cc),
                conv1=_mat_w(nxt(), cc, mid),
                bn2=_bn_params(nxt(), mid),
                conv2=_conv3_w(nxt(), mid, growth_rate),
            ))
            cc += growth_rate
        return blocks, cc

    params['db1'], c = dense_block(c)
    c_out = int(math.floor(c * reduction))
    params['tr1'] = dict(bn1=_bn_params(nxt(), c), conv1=_mat_w(nxt(), c, c_out))
    c = c_out
    params['db2'], c = dense_block(c)
    c_out = int(math.floor(c * reduction))
    params['tr2'] = dict(bn1=_bn_params(nxt(), c), conv1=_mat_w(nxt(), c, c_out))
    c = c_out
    params['db3'], c = dense_block(c)
    params['bn_final'] = _bn_params(nxt(), c)

    feats = [c, c // 2, c // 4]
    head = []
    for fi, fo in zip(feats[:-1], feats[1:]):
        head.append(dict(w=_mat_w(nxt(), fi, fo),
                         b=jnp.zeros((fo,), jnp.float32),        # nn.init.constant_(bias, 0)
                         bn=_bn_params(nxt(), fo)))
    params['head'] = head
    params['head_final'] = dict(w=_mat_w(nxt(), feats[-1], num_classes),
                                b=jnp.zeros((num_classes,), jnp.float32))
    return params


# ---------------------------------------------------------------------------
# Forward pass (thin JAX glue around fused Pallas kernels)
# ---------------------------------------------------------------------------

def densenet_forward(params, x_nchw):
    n, cin, h, w = x_nchw.shape
    hp, wp = h + 2, w + 2
    l = _round_up(hp * wp, 128)

    # NCHW -> channel-first, zero-padded spatial ring, lanes padded to a 128 multiple.
    # TODO(synk): for larger H*W*batch, tile the per-image lane axis with a halo instead of
    # one full image per grid step so the resident block stays bounded on v7x (64 MiB VMEM).
    x = jnp.pad(x_nchw.astype(jnp.float32),
                ((0, 0), (0, _CIN_PAD - cin), (1, 1), (1, 1)))
    x = jnp.transpose(x, (1, 0, 2, 3)).reshape(_CIN_PAD, n, hp * wp)
    x = jnp.pad(x, ((0, 0), (0, 0), (0, l - hp * wp))).reshape(_CIN_PAD, n * l)
    mask = _interior_mask(h, w)

    feat = stem_conv(x, mask, params['conv1'], n=n, l=l, wp=wp)   # (c0, n*l) bf16
    c = params['conv1'].shape[0]

    lay = None
    for bkey, tkey in (('db1', 'tr1'), ('db2', 'tr2'), ('db3', None)):
        slab, lay = _dense_block(feat, c, mask, params[bkey], n=n, l=l, wp=wp)
        if tkey is None:
            feat = slab
        else:
            y = transition(slab, params[tkey], lay=lay, n=n, l=l)
            feat, h, w = _pool_and_repad(y, n, h, w)
            c = params[tkey]['conv1'].shape[0]
            wp = w + 2
            l = _round_up((h + 2) * (w + 2), 128)
            mask = _interior_mask(h, w)

    return head_forward(feat, params, lay=lay, n=n, h=h, w=w, l=l)


# ---------------------------------------------------------------------------

if __name__ == "__main__":
    key = jax.random.PRNGKey(0)
    kp, kx = jax.random.split(key)

    # small config: growth_rate=8, depth=10 -> 1 BottleNeck per dense block; 32x32 inputs
    # (the forward's AvgPool2d(kernel_size=8) implies a 32x32 input -> 8x8 final map)
    params = init_densenet(kp, growth_rate=8, depth=10, reduction=0.5,
                           num_classes=10, bn_size=4)
    x = jax.random.normal(kx, (2, 3, 32, 32), jnp.float32)        # NCHW, as in PyTorch

    fwd = jax.jit(densenet_forward)
    out = fwd(params, x)
    jax.block_until_ready(out)
    assert out.shape == (2, 10) and out.dtype == jnp.float32
    print("KERNEL_OK")
</pallas_src>

<mosaic_0001>
module attributes {stable_mosaic.version = 11 : i64} {
  func.func @_stem_kernel(%arg0: i32, %arg1: memref<8x1280xf32, #tpu.memory_space<vmem>>, %arg2: memref<1x1280xf32, #tpu.memory_space<vmem>>, %arg3: memref<16x72xbf16, #tpu.memory_space<vmem>>, %arg4: memref<16x1280xbf16, #tpu.memory_space<vmem>>) attributes {dimension_semantics = [#tpu.dimension_semantics<parallel>], iteration_bounds = array<i64: 2>, scalar_prefetch = 0 : i64, scratch_operands = 0 : i64, tpu.core_type = #tpu.core_type<tc>, window_params = [{transform_indices = @transform_0, window_bounds = array<i64: 8, 1280>}, {pipeline_mode = #tpu.pipeline_mode<synchronous>, transform_indices = @transform_1, window_bounds = array<i64: 1, 1280>}, {pipeline_mode = #tpu.pipeline_mode<synchronous>, transform_indices = @transform_2, window_bounds = array<i64: 16, 72>}, {transform_indices = @transform_3, window_bounds = array<i64: 16, 1280>}]} {
    %c0 = arith.constant 0 : index
    %c0_0 = arith.constant 0 : index
    %0 = vector.load %arg1[%c0, %c0_0] : memref<8x1280xf32, #tpu.memory_space<vmem>>, vector<8x1280xf32>
    %c35_i32 = arith.constant 35 : i32
    %1 = tpu.dynamic_rotate %0 by %c35_i32 dim 1 : vector<8x1280xf32>, i32 -> vector<8x1280xf32>
    %c34_i32 = arith.constant 34 : i32
    %2 = tpu.dynamic_rotate %0 by %c34_i32 dim 1 : vector<8x1280xf32>, i32 -> vector<8x1280xf32>
    %c33_i32 = arith.constant 33 : i32
    %3 = tpu.dynamic_rotate %0 by %c33_i32 dim 1 : vector<8x1280xf32>, i32 -> vector<8x1280xf32>
    %c1_i32 = arith.constant 1 : i32
    %4 = tpu.dynamic_rotate %0 by %c1_i32 dim 1 : vector<8x1280xf32>, i32 -> vector<8x1280xf32>
    %c1279_i32 = arith.constant 1279 : i32
    %5 = tpu.dynamic_rotate %0 by %c1279_i32 dim 1 : vector<8x1280xf32>, i32 -> vector<8x1280xf32>
    %c1247_i32 = arith.constant 1247 : i32
    %6 = tpu.dynamic_rotate %0 by %c1247_i32 dim 1 : vector<8x1280xf32>, i32 -> vector<8x1280xf32>
    %c1246_i32 = arith.constant 1246 : i32
    %7 = tpu.dynamic_rotate %0 by %c1246_i32 dim 1 : vector<8x1280xf32>, i32 -> vector<8x1280xf32>
    %c1245_i32 = arith.constant 1245 : i32
    %8 = tpu.dynamic_rotate %0 by %c1245_i32 dim 1 : vector<8x1280xf32>, i32 -> vector<8x1280xf32>
    %9 = tpu.concatenate %1, %2, %3, %4, %0, %5, %6, %7, %8 in 0 : vector<8x1280xf32>, vector<8x1280xf32>, vector<8x1280xf32>, vector<8x1280xf32>, vector<8x1280xf32>, vector<8x1280xf32>, vector<8x1280xf32>, vector<8x1280xf32>, vector<8x1280xf32> -> vector<72x1280xf32>
    %10 = arith.truncf %9 : vector<72x1280xf32> to vector<72x1280xbf16>
    %c0_1 = arith.constant 0 : index
    %c0_2 = arith.constant 0 : index
    %11 = vector.load %arg3[%c0_1, %c0_2] : memref<16x72xbf16, #tpu.memory_space<vmem>>, vector<16x72xbf16>
    %cst = arith.constant dense<0.000000e+00> : vector<16x1280xf32>
    %12 = tpu.matmul %11, %10, %cst {dimension_numbers = #tpu.dot_dimension_numbers<[1], [0], [0], [1], [0, 0, 1, 1], [], []>} : vector<16x72xbf16>, vector<72x1280xbf16>, vector<16x1280xf32> -> vector<16x1280xf32>
    %c0_3 = arith.constant 0 : index
    %c0_4 = arith.constant 0 : index
    %13 = vector.load %arg2[%c0_3, %c0_4] : memref<1x1280xf32, #tpu.memory_space<vmem>>, vector<1x1280xf32>
    %14 = vector.broadcast %13 : vector<1x1280xf32> to vector<16x1280xf32>
    %15 = arith.mulf %12, %14 : vector<16x1280xf32>
    %16 = arith.truncf %15 : vector<16x1280xf32> to vector<16x1280xbf16>
    %c0_5 = arith.constant 0 : index
    %c0_6 = arith.constant 0 : index
    %17 = vector.load %arg4[%c0_5, %c0_6] : memref<16x1280xbf16, #tpu.memory_space<vmem>>, vector<16x1280xbf16>
    tpu.vector_store %arg4[%c0_5, %c0_6], %16 {strides = array<i32>} : memref<16x1280xbf16, #tpu.memory_space<vmem>>, vector<16x1280xbf16>,
    return
  }
  func.func @transform_0(%arg0: i32) -> (i32, i32) {
    %c0_i32 = arith.constant 0 : i32
    %c0_i32_0 = arith.constant 0 : i32
    return %c0_i32, %arg0 : i32, i32
  }
  func.func @transform_1(%arg0: i32) -> (i32, i32) {
    %c0_i32 = arith.constant 0 : i32
    %c0_i32_0 = arith.constant 0 : i32
    %c0_i32_1 = arith.constant 0 : i32
    return %c0_i32, %c0_i32_0 : i32, i32
  }
  func.func @transform_2(%arg0: i32) -> (i32, i32) {
    %c0_i32 = arith.constant 0 : i32
    %c0_i32_0 = arith.constant 0 : i32
    %c0_i32_1 = arith.constant 0 : i32
    return %c0_i32, %c0_i32_0 : i32, i32
  }
  func.func @transform_3(%arg0: i32) -> (i32, i32) {
    %c0_i32 = arith.constant 0 : i32
    %c0_i32_0 = arith.constant 0 : i32
    return %c0_i32, %arg0 : i32, i32
  }
}

module attributes {stable_mosaic.version = 11 : i64} {
  func.func @_dense_layer_kernel(%arg0: i32, %arg1: memref<32x1280xbf16, #tpu.memory_space<vmem>>, %arg2: memref<1x1280xf32, #tpu.memory_space<vmem>>, %arg3: memref<32x1xf32, #tpu.memory_space<vmem>>, %arg4: memref<32x1xf32, #tpu.memory_space<vmem>>, %arg5: memref<32x32xbf16, #tpu.memory_space<vmem>>, %arg6: memref<32x1xf32, #tpu.memory_space<vmem>>, %arg7: memref<32x1xf32, #tpu.memory_space<vmem>>, %arg8: memref<8x288xbf16, #tpu.memory_space<vmem>>, %arg9: memref<16x1280xbf16, #tpu.memory_space<vmem>>) attributes {dimension_semantics = [#tpu.dimension_semantics<parallel>], iteration_bounds = array<i64: 2>, scalar_prefetch = 0 : i64, scratch_operands = 0 : i64, tpu.core_type = #tpu.core_type<tc>, window_params = [{transform_indices = @transform_0, window_bounds = array<i64: 32, 1280>}, {pipeline_mode = #tpu.pipeline_mode<synchronous>, transform_indices = @transform_1, window_bounds = array<i64: 1, 1280>}, {pipeline_mode = #tpu.pipeline_mode<synchronous>, transform_indices = @transform_2, window_bounds = array<i64: 32, 1>}, {pipeline_mode = #tpu.pipeline_mode<synchronous>, transform_indices = @transform_3, window_bounds = array<i64: 32, 1>}, {pipeline_mode = #tpu.pipeline_mode<synchronous>, transform_indices = @transform_4, window_bounds = array<i64: 32, 32>}, {pipeline_mode = #tpu.pipeline_mode<synchronous>, transform_indices = @transform_5, window_bounds = array<i64: 32, 1>}, {pipeline_mode = #tpu.pipeline_mode<synchronous>, transform_indices = @transform_6, window_bounds = array<i64: 32, 1>}, {pipeline_mode = #tpu.pipeline_mode<synchronous>, transform_indices = @transform_7, window_bounds = array<i64: 8, 288>}, {transform_indices = @transform_8, window_bounds = array<i64: 16, 1280>}]} {
    %c0 = arith.constant 0 : index
    %c0_0 = arith.constant 0 : index
    %0 = vector.load %arg1[%c0, %c0_0] : memref<32x1280xbf16, #tpu.memory_space<vmem>>, vector<32x1280xbf16>
    %1 = arith.extf %0 : vector<32x1280xbf16> to vector<32x1280xf32>
    %c0_1 = arith.constant 0 : index
    %c0_2 = arith.constant 0 : index
    %2 = vector.load %arg3[%c0_1, %c0_2] : memref<32x1xf32, #tpu.memory_space<vmem>>, vector<32x1xf32>
    %3 = vector.broadcast %2 : vector<32x1xf32> to vector<32x1280xf32>
    %4 = arith.mulf %1, %3 : vector<32x1280xf32>
    %c0_3 = arith.constant 0 : index
    %c0_4 = arith.constant 0 : index
    %5 = vector.load %arg4[%c0_3, %c0_4] : memref<32x1xf32, #tpu.memory_space<vmem>>, vector<32x1xf32>
    %6 = vector.broadcast %5 : vector<32x1xf32> to vector<32x1280xf32>
    %7 = arith.addf %4, %6 : vector<32x1280xf32>
    %cst = arith.constant 0.000000e+00 : f32
    %8 = vector.broadcast %cst : f32 to vector<32x1280xf32>
    %9 = arith.cmpf oge, %7, %8 : vector<32x1280xf32>
    %cst_5 = arith.constant 0.00999999977 : f32
    %10 = vector.broadcast %cst_5 : f32 to vector<32x1280xf32>
    %11 = arith.mulf %10, %7 : vector<32x1280xf32>
    %12 = arith.select %9, %7, %11 : vector<32x1280xi1>, vector<32x1280xf32>
    %c0_6 = arith.constant 0 : index
    %c0_7 = arith.constant 0 : index
    %13 = vector.load %arg5[%c0_6, %c0_7] : memref<32x32xbf16, #tpu.memory_space<vmem>>, vector<32x32xbf16>
    %14 = arith.truncf %12 : vector<32x1280xf32> to vector<32x1280xbf16>
    %cst_8 = arith.constant dense<0.000000e+00> : vector<32x1280xf32>
    %15 = tpu.matmul %13, %14, %cst_8 {dimension_numbers = #tpu.dot_dimension_numbers<[1], [0], [0], [1], [0, 0, 1, 1], [], []>} : vector<32x32xbf16>, vector<32x1280xbf16>, vector<32x1280xf32> -> vector<32x1280xf32>
    %c0_9 = arith.constant 0 : index
    %c0_10 = arith.constant 0 : index
    %16 = vector.load %arg6[%c0_9, %c0_10] : memref<32x1xf32, #tpu.memory_space<vmem>>, vector<32x1xf32>
    %17 = vector.broadcast %16 : vector<32x1xf32> to vector<32x1280xf32>
    %18 = arith.mulf %15, %17 : vector<32x1280xf32>
    %c0_11 = arith.constant 0 : index
    %c0_12 = arith.constant 0 : index
    %19 = vector.load %arg7[%c0_11, %c0_12] : memref<32x1xf32, #tpu.memory_space<vmem>>, vector<32x1xf32>
    %20 = vector.broadcast %19 : vector<32x1xf32> to vector<32x1280xf32>
    %21 = arith.addf %18, %20 : vector<32x1280xf32>
    %cst_13 = arith.constant 0.000000e+00 : f32
    %22 = vector.broadcast %cst_13 : f32 to vector<32x1280xf32>
    %23 = arith.cmpf oge, %21, %22 : vector<32x1280xf32>
    %cst_14 = arith.constant 0.00999999977 : f32
    %24 = vector.broadcast %cst_14 : f32 to vector<32x1280xf32>
    %25 = arith.mulf %24, %21 : vector<32x1280xf32>
    %26 = arith.select %23, %21, %25 : vector<32x1280xi1>, vector<32x1280xf32>
    %c0_15 = arith.constant 0 : index
    %c0_16 = arith.constant 0 : index
    %27 = vector.load %arg2[%c0_15, %c0_16] : memref<1x1280xf32, #tpu.memory_space<vmem>>, vector<1x1280xf32>
    %28 = vector.broadcast %27 : vector<1x1280xf32> to vector<32x1280xf32>
    %29 = arith.mulf %26, %28 : vector<32x1280xf32>
    %c35_i32 = arith.constant 35 : i32
    %30 = tpu.dynamic_rotate %29 by %c35_i32 dim 1 : vector<32x1280xf32>, i32 -> vector<32x1280xf32>
    %c34_i32 = arith.constant 34 : i32
    %31 = tpu.dynamic_rotate %29 by %c34_i32 dim 1 : vector<32x1280xf32>, i32 -> vector<32x1280xf32>
    %c33_i32 = arith.constant 33 : i32
    %32 = tpu.dynamic_rotate %29 by %c33_i32 dim 1 : vector<32x1280xf32>, i32 -> vector<32x1280xf32>
    %c1_i32 = arith.constant 1 : i32
    %33 = tpu.dynamic_rotate %29 by %c1_i32 dim 1 : vector<32x1280xf32>, i32 -> vector<32x1280xf32>
    %c1279_i32 = arith.constant 1279 : i32
    %34 = tpu.dynamic_rotate %29 by %c1279_i32 dim 1 : vector<32x1280xf32>, i32 -> vector<32x1280xf32>
    %c1247_i32 = arith.constant 1247 : i32
    %35 = tpu.dynamic_rotate %29 by %c1247_i32 dim 1 : vector<32x1280xf32>, i32 -> vector<32x1280xf32>
    %c1246_i32 = arith.constant 1246 : i32
    %36 = tpu.dynamic_rotate %29 by %c1246_i32 dim 1 : vector<32x1280xf32>, i32 -> vector<32x1280xf32>
    %c1245_i32 = arith.constant 1245 : i32
    %37 = tpu.dynamic_rotate %29 by %c1245_i32 dim 1 : vector<32x1280xf32>, i32 -> vector<32x1280xf32>
    %38 = tpu.concatenate %30, %31, %32, %33, %29, %34, %35, %36, %37 in 0 : vector<32x1280xf32>, vector<32x1280xf32>, vector<32x1280xf32>, vector<32x1280xf32>, vector<32x1280xf32>, vector<32x1280xf32>, vector<32x1280xf32>, vector<32x1280xf32>, vector<32x1280xf32> -> vector<288x1280xf32>
    %39 = arith.truncf %38 : vector<288x1280xf32> to vector<288x1280xbf16>
    %c0_17 = arith.constant 0 : index
    %c0_18 = arith.constant 0 : index
    %40 = vector.load %arg8[%c0_17, %c0_18] : memref<8x288xbf16, #tpu.memory_space<vmem>>, vector<8x288xbf16>
    %cst_19 = arith.constant dense<0.000000e+00> : vector<8x1280xf32>
    %41 = tpu.matmul %40, %39, %cst_19 {dimension_numbers = #tpu.dot_dimension_numbers<[1], [0], [0], [1], [0, 0, 1, 1], [], []>} : vector<8x288xbf16>, vector<288x1280xbf16>, vector<8x1280xf32> -> vector<8x1280xf32>
    %c0_20 = arith.constant 0 : index
    %c0_21 = arith.constant 0 : index
    %42 = vector.load %arg2[%c0_20, %c0_21] : memref<1x1280xf32, #tpu.memory_space<vmem>>, vector<1x1280xf32>
    %43 = vector.broadcast %42 : vector<1x1280xf32> to vector<8x1280xf32>
    %44 = arith.mulf %41, %43 : vector<8x1280xf32>
    %cst_22 = arith.constant 0.000000e+00 : f32
    %45 = vector.broadcast %cst_22 : f32 to vector<8x1280xf32>
    %46 = tpu.concatenate %44, %45 in 0 : vector<8x1280xf32>, vector<8x1280xf32> -> vector<16x1280xf32>
    %47 = arith.truncf %46 : vector<16x1280xf32> to vector<16x1280xbf16>
    %c0_23 = arith.constant 0 : index
    %c0_24 = arith.constant 0 : index
    %48 = vector.load %arg9[%c0_23, %c0_24] : memref<16x1280xbf16, #tpu.memory_space<vmem>>, vector<16x1280xbf16>
    tpu.vector_store %arg9[%c0_23, %c0_24], %47 {strides = array<i32>} : memref<16x1280xbf16, #tpu.memory_space<vmem>>, vector<16x1280xbf16>,
    return
  }
  func.func @transform_0(%arg0: i32) -> (i32, i32) {
    %c0_i32 = arith.constant 0 : i32
    %c0_i32_0 = arith.constant 0 : i32
    return %c0_i32, %arg0 : i32, i32
  }
  func.func @transform_1(%arg0: i32) -> (i32, i32) {
    %c0_i32 = arith.constant 0 : i32
    %c0_i32_0 = arith.constant 0 : i32
    %c0_i32_1 = arith.constant 0 : i32
    return %c0_i32, %c0_i32_0 : i32, i32
  }
  func.func @transform_2(%arg0: i32) -> (i32, i32) {
    %c0_i32 = arith.constant 0 : i32
    %c0_i32_0 = arith.constant 0 : i32
    %c0_i32_1 = arith.constant 0 : i32
    return %c0_i32, %c0_i32_0 : i32, i32
  }
  func.func @transform_3(%arg0: i32) -> (i32, i32) {
    %c0_i32 = arith.constant 0 : i32
    %c0_i32_0 = arith.constant 0 : i32
    %c0_i32_1 = arith.constant 0 : i32
    return %c0_i32, %c0_i32_0 : i32, i32
  }
  func.func @transform_4(%arg0: i32) -> (i32, i32) {
    %c0_i32 = arith.constant 0 : i32
    %c0_i32_0 = arith.constant 0 : i32
    %c0_i32_1 = arith.constant 0 : i32
    return %c0_i32, %c0_i32_0 : i32, i32
  }
  func.func @transform_5(%arg0: i32) -> (i32, i32) {
    %c0_i32 = arith.constant 0 : i32
    %c0_i32_0 = arith.constant 0 : i32
    %c0_i32_1 = arith.constant 0 : i32
    return %c0_i32, %c0_i32_0 : i32, i32
  }
  func.func @transform_6(%arg0: i32) -> (i32, i32) {
    %c0_i32 = arith.constant 0 : i32
    %c0_i32_0 = arith.constant 0 : i32
    %c0_i32_1 = arith.constant 0 : i32
    return %c0_i32, %c0_i32_0 : i32, i32
  }
  func.func @transform_7(%arg0: i32) -> (i32, i32) {
    %c0_i32 = arith.constant 0 : i32
    %c0_i32_0 = arith.constant 0 : i32
    %c0_i32_1 = arith.constant 0 : i32
    return %c0_i32, %c0_i32_0 : i32, i32
  }
  func.func @transform_8(%arg0: i32) -> (i32, i32) {
    %c1_i32 = arith.constant 1 : i32
    %c0_i32 = arith.constant 0 : i32
    return %c1_i32, %arg0 : i32, i32
  }
}

module attributes {stable_mosaic.version = 11 : i64} {
  func.func @_transition_kernel(%arg0: i32, %arg1: memref<32x1280xbf16, #tpu.memory_space<vmem>>, %arg2: memref<32x1xf32, #tpu.memory_space<vmem>>, %arg3: memref<32x1xf32, #tpu.memory_space<vmem>>, %arg4: memref<12x32xbf16, #tpu.memory_space<vmem>>, %arg5: memref<12x1280xbf16, #tpu.memory_space<vmem>>) attributes {dimension_semantics = [#tpu.dimension_semantics<parallel>], iteration_bounds = array<i64: 2>, scalar_prefetch = 0 : i64, scratch_operands = 0 : i64, tpu.core_type = #tpu.core_type<tc>, window_params = [{transform_indices = @transform_0, window_bounds = array<i64: 32, 1280>}, {pipeline_mode = #tpu.pipeline_mode<synchronous>, transform_indices = @transform_1, window_bounds = array<i64: 32, 1>}, {pipeline_mode = #tpu.pipeline_mode<synchronous>, transform_indices = @transform_2, window_bounds = array<i64: 32, 1>}, {pipeline_mode = #tpu.pipeline_mode<synchronous>, transform_indices = @transform_3, window_bounds = array<i64: 12, 32>}, {transform_indices = @transform_4, window_bounds = array<i64: 12, 1280>}]} {
    %c0 = arith.constant 0 : index
    %c0_0 = arith.constant 0 : index
    %0 = vector.load %arg1[%c0, %c0_0] : memref<32x1280xbf16, #tpu.memory_space<vmem>>, vector<32x1280xbf16>
    %1 = arith.extf %0 : vector<32x1280xbf16> to vector<32x1280xf32>
    %c0_1 = arith.constant 0 : index
    %c0_2 = arith.constant 0 : index
    %2 = vector.load %arg2[%c0_1, %c0_2] : memref<32x1xf32, #tpu.memory_space<vmem>>, vector<32x1xf32>
    %3 = vector.broadcast %2 : vector<32x1xf32> to vector<32x1280xf32>
    %4 = arith.mulf %1, %3 : vector<32x1280xf32>
    %c0_3 = arith.constant 0 : index
    %c0_4 = arith.constant 0 : index
    %5 = vector.load %arg3[%c0_3, %c0_4] : memref<32x1xf32, #tpu.memory_space<vmem>>, vector<32x1xf32>
    %6 = vector.broadcast %5 : vector<32x1xf32> to vector<32x1280xf32>
    %7 = arith.addf %4, %6 : vector<32x1280xf32>
    %cst = arith.constant 0.000000e+00 : f32
    %8 = vector.broadcast %cst : f32 to vector<32x1280xf32>
    %9 = arith.cmpf oge, %7, %8 : vector<32x1280xf32>
    %cst_5 = arith.constant 0.00999999977 : f32
    %10 = vector.broadcast %cst_5 : f32 to vector<32x1280xf32>
    %11 = arith.mulf %10, %7 : vector<32x1280xf32>
    %12 = arith.select %9, %7, %11 : vector<32x1280xi1>, vector<32x1280xf32>
    %c0_6 = arith.constant 0 : index
    %c0_7 = arith.constant 0 : index
    %13 = vector.load %arg4[%c0_6, %c0_7] : memref<12x32xbf16, #tpu.memory_space<vmem>>, vector<12x32xbf16>
    %14 = arith.truncf %12 : vector<32x1280xf32> to vector<32x1280xbf16>
    %cst_8 = arith.constant dense<0.000000e+00> : vector<12x1280xf32>
    %15 = tpu.matmul %13, %14, %cst_8 {dimension_numbers = #tpu.dot_dimension_numbers<[1], [0], [0], [1], [0, 0, 1, 1], [], []>} : vector<12x32xbf16>, vector<32x1280xbf16>, vector<12x1280xf32> -> vector<12x1280xf32>
    %16 = arith.truncf %15 : vector<12x1280xf32> to vector<12x1280xbf16>
    %c0_9 = arith.constant 0 : index
    %c0_10 = arith.constant 0 : index
    %17 = vector.load %arg5[%c0_9, %c0_10] : memref<12x1280xbf16, #tpu.memory_space<vmem>>, vector<12x1280xbf16>
    tpu.vector_store %arg5[%c0_9, %c0_10], %16 {strides = array<i32>} : memref<12x1280xbf16, #tpu.memory_space<vmem>>, vector<12x1280xbf16>,
    return
  }
  func.func @transform_0(%arg0: i32) -> (i32, i32) {
    %c0_i32 = arith.constant 0 : i32
    %c0_i32_0 = arith.constant 0 : i32
    return %c0_i32, %arg0 : i32, i32
  }
  func.func @transform_1(%arg0: i32) -> (i32, i32) {
    %c0_i32 = arith.constant 0 : i32
    %c0_i32_0 = arith.constant 0 : i32
    %c0_i32_1 = arith.constant 0 : i32
    return %c0_i32, %c0_i32_0 : i32, i32
  }
  func.func @transform_2(%arg0: i32) -> (i32, i32) {
    %c0_i32 = arith.constant 0 : i32
    %c0_i32_0 = arith.constant 0 : i32
    %c0_i32_1 = arith.constant 0 : i32
    return %c0_i32, %c0_i32_0 : i32, i32
  }
  func.func @transform_3(%arg0: i32) -> (i32, i32) {
    %c0_i32 = arith.constant 0 : i32
    %c0_i32_0 = arith.constant 0 : i32
    %c0_i32_1 = arith.constant 0 : i32
    return %c0_i32, %c0_i32_0 : i32, i32
  }
  func.func @transform_4(%arg0: i32) -> (i32, i32) {
    %c0_i32 = arith.constant 0 : i32
    %c0_i32_0 = arith.constant 0 : i32
    return %c0_i32, %arg0 : i32, i32
  }
}

module attributes {stable_mosaic.version = 11 : i64} {
  func.func @_dense_layer_kernel(%arg0: i32, %arg1: memref<32x384xbf16, #tpu.memory_space<vmem>>, %arg2: memref<1x384xf32, #tpu.memory_space<vmem>>, %arg3: memref<32x1xf32, #tpu.memory_space<vmem>>, %arg4: memref<32x1xf32, #tpu.memory_space<vmem>>, %arg5: memref<32x32xbf16, #tpu.memory_space<vmem>>, %arg6: memref<32x1xf32, #tpu.memory_space<vmem>>, %arg7: memref<32x1xf32, #tpu.memory_space<vmem>>, %arg8: memref<8x288xbf16, #tpu.memory_space<vmem>>, %arg9: memref<16x384xbf16, #tpu.memory_space<vmem>>) attributes {dimension_semantics = [#tpu.dimension_semantics<parallel>], iteration_bounds = array<i64: 2>, scalar_prefetch = 0 : i64, scratch_operands = 0 : i64, tpu.core_type = #tpu.core_type<tc>, window_params = [{transform_indices = @transform_0, window_bounds = array<i64: 32, 384>}, {pipeline_mode = #tpu.pipeline_mode<synchronous>, transform_indices = @transform_1, window_bounds = array<i64: 1, 384>}, {pipeline_mode = #tpu.pipeline_mode<synchronous>, transform_indices = @transform_2, window_bounds = array<i64: 32, 1>}, {pipeline_mode = #tpu.pipeline_mode<synchronous>, transform_indices = @transform_3, window_bounds = array<i64: 32, 1>}, {pipeline_mode = #tpu.pipeline_mode<synchronous>, transform_indices = @transform_4, window_bounds = array<i64: 32, 32>}, {pipeline_mode = #tpu.pipeline_mode<synchronous>, transform_indices = @transform_5, window_bounds = array<i64: 32, 1>}, {pipeline_mode = #tpu.pipeline_mode<synchronous>, transform_indices = @transform_6, window_bounds = array<i64: 32, 1>}, {pipeline_mode = #tpu.pipeline_mode<synchronous>, transform_indices = @transform_7, window_bounds = array<i64: 8, 288>}, {transform_indices = @transform_8, window_bounds = array<i64: 16, 384>}]} {
    %c0 = arith.constant 0 : index
    %c0_0 = arith.constant 0 : index
    %0 = vector.load %arg1[%c0, %c0_0] : memref<32x384xbf16, #tpu.memory_space<vmem>>, vector<32x384xbf16>
    %1 = arith.extf %0 : vector<32x384xbf16> to vector<32x384xf32>
    %c0_1 = arith.constant 0 : index
    %c0_2 = arith.constant 0 : index
    %2 = vector.load %arg3[%c0_1, %c0_2] : memref<32x1xf32, #tpu.memory_space<vmem>>, vector<32x1xf32>
    %3 = vector.broadcast %2 : vector<32x1xf32> to vector<32x384xf32>
    %4 = arith.mulf %1, %3 : vector<32x384xf32>
    %c0_3 = arith.constant 0 : index
    %c0_4 = arith.constant 0 : index
    %5 = vector.load %arg4[%c0_3, %c0_4] : memref<32x1xf32, #tpu.memory_space<vmem>>, vector<32x1xf32>
    %6 = vector.broadcast %5 : vector<32x1xf32> to vector<32x384xf32>
    %7 = arith.addf %4, %6 : vector<32x384xf32>
    %cst = arith.constant 0.000000e+00 : f32
    %8 = vector.broadcast %cst : f32 to vector<32x384xf32>
    %9 = arith.cmpf oge, %7, %8 : vector<32x384xf32>
    %cst_5 = arith.constant 0.00999999977 : f32
    %10 = vector.broadcast %cst_5 : f32 to vector<32x384xf32>
    %11 = arith.mulf %10, %7 : vector<32x384xf32>
    %12 = arith.select %9, %7, %11 : vector<32x384xi1>, vector<32x384xf32>
    %c0_6 = arith.constant 0 : index
    %c0_7 = arith.constant 0 : index
    %13 = vector.load %arg5[%c0_6, %c0_7] : memref<32x32xbf16, #tpu.memory_space<vmem>>, vector<32x32xbf16>
    %14 = arith.truncf %12 : vector<32x384xf32> to vector<32x384xbf16>
    %cst_8 = arith.constant dense<0.000000e+00> : vector<32x384xf32>
    %15 = tpu.matmul %13, %14, %cst_8 {dimension_numbers = #tpu.dot_dimension_numbers<[1], [0], [0], [1], [0, 0, 1, 1], [], []>} : vector<32x32xbf16>, vector<32x384xbf16>, vector<32x384xf32> -> vector<32x384xf32>
    %c0_9 = arith.constant 0 : index
    %c0_10 = arith.constant 0 : index
    %16 = vector.load %arg6[%c0_9, %c0_10] : memref<32x1xf32, #tpu.memory_space<vmem>>, vector<32x1xf32>
    %17 = vector.broadcast %16 : vector<32x1xf32> to vector<32x384xf32>
    %18 = arith.mulf %15, %17 : vector<32x384xf32>
    %c0_11 = arith.constant 0 : index
    %c0_12 = arith.constant 0 : index
    %19 = vector.load %arg7[%c0_11, %c0_12] : memref<32x1xf32, #tpu.memory_space<vmem>>, vector<32x1xf32>
    %20 = vector.broadcast %19 : vector<32x1xf32> to vector<32x384xf32>
    %21 = arith.addf %18, %20 : vector<32x384xf32>
    %cst_13 = arith.constant 0.000000e+00 : f32
    %22 = vector.broadcast %cst_13 : f32 to vector<32x384xf32>
    %23 = arith.cmpf oge, %21, %22 : vector<32x384xf32>
    %cst_14 = arith.constant 0.00999999977 : f32
    %24 = vector.broadcast %cst_14 : f32 to vector<32x384xf32>
    %25 = arith.mulf %24, %21 : vector<32x384xf32>
    %26 = arith.select %23, %21, %25 : vector<32x384xi1>, vector<32x384xf32>
    %c0_15 = arith.constant 0 : index
    %c0_16 = arith.constant 0 : index
    %27 = vector.load %arg2[%c0_15, %c0_16] : memref<1x384xf32, #tpu.memory_space<vmem>>, vector<1x384xf32>
    %28 = vector.broadcast %27 : vector<1x384xf32> to vector<32x384xf32>
    %29 = arith.mulf %26, %28 : vector<32x384xf32>
    %c19_i32 = arith.constant 19 : i32
    %30 = tpu.dynamic_rotate %29 by %c19_i32 dim 1 : vector<32x384xf32>, i32 -> vector<32x384xf32>
    %c18_i32 = arith.constant 18 : i32
    %31 = tpu.dynamic_rotate %29 by %c18_i32 dim 1 : vector<32x384xf32>, i32 -> vector<32x384xf32>
    %c17_i32 = arith.constant 17 : i32
    %32 = tpu.dynamic_rotate %29 by %c17_i32 dim 1 : vector<32x384xf32>, i32 -> vector<32x384xf32>
    %c1_i32 = arith.constant 1 : i32
    %33 = tpu.dynamic_rotate %29 by %c1_i32 dim 1 : vector<32x384xf32>, i32 -> vector<32x384xf32>
    %c383_i32 = arith.constant 383 : i32
    %34 = tpu.dynamic_rotate %29 by %c383_i32 dim 1 : vector<32x384xf32>, i32 -> vector<32x384xf32>
    %c367_i32 = arith.constant 367 : i32
    %35 = tpu.dynamic_rotate %29 by %c367_i32 dim 1 : vector<32x384xf32>, i32 -> vector<32x384xf32>
    %c366_i32 = arith.constant 366 : i32
    %36 = tpu.dynamic_rotate %29 by %c366_i32 dim 1 : vector<32x384xf32>, i32 -> vector<32x384xf32>
    %c365_i32 = arith.constant 365 : i32
    %37 = tpu.dynamic_rotate %29 by %c365_i32 dim 1 : vector<32x384xf32>, i32 -> vector<32x384xf32>
    %38 = tpu.concatenate %30, %31, %32, %33, %29, %34, %35, %36, %37 in 0 : vector<32x384xf32>, vector<32x384xf32>, vector<32x384xf32>, vector<32x384xf32>, vector<32x384xf32>, vector<32x384xf32>, vector<32x384xf32>, vector<32x384xf32>, vector<32x384xf32> -> vector<288x384xf32>
    %39 = arith.truncf %38 : vector<288x384xf32> to vector<288x384xbf16>
    %c0_17 = arith.constant 0 : index
    %c0_18 = arith.constant 0 : index
    %40 = vector.load %arg8[%c0_17, %c0_18] : memref<8x288xbf16, #tpu.memory_space<vmem>>, vector<8x288xbf16>
    %cst_19 = arith.constant dense<0.000000e+00> : vector<8x384xf32>
    %41 = tpu.matmul %40, %39, %cst_19 {dimension_numbers = #tpu.dot_dimension_numbers<[1], [0], [0], [1], [0, 0, 1, 1], [], []>} : vector<8x288xbf16>, vector<288x384xbf16>, vector<8x384xf32> -> vector<8x384xf32>
    %c0_20 = arith.constant 0 : index
    %c0_21 = arith.constant 0 : index
    %42 = vector.load %arg2[%c0_20, %c0_21] : memref<1x384xf32, #tpu.memory_space<vmem>>, vector<1x384xf32>
    %43 = vector.broadcast %42 : vector<1x384xf32> to vector<8x384xf32>
    %44 = arith.mulf %41, %43 : vector<8x384xf32>
    %cst_22 = arith.constant 0.000000e+00 : f32
    %45 = vector.broadcast %cst_22 : f32 to vector<8x384xf32>
    %46 = tpu.concatenate %44, %45 in 0 : vector<8x384xf32>, vector<8x384xf32> -> vector<16x384xf32>
    %47 = arith.truncf %46 : vector<16x384xf32> to vector<16x384xbf16>
    %c0_23 = arith.constant 0 : index
    %c0_24 = arith.constant 0 : index
    %48 = vector.load %arg9[%c0_23, %c0_24] : memref<16x384xbf16, #tpu.memory_space<vmem>>, vector<16x384xbf16>
    tpu.vector_store %arg9[%c0_23, %c0_24], %47 {strides = array<i32>} : memref<16x384xbf16, #tpu.memory_space<vmem>>, vector<16x384xbf16>,
    return
  }
  func.func @transform_0(%arg0: i32) -> (i32, i32) {
    %c0_i32 = arith.constant 0 : i32
    %c0_i32_0 = arith.constant 0 : i32
    return %c0_i32, %arg0 : i32, i32
  }
  func.func @transform_1(%arg0: i32) -> (i32, i32) {
    %c0_i32 = arith.constant 0 : i32
    %c0_i32_0 = arith.constant 0 : i32
    %c0_i32_1 = arith.constant 0 : i32
    return %c0_i32, %c0_i32_0 : i32, i32
  }
  func.func @transform_2(%arg0: i32) -> (i32, i32) {
    %c0_i32 = arith.constant 0 : i32
    %c0_i32_0 = arith.constant 0 : i32
    %c0_i32_1 = arith.constant 0 : i32
    return %c0_i32, %c0_i32_0 : i32, i32
  }
  func.func @transform_3(%arg0: i32) -> (i32, i32) {
    %c0_i32 = arith.constant 0 : i32
    %c0_i32_0 = arith.constant 0 : i32
    %c0_i32_1 = arith.constant 0 : i32
    return %c0_i32, %c0_i32_0 : i32, i32
  }
  func.func @transform_4(%arg0: i32) -> (i32, i32) {
    %c0_i32 = arith.constant 0 : i32
    %c0_i32_0 = arith.constant 0 : i32
    %c0_i32_1 = arith.constant 0 : i32
    return %c0_i32, %c0_i32_0 : i32, i32
  }
  func.func @transform_5(%arg0: i32) -> (i32, i32) {
    %c0_i32 = arith.constant 0 : i32
    %c0_i32_0 = arith.constant 0 : i32
    %c0_i32_1 = arith.constant 0 : i32
    return %c0_i32, %c0_i32_0 : i32, i32
  }
  func.func @transform_6(%arg0: i32) -> (i32, i32) {
    %c0_i32 = arith.constant 0 : i32
    %c0_i32_0 = arith.constant 0 : i32
    %c0_i32_1 = arith.constant 0 : i32
    return %c0_i32, %c0_i32_0 : i32, i32
  }
  func.func @transform_7(%arg0: i32) -> (i32, i32) {
    %c0_i32 = arith.constant 0 : i32
    %c0_i32_0 = arith.constant 0 : i32
    %c0_i32_1 = arith.constant 0 : i32
    return %c0_i32, %c0_i32_0 : i32, i32
  }
  func.func @transform_8(%arg0: i32) -> (i32, i32) {
    %c1_i32 = arith.constant 1 : i32
    %c0_i32 = arith.constant 0 : i32
    return %c1_i32, %arg0 : i32, i32
  }
}

module attributes {stable_mosaic.version = 11 : i64} {
  func.func @_transition_kernel(%arg0: i32, %arg1: memref<32x384xbf16, #tpu.memory_space<vmem>>, %arg2: memref<32x1xf32, #tpu.memory_space<vmem>>, %arg3: memref<32x1xf32, #tpu.memory_space<vmem>>, %arg4: memref<10x32xbf16, #tpu.memory_space<vmem>>, %arg5: memref<10x384xbf16, #tpu.memory_space<vmem>>) attributes {dimension_semantics = [#tpu.dimension_semantics<parallel>], iteration_bounds = array<i64: 2>, scalar_prefetch = 0 : i64, scratch_operands = 0 : i64, tpu.core_type = #tpu.core_type<tc>, window_params = [{transform_indices = @transform_0, window_bounds = array<i64: 32, 384>}, {pipeline_mode = #tpu.pipeline_mode<synchronous>, transform_indices = @transform_1, window_bounds = array<i64: 32, 1>}, {pipeline_mode = #tpu.pipeline_mode<synchronous>, transform_indices = @transform_2, window_bounds = array<i64: 32, 1>}, {pipeline_mode = #tpu.pipeline_mode<synchronous>, transform_indices = @transform_3, window_bounds = array<i64: 10, 32>}, {transform_indices = @transform_4, window_bounds = array<i64: 10, 384>}]} {
    %c0 = arith.constant 0 : index
    %c0_0 = arith.constant 0 : index
    %0 = vector.load %arg1[%c0, %c0_0] : memref<32x384xbf16, #tpu.memory_space<vmem>>, vector<32x384xbf16>
    %1 = arith.extf %0 : vector<32x384xbf16> to vector<32x384xf32>
    %c0_1 = arith.constant 0 : index
    %c0_2 = arith.constant 0 : index
    %2 = vector.load %arg2[%c0_1, %c0_2] : memref<32x1xf32, #tpu.memory_space<vmem>>, vector<32x1xf32>
    %3 = vector.broadcast %2 : vector<32x1xf32> to vector<32x384xf32>
    %4 = arith.mulf %1, %3 : vector<32x384xf32>
    %c0_3 = arith.constant 0 : index
    %c0_4 = arith.constant 0 : index
    %5 = vector.load %arg3[%c0_3, %c0_4] : memref<32x1xf32, #tpu.memory_space<vmem>>, vector<32x1xf32>
    %6 = vector.broadcast %5 : vector<32x1xf32> to vector<32x384xf32>
    %7 = arith.addf %4, %6 : vector<32x384xf32>
    %cst = arith.constant 0.000000e+00 : f32
    %8 = vector.broadcast %cst : f32 to vector<32x384xf32>
    %9 = arith.cmpf oge, %7, %8 : vector<32x384xf32>
    %cst_5 = arith.constant 0.00999999977 : f32
    %10 = vector.broadcast %cst_5 : f32 to vector<32x384xf32>
    %11 = arith.mulf %10, %7 : vector<32x384xf32>
    %12 = arith.select %9, %7, %11 : vector<32x384xi1>, vector<32x384xf32>
    %c0_6 = arith.constant 0 : index
    %c0_7 = arith.constant 0 : index
    %13 = vector.load %arg4[%c0_6, %c0_7] : memref<10x32xbf16, #tpu.memory_space<vmem>>, vector<10x32xbf16>
    %14 = arith.truncf %12 : vector<32x384xf32> to vector<32x384xbf16>
    %cst_8 = arith.constant dense<0.000000e+00> : vector<10x384xf32>
    %15 = tpu.matmul %13, %14, %cst_8 {dimension_numbers = #tpu.dot_dimension_numbers<[1], [0], [0], [1], [0, 0, 1, 1], [], []>} : vector<10x32xbf16>, vector<32x384xbf16>, vector<10x384xf32> -> vector<10x384xf32>
    %16 = arith.truncf %15 : vector<10x384xf32> to vector<10x384xbf16>
    %c0_9 = arith.constant 0 : index
    %c0_10 = arith.constant 0 : index
    %17 = vector.load %arg5[%c0_9, %c0_10] : memref<10x384xbf16, #tpu.memory_space<vmem>>, vector<10x384xbf16>
    tpu.vector_store %arg5[%c0_9, %c0_10], %16 {strides = array<i32>} : memref<10x384xbf16, #tpu.memory_space<vmem>>, vector<10x384xbf16>,
    return
  }
  func.func @transform_0(%arg0: i32) -> (i32, i32) {
    %c0_i32 = arith.constant 0 : i32
    %c0_i32_0 = arith.constant 0 : i32
    return %c0_i32, %arg0 : i32, i32
  }
  func.func @transform_1(%arg0: i32) -> (i32, i32) {
    %c0_i32 = arith.constant 0 : i32
    %c0_i32_0 = arith.constant 0 : i32
    %c0_i32_1 = arith.constant 0 : i32
    return %c0_i32, %c0_i32_0 : i32, i32
  }
  func.func @transform_2(%arg0: i32) -> (i32, i32) {
    %c0_i32 = arith.constant 0 : i32
    %c0_i32_0 = arith.constant 0 : i32
    %c0_i32_1 = arith.constant 0 : i32
    return %c0_i32, %c0_i32_0 : i32, i32
  }
  func.func @transform_3(%arg0: i32) -> (i32, i32) {
    %c0_i32 = arith.constant 0 : i32
    %c0_i32_0 = arith.constant 0 : i32
    %c0_i32_1 = arith.constant 0 : i32
    return %c0_i32, %c0_i32_0 : i32, i32
  }
  func.func @transform_4(%arg0: i32) -> (i32, i32) {
    %c0_i32 = arith.constant 0 : i32
    %c0_i32_0 = arith.constant 0 : i32
    return %c0_i32, %arg0 : i32, i32
  }
}

module attributes {stable_mosaic.version = 11 : i64} {
  func.func @_dense_layer_kernel(%arg0: i32, %arg1: memref<32x128xbf16, #tpu.memory_space<vmem>>, %arg2: memref<1x128xf32, #tpu.memory_space<vmem>>, %arg3: memref<32x1xf32, #tpu.memory_space<vmem>>, %arg4: memref<32x1xf32, #tpu.memory_space<vmem>>, %arg5: memref<32x32xbf16, #tpu.memory_space<vmem>>, %arg6: memref<32x1xf32, #tpu.memory_space<vmem>>, %arg7: memref<32x1xf32, #tpu.memory_space<vmem>>, %arg8: memref<8x288xbf16, #tpu.memory_space<vmem>>, %arg9: memref<16x128xbf16, #tpu.memory_space<vmem>>) attributes {dimension_semantics = [#tpu.dimension_semantics<parallel>], iteration_bounds = array<i64: 2>, scalar_prefetch = 0 : i64, scratch_operands = 0 : i64, tpu.core_type = #tpu.core_type<tc>, window_params = [{transform_indices = @transform_0, window_bounds = array<i64: 32, 128>}, {pipeline_mode = #tpu.pipeline_mode<synchronous>, transform_indices = @transform_1, window_bounds = array<i64: 1, 128>}, {pipeline_mode = #tpu.pipeline_mode<synchronous>, transform_indices = @transform_2, window_bounds = array<i64: 32, 1>}, {pipeline_mode = #tpu.pipeline_mode<synchronous>, transform_indices = @transform_3, window_bounds = array<i64: 32, 1>}, {pipeline_mode = #tpu.pipeline_mode<synchronous>, transform_indices = @transform_4, window_bounds = array<i64: 32, 32>}, {pipeline_mode = #tpu.pipeline_mode<synchronous>, transform_indices = @transform_5, window_bounds = array<i64: 32, 1>}, {pipeline_mode = #tpu.pipeline_mode<synchronous>, transform_indices = @transform_6, window_bounds = array<i64: 32, 1>}, {pipeline_mode = #tpu.pipeline_mode<synchronous>, transform_indices = @transform_7, window_bounds = array<i64: 8, 288>}, {transform_indices = @transform_8, window_bounds = array<i64: 16, 128>}]} {
    %c0 = arith.constant 0 : index
    %c0_0 = arith.constant 0 : index
    %0 = vector.load %arg1[%c0, %c0_0] : memref<32x128xbf16, #tpu.memory_space<vmem>>, vector<32x128xbf16>
    %1 = arith.extf %0 : vector<32x128xbf16> to vector<32x128xf32>
    %c0_1 = arith.constant 0 : index
    %c0_2 = arith.constant 0 : index
    %2 = vector.load %arg3[%c0_1, %c0_2] : memref<32x1xf32, #tpu.memory_space<vmem>>, vector<32x1xf32>
    %3 = vector.broadcast %2 : vector<32x1xf32> to vector<32x128xf32>
    %4 = arith.mulf %1, %3 : vector<32x128xf32>
    %c0_3 = arith.constant 0 : index
    %c0_4 = arith.constant 0 : index
    %5 = vector.load %arg4[%c0_3, %c0_4] : memref<32x1xf32, #tpu.memory_space<vmem>>, vector<32x1xf32>
    %6 = vector.broadcast %5 : vector<32x1xf32> to vector<32x128xf32>
    %7 = arith.addf %4, %6 : vector<32x128xf32>
    %cst = arith.constant 0.000000e+00 : f32
    %8 = vector.broadcast %cst : f32 to vector<32x128xf32>
    %9 = arith.cmpf oge, %7, %8 : vector<32x128xf32>
    %cst_5 = arith.constant 0.00999999977 : f32
    %10 = vector.broadcast %cst_5 : f32 to vector<32x128xf32>
    %11 = arith.mulf %10, %7 : vector<32x128xf32>
    %12 = arith.select %9, %7, %11 : vector<32x128xi1>, vector<32x128xf32>
    %c0_6 = arith.constant 0 : index
    %c0_7 = arith.constant 0 : index
    %13 = vector.load %arg5[%c0_6, %c0_7] : memref<32x32xbf16, #tpu.memory_space<vmem>>, vector<32x32xbf16>
    %14 = arith.truncf %12 : vector<32x128xf32> to vector<32x128xbf16>
    %cst_8 = arith.constant dense<0.000000e+00> : vector<32x128xf32>
    %15 = tpu.matmul %13, %14, %cst_8 {dimension_numbers = #tpu.dot_dimension_numbers<[1], [0], [0], [1], [0, 0, 1, 1], [], []>} : vector<32x32xbf16>, vector<32x128xbf16>, vector<32x128xf32> -> vector<32x128xf32>
    %c0_9 = arith.constant 0 : index
    %c0_10 = arith.constant 0 : index
    %16 = vector.load %arg6[%c0_9, %c0_10] : memref<32x1xf32, #tpu.memory_space<vmem>>, vector<32x1xf32>
    %17 = vector.broadcast %16 : vector<32x1xf32> to vector<32x128xf32>
    %18 = arith.mulf %15, %17 : vector<32x128xf32>
    %c0_11 = arith.constant 0 : index
    %c0_12 = arith.constant 0 : index
    %19 = vector.load %arg7[%c0_11, %c0_12] : memref<32x1xf32, #tpu.memory_space<vmem>>, vector<32x1xf32>
    %20 = vector.broadcast %19 : vector<32x1xf32> to vector<32x128xf32>
    %21 = arith.addf %18, %20 : vector<32x128xf32>
    %cst_13 = arith.constant 0.000000e+00 : f32
    %22 = vector.broadcast %cst_13 : f32 to vector<32x128xf32>
    %23 = arith.cmpf oge, %21, %22 : vector<32x128xf32>
    %cst_14 = arith.constant 0.00999999977 : f32
    %24 = vector.broadcast %cst_14 : f32 to vector<32x128xf32>
    %25 = arith.mulf %24, %21 : vector<32x128xf32>
    %26 = arith.select %23, %21, %25 : vector<32x128xi1>, vector<32x128xf32>
    %c0_15 = arith.constant 0 : index
    %c0_16 = arith.constant 0 : index
    %27 = vector.load %arg2[%c0_15, %c0_16] : memref<1x128xf32, #tpu.memory_space<vmem>>, vector<1x128xf32>
    %28 = vector.broadcast %27 : vector<1x128xf32> to vector<32x128xf32>
    %29 = arith.mulf %26, %28 : vector<32x128xf32>
    %c11_i32 = arith.constant 11 : i32
    %30 = tpu.dynamic_rotate %29 by %c11_i32 dim 1 : vector<32x128xf32>, i32 -> vector<32x128xf32>
    %c10_i32 = arith.constant 10 : i32
    %31 = tpu.dynamic_rotate %29 by %c10_i32 dim 1 : vector<32x128xf32>, i32 -> vector<32x128xf32>
    %c9_i32 = arith.constant 9 : i32
    %32 = tpu.dynamic_rotate %29 by %c9_i32 dim 1 : vector<32x128xf32>, i32 -> vector<32x128xf32>
    %c1_i32 = arith.constant 1 : i32
    %33 = tpu.dynamic_rotate %29 by %c1_i32 dim 1 : vector<32x128xf32>, i32 -> vector<32x128xf32>
    %c127_i32 = arith.constant 127 : i32
    %34 = tpu.dynamic_rotate %29 by %c127_i32 dim 1 : vector<32x128xf32>, i32 -> vector<32x128xf32>
    %c119_i32 = arith.constant 119 : i32
    %35 = tpu.dynamic_rotate %29 by %c119_i32 dim 1 : vector<32x128xf32>, i32 -> vector<32x128xf32>
    %c118_i32 = arith.constant 118 : i32
    %36 = tpu.dynamic_rotate %29 by %c118_i32 dim 1 : vector<32x128xf32>, i32 -> vector<32x128xf32>
    %c117_i32 = arith.constant 117 : i32
    %37 = tpu.dynamic_rotate %29 by %c117_i32 dim 1 : vector<32x128xf32>, i32 -> vector<32x128xf32>
    %38 = tpu.concatenate %30, %31, %32, %33, %29, %34, %35, %36, %37 in 0 : vector<32x128xf32>, vector<32x128xf32>, vector<32x128xf32>, vector<32x128xf32>, vector<32x128xf32>, vector<32x128xf32>, vector<32x128xf32>, vector<32x128xf32>, vector<32x128xf32> -> vector<288x128xf32>
    %39 = arith.truncf %38 : vector<288x128xf32> to vector<288x128xbf16>
    %c0_17 = arith.constant 0 : index
    %c0_18 = arith.constant 0 : index
    %40 = vector.load %arg8[%c0_17, %c0_18] : memref<8x288xbf16, #tpu.memory_space<vmem>>, vector<8x288xbf16>
    %cst_19 = arith.constant dense<0.000000e+00> : vector<8x128xf32>
    %41 = tpu.matmul %40, %39, %cst_19 {dimension_numbers = #tpu.dot_dimension_numbers<[1], [0], [0], [1], [0, 0, 1, 1], [], []>} : vector<8x288xbf16>, vector<288x128xbf16>, vector<8x128xf32> -> vector<8x128xf32>
    %c0_20 = arith.constant 0 : index
    %c0_21 = arith.constant 0 : index
    %42 = vector.load %arg2[%c0_20, %c0_21] : memref<1x128xf32, #tpu.memory_space<vmem>>, vector<1x128xf32>
    %43 = vector.broadcast %42 : vector<1x128xf32> to vector<8x128xf32>
    %44 = arith.mulf %41, %43 : vector<8x128xf32>
    %cst_22 = arith.constant 0.000000e+00 : f32
    %45 = vector.broadcast %cst_22 : f32 to vector<8x128xf32>
    %46 = tpu.concatenate %44, %45 in 0 : vector<8x128xf32>, vector<8x128xf32> -> vector<16x128xf32>
    %47 = arith.truncf %46 : vector<16x128xf32> to vector<16x128xbf16>
    %c0_23 = arith.constant 0 : index
    %c0_24 = arith.constant 0 : index
    %48 = vector.load %arg9[%c0_23, %c0_24] : memref<16x128xbf16, #tpu.memory_space<vmem>>, vector<16x128xbf16>
    tpu.vector_store %arg9[%c0_23, %c0_24], %47 {strides = array<i32>} : memref<16x128xbf16, #tpu.memory_space<vmem>>, vector<16x128xbf16>,
    return
  }
  func.func @transform_0(%arg0: i32) -> (i32, i32) {
    %c0_i32 = arith.constant 0 : i32
    %c0_i32_0 = arith.constant 0 : i32
    return %c0_i32, %arg0 : i32, i32
  }
  func.func @transform_1(%arg0: i32) -> (i32, i32) {
    %c0_i32 = arith.constant 0 : i32
    %c0_i32_0 = arith.constant 0 : i32
    %c0_i32_1 = arith.constant 0 : i32
    return %c0_i32, %c0_i32_0 : i32, i32
  }
  func.func @transform_2(%arg0: i32) -> (i32, i32) {
    %c0_i32 = arith.constant 0 : i32
    %c0_i32_0 = arith.constant 0 : i32
    %c0_i32_1 = arith.constant 0 : i32
    return %c0_i32, %c0_i32_0 : i32, i32
  }
  func.func @transform_3(%arg0: i32) -> (i32, i32) {
    %c0_i32 = arith.constant 0 : i32
    %c0_i32_0 = arith.constant 0 : i32
    %c0_i32_1 = arith.constant 0 : i32
    return %c0_i32, %c0_i32_0 : i32, i32
  }
  func.func @transform_4(%arg0: i32) -> (i32, i32) {
    %c0_i32 = arith.constant 0 : i32
    %c0_i32_0 = arith.constant 0 : i32
    %c0_i32_1 = arith.constant 0 : i32
    return %c0_i32, %c0_i32_0 : i32, i32
  }
  func.func @transform_5(%arg0: i32) -> (i32, i32) {
    %c0_i32 = arith.constant 0 : i32
    %c0_i32_0 = arith.constant 0 : i32
    %c0_i32_1 = arith.constant 0 : i32
    return %c0_i32, %c0_i32_0 : i32, i32
  }
  func.func @transform_6(%arg0: i32) -> (i32, i32) {
    %c0_i32 = arith.constant 0 : i32
    %c0_i32_0 = arith.constant 0 : i32
    %c0_i32_1 = arith.constant 0 : i32
    return %c0_i32, %c0_i32_0 : i32, i32
  }
  func.func @transform_7(%arg0: i32) -> (i32, i32) {
    %c0_i32 = arith.constant 0 : i32
    %c0_i32_0 = arith.constant 0 : i32
    %c0_i32_1 = arith.constant 0 : i32
    return %c0_i32, %c0_i32_0 : i32, i32
  }
  func.func @transform_8(%arg0: i32) -> (i32, i32) {
    %c1_i32 = arith.constant 1 : i32
    %c0_i32 = arith.constant 0 : i32
    return %c1_i32, %arg0 : i32, i32
  }
}

module attributes {stable_mosaic.version = 11 : i64} {
  func.func @_head_kernel(%arg0: i32, %arg1: memref<32x2x128xbf16, #tpu.memory_space<vmem>>, %arg2: memref<1x1x128xf32, #tpu.memory_space<vmem>>, %arg3: memref<32x1x1xf32, #tpu.memory_space<vmem>>, %arg4: memref<32x1x1xf32, #tpu.memory_space<vmem>>, %arg5: memref<9x32xbf16, #tpu.memory_space<vmem>>, %arg6: memref<9x1xf32, #tpu.memory_space<vmem>>, %arg7: memref<9x1xf32, #tpu.memory_space<vmem>>, %arg8: memref<9x1xf32, #tpu.memory_space<vmem>>, %arg9: memref<4x9xbf16, #tpu.memory_space<vmem>>, %arg10: memref<4x1xf32, #tpu.memory_space<vmem>>, %arg11: memref<4x1xf32, #tpu.memory_space<vmem>>, %arg12: memref<4x1xf32, #tpu.memory_space<vmem>>, %arg13: memref<10x4xbf16, #tpu.memory_space<vmem>>, %arg14: memref<10x1xf32, #tpu.memory_space<vmem>>, %arg15: memref<10x2xf32, #tpu.memory_space<vmem>>) attributes {dimension_semantics = [#tpu.dimension_semantics<arbitrary>], iteration_bounds = array<i64: 1>, scalar_prefetch = 0 : i64, scratch_operands = 0 : i64, tpu.core_type = #tpu.core_type<tc>, window_params = [{pipeline_mode = #tpu.pipeline_mode<synchronous>, transform_indices = @transform_0, window_bounds = array<i64: 32, 2, 128>}, {pipeline_mode = #tpu.pipeline_mode<synchronous>, transform_indices = @transform_1, window_bounds = array<i64: 1, 1, 128>}, {pipeline_mode = #tpu.pipeline_mode<synchronous>, transform_indices = @transform_2, window_bounds = array<i64: 32, 1, 1>}, {pipeline_mode = #tpu.pipeline_mode<synchronous>, transform_indices = @transform_3, window_bounds = array<i64: 32, 1, 1>}, {pipeline_mode = #tpu.pipeline_mode<synchronous>, transform_indices = @transform_4, window_bounds = array<i64: 9, 32>}, {pipeline_mode = #tpu.pipeline_mode<synchronous>, transform_indices = @transform_5, window_bounds = array<i64: 9, 1>}, {pipeline_mode = #tpu.pipeline_mode<synchronous>, transform_indices = @transform_6, window_bounds = array<i64: 9, 1>}, {pipeline_mode = #tpu.pipeline_mode<synchronous>, transform_indices = @transform_7, window_bounds = array<i64: 9, 1>}, {pipeline_mode = #tpu.pipeline_mode<synchronous>, transform_indices = @transform_8, window_bounds = array<i64: 4, 9>}, {pipeline_mode = #tpu.pipeline_mode<synchronous>, transform_indices = @transform_9, window_bounds = array<i64: 4, 1>}, {pipeline_mode = #tpu.pipeline_mode<synchronous>, transform_indices = @transform_10, window_bounds = array<i64: 4, 1>}, {pipeline_mode = #tpu.pipeline_mode<synchronous>, transform_indices = @transform_11, window_bounds = array<i64: 4, 1>}, {pipeline_mode = #tpu.pipeline_mode<synchronous>, transform_indices = @transform_12, window_bounds = array<i64: 10, 4>}, {pipeline_mode = #tpu.pipeline_mode<synchronous>, transform_indices = @transform_13, window_bounds = array<i64: 10, 1>}, {pipeline_mode = #tpu.pipeline_mode<synchronous>, transform_indices = @transform_14, window_bounds = array<i64: 10, 2>}]} {
    %c0 = arith.constant 0 : index
    %c0_0 = arith.constant 0 : index
    %c0_1 = arith.constant 0 : index
    %0 = vector.load %arg1[%c0, %c0_0, %c0_1] : memref<32x2x128xbf16, #tpu.memory_space<vmem>>, vector<32x2x128xbf16>
    %1 = arith.extf %0 : vector<32x2x128xbf16> to vector<32x2x128xf32>
    %c0_2 = arith.constant 0 : index
    %c0_3 = arith.constant 0 : index
    %c0_4 = arith.constant 0 : index
    %2 = vector.load %arg3[%c0_2, %c0_3, %c0_4] : memref<32x1x1xf32, #tpu.memory_space<vmem>>, vector<32x1x1xf32>
    %3 = vector.broadcast %2 : vector<32x1x1xf32> to vector<32x2x128xf32>
    %4 = arith.mulf %1, %3 : vector<32x2x128xf32>
    %c0_5 = arith.constant 0 : index
    %c0_6 = arith.constant 0 : index
    %c0_7 = arith.constant 0 : index
    %5 = vector.load %arg4[%c0_5, %c0_6, %c0_7] : memref<32x1x1xf32, #tpu.memory_space<vmem>>, vector<32x1x1xf32>
    %6 = vector.broadcast %5 : vector<32x1x1xf32> to vector<32x2x128xf32>
    %7 = arith.addf %4, %6 : vector<32x2x128xf32>
    %cst = arith.constant 0.000000e+00 : f32
    %8 = vector.broadcast %cst : f32 to vector<32x2x128xf32>
    %9 = arith.cmpf oge, %7, %8 : vector<32x2x128xf32>
    %cst_8 = arith.constant 0.00999999977 : f32
    %10 = vector.broadcast %cst_8 : f32 to vector<32x2x128xf32>
    %11 = arith.mulf %10, %7 : vector<32x2x128xf32>
    %12 = arith.select %9, %7, %11 : vector<32x2x128xi1>, vector<32x2x128xf32>
    %c0_9 = arith.constant 0 : index
    %c0_10 = arith.constant 0 : index
    %c0_11 = arith.constant 0 : index
    %13 = vector.load %arg2[%c0_9, %c0_10, %c0_11] : memref<1x1x128xf32, #tpu.memory_space<vmem>>, vector<1x1x128xf32>
    %14 = vector.broadcast %13 : vector<1x1x128xf32> to vector<32x2x128xf32>
    %15 = arith.mulf %12, %14 : vector<32x2x128xf32>
    %cst_12 = arith.constant dense<0.000000e+00> : vector<32x2xf32>
    %16 = vector.multi_reduction <add>, %15, %cst_12 [2] : vector<32x2x128xf32> to vector<32x2xf32>
    %cst_13 = arith.constant 1.562500e-02 : f32
    %17 = vector.broadcast %cst_13 : f32 to vector<32x2xf32>
    %18 = arith.mulf %16, %17 : vector<32x2xf32>
    %c0_14 = arith.constant 0 : index
    %c0_15 = arith.constant 0 : index
    %19 = vector.load %arg5[%c0_14, %c0_15] : memref<9x32xbf16, #tpu.memory_space<vmem>>, vector<9x32xbf16>
    %20 = arith.truncf %18 : vector<32x2xf32> to vector<32x2xbf16>
    %cst_16 = arith.constant dense<0.000000e+00> : vector<9x2xf32>
    %21 = tpu.matmul %19, %20, %cst_16 {dimension_numbers = #tpu.dot_dimension_numbers<[1], [0], [0], [1], [0, 0, 1, 1], [], []>} : vector<9x32xbf16>, vector<32x2xbf16>, vector<9x2xf32> -> vector<9x2xf32>
    %c0_17 = arith.constant 0 : index
    %c0_18 = arith.constant 0 : index
    %22 = vector.load %arg6[%c0_17, %c0_18] : memref<9x1xf32, #tpu.memory_space<vmem>>, vector<9x1xf32>
    %23 = vector.broadcast %22 : vector<9x1xf32> to vector<9x2xf32>
    %24 = arith.addf %21, %23 : vector<9x2xf32>
    %cst_19 = arith.constant 0.000000e+00 : f32
    %25 = vector.broadcast %cst_19 : f32 to vector<9x2xf32>
    %26 = arith.cmpf oge, %24, %25 : vector<9x2xf32>
    %cst_20 = arith.constant 0.00999999977 : f32
    %27 = vector.broadcast %cst_20 : f32 to vector<9x2xf32>
    %28 = arith.mulf %27, %24 : vector<9x2xf32>
    %29 = arith.select %26, %24, %28 : vector<9x2xi1>, vector<9x2xf32>
    %c0_21 = arith.constant 0 : index
    %c0_22 = arith.constant 0 : index
    %30 = vector.load %arg7[%c0_21, %c0_22] : memref<9x1xf32, #tpu.memory_space<vmem>>, vector<9x1xf32>
    %31 = vector.broadcast %30 : vector<9x1xf32> to vector<9x2xf32>
    %32 = arith.mulf %29, %31 : vector<9x2xf32>
    %c0_23 = arith.constant 0 : index
    %c0_24 = arith.constant 0 : index
    %33 = vector.load %arg8[%c0_23, %c0_24] : memref<9x1xf32, #tpu.memory_space<vmem>>, vector<9x1xf32>
    %34 = vector.broadcast %33 : vector<9x1xf32> to vector<9x2xf32>
    %35 = arith.addf %32, %34 : vector<9x2xf32>
    %c0_25 = arith.constant 0 : index
    %c0_26 = arith.constant 0 : index
    %36 = vector.load %arg9[%c0_25, %c0_26] : memref<4x9xbf16, #tpu.memory_space<vmem>>, vector<4x9xbf16>
    %37 = arith.truncf %35 : vector<9x2xf32> to vector<9x2xbf16>
    %cst_27 = arith.constant dense<0.000000e+00> : vector<4x2xf32>
    %38 = tpu.matmul %36, %37, %cst_27 {dimension_numbers = #tpu.dot_dimension_numbers<[1], [0], [0], [1], [0, 0, 1, 1], [], []>} : vector<4x9xbf16>, vector<9x2xbf16>, vector<4x2xf32> -> vector<4x2xf32>
    %c0_28 = arith.constant 0 : index
    %c0_29 = arith.constant 0 : index
    %39 = vector.load %arg10[%c0_28, %c0_29] : memref<4x1xf32, #tpu.memory_space<vmem>>, vector<4x1xf32>
    %40 = vector.broadcast %39 : vector<4x1xf32> to vector<4x2xf32>
    %41 = arith.addf %38, %40 : vector<4x2xf32>
    %cst_30 = arith.constant 0.000000e+00 : f32
    %42 = vector.broadcast %cst_30 : f32 to vector<4x2xf32>
    %43 = arith.cmpf oge, %41, %42 : vector<4x2xf32>
    %cst_31 = arith.constant 0.00999999977 : f32
    %44 = vector.broadcast %cst_31 : f32 to vector<4x2xf32>
    %45 = arith.mulf %44, %41 : vector<4x2xf32>
    %46 = arith.select %43, %41, %45 : vector<4x2xi1>, vector<4x2xf32>
    %c0_32 = arith.constant 0 : index
    %c0_33 = arith.constant 0 : index
    %47 = vector.load %arg11[%c0_32, %c0_33] : memref<4x1xf32, #tpu.memory_space<vmem>>, vector<4x1xf32>
    %48 = vector.broadcast %47 : vector<4x1xf32> to vector<4x2xf32>
    %49 = arith.mulf %46, %48 : vector<4x2xf32>
    %c0_34 = arith.constant 0 : index
    %c0_35 = arith.constant 0 : index
    %50 = vector.load %arg12[%c0_34, %c0_35] : memref<4x1xf32, #tpu.memory_space<vmem>>, vector<4x1xf32>
    %51 = vector.broadcast %50 : vector<4x1xf32> to vector<4x2xf32>
    %52 = arith.addf %49, %51 : vector<4x2xf32>
    %c0_36 = arith.constant 0 : index
    %c0_37 = arith.constant 0 : index
    %53 = vector.load %arg13[%c0_36, %c0_37] : memref<10x4xbf16, #tpu.memory_space<vmem>>, vector<10x4xbf16>
    %54 = arith.truncf %52 : vector<4x2xf32> to vector<4x2xbf16>
    %cst_38 = arith.constant dense<0.000000e+00> : vector<10x2xf32>
    %55 = tpu.matmul %53, %54, %cst_38 {dimension_numbers = #tpu.dot_dimension_numbers<[1], [0], [0], [1], [0, 0, 1, 1], [], []>} : vector<10x4xbf16>, vector<4x2xbf16>, vector<10x2xf32> -> vector<10x2xf32>
    %c0_39 = arith.constant 0 : index
    %c0_40 = arith.constant 0 : index
    %56 = vector.load %arg14[%c0_39, %c0_40] : memref<10x1xf32, #tpu.memory_space<vmem>>, vector<10x1xf32>
    %57 = vector.broadcast %56 : vector<10x1xf32> to vector<10x2xf32>
    %58 = arith.addf %55, %57 : vector<10x2xf32>
    %c0_41 = arith.constant 0 : index
    %c0_42 = arith.constant 0 : index
    %59 = vector.load %arg15[%c0_41, %c0_42] : memref<10x2xf32, #tpu.memory_space<vmem>>, vector<10x2xf32>
    tpu.vector_store %arg15[%c0_41, %c0_42], %58 {strides = array<i32>} : memref<10x2xf32, #tpu.memory_space<vmem>>, vector<10x2xf32>,
    return
  }
  func.func @transform_0(%arg0: i32) -> (i32, i32, i32) {
    %c0_i32 = arith.constant 0 : i32
    %c0_i32_0 = arith.constant 0 : i32
    %c0_i32_1 = arith.constant 0 : i32
    %c0_i32_2 = arith.constant 0 : i32
    return %c0_i32, %c0_i32_0, %c0_i32_1 : i32, i32, i32
  }
  func.func @transform_1(%arg0: i32) -> (i32, i32, i32) {
    %c0_i32 = arith.constant 0 : i32
    %c0_i32_0 = arith.constant 0 : i32
    %c0_i32_1 = arith.constant 0 : i32
    %c0_i32_2 = arith.constant 0 : i32
    return %c0_i32, %c0_i32_0, %c0_i32_1 : i32, i32, i32
  }
  func.func @transform_2(%arg0: i32) -> (i32, i32, i32) {
    %c0_i32 = arith.constant 0 : i32
    %c0_i32_0 = arith.constant 0 : i32
    %c0_i32_1 = arith.constant 0 : i32
    %c0_i32_2 = arith.constant 0 : i32
    return %c0_i32, %c0_i32_0, %c0_i32_1 : i32, i32, i32
  }
  func.func @transform_3(%arg0: i32) -> (i32, i32, i32) {
    %c0_i32 = arith.constant 0 : i32
    %c0_i32_0 = arith.constant 0 : i32
    %c0_i32_1 = arith.constant 0 : i32
    %c0_i32_2 = arith.constant 0 : i32
    return %c0_i32, %c0_i32_0, %c0_i32_1 : i32, i32, i32
  }
  func.func @transform_4(%arg0: i32) -> (i32, i32) {
    %c0_i32 = arith.constant 0 : i32
    %c0_i32_0 = arith.constant 0 : i32
    %c0_i32_1 = arith.constant 0 : i32
    return %c0_i32, %c0_i32_0 : i32, i32
  }
  func.func @transform_5(%arg0: i32) -> (i32, i32) {
    %c0_i32 = arith.constant 0 : i32
    %c0_i32_0 = arith.constant 0 : i32
    %c0_i32_1 = arith.constant 0 : i32
    return %c0_i32, %c0_i32_0 : i32, i32
  }
  func.func @transform_6(%arg0: i32) -> (i32, i32) {
    %c0_i32 = arith.constant 0 : i32
    %c0_i32_0 = arith.constant 0 : i32
    %c0_i32_1 = arith.constant 0 : i32
    return %c0_i32, %c0_i32_0 : i32, i32
  }
  func.func @transform_7(%arg0: i32) -> (i32, i32) {
    %c0_i32 = arith.constant 0 : i32
    %c0_i32_0 = arith.constant 0 : i32
    %c0_i32_1 = arith.constant 0 : i32
    return %c0_i32, %c0_i32_0 : i32, i32
  }
  func.func @transform_8(%arg0: i32) -> (i32, i32) {
    %c0_i32 = arith.constant 0 : i32
    %c0_i32_0 = arith.constant 0 : i32
    %c0_i32_1 = arith.constant 0 : i32
    return %c0_i32, %c0_i32_0 : i32, i32
  }
  func.func @transform_9(%arg0: i32) -> (i32, i32) {
    %c0_i32 = arith.constant 0 : i32
    %c0_i32_0 = arith.constant 0 : i32
    %c0_i32_1 = arith.constant 0 : i32
    return %c0_i32, %c0_i32_0 : i32, i32
  }
  func.func @transform_10(%arg0: i32) -> (i32, i32) {
    %c0_i32 = arith.constant 0 : i32
    %c0_i32_0 = arith.constant 0 : i32
    %c0_i32_1 = arith.constant 0 : i32
    return %c0_i32, %c0_i32_0 : i32, i32
  }
  func.func @transform_11(%arg0: i32) -> (i32, i32) {
    %c0_i32 = arith.constant 0 : i32
    %c0_i32_0 = arith.constant 0 : i32
    %c0_i32_1 = arith.constant 0 : i32
    return %c0_i32, %c0_i32_0 : i32, i32
  }
  func.func @transform_12(%arg0: i32) -> (i32, i32) {
    %c0_i32 = arith.constant 0 : i32
    %c0_i32_0 = arith.constant 0 : i32
    %c0_i32_1 = arith.constant 0 : i32
    return %c0_i32, %c0_i32_0 : i32, i32
  }
  func.func @transform_13(%arg0: i32) -> (i32, i32) {
    %c0_i32 = arith.constant 0 : i32
    %c0_i32_0 = arith.constant 0 : i32
    %c0_i32_1 = arith.constant 0 : i32
    return %c0_i32, %c0_i32_0 : i32, i32
  }
  func.func @transform_14(%arg0: i32) -> (i32, i32) {
    %c0_i32 = arith.constant 0 : i32
    %c0_i32_0 = arith.constant 0 : i32
    %c0_i32_1 = arith.constant 0 : i32
    return %c0_i32, %c0_i32_0 : i32, i32
  }
}

</mosaic_0001>

<bundles_post_ra>
// kernel: densenet_forward.7
= control target key start
LH: loop header
LB: loop body
LE: loop exit
PB: predicated region body
PF: predicated region fallthrough
CT: control target
= control target key end

     0   :  { %s1279_s12 = smov 0   ;;  %s1281_s13 = smov 0   ;;  %s1858_s0 = inlined_call_operand.vmem [shape: f32[8,2560], index: 0, kind: input, shape index: {}]   ;;  %s1859_s1 = inlined_call_operand.vmem [shape: f32[1,1280], index: 1, kind: input, shape index: {}]   ;;  %s1860_s2 = inlined_call_operand.vmem [shape: bf16[16,72], index: 2, kind: input, shape index: {}]   ;;  %s1861_s3 = inlined_call_operand.vmem [shape: bf16[16,2560], index: 3, kind: output, shape index: {}]  }
   0x1   :  { %s1283_s14 = smov 0  }
   0x2 LB: > { %s1292_s15 = sadd.s32 4294967295, %s1248_s14   ;;  %s1294_s16 = sadd.s32 1, %s1248_s14   ;;  %s1248_s14 = sphi %s1283_s14, %s1867_s14   ;;  %s1244_s13 = sphi %s1281_s13, %s1866_s13   ;;  %s1240_s12 = sphi %s1279_s12, %s1865_s12  }
   0x3   : > { %s85_s17 = ssub.s32 %s1248_s14, %s1294_s16  ;;  %s88_s18 = sadd.s32 1, %s1244_s13 }
   0x4   : > { %p86_p0 = scmp.eq.s32.totalorder %s85_s17, 0  ;;  %p98_p1 = scmp.ne.s32.totalorder %s1244_s13, %s1240_s12 }
   0x5   : > { %p99_p2 = scmp.eq.s32.totalorder %s1292_s15, 1  ;;  %p979_p3 = scmp.ge.s32.totalorder %s1248_s14, 1 }
   0x6   : > { %s1302_s19 = scalar_select %p86_p0, %s1244_s13, %s88_s18  }
   0x7   : > { %p1304_p4 = por %p99_p2, %p98_p1  ;;  %p138_p5 = scmp.lt.s32.totalorder %s1248_s14, 3 }
   0x9   : > { %p139_p6 = pnand %p979_p3, %p138_p5 }
   0xa   : > { %s161_s21 = smul.u32 (!%p139_p6), 10, %s1292_s15  ;;  %s1250_s26 = smov (!%p139_p6), 35   ;;  %v1258_v15 = vmov (!%p139_p6), 0   ;;  %v1862_v21 = vlaneseq (!%p139_p6)  ;;  %vm490_vm8 = vcmask (!%p139_p6), 1043456   ;;  %vm486_vm9 = vcmask (!%p139_p6), 588800  }
   0xb   : > { %142 = sbr.rel (%p139_p6) target bundleno = 463 (0x1cf), region = 32  ;;  %s1251_s27 = smov (!%p139_p6), 34   ;;  %553 = vmatprep.mubr.bf16.mxu0 (!%p139_p6), %v1258_v15  ;;  %596 = vmatprep.mubr.bf16.mxu1 (!%p139_p6), %v1258_v15 }
   0xc   : > { %p162_p7 = scmp.lt.s32.totalorder (!%p139_p6), %s161_s21, 19  ;;  %s1252_s28 = smov (!%p139_p6), 1   ;;  %v1426_v24 = vand.u32 (!%p139_p6), 127, %v1862_v21 }
   0xd   : > { %s1253_s29 = smov (!%p139_p6), 33   ;;  %s1254_s30 = smov (!%p139_p6), 127  }
   0xe   : > { %s1255_s4 = smov (!%p139_p6), 94   ;;  %s1256_s5 = smov (!%p139_p6), 95   ;;  %vm201_vm0 = vcmp.lt.s32.totalorder (!%p139_p6), %v1426_v24, 35  ;;  %vm232_vm1 = vcmp.lt.s32.totalorder (!%p139_p6), %v1426_v24, 34  ;;  %vm263_vm2 = vcmp.lt.s32.totalorder (!%p139_p6), %v1426_v24, 33  ;;  %vm294_vm3 = vcmp.lt.s32.totalorder (!%p139_p6), %v1426_v24, 1 }
   0xf   : > { %s1257_s6 = smov (!%p139_p6), 93   ;;  %vm325_vm4 = vcmp.lt.s32.totalorder (!%p139_p6), %v1426_v24, 127  ;;  %vm356_vm5 = vcmp.lt.s32.totalorder (!%p139_p6), %v1426_v24, 95  ;;  %vm387_vm6 = vcmp.lt.s32.totalorder (!%p139_p6), %v1426_v24, 94  ;;  %vm418_vm7 = vcmp.lt.s32.totalorder (!%p139_p6), %v1426_v24, 93  ;;  %s158_s11 = sand.u32 (!%p139_p6), 1, %s1240_s12  }
  0x10   : > { %v1864_v24 = vlaneseq (!%p139_p6)  ;;  %s1016_s14 = smul.u32 (!%p139_p6), 80, %s158_s11 }
  0x12   : > { %s1869_s21 = smov (!%p162_p7, %s161_s21), 19  ;;  %s1811_s17 = scalar_lea.vmem [#allocation2], %s1016_s14 }
  0x13   : > { %s980_s22 = sshll.u32 %s1869_s21, 3  ;;  %s1015_s21 = smul.u32 (%p1304_p4), 40, %s1292_s15 }
  0x14   : > { %s1312_s25 = scalar_lea.vmem %s1858_s0, %s980_s22 }
  0x15   : > { %v1315_v0 = vld [vmem:[%s1312_s25 + $0x10] sm:$0xff]  ;;  %v1318_v1 = vld [vmem:[%s1312_s25 + $0x48] sm:$0xff]  ;;  %v1321_v2 = vld [vmem:[%s1312_s25] sm:$0xff]  ;;  %s889_s23 = scalar_lea.vmem (%p1304_p4), %s1861_s3, %s1015_s21 }
  0x16   : > { %v1060_v3 = vpack.i.bf16 %v1315_v0, %v1318_v1  ;;  %v1326_v4 = vld [vmem:[%s1312_s25 + $0x8] sm:$0xff]  ;;  %v1337_v6 = vld [vmem:[%s1312_s25 + $0x18] sm:$0xff]  ;;  %v1357_v11 = vld [vmem:[%s1312_s25 + $0x30] sm:$0xff] }
  0x17   : > { %v1050_v5 = vpack.i.bf16 %v1326_v4, %v1321_v2  ;;  %v1095_v7 = vpack.i.bf16 %v1337_v6, %v1321_v2  ;;  %v1090_v8 = vpack.i.bf16 %v1315_v0, %v1326_v4  ;;  %v1125_v9 = vpack.i.bf16 %v1337_v6, %v1315_v0  ;;  %v1354_v10 = vld [vmem:[%s1312_s25 + $0x28] sm:$0xff]  ;;  %v1360_v12 = vld [vmem:[%s1312_s25 + $0x20] sm:$0xff]  ;;  %v1391_v17 = vld [vmem:[%s1312_s25 + $0x38] sm:$0xff] }
  0x18   : > { %1061 = vrot.lane.b32.xlu1 %v1060_v3, %s1250_s26  ;;  %v1135_v13 = vpack.i.bf16 %v1357_v11, %v1354_v10  ;;  %v1130_v14 = vpack.i.bf16 %v1360_v12, %v1337_v6  ;;  %v1165_v16 = vpack.i.bf16 %v1354_v10, %v1360_v12  ;;  %v1394_v18 = vld [vmem:[%s1312_s25 + $0x40] sm:$0xff]  ;;  %v1200_v20 = vpack.i.bf16 %v1391_v17, %v1357_v11 }
  0x19   : > { %1051 = vrot.lane.b32.xlu0 %v1050_v5, %s1250_s26  ;;  %v1190_v19 = vpack.i.bf16 %v1394_v18, %v1391_v17 }
  0x1c   : > { %1066 = vrot.lane.b32.xlu1 %v1060_v3, %s1251_s27 }
  0x1d   : > { %1056 = vrot.lane.b32.xlu0 %v1050_v5, %s1251_s27 }
  0x20   : > { %1076 = vrot.lane.b32.xlu1 %v1050_v5, %s1252_s28 }
  0x21   : > { %1071 = vrot.lane.b32.xlu0 %v1050_v5, %s1253_s29 }
  0x24   : > { %1086 = vrot.lane.b32.xlu1 %v1060_v3, %s1252_s28 }
  0x25   : > { %1081 = vrot.lane.b32.xlu0 %v1060_v3, %s1253_s29 }
  0x28   : > { %1096 = vrot.lane.b32.xlu1 %v1095_v7, %s1254_s30 }
  0x29   : > { %1091 = vrot.lane.b32.xlu0 %v1090_v8, %s1254_s30 }
  0x2c   : > { %1106 = vrot.lane.b32.xlu1 %v1090_v8, %s1255_s4 }
  0x2d   : > { %1101 = vrot.lane.b32.xlu0 %v1090_v8, %s1256_s5 }
  0x30   : > { %1116 = vrot.lane.b32.xlu1 %v1095_v7, %s1255_s4 }
  0x31   : > { %1111 = vrot.lane.b32.xlu0 %v1095_v7, %s1256_s5 }
  0x34   : > { %1126 = vrot.lane.b32.xlu1 %v1125_v9, %s1257_s6 }
  0x35   : > { %1121 = vrot.lane.b32.xlu0 %v1050_v5, %s1257_s6 }
  0x38   : > { %1136 = vrot.lane.b32.xlu1 %v1135_v13, %s1250_s26 }
  0x39   : > { %1131 = vrot.lane.b32.xlu0 %v1130_v14, %s1250_s26 }
  0x3c   : > { %1146 = vrot.lane.b32.xlu1 %v1135_v13, %s1251_s27 }
  0x3d   : > { %1141 = vrot.lane.b32.xlu0 %v1130_v14, %s1251_s27 }
  0x40   : > { %1156 = vrot.lane.b32.xlu1 %v1135_v13, %s1253_s29 }
  0x41   : > { %1151 = vrot.lane.b32.xlu0 %v1130_v14, %s1253_s29 }
  0x44   : > { %284 = vrot.lane.b32.xlu1 %v1354_v10, %s1252_s28 }
  0x45   : > { %1161 = vrot.lane.b32.xlu0 %v1130_v14, %s1252_s28 }
  0x48   : > { %317 = vrot.lane.b32.xlu1 %v1357_v11, %s1254_s30 }
  0x49   : > { %1166 = vrot.lane.b32.xlu0 %v1165_v16, %s1254_s30 }
  0x4c   : > { %348 = vrot.lane.b32.xlu1 %v1357_v11, %s1256_s5 }
  0x4d   : > { %1171 = vrot.lane.b32.xlu0 %v1165_v16, %s1256_s5 }
  0x50   : > { %379 = vrot.lane.b32.xlu1 %v1357_v11, %s1255_s4 }
  0x51   : > { %1176 = vrot.lane.b32.xlu0 %v1165_v16, %s1255_s4 }
  0x54   : > { %410 = vrot.lane.b32.xlu1 %v1357_v11, %s1257_s6 }
  0x55   : > { %1181 = vrot.lane.b32.xlu0 %v1165_v16, %s1257_s6 }
  0x58   : > { %1191 = vrot.lane.b32.xlu1 %v1190_v19, %s1251_s27 }
  0x59   : > { %1186 = vrot.lane.b32.xlu0 %v1190_v19, %s1250_s26 }
  0x5c   : > { %1201 = vrot.lane.b32.xlu1 %v1200_v20, %s1252_s28 }
  0x5d   : > { %1196 = vrot.lane.b32.xlu0 %v1190_v19, %s1253_s29 }
  0x60   : > { %1206 = vrot.lane.b32.xlu1 %v1190_v19, %s1254_s30 }
  0x61   : > { %290 = vrot.lane.b32.xlu0 %v1394_v18, %s1252_s28 }
  0x64   : > { %1211 = vrot.lane.b32.xlu1 %v1190_v19, %s1256_s5 }
  0x65   : > { %323 = vrot.lane.b32.xlu0 %v1318_v1, %s1254_s30 }
  0x68   : > { %1216 = vrot.lane.b32.xlu1 %v1190_v19, %s1255_s4 }
  0x69   : > { %354 = vrot.lane.b32.xlu0 %v1318_v1, %s1256_s5 }
  0x6c   : > { %1221 = vrot.lane.b32.xlu1 %v1190_v19, %s1257_s6 }
  0x6d   : > { %385 = vrot.lane.b32.xlu0 %v1318_v1, %s1255_s4 }
  0x71   : > { %416 = vrot.lane.b32.xlu0 %v1318_v1, %s1257_s6 }
  0x8a   : > { %v1421_v22 = vpop.permute.xlu1 %1061 }
  0x8b   : > { %v1423_v23 = vpop.permute.xlu0 %1051  ;;  %v1063_v25 = vunpack.i.l.bf16 %v1421_v22 }
  0x8c   : > { %v1054_v26 = vunpack.i.h.bf16 %v1423_v23  ;;  %v1053_v27 = vunpack.i.l.bf16 %v1423_v23 }
  0x8e   : > { %v1431_v28 = vpop.permute.xlu1 %1066  ;;  %v210_v34 = vsel %vm201_vm0, %v1053_v27, %v1054_v26  ;;  %v211_v36 = vsel %vm201_vm0, %v1063_v25, %v1053_v27 }
  0x8f   : > { %v1068_v29 = vunpack.i.l.bf16 %v1431_v28  ;;  %v1434_v30 = vpop.permute.xlu0 %1056 }
  0x90   : > { %v1059_v31 = vunpack.i.h.bf16 %v1434_v30  ;;  %v1058_v32 = vunpack.i.l.bf16 %v1434_v30 }
  0x92   : > { %v1442_v33 = vpop.permute.xlu1 %1076  ;;  %v241_v35 = vsel %vm232_vm1, %v1058_v32, %v1059_v31  ;;  %v242_v37 = vsel %vm232_vm1, %v1068_v29, %v1058_v32 }
  0x93   : > { %v1079_v38 = vunpack.i.h.bf16 %v1442_v33  ;;  %v1078_v39 = vunpack.i.l.bf16 %v1442_v33  ;;  %v1462_v40 = vpop.permute.xlu0 %1071  ;;  %v430_v41 = vpack.c.bf16 %v241_v35, %v210_v34  ;;  %v429_v42 = vpack.c.bf16 %v242_v37, %v211_v36 }
  0x94   : > { %v1074_v43 = vunpack.i.h.bf16 %v1462_v40  ;;  %v1073_v44 = vunpack.i.l.bf16 %v1462_v40 }
  0x95   : > { %521 = vmatprep.subr.bf16.mxu0 %v430_v41  ;;  %v303_v45 = vsel %vm294_vm3, %v1078_v39, %v1079_v38 }
  0x96   : > { %522 = vmatpush1.bf16.msra.mxu0 %v429_v42  ;;  %v1470_v46 = vpop.permute.xlu1 %1086  ;;  %v272_v47 = vsel %vm263_vm2, %v1073_v44, %v1074_v43 }
  0x97   : > { %v1088_v48 = vunpack.i.l.bf16 %v1470_v46  ;;  %v1477_v49 = vpop.permute.xlu0 %1081  ;;  %v440_v50 = vpack.c.bf16 %v303_v45, %v272_v47 }
  0x98   : > { %v1083_v51 = vunpack.i.l.bf16 %v1477_v49 }
  0x99   : > { %523 = vmatprep.subr.bf16.mxu0 %v440_v50  ;;  %v304_v52 = vsel %vm294_vm3, %v1088_v48, %v1078_v39 }
  0x9a   : > { %v1484_v53 = vpop.permute.xlu1 %1096  ;;  %v273_v54 = vsel %vm263_vm2, %v1083_v51, %v1073_v44 }
  0x9b   : > { %v1098_v55 = vunpack.i.l.bf16 %v1484_v53  ;;  %v1491_v56 = vpop.permute.xlu0 %1091  ;;  %v439_v57 = vpack.c.bf16 %v304_v52, %v273_v54 }
  0x9c   : > { %v1094_v58 = vunpack.i.h.bf16 %v1491_v56  ;;  %v1093_v59 = vunpack.i.l.bf16 %v1491_v56 }
  0x9d   : > { %524 = vmatpush1.bf16.msra.mxu0 %v439_v57  ;;  %v1069_v57 = vunpack.i.h.bf16 %v1431_v28 }
  0x9e   : > { %v1496_v60 = vpop.permute.xlu1 %1106  ;;  %v333_v61 = vsel %vm325_vm4, %v1093_v59, %v1094_v58  ;;  %v334_v62 = vsel %vm325_vm4, %v1098_v55, %v1093_v59 }
  0x9f   : > { %v1109_v63 = vunpack.i.h.bf16 %v1496_v60  ;;  %v1108_v3 = vunpack.i.l.bf16 %v1496_v60  ;;  %v1510_v5 = vpop.permute.xlu0 %1101  ;;  %v450_v7 = vpack.c.bf16 %v333_v61, %v1326_v4  ;;  %v449_v8 = vpack.c.bf16 %v334_v62, %v1321_v2 }
  0xa0   : > { %v1104_v9 = vunpack.i.h.bf16 %v1510_v5  ;;  %v1103_v13 = vunpack.i.l.bf16 %v1510_v5 }
  0xa1   : > { %525 = vmatprep.subr.bf16.mxu0 %v450_v7  ;;  %v395_v14 = vsel %vm387_vm6, %v1108_v3, %v1109_v63 }
  0xa2   : > { %526 = vmatpush1.bf16.msra.mxu0 %v449_v8  ;;  %v1520_v16 = vpop.permute.xlu1 %1116  ;;  %v364_v4 = vsel %vm356_vm5, %v1103_v13, %v1104_v9  ;;  %v1064_v8 = vunpack.i.h.bf16 %v1421_v22 }
  0xa3   : > { %v1118_v2 = vunpack.i.l.bf16 %v1520_v16  ;;  %v1527_v19 = vpop.permute.xlu0 %1111  ;;  %v460_v20 = vpack.c.bf16 %v395_v14, %v364_v4 }
  0xa4   : > { %v1113_v27 = vunpack.i.l.bf16 %v1527_v19 }
  0xa5   : > { %527 = vmatprep.subr.bf16.mxu0 %v460_v20  ;;  %v396_v32 = vsel %vm387_vm6, %v1118_v2, %v1108_v3  ;;  %v1562_v3 = vld [vmem:[%s1860_s2] sm:$0xff]  }
  0xa6   : > { %v1534_v34 = vpop.permute.xlu1 %1126  ;;  %v365_v35 = vsel %vm356_vm5, %v1113_v27, %v1103_v13 }
  0xa7   : > { %v1128_v36 = vunpack.i.l.bf16 %v1534_v34  ;;  %v1542_v37 = vpop.permute.xlu0 %1121  ;;  %v459_v39 = vpack.c.bf16 %v396_v32, %v365_v35 }
  0xa8   : > { %v1124_v41 = vunpack.i.h.bf16 %v1542_v37  ;;  %v1123_v42 = vunpack.i.l.bf16 %v1542_v37  ;;  %v1803_v37 = vshrl.u32 %v1864_v24, 7 }
  0xa9   : > { %528 = vmatpush1.bf16.msra.mxu0 %v459_v39  ;;  %v240_v39 = vsel %vm232_vm1, %v1059_v31, %v1069_v57 }
  0xaa   : > { %v426_v44 = vsel %vm418_vm7, %v1124_v41, %v1128_v36  ;;  %v1550_v45 = vpop.permute.xlu1 %1136  ;;  %v427_v47 = vsel %vm418_vm7, %v1123_v42, %v1124_v41 }
  0xab   : > { %v470_v50 = vpack.c.bf16 %v426_v44, %v426_v44  ;;  %v1132_v52 = vpop.permute.xlu0 %1131  ;;  %v469_v54 = vpack.c.bf16 %v427_v47, %v427_v47  ;;  %v1138_v13 = vunpack.i.l.bf16 %v1550_v45 }
  0xac   : > { %v1134_v59 = vunpack.i.h.bf16 %v1132_v52  ;;  %v1133_v61 = vunpack.i.l.bf16 %v1132_v52 }
  0xad   : > { %982 = vmatprep.subr.msk.bf16.mxu0 %vm490_vm8, %v470_v50  ;;  %v492_v62 = vsel %vm490_vm8, %v469_v54, 0 }
  0xae   : > { %530 = vmatpush1.bf16.msra.mxu0 %v492_v62  ;;  %v1564_v7 = vpop.permute.xlu1 %1146  ;;  %v207_v35 = vsel %vm201_vm0, %v1133_v61, %v1134_v59  ;;  %v208_v47 = vsel %vm201_vm0, %v1064_v8, %v1133_v61  ;;  %v206_v62 = vsel %vm201_vm0, %v1134_v59, %v1138_v13  ;;  %v1089_v61 = vunpack.i.h.bf16 %v1470_v46 }
  0xaf   : > { %v1148_v14 = vunpack.i.l.bf16 %v1564_v7  ;;  %v1142_v4 = vpop.permute.xlu0 %1141 }
  0xb0   : > { %v1144_v20 = vunpack.i.h.bf16 %v1142_v4  ;;  %v1143_v32 = vunpack.i.l.bf16 %v1142_v4 }
  0xb1   : > { %983 = vmatmul.mubr.msk.bf16.vlgmr.msra.gmra.mrb[0].mxu0 %vm486_vm9, %v1562_v3 }
  0xb2   : > { %v238_v41 = vsel %vm232_vm1, %v1143_v32, %v1144_v20  ;;  %v1579_v44 = vpop.permute.xlu1 %1156  ;;  %v239_v50 = vsel %vm232_vm1, %v1069_v57, %v1143_v32  ;;  %v237_v52 = vsel %vm232_vm1, %v1144_v20, %v1148_v14  ;;  %639 = vmatprep.mubr.bf16.mxu0 %v1258_v15  ;;  %v209_v57 = vsel %vm201_vm0, %v1054_v26, %v1064_v8 }
  0xb3   : > { %v433_v30 = vpack.c.bf16 %v238_v41, %v207_v35  ;;  %v1152_v31 = vpop.permute.xlu0 %1151  ;;  %v432_v54 = vpack.c.bf16 %v239_v50, %v208_v47  ;;  %v434_v4 = vpack.c.bf16 %v237_v52, %v206_v62  ;;  %v431_v32 = vpack.c.bf16 %v240_v39, %v209_v57 }
  0xb4   : > { %v1084_v20 = vunpack.i.h.bf16 %v1477_v49  ;;  %v1154_v21 = vunpack.i.h.bf16 %v1152_v31  ;;  %v1153_v35 = vunpack.i.l.bf16 %v1152_v31  ;;  %v1158_v41 = vunpack.i.l.bf16 %v1579_v44 }
  0xb5   : > { %564 = vmatprep.subr.bf16.mxu1 %v432_v54  ;;  %607 = vmatprep.subr.bf16.mxu0 %v434_v4  ;;  %v302_v26 = vsel %vm294_vm3, %v1079_v38, %v1089_v61  ;;  %v1099_v8 = vunpack.i.h.bf16 %v1484_v53 }
  0xb6   : > { %565 = vmatpush1.bf16.msra.mxu1 %v431_v32  ;;  %v1601_v47 = vpop.permute.xlu1 %284  ;;  %608 = vmatpush1.bf16.msra.mxu0 %v433_v30  ;;  %v269_v39 = vsel %vm263_vm2, %v1153_v35, %v1154_v21  ;;  %v270_v52 = vsel %vm263_vm2, %v1084_v20, %v1153_v35  ;;  %v271_v30 = vsel %vm263_vm2, %v1074_v43, %v1084_v20 }
  0xb7   : > { %v1162_v23 = vpop.permute.xlu0 %1161  ;;  %v268_v54 = vsel %vm263_vm2, %v1154_v21, %v1158_v41  ;;  %v441_v35 = vpack.c.bf16 %v302_v26, %v271_v30  ;;  %v1129_v21 = vunpack.i.h.bf16 %v1534_v34  ;;  %v1119_v30 = vunpack.i.h.bf16 %v1520_v16 }
  0xb8   : > { %v1164_v59 = vunpack.i.h.bf16 %v1162_v23  ;;  %v1163_v50 = vunpack.i.l.bf16 %v1162_v23 }
  0xba   : > { %v300_v31 = vsel %vm294_vm3, %v1163_v50, %v1164_v59  ;;  %v1618_v33 = vpop.permute.xlu1 %317  ;;  %v301_v38 = vsel %vm294_vm3, %v1089_v61, %v1163_v50  ;;  %v299_v40 = vsel %vm294_vm3, %v1164_v59, %v1601_v47  ;;  %v332_v61 = vsel %vm325_vm4, %v1094_v58, %v1099_v8 }
  0xbb   : > { %v443_v62 = vpack.c.bf16 %v300_v31, %v269_v39  ;;  %v1167_v57 = vpop.permute.xlu0 %1166  ;;  %v442_v43 = vpack.c.bf16 %v301_v38, %v270_v52  ;;  %v444_v4 = vpack.c.bf16 %v299_v40, %v268_v54  ;;  %v1114_v31 = vunpack.i.h.bf16 %v1527_v19 }
  0xbc   : > { %v1169_v32 = vunpack.i.h.bf16 %v1167_v57  ;;  %v1168_v20 = vunpack.i.l.bf16 %v1167_v57  ;;  %v451_v38 = vpack.c.bf16 %v332_v61, %v1315_v0  ;;  %v394_v57 = vsel %vm387_vm6, %v1109_v63, %v1119_v30 }
  0xbd   : > { %566 = vmatprep.subr.bf16.mxu1 %v442_v43  ;;  %609 = vmatprep.subr.bf16.mxu0 %v444_v4  ;;  %v363_v0 = vsel %vm356_vm5, %v1104_v9, %v1114_v31  ;;  %v1139_v43 = vunpack.i.h.bf16 %v1550_v45 }
  0xbe   : > { %v330_v23 = vsel %vm325_vm4, %v1168_v20, %v1169_v32  ;;  %567 = vmatpush1.bf16.msra.mxu1 %v441_v35  ;;  %610 = vmatpush1.bf16.msra.mxu0 %v443_v62  ;;  %v1636_v59 = vpop.permute.xlu1 %348  ;;  %v331_v50 = vsel %vm325_vm4, %v1099_v8, %v1168_v20  ;;  %v329_v26 = vsel %vm325_vm4, %v1169_v32, %v1618_v33 }
  0xbf   : > { %v453_v56 = vpack.c.bf16 %v330_v23, %v1360_v12  ;;  %v1172_v39 = vpop.permute.xlu0 %1171  ;;  %v452_v58 = vpack.c.bf16 %v331_v50, %v1337_v6  ;;  %v454_v52 = vpack.c.bf16 %v329_v26, %v1354_v10  ;;  %v425_v6 = vsel %vm418_vm7, %v1128_v36, %v1129_v21 }
  0xc0   : > { %v1174_v54 = vunpack.i.h.bf16 %v1172_v39  ;;  %v1173_v40 = vunpack.i.l.bf16 %v1172_v39  ;;  %v471_v4 = vpack.c.bf16 %v425_v6, %v425_v6  ;;  %v1149_v50 = vunpack.i.h.bf16 %v1564_v7 }
  0xc1   : > { %568 = vmatprep.subr.bf16.mxu1 %v452_v58  ;;  %611 = vmatprep.subr.bf16.mxu0 %v454_v52  ;;  %v461_v39 = vpack.c.bf16 %v394_v57, %v363_v0  ;;  %v205_v58 = vsel %vm201_vm0, %v1138_v13, %v1139_v43  ;;  %v1159_v57 = vunpack.i.h.bf16 %v1579_v44 }
  0xc2   : > { %569 = vmatpush1.bf16.msra.mxu1 %v451_v38  ;;  %612 = vmatpush1.bf16.msra.mxu0 %v453_v56  ;;  %v1649_v8 = vpop.permute.xlu1 %379  ;;  %v361_v34 = vsel %vm356_vm5, %v1173_v40, %v1174_v54  ;;  %v362_v36 = vsel %vm356_vm5, %v1114_v31, %v1173_v40  ;;  %v360_v63 = vsel %vm356_vm5, %v1174_v54, %v1636_v59  ;;  %v498_v38 = vsel %vm490_vm8, %v471_v4, 0 }
  0xc3   : > { %v1177_v10 = vpop.permute.xlu0 %1176 }
  0xc4   : > { %v1179_v12 = vunpack.i.h.bf16 %v1177_v10  ;;  %v1178_v62 = vunpack.i.l.bf16 %v1177_v10 }
  0xc6   : > { %v392_v5 = vsel %vm387_vm6, %v1178_v62, %v1179_v12  ;;  %v1670_v32 = vpop.permute.xlu1 %410  ;;  %v393_v60 = vsel %vm387_vm6, %v1119_v30, %v1178_v62  ;;  %v391_v9 = vsel %vm387_vm6, %v1179_v12, %v1649_v8  ;;  %v236_v12 = vsel %vm232_vm1, %v1148_v14, %v1149_v50 }
  0xc7   : > { %v463_v20 = vpack.c.bf16 %v392_v5, %v361_v34  ;;  %v1182_v35 = vpop.permute.xlu0 %1181  ;;  %v462_v61 = vpack.c.bf16 %v393_v60, %v362_v36  ;;  %v464_v23 = vpack.c.bf16 %v391_v9, %v360_v63 }
  0xc8   : > { %v1184_v26 = vunpack.i.h.bf16 %v1182_v35  ;;  %v1183_v56 = vunpack.i.l.bf16 %v1182_v35 }
  0xc9   : > { %570 = vmatprep.subr.bf16.mxu1 %v462_v61  ;;  %613 = vmatprep.subr.bf16.mxu0 %v464_v23  ;;  %v435_v61 = vpack.c.bf16 %v236_v12, %v205_v58 }
  0xca   : > { %v422_v52 = vsel %vm418_vm7, %v1184_v26, %v1670_v32  ;;  %v424_v30 = vsel %vm418_vm7, %v1129_v21, %v1183_v56  ;;  %571 = vmatpush1.bf16.msra.mxu1 %v461_v39  ;;  %614 = vmatpush1.bf16.msra.mxu0 %v463_v20  ;;  %v1192_v31 = vpop.permute.xlu1 %1191  ;;  %v423_v45 = vsel %vm418_vm7, %v1183_v56, %v1184_v26 }
  0xcb   : > { %v474_v54 = vpack.c.bf16 %v422_v52, %v422_v52  ;;  %v472_v40 = vpack.c.bf16 %v424_v30, %v424_v30  ;;  %v1194_v13 = vunpack.i.h.bf16 %v1192_v31  ;;  %v1193_v6 = vunpack.i.l.bf16 %v1192_v31  ;;  %v1187_v10 = vpop.permute.xlu0 %1186 }
  0xcc   : > { %v1189_v62 = vunpack.i.h.bf16 %v1187_v10  ;;  %v1188_v21 = vunpack.i.l.bf16 %v1187_v10  ;;  %v473_v0 = vpack.c.bf16 %v423_v45, %v423_v45 }
  0xcd   : > { %v234_v34 = vsel %vm232_vm1, %v1193_v6, %v1194_v13  ;;  %984 = vmatprep.subr.msk.bf16.mxu1 %vm490_vm8, %v472_v40  ;;  %986 = vmatprep.subr.msk.bf16.mxu0 %vm490_vm8, %v474_v54  ;;  %v235_v36 = vsel %vm232_vm1, %v1149_v50, %v1193_v6  ;;  %v233_v7 = vsel %vm232_vm1, %v1194_v13, %v1068_v29 }
  0xce   : > { %v203_v14 = vsel %vm201_vm0, %v1188_v21, %v1189_v62  ;;  %573 = vmatpush1.bf16.msra.mxu1 %v498_v38  ;;  %v504_v4 = vsel %vm490_vm8, %v473_v0, 0  ;;  %v1202_v5 = vpop.permute.xlu1 %1201  ;;  %v204_v60 = vsel %vm201_vm0, %v1139_v43, %v1188_v21  ;;  %v202_v63 = vsel %vm201_vm0, %v1189_v62, %v1063_v25 }
  0xcf   : > { %v437_v9 = vpack.c.bf16 %v234_v34, %v203_v14  ;;  %616 = vmatpush1.bf16.msra.mxu0 %v504_v4  ;;  %v1204_v28 = vunpack.i.h.bf16 %v1202_v5  ;;  %v1203_v20 = vunpack.i.l.bf16 %v1202_v5  ;;  %v1197_v29 = vpop.permute.xlu0 %1196  ;;  %v436_v35 = vpack.c.bf16 %v235_v36, %v204_v60 }
  0xd0   : > { %v1199_v23 = vunpack.i.h.bf16 %v1197_v29  ;;  %v1198_v50 = vunpack.i.l.bf16 %v1197_v29  ;;  %v438_v26 = vpack.c.bf16 %v233_v7, %v202_v63  ;;  %v267_v43 = vsel %vm263_vm2, %v1158_v41, %v1159_v57 }
  0xd1   : > { %v298_v22 = vsel %vm294_vm3, %v1601_v47, %v1203_v20  ;;  %650 = vmatprep.subr.bf16.mxu1 %v436_v35  ;;  %985 = vmatmul.mubr.msk.bf16.vlgmr.msra.gmra.mrb[0].mxu1 %vm486_vm9, %v1562_v3  ;;  %v297_v25 = vsel %vm294_vm3, %v1203_v20, %v1204_v28 }
  0xd2   : > { %v445_v56 = vpack.c.bf16 %v298_v22, %v267_v43  ;;  %693 = vmatprep.subr.bf16.mxu0 %v438_v26  ;;  %987 = vmatmul.mubr.msk.bf16.vlgmr.msra.gmra.mrb[4].mxu0 %vm486_vm9, %v1562_v3  ;;  %v1207_v44 = vpop.permute.xlu1 %1206  ;;  %v264_v41 = vsel %vm263_vm2, %v1199_v23, %v1083_v51  ;;  %v265_v52 = vsel %vm263_vm2, %v1198_v50, %v1199_v23  ;;  %v736_v26 = vld [vmem:[%s1859_s1] sm:$0xff]  ;;  %v746_v43 = vsub.s32 1, %v1803_v37 }
  0xd3   : > { %651 = vmatpush1.bf16.msra.mxu1 %v435_v61  ;;  %694 = vmatpush1.bf16.msra.mxu0 %v437_v9  ;;  %v1209_v47 = vunpack.i.h.bf16 %v1207_v44  ;;  %v1208_v39 = vunpack.i.l.bf16 %v1207_v44  ;;  %v291_v58 = vpop.permute.xlu0 %290  ;;  %v266_v30 = vsel %vm263_vm2, %v1159_v57, %v1198_v50 }
  0xd4   : > { %v295_v31 = vsel %vm294_vm3, %v291_v58, %v1088_v48  ;;  %v296_v49 = vsel %vm294_vm3, %v1204_v28, %v291_v58  ;;  %v446_v51 = vpack.c.bf16 %v297_v25, %v266_v30  ;;  %682 = vmatprep.mubr.bf16.mxu1 %v1258_v15  ;;  %725 = vmatprep.mubr.bf16.mxu0 %v1258_v15 }
  0xd5   : > { %v328_v38 = vsel %vm325_vm4, %v1618_v33, %v1208_v39  ;;  %v447_v45 = vpack.c.bf16 %v296_v49, %v265_v52  ;;  %v448_v54 = vpack.c.bf16 %v295_v31, %v264_v41  ;;  %v327_v46 = vsel %vm325_vm4, %v1208_v39, %v1209_v47 }
  0xd6   : > { %652 = vmatprep.subr.bf16.mxu1 %v446_v51  ;;  %v1212_v40 = vpop.permute.xlu1 %1211  ;;  %v456_v48 = vpack.c.bf16 %v327_v46, %v1391_v17  ;;  %v455_v13 = vpack.c.bf16 %v328_v38, %v1357_v11  ;;  %v747_v25 = vrot.slane %v736_v26, %v746_v43  ;;  %v750_v49 = vsub.s32 2, %v1803_v37 }
  0xd7   : > { %653 = vmatpush1.bf16.msra.mxu1 %v445_v56  ;;  %v324_v6 = vpop.permute.xlu0 %323  ;;  %695 = vmatprep.subr.bf16.mxu0 %v448_v54  ;;  %v1214_v10 = vunpack.i.h.bf16 %v1212_v40  ;;  %v1213_v12 = vunpack.i.l.bf16 %v1212_v40  ;;  %v758_v51 = vsub.s32 4, %v1803_v37  ;;  %v754_v38 = vsub.s32 3, %v1803_v37 }
  0xd8   : > { %v326_v15 = vsel %vm325_vm4, %v1209_v47, %v324_v6  ;;  %v335_v33 = vsel %vm325_vm4, %v324_v6, %v1098_v55  ;;  %696 = vmatpush1.bf16.msra.mxu0 %v447_v45  ;;  %654 = vmatprep.subr.bf16.mxu1 %v456_v48  ;;  %v762_v45 = vsub.s32 5, %v1803_v37  ;;  %v751_v54 = vrot.slane %v736_v26, %v750_v49 }
  0xd9   : > { %v457_v62 = vpack.c.bf16 %v326_v15, %v1394_v18  ;;  %v458_v17 = vpack.c.bf16 %v335_v33, %v1318_v1  ;;  %v359_v53 = vsel %vm356_vm5, %v1636_v59, %v1213_v12  ;;  %v358_v18 = vsel %vm356_vm5, %v1213_v12, %v1214_v10 }
  0xda   : > { %v1217_v11 = vpop.permute.xlu1 %1216  ;;  %v759_v46 = vrot.slane %v736_v26, %v758_v51  ;;  %v755_v40 = vrot.slane %v736_v26, %v754_v38  ;;  %v763_v48 = vrot.slane %v736_v26, %v762_v45 }
  0xdb   : > { %655 = vmatpush1.bf16.msra.mxu1 %v455_v13  ;;  %v1219_v21 = vunpack.i.h.bf16 %v1217_v11  ;;  %v1218_v0 = vunpack.i.l.bf16 %v1217_v11  ;;  %v355_v57 = vpop.permute.xlu0 %354  ;;  %697 = vmatprep.subr.bf16.mxu0 %v458_v17 }
  0xdc   : > { %698 = vmatpush1.bf16.msra.mxu0 %v457_v62  ;;  %v357_v60 = vsel %vm356_vm5, %v1214_v10, %v355_v57  ;;  %v366_v59 = vsel %vm356_vm5, %v355_v57, %v1113_v27 }
  0xdd   : > { %v390_v55 = vsel %vm387_vm6, %v1649_v8, %v1218_v0  ;;  %v389_v1 = vsel %vm387_vm6, %v1218_v0, %v1219_v21 }
  0xde   : > { %v465_v34 = vpack.c.bf16 %v390_v55, %v359_v53  ;;  %v1222_v36 = vpop.permute.xlu1 %1221  ;;  %v466_v7 = vpack.c.bf16 %v389_v1, %v358_v18 }
  0xdf   : > { %v1224_v14 = vunpack.i.h.bf16 %v1222_v36  ;;  %v1223_v4 = vunpack.i.l.bf16 %v1222_v36  ;;  %v386_v5 = vpop.permute.xlu0 %385 }
  0xe0   : > { %v388_v8 = vsel %vm387_vm6, %v1219_v21, %v386_v5  ;;  %v397_v63 = vsel %vm387_vm6, %v386_v5, %v1118_v2  ;;  %656 = vmatprep.subr.bf16.mxu1 %v466_v7  ;;  %v770_v5 = vsub.s32 7, %v1803_v37 }
  0xe1   : > { %v420_v9 = vsel %vm418_vm7, %v1223_v4, %v1224_v14  ;;  %v421_v28 = vsel %vm418_vm7, %v1670_v32, %v1223_v4  ;;  %v467_v19 = vpack.c.bf16 %v388_v8, %v357_v60  ;;  %v468_v20 = vpack.c.bf16 %v397_v63, %v366_v59  ;;  %657 = vmatpush1.bf16.msra.mxu1 %v465_v34  ;;  %v737_v59 = vld [vmem:[%s1859_s1 + $0x8] sm:$0x3] }
  0xe2   : > { %v475_v27 = vpack.c.bf16 %v421_v28, %v421_v28  ;;  %v476_v29 = vpack.c.bf16 %v420_v9, %v420_v9  ;;  %v766_v4 = vsub.s32 6, %v1803_v37  ;;  %v771_v8 = vrot.slane %v736_v26, %v770_v5 }
  0xe3   : > { %v417_v35 = vpop.permute.xlu0 %416  ;;  %699 = vmatprep.subr.bf16.mxu0 %v468_v20  ;;  %v779_v20 = vrot.slane %v737_v59, %v746_v43 }
  0xe4   : > { %v419_v16 = vsel %vm418_vm7, %v1224_v14, %v417_v35  ;;  %v428_v2 = vsel %vm418_vm7, %v417_v35, %v1123_v42  ;;  %700 = vmatpush1.bf16.msra.mxu0 %v467_v19  ;;  %988 = vmatprep.subr.msk.bf16.mxu1 %vm490_vm8, %v476_v29  ;;  %v510_v32 = vsel %vm490_vm8, %v475_v27, 0  ;;  %v742_v42 = vsub.s32 0, %v1803_v37 }
  0xe5   : > { %v477_v61 = vpack.c.bf16 %v419_v16, %v419_v16  ;;  %v478_v23 = vpack.c.bf16 %v428_v2, %v428_v2  ;;  %659 = vmatpush1.bf16.msra.mxu1 %v510_v32  ;;  %v767_v60 = vrot.slane %v736_v26, %v766_v4 }
  0xe6   : > { %v743_v22 = vrot.slane %v736_v26, %v742_v42  ;;  %v775_v9 = vrot.slane %v737_v59, %v742_v42 }
  0xe7   : > { %990 = vmatprep.subr.msk.bf16.mxu0 %vm490_vm8, %v478_v23  ;;  %v516_v50 = vsel %vm490_vm8, %v477_v61, 0 }
  0xe8   : > { %702 = vmatpush1.bf16.msra.mxu0 %v516_v50  ;;  %989 = vmatmul.mubr.msk.bf16.vlgmr.msra.gmra.mrb[4].mxu1 %vm486_vm9, %v1562_v3 }
  0xeb   : > { %991 = vmatmul.mubr.msk.bf16.vlgmr.msra.gmra.mrb[8].mxu0 %vm486_vm9, %v1562_v3 }
 0x184   : > { %v555_v56 = vpop.f32.mrb[0].mxu0 }
 0x185   : > { %v790_v44 = vmul.f32 %v743_v22, %v555_v56  ;;  %v557_v41 = vpop.f32.mrb[1].mxu0 }
 0x186   : > { %v791_v47 = vmul.f32 %v747_v25, %v557_v41  ;;  %v559_v3 = vpop.f32.mrb[2].mxu0 }
 0x187   : > { %v800_v39 = vmul.f32 %v743_v22, %v559_v3  ;;  %v561_v58 = vpop.f32.mrb[3].mxu0 }
 0x188   : > { %v1005_v52 = vpack.c.bf16 %v791_v47, %v790_v44  ;;  %v801_v30 = vmul.f32 %v747_v25, %v561_v58 }
 0x18a   : > { %870 = vst [vmem:[%s1811_s17] sm:$0xff] %v1005_v52  ;;  %v1010_v31 = vpack.c.bf16 %v801_v30, %v800_v39 }
 0x18c   : > { %875 = vst [vmem:[%s1811_s17 + $0x28] sm:$0xff] %v1010_v31 }
 0x191   : > { %v902_v44 = vld [vmem:[%s1811_s17] sm:$0xff] (%p1304_p4) }
 0x192   : > { %903 = vst [vmem:[%s889_s23] sm:$0xff] (%p1304_p4), %v902_v44 }
 0x193   : > { %v912_v58 = vld [vmem:[%s1811_s17 + $0x28] sm:$0xff] (%p1304_p4) }
 0x194   : > { %913 = vst [vmem:[%s889_s23 + $0x50] sm:$0xff] (%p1304_p4), %v912_v58 }
 0x1a4   : > { %v598_v13 = vpop.f32.mrb[0].mxu1 }
 0x1a5   : > { %v792_v6 = vmul.f32 %v751_v54, %v598_v13  ;;  %v641_v15 = vpop.f32.mrb[4].mxu0  ;;  %v600_v33 = vpop.f32.mrb[1].mxu1 }
 0x1a6   : > { %v794_v10 = vmul.f32 %v759_v46, %v641_v15  ;;  %v793_v12 = vmul.f32 %v755_v40, %v600_v33  ;;  %v643_v62 = vpop.f32.mrb[5].mxu0  ;;  %v602_v17 = vpop.f32.mrb[2].mxu1 }
 0x1a7   : > { %v795_v11 = vmul.f32 %v763_v48, %v643_v62  ;;  %v802_v21 = vmul.f32 %v751_v54, %v602_v17  ;;  %v645_v0 = vpop.f32.mrb[6].mxu0  ;;  %v604_v57 = vpop.f32.mrb[3].mxu1 }
 0x1a8   : > { %v1006_v53 = vpack.c.bf16 %v793_v12, %v792_v6  ;;  %v804_v55 = vmul.f32 %v759_v46, %v645_v0  ;;  %v803_v18 = vmul.f32 %v755_v40, %v604_v57  ;;  %v647_v1 = vpop.f32.mrb[7].mxu0 }
 0x1a9   : > { %v1007_v34 = vpack.c.bf16 %v795_v11, %v794_v10  ;;  %v805_v36 = vmul.f32 %v763_v48, %v647_v1 }
 0x1aa   : > { %871 = vst [vmem:[%s1811_s17 + $0x8] sm:$0xff] %v1006_v53  ;;  %v1011_v7 = vpack.c.bf16 %v803_v18, %v802_v21 }
 0x1ab   : > { %872 = vst [vmem:[%s1811_s17 + $0x10] sm:$0xff] %v1007_v34  ;;  %v1012_v14 = vpack.c.bf16 %v805_v36, %v804_v55 }
 0x1ac   : > { %876 = vst [vmem:[%s1811_s17 + $0x30] sm:$0xff] %v1011_v7 }
 0x1ad   : > { %877 = vst [vmem:[%s1811_s17 + $0x38] sm:$0xff] %v1012_v14 }
 0x1b1   : > { %v904_v41 = vld [vmem:[%s1811_s17 + $0x8] sm:$0xff] (%p1304_p4) }
 0x1b2   : > { %v906_v47 = vld [vmem:[%s1811_s17 + $0x10] sm:$0xff] (%p1304_p4)  ;;  %905 = vst [vmem:[%s889_s23 + $0x8] sm:$0xff] (%p1304_p4), %v904_v41 }
 0x1b3   : > { %v914_v52 = vld [vmem:[%s1811_s17 + $0x30] sm:$0xff] (%p1304_p4)  ;;  %907 = vst [vmem:[%s889_s23 + $0x10] sm:$0xff] (%p1304_p4), %v906_v47 }
 0x1b4   : > { %v916_v30 = vld [vmem:[%s1811_s17 + $0x38] sm:$0xff] (%p1304_p4)  ;;  %915 = vst [vmem:[%s889_s23 + $0x58] sm:$0xff] (%p1304_p4), %v914_v52 }
 0x1b5   : > { %917 = vst [vmem:[%s889_s23 + $0x60] sm:$0xff] (%p1304_p4), %v916_v30 }
 0x1bb   : > { %v684_v63 = vpop.f32.mrb[4].mxu1 }
 0x1bc   : > { %v796_v28 = vmul.f32 %v767_v60, %v684_v63  ;;  %v686_v19 = vpop.f32.mrb[5].mxu1 }
 0x1bd   : > { %v797_v27 = vmul.f32 %v771_v8, %v686_v19  ;;  %v688_v29 = vpop.f32.mrb[6].mxu1 }
 0x1be   : > { %v806_v35 = vmul.f32 %v767_v60, %v688_v29  ;;  %v727_v16 = vpop.f32.mrb[8].mxu0  ;;  %v690_v2 = vpop.f32.mrb[7].mxu1 }
 0x1bf   : > { %v1008_v32 = vpack.c.bf16 %v797_v27, %v796_v28  ;;  %v798_v61 = vmul.f32 %v775_v9, %v727_v16  ;;  %v807_v23 = vmul.f32 %v771_v8, %v690_v2  ;;  %v729_v50 = vpop.f32.mrb[9].mxu0 }
 0x1c0   : > { %v799_v24 = vmul.f32 %v779_v20, %v729_v50  ;;  %v731_v37 = vpop.f32.mrb[10].mxu0  ;;  %886 = sbr.rel (!%p1304_p4) target bundleno = 463 (0x1cf), region = 36 }
 0x1c1   : > { %873 = vst [vmem:[%s1811_s17 + $0x18] sm:$0xff] %v1008_v32  ;;  %v1013_v26 = vpack.c.bf16 %v807_v23, %v806_v35  ;;  %v808_v42 = vmul.f32 %v775_v9, %v731_v37  ;;  %v733_v22 = vpop.f32.mrb[11].mxu0 }
 0x1c2   : > { %v1009_v25 = vpack.c.bf16 %v799_v24, %v798_v61  ;;  %v809_v43 = vmul.f32 %v779_v20, %v733_v22 }
 0x1c3   : > { %878 = vst [vmem:[%s1811_s17 + $0x40] sm:$0xff] %v1013_v26 }
 0x1c4   : > { %874 = vst [vmem:[%s1811_s17 + $0x20] sm:$0xff] %v1009_v25  ;;  %v1014_v56 = vpack.c.bf16 %v809_v43, %v808_v42 }
 0x1c6   : > { %879 = vst [vmem:[%s1811_s17 + $0x48] sm:$0xff] %v1014_v56 }
 0x1c8   : > { %v908_v3 = vld [vmem:[%s1811_s17 + $0x18] sm:$0xff] }
 0x1c9   : > { %909 = vst [vmem:[%s889_s23 + $0x18] sm:$0xff] %v908_v3 }
 0x1ca   : > { %v918_v31 = vld [vmem:[%s1811_s17 + $0x40] sm:$0xff] }
 0x1cb   : > { %v910_v39 = vld [vmem:[%s1811_s17 + $0x20] sm:$0xff]  ;;  %919 = vst [vmem:[%s889_s23 + $0x68] sm:$0xff] %v918_v31 }
 0x1cc   : > { %911 = vst [vmem:[%s889_s23 + $0x20] sm:$0xff] %v910_v39 }
 0x1cd   : > { %v920_v49 = vld [vmem:[%s1811_s17 + $0x48] sm:$0xff] }
 0x1ce   : > { %921 = vst [vmem:[%s889_s23 + $0x70] sm:$0xff] %v920_v49 }
 0x1cf PF: > { %p10_p8 = scmp.ge.s32.totalorder %s1294_s16, 4   ;;  %s1865_s12 = smov %s1244_s13 }
 0x1d0   : > { %s1866_s13 = smov %s1302_s19  ;;  %s1867_s14 = smov %s1294_s16 }
 0x1d1   :  { %12 = sbr.rel (!%p10_p8) target bundleno = 2 (0x2), region = 85 }

// kernel: densenet_forward.9
= control target key start
LH: loop header
LB: loop body
LE: loop exit
PB: predicated region body
PF: predicated region fallthrough
CT: control target
= control target key end

     0   :  { %s1096_s15 = smov 0   ;;  %s1098_s16 = smov 0   ;;  %s1558_s0 = inlined_call_operand.vmem [shape: bf16[32,2560], index: 0, kind: input, shape index: {}]   ;;  %s1559_s1 = inlined_call_operand.vmem [shape: f32[32,1], index: 1, kind: input, shape index: {}]   ;;  %s1560_s2 = inlined_call_operand.vmem [shape: f32[32,1], index: 2, kind: input, shape index: {}]   ;;  %s1561_s3 = inlined_call_operand.vmem [shape: bf16[12,32], index: 3, kind: input, shape index: {}]   ;;  %s1562_s4 = inlined_call_operand.vmem [shape: bf16[12,2560], index: 4, kind: output, shape index: {}]  }
   0x1   :  { %s1100_s17 = smov 0  }
   0x2 LB: > { %s978_s18 = sadd.s32 4294967295, %s1068_s17   ;;  %s1113_s19 = sadd.s32 1, %s1068_s17   ;;  %s1068_s17 = sphi %s1100_s17, %s1579_s17   ;;  %s1064_s16 = sphi %s1098_s16, %s1578_s16   ;;  %s1060_s15 = sphi %s1096_s15, %s1577_s15  }
   0x3   : > { %s18_s20 = ssub.s32 %s1068_s17, %s1113_s19  ;;  %s21_s21 = sadd.s32 1, %s1064_s16 }
   0x4   : > { %p19_p0 = scmp.eq.s32.totalorder %s18_s20, 0  ;;  %p28_p1 = scmp.ne.s32.totalorder %s1064_s16, %s1060_s15 }
   0x5   : > { %p29_p2 = scmp.eq.s32.totalorder %s1068_s17, 0  ;;  %p121_p3 = scmp.eq.s32.totalorder %s978_s18, 1 }
   0x6   : > { %s1124_s22 = scalar_select %p19_p0, %s1064_s16, %s21_s21  }
   0x7   : > { %p30_p4 = por %p29_p2, %p28_p1  ;;  %p1126_p5 = por %p121_p3, %p28_p1 }
   0x8   : > { %p981_p6 = scmp.ge.s32.totalorder %s1068_s17, 2 }
   0xa   : > { %152 = sbr.rel (%p981_p6) target bundleno = 32 (0x20), region = 28 }
  0x11   : > { %155 = sbr.rel (!%p30_p4) target bundleno = 32 (0x20), region = 32  ;;  %s157_s24 = sand.u32 (%p30_p4), 1, %s1064_s16  }
  0x12   : > { %s1003_s25 = smul.u32 (%p30_p4), 40, %s1068_s17 }
  0x13   : > { %s1015_s26 = smul.u32 (%p30_p4), 160, %s157_s24 }
  0x14   : > { %s1136_s29 = scalar_lea.vmem (%p30_p4), %s1558_s0, %s1003_s25 }
  0x15   : > { %v175_v0 = vld [vmem:[%s1136_s29] sm:$0xff] (%p30_p4)  ;;  %v177_v1 = vld [vmem:[%s1136_s29 + $0x8] sm:$0xff] (%p30_p4)  ;;  %v179_v2 = vld [vmem:[%s1136_s29 + $0x10] sm:$0xff] (%p30_p4)  ;;  %s1141_s30 = scalar_lea.vmem (%p30_p4), [#allocation2], %s1015_s26 }
  0x16   : > { %176 = vst [vmem:[%s1141_s30] sm:$0xff] (%p30_p4), %v175_v0  ;;  %178 = vst [vmem:[%s1141_s30 + $0x8] sm:$0xff] (%p30_p4), %v177_v1  ;;  %v181_v3 = vld [vmem:[%s1136_s29 + $0x18] sm:$0xff] (%p30_p4)  ;;  %v183_v4 = vld [vmem:[%s1136_s29 + $0x20] sm:$0xff] (%p30_p4) }
  0x17   : > { %180 = vst [vmem:[%s1141_s30 + $0x10] sm:$0xff] (%p30_p4), %v179_v2  ;;  %v185_v5 = vld [vmem:[%s1136_s29 + $0x50] sm:$0xff] (%p30_p4)  ;;  %182 = vst [vmem:[%s1141_s30 + $0x18] sm:$0xff] (%p30_p4), %v181_v3  ;;  %v187_v6 = vld [vmem:[%s1136_s29 + $0x58] sm:$0xff] (%p30_p4) }
  0x18   : > { %184 = vst [vmem:[%s1141_s30 + $0x20] sm:$0xff] %v183_v4  ;;  %186 = vst [vmem:[%s1141_s30 + $0x28] sm:$0xff] %v185_v5  ;;  %v189_v7 = vld [vmem:[%s1136_s29 + $0x60] sm:$0xff]  ;;  %v191_v8 = vld [vmem:[%s1136_s29 + $0x68] sm:$0xff] }
  0x19   : > { %188 = vst [vmem:[%s1141_s30 + $0x30] sm:$0xff] %v187_v6  ;;  %190 = vst [vmem:[%s1141_s30 + $0x38] sm:$0xff] %v189_v7  ;;  %v193_v9 = vld [vmem:[%s1136_s29 + $0x70] sm:$0xff]  ;;  %v195_v10 = vld [vmem:[%s1136_s29 + $0xa0] sm:$0xff] }
  0x1a   : > { %192 = vst [vmem:[%s1141_s30 + $0x40] sm:$0xff] %v191_v8  ;;  %v197_v11 = vld [vmem:[%s1136_s29 + $0xa8] sm:$0xff]  ;;  %194 = vst [vmem:[%s1141_s30 + $0x48] sm:$0xff] %v193_v9  ;;  %v199_v12 = vld [vmem:[%s1136_s29 + $0xb0] sm:$0xff] }
  0x1b   : > { %196 = vst [vmem:[%s1141_s30 + $0x50] sm:$0xff] %v195_v10  ;;  %198 = vst [vmem:[%s1141_s30 + $0x58] sm:$0xff] %v197_v11  ;;  %v201_v13 = vld [vmem:[%s1136_s29 + $0xb8] sm:$0xff]  ;;  %v203_v14 = vld [vmem:[%s1136_s29 + $0xc0] sm:$0xff] }
  0x1c   : > { %200 = vst [vmem:[%s1141_s30 + $0x60] sm:$0xff] %v199_v12  ;;  %202 = vst [vmem:[%s1141_s30 + $0x68] sm:$0xff] %v201_v13  ;;  %v205_v15 = vld [vmem:[%s1136_s29 + $0xf0] sm:$0xff]  ;;  %v207_v16 = vld [vmem:[%s1136_s29 + $0xf8] sm:$0xff] }
  0x1d   : > { %204 = vst [vmem:[%s1141_s30 + $0x70] sm:$0xff] %v203_v14  ;;  %v209_v17 = vld [vmem:[%s1136_s29 + $0x100] sm:$0xff]  ;;  %206 = vst [vmem:[%s1141_s30 + $0x78] sm:$0xff] %v205_v15  ;;  %v211_v18 = vld [vmem:[%s1136_s29 + $0x108] sm:$0xff] }
  0x1e   : > { %208 = vst [vmem:[%s1141_s30 + $0x80] sm:$0xff] %v207_v16  ;;  %210 = vst [vmem:[%s1141_s30 + $0x88] sm:$0xff] %v209_v17  ;;  %v213_v19 = vld [vmem:[%s1136_s29 + $0x110] sm:$0xff] }
  0x1f   : > { %212 = vst [vmem:[%s1141_s30 + $0x90] sm:$0xff] %v211_v18  ;;  %214 = vst [vmem:[%s1141_s30 + $0x98] sm:$0xff] %v213_v19 }
  0x20 PF: > { %p983_p7 = scmp.ge.s32.totalorder %s1068_s17, 1  ;;  %p219_p8 = scmp.lt.s32.totalorder %s1068_s17, 3 }
  0x22   : > { %p220_p9 = pnand %p983_p7, %p219_p8 }
  0x23   : > { %v377_v20 = vld [vmem:[%s1560_s2] sm:$0xff] (!%p220_p9)  ;;  %v1070_v22 = vmov (!%p220_p9), 0   ;;  %v378_v23 = vld [vmem:[%s1560_s2 + $0x8] sm:$0xff] (!%p220_p9)  ;;  %v316_v25 = vld [vmem:[%s1559_s1 + $0x18] sm:$0xff] (!%p220_p9)  ;;  %s226_s28 = sand.u32 (!%p220_p9), 1, %s1060_s15   ;;  %vm588_vm12 = vcmask (!%p220_p9), 261120  }
  0x24   : > { %223 = sbr.rel (%p220_p9) target bundleno = 457 (0x1c9), region = 55  ;;  %v313_v21 = vld [vmem:[%s1559_s1] sm:$0xff] (!%p220_p9)  ;;  %1044 = vset.pattern.permute.xlu1 (!%p220_p9), %v1070_v22  ;;  %1043 = vset.pattern.permute.xlu0 (!%p220_p9), %v1070_v22  ;;  %v314_v24 = vld [vmem:[%s1559_s1 + $0x8] sm:$0xff] (!%p220_p9)  ;;  %v315_v26 = vld [vmem:[%s1559_s1 + $0x10] sm:$0xff] (!%p220_p9) }
  0x25   : > { %383 = vperm.xlu1 (!%p220_p9), %1044, %v377_v20   ;;  %319 = vperm.xlu0 (!%p220_p9), %1043, %v313_v21   ;;  %v380_v27 = vld [vmem:[%s1560_s2 + $0x18] sm:$0xff] (!%p220_p9)  ;;  %v379_v28 = vld [vmem:[%s1560_s2 + $0x10] sm:$0xff] (!%p220_p9)  ;;  %s1016_s29 = smul.u32 (!%p220_p9), 160, %s226_s28 }
  0x26   : > { %624 = vmatprep.mubr.bf16.mxu0 (!%p220_p9), %v1070_v22  ;;  %667 = vmatprep.mubr.bf16.mxu1 (!%p220_p9), %v1070_v22  ;;  %s1017_s7 = smul.u32 (!%p220_p9), 80, %s226_s28 }
  0x27   : > { %s1213_s30 = scalar_lea.vmem (!%p220_p9), [#allocation2], %s1016_s29 }
  0x28   : > { %v1216_v29 = vld [vmem:[%s1213_s30] sm:$0xff] (!%p220_p9)  ;;  %v1219_v30 = vld [vmem:[%s1213_s30 + $0x28] sm:$0xff] (!%p220_p9)  ;;  %v1225_v32 = vld [vmem:[%s1213_s30 + $0x30] sm:$0xff] (!%p220_p9)  ;;  %s1519_s8 = scalar_lea.vmem (!%p220_p9), [#allocation3], %s1017_s7 }
  0x29   : > { %388 = vperm.xlu1 (!%p220_p9), %1044, %v378_v23   ;;  %324 = vperm.xlu0 (!%p220_p9), %1043, %v314_v24   ;;  %v1222_v31 = vld [vmem:[%s1213_s30 + $0x8] sm:$0xff] (!%p220_p9)  ;;  %v1228_v33 = vld [vmem:[%s1213_s30 + $0x50] sm:$0xff] (!%p220_p9)  ;;  %v274_v35 = vunpack.c.h.bf16 (!%p220_p9), %v1216_v29  ;;  %v284_v36 = vunpack.c.h.bf16 (!%p220_p9), %v1219_v30  ;;  %v1237_v38 = vld [vmem:[%s1213_s30 + $0x78] sm:$0xff] (!%p220_p9)  ;;  %v286_v41 = vunpack.c.h.bf16 (!%p220_p9), %v1225_v32  ;;  %v273_v42 = vunpack.c.l.bf16 (!%p220_p9), %v1216_v29 }
  0x2a   : > { %v1231_v34 = vld [vmem:[%s1213_s30 + $0x10] sm:$0xff] (!%p220_p9)  ;;  %v276_v37 = vunpack.c.h.bf16 (!%p220_p9), %v1222_v31  ;;  %v1240_v39 = vld [vmem:[%s1213_s30 + $0x58] sm:$0xff] (!%p220_p9)  ;;  %v1243_v40 = vld [vmem:[%s1213_s30 + $0x80] sm:$0xff] (!%p220_p9)  ;;  %v283_v43 = vunpack.c.l.bf16 (!%p220_p9), %v1219_v30  ;;  %v275_v44 = vunpack.c.l.bf16 (!%p220_p9), %v1222_v31  ;;  %v285_v46 = vunpack.c.l.bf16 (!%p220_p9), %v1225_v32 }
  0x2b   : > { %v1250_v45 = vld [vmem:[%s1213_s30 + $0x38] sm:$0xff]  ;;  %v294_v47 = vunpack.c.h.bf16 %v1228_v33  ;;  %v277_v48 = vunpack.c.l.bf16 %v1231_v34  ;;  %v278_v49 = vunpack.c.h.bf16 %v1231_v34  ;;  %v1258_v51 = vld [vmem:[%s1213_s30 + $0x40] sm:$0xff]  ;;  %v304_v52 = vunpack.c.h.bf16 %v1237_v38  ;;  %v1275_v62 = vld [vmem:[%s1213_s30 + $0x88] sm:$0xff]  ;;  %s1014_s15 = smul.u32 (%p1126_p5), 40, %s978_s18 }
  0x2c   : > { %v256_v50 = vld [vmem:[%s1213_s30 + $0x18] sm:$0xff]  ;;  %v296_v53 = vunpack.c.h.bf16 %v1240_v39  ;;  %v306_v54 = vunpack.c.h.bf16 %v1243_v40  ;;  %v293_v55 = vunpack.c.l.bf16 %v1228_v33  ;;  %v1265_v56 = vld [vmem:[%s1213_s30 + $0x60] sm:$0xff]  ;;  %v303_v58 = vunpack.c.l.bf16 %v1237_v38  ;;  %v1278_v63 = vld [vmem:[%s1213_s30 + $0x68] sm:$0xff] }
  0x2d   : > { %334 = vperm.xlu1 %1044, %v316_v25   ;;  %329 = vperm.xlu0 %1043, %v315_v26   ;;  %v1268_v57 = vld [vmem:[%s1213_s30 + $0x20] sm:$0xff]  ;;  %v295_v59 = vunpack.c.l.bf16 %v1240_v39  ;;  %v305_v60 = vunpack.c.l.bf16 %v1243_v40  ;;  %v287_v61 = vunpack.c.l.bf16 %v1250_v45  ;;  %v288_v0 = vunpack.c.h.bf16 %v1250_v45  ;;  %v1283_v4 = vld [vmem:[%s1213_s30 + $0x90] sm:$0xff]  ;;  %v1286_v5 = vld [vmem:[%s1213_s30 + $0x48] sm:$0xff]  ;;  %s886_s17 = scalar_lea.vmem (%p1126_p5), %s1562_s4, %s1014_s15 }
  0x2e   : > { %v279_v1 = vunpack.c.l.bf16 %v256_v50  ;;  %v280_v2 = vunpack.c.h.bf16 %v256_v50  ;;  %v289_v3 = vunpack.c.l.bf16 %v1258_v51  ;;  %v290_v6 = vunpack.c.h.bf16 %v1258_v51  ;;  %v1293_v10 = vld [vmem:[%s1213_s30 + $0x70] sm:$0xff]  ;;  %v1296_v11 = vld [vmem:[%s1213_s30 + $0x98] sm:$0xff] }
  0x2f   : > { %v298_v12 = vunpack.c.h.bf16 %v1265_v56  ;;  %v308_v14 = vunpack.c.h.bf16 %v1275_v62 }
  0x31   : > { %398 = vperm.xlu1 %1044, %v380_v27   ;;  %393 = vperm.xlu0 %1043, %v379_v28  }
  0xa4   : > { %v1306_v20 = vpop.permute.xlu1 %383  ;;  %v1308_v21 = vpop.permute.xlu0 %319 }
  0xa5   : > { %v338_v27 = vmul.f32 %v1308_v21, %v274_v35  ;;  %v340_v28 = vmul.f32 %v1308_v21, %v276_v37  ;;  %v337_v29 = vmul.f32 %v1308_v21, %v273_v42  ;;  %v339_v31 = vmul.f32 %v1308_v21, %v275_v44 }
  0xa6   : > { %v342_v34 = vmul.f32 %v1308_v21, %v278_v49  ;;  %v344_v50 = vmul.f32 %v1308_v21, %v280_v2  ;;  %v341_v19 = vmul.f32 %v1308_v21, %v277_v48  ;;  %v343_v24 = vmul.f32 %v1308_v21, %v279_v1 }
  0xa7   : > { %v402_v25 = vadd.f32 %v1306_v20, %v338_v27  ;;  %v404_v26 = vadd.f32 %v1306_v20, %v340_v28  ;;  %v401_v35 = vadd.f32 %v1306_v20, %v337_v29  ;;  %v403_v37 = vadd.f32 %v1306_v20, %v339_v31 }
  0xa8   : > { %v1326_v8 = vpop.permute.xlu1 %388  ;;  %v1328_v42 = vpop.permute.xlu0 %324  ;;  %v1331_v44 = vadd.f32 %v1306_v20, %v342_v34  ;;  %v1334_v49 = vadd.f32 %v1306_v20, %v344_v50  ;;  %v1337_v48 = vadd.f32 %v1306_v20, %v341_v19  ;;  %v1340_v1 = vadd.f32 %v1306_v20, %v343_v24 }
  0xa9   : > { %v348_v2 = vmul.f32 %v1328_v42, %v284_v36  ;;  %vm442_vm0 = vcmp.ge.f32.partialorder %v402_v25, 0.0  ;;  %v482_v27 = vmul.f32 0.01, %v402_v25  ;;  %v350_v28 = vmul.f32 %v1328_v42, %v286_v41 }
  0xaa   : > { %vm444_vm1 = vcmp.ge.f32.partialorder %v404_v26, 0.0  ;;  %v484_v29 = vmul.f32 0.01, %v404_v26  ;;  %v347_v19 = vmul.f32 %v1328_v42, %v283_v43  ;;  %vm441_vm2 = vcmp.ge.f32.partialorder %v401_v35, 0.0 }
  0xab   : > { %v412_v24 = vadd.f32 %v1326_v8, %v348_v2  ;;  %v522_v31 = vsel %vm442_vm0, %v402_v25, %v482_v27  ;;  %v414_v34 = vadd.f32 %v1326_v8, %v350_v28  ;;  %v481_v50 = vmul.f32 0.01, %v401_v35 }
  0xac   : > { %v1353_v36 = vpop.permute.xlu1 %334  ;;  %v1355_v23 = vpop.permute.xlu0 %329  ;;  %v524_v9 = vsel %vm444_vm1, %v404_v26, %v484_v29  ;;  %v411_v41 = vadd.f32 %v1326_v8, %v347_v19  ;;  %v349_v30 = vmul.f32 %v1328_v42, %v285_v46  ;;  %vm443_vm3 = vcmp.ge.f32.partialorder %v403_v37, 0.0 }
  0xad   : > { %vm452_vm4 = vcmp.ge.f32.partialorder %v412_v24, 0.0  ;;  %v492_v43 = vmul.f32 0.01, %v412_v24  ;;  %vm454_vm5 = vcmp.ge.f32.partialorder %v414_v34, 0.0  ;;  %v494_v2 = vmul.f32 0.01, %v414_v34 }
  0xae   : > { %vm451_vm6 = vcmp.ge.f32.partialorder %v411_v41, 0.0  ;;  %v491_v25 = vmul.f32 0.01, %v411_v41  ;;  %v521_v27 = vsel %vm441_vm2, %v401_v35, %v481_v50  ;;  %v413_v28 = vadd.f32 %v1326_v8, %v349_v30 }
  0xaf   : > { %v532_v17 = vsel %vm452_vm4, %v412_v24, %v492_v43  ;;  %v534_v15 = vsel %vm454_vm5, %v414_v34, %v494_v2  ;;  %v483_v26 = vmul.f32 0.01, %v403_v37  ;;  %v358_v32 = vmul.f32 %v1355_v23, %v294_v47 }
  0xb0   : > { %v1366_v29 = vpop.permute.xlu1 %398  ;;  %v1368_v46 = vpop.permute.xlu0 %393  ;;  %v564_v19 = vpack.c.bf16 %v532_v17, %v522_v31  ;;  %v566_v13 = vpack.c.bf16 %v534_v15, %v524_v9  ;;  %v531_v7 = vsel %vm451_vm6, %v411_v41, %v491_v25  ;;  %vm453_vm7 = vcmp.ge.f32.partialorder %v413_v28, 0.0 }
  0xb1   : > { %v563_v18 = vpack.c.bf16 %v531_v7, %v521_v27  ;;  %v493_v16 = vmul.f32 0.01, %v413_v28  ;;  %v523_v35 = vsel %vm443_vm3, %v403_v37, %v483_v26  ;;  %v368_v24 = vmul.f32 %v1353_v36, %v304_v52 }
  0xb2   : > { %592 = vmatprep.subr.bf16.mxu0 %v564_v19  ;;  %635 = vmatprep.subr.bf16.mxu1 %v566_v13  ;;  %v422_v47 = vadd.f32 %v1368_v46, %v358_v32  ;;  %v360_v34 = vmul.f32 %v1355_v23, %v296_v53  ;;  %v370_v9 = vmul.f32 %v1353_v36, %v306_v54  ;;  %vm446_vm8 = vcmp.ge.f32.partialorder %v1331_v44, 0.0 }
  0xb3   : > { %593 = vmatpush1.bf16.msra.mxu0 %v563_v18  ;;  %v533_v7 = vsel %vm453_vm7, %v413_v28, %v493_v16  ;;  %v432_v15 = vadd.f32 %v1366_v29, %v368_v24  ;;  %v357_v52 = vmul.f32 %v1355_v23, %v293_v55  ;;  %v367_v13 = vmul.f32 %v1353_v36, %v303_v58 }
  0xb4   : > { %v565_v17 = vpack.c.bf16 %v533_v7, %v523_v35  ;;  %vm462_vm9 = vcmp.ge.f32.partialorder %v422_v47, 0.0  ;;  %v502_v53 = vmul.f32 0.01, %v422_v47  ;;  %v424_v37 = vadd.f32 %v1368_v46, %v360_v34 }
  0xb5   : > { %vm472_vm10 = vcmp.ge.f32.partialorder %v432_v15, 0.0  ;;  %v512_v54 = vmul.f32 0.01, %v432_v15  ;;  %v434_v18 = vadd.f32 %v1366_v29, %v370_v9  ;;  %v421_v16 = vadd.f32 %v1368_v46, %v357_v52 }
  0xb6   : > { %636 = vmatpush1.bf16.msra.mxu1 %v565_v17  ;;  %v542_v31 = vsel %vm462_vm9, %v422_v47, %v502_v53  ;;  %vm464_vm11 = vcmp.ge.f32.partialorder %v424_v37, 0.0  ;;  %v504_v33 = vmul.f32 0.01, %v424_v37  ;;  %v431_v55 = vadd.f32 %v1366_v29, %v367_v13 }
  0xb7   : > { %v552_v38 = vsel %vm472_vm10, %v432_v15, %v512_v54  ;;  %vm474_vm13 = vcmp.ge.f32.partialorder %v434_v18, 0.0  ;;  %v514_v58 = vmul.f32 0.01, %v434_v18  ;;  %vm461_vm14 = vcmp.ge.f32.partialorder %v421_v16, 0.0 }
  0xb8   : > { %v574_v50 = vpack.c.bf16 %v552_v38, %v542_v31  ;;  %v544_v41 = vsel %vm464_vm11, %v424_v37, %v504_v33  ;;  %vm471_vm15 = vcmp.ge.f32.partialorder %v431_v55, 0.0  ;;  %v501_v30 = vmul.f32 0.01, %v421_v16 }
  0xb9   : > { %v554_v43 = vsel %vm474_vm13, %v434_v18, %v514_v58  ;;  %v511_v2 = vmul.f32 0.01, %v431_v55  ;;  %v359_v25 = vmul.f32 %v1355_v23, %v295_v59  ;;  %v369_v27 = vmul.f32 %v1353_v36, %v305_v60 }
  0xba   : > { %594 = vmatprep.subr.bf16.mxu0 %v574_v50  ;;  %v576_v28 = vpack.c.bf16 %v554_v43, %v544_v41  ;;  %v541_v26 = vsel %vm461_vm14, %v421_v16, %v501_v30  ;;  %v352_v32 = vmul.f32 %v1328_v42, %v288_v0  ;;  %v486_v19 = vmul.f32 0.01, %v1331_v44  ;;  %v1416_v0 = vld [vmem:[%s1561_s3] sm:$0x3f]  }
  0xbb   : > { %v551_v35 = vsel %vm471_vm15, %v431_v55, %v511_v2  ;;  %v423_v24 = vadd.f32 %v1368_v46, %v359_v25  ;;  %v433_v39 = vadd.f32 %v1366_v29, %v369_v27  ;;  %v354_v40 = vmul.f32 %v1328_v42, %v290_v6 }
  0xbc   : > { %637 = vmatprep.subr.bf16.mxu1 %v576_v28  ;;  %v573_v59 = vpack.c.bf16 %v551_v35, %v541_v26  ;;  %v416_v60 = vadd.f32 %v1326_v8, %v352_v32  ;;  %v526_v47 = vsel %vm446_vm8, %v1331_v44, %v486_v19  ;;  %vm448_vm0 = vcmp.ge.f32.partialorder %v1334_v49, 0.0 }
  0xbd   : > { %vm463_vm1 = vcmp.ge.f32.partialorder %v423_v24, 0.0  ;;  %vm473_vm2 = vcmp.ge.f32.partialorder %v433_v39, 0.0  ;;  %v503_v34 = vmul.f32 0.01, %v423_v24  ;;  %v513_v9 = vmul.f32 0.01, %v433_v39 }
  0xbe   : > { %595 = vmatpush1.bf16.msra.mxu0 %v573_v59  ;;  %vm456_vm3 = vcmp.ge.f32.partialorder %v416_v60, 0.0  ;;  %v496_v6 = vmul.f32 0.01, %v416_v60  ;;  %v418_v7 = vadd.f32 %v1326_v8, %v354_v40  ;;  %v488_v15 = vmul.f32 0.01, %v1334_v49 }
  0xbf   : > { %v543_v52 = vsel %vm463_vm1, %v423_v24, %v503_v34  ;;  %v553_v44 = vsel %vm473_vm2, %v433_v39, %v513_v9  ;;  %v351_v13 = vmul.f32 %v1328_v42, %v287_v61  ;;  %vm445_vm4 = vcmp.ge.f32.partialorder %v1337_v48, 0.0 }
  0xc0   : > { %v575_v17 = vpack.c.bf16 %v553_v44, %v543_v52  ;;  %v536_v53 = vsel %vm456_vm3, %v416_v60, %v496_v6  ;;  %vm458_vm5 = vcmp.ge.f32.partialorder %v418_v7, 0.0  ;;  %v498_v37 = vmul.f32 0.01, %v418_v7 }
  0xc1   : > { %v568_v54 = vpack.c.bf16 %v536_v53, %v526_v47  ;;  %v528_v18 = vsel %vm448_vm0, %v1334_v49, %v488_v15  ;;  %985 = vmatmul.mubr.msk.bf16.vlgmr.msra.gmra.mrb[0].mxu0 %vm588_vm12, %v1416_v0  ;;  %v415_v16 = vadd.f32 %v1326_v8, %v351_v13  ;;  %v485_v45 = vmul.f32 0.01, %v1337_v48 }
  0xc2   : > { %638 = vmatpush1.bf16.msra.mxu1 %v575_v17  ;;  %v538_v61 = vsel %vm458_vm5, %v418_v7, %v498_v37  ;;  %v353_v31 = vmul.f32 %v1328_v42, %v289_v3  ;;  %vm447_vm6 = vcmp.ge.f32.partialorder %v1340_v1, 0.0  ;;  %v487_v33 = vmul.f32 0.01, %v1340_v1  ;;  %710 = vmatprep.mubr.bf16.mxu0 %v1070_v22 }
  0xc3   : > { %678 = vmatprep.subr.bf16.mxu0 %v568_v54  ;;  %v570_v49 = vpack.c.bf16 %v538_v61, %v528_v18  ;;  %vm455_vm7 = vcmp.ge.f32.partialorder %v415_v16, 0.0  ;;  %v495_v55 = vmul.f32 0.01, %v415_v16  ;;  %v525_v38 = vsel %vm445_vm4, %v1337_v48, %v485_v45 }
  0xc4   : > { %v417_v58 = vadd.f32 %v1326_v8, %v353_v31  ;;  %v527_v51 = vsel %vm447_vm6, %v1340_v1, %v487_v33  ;;  %v362_v3 = vmul.f32 %v1355_v23, %v298_v12  ;;  %v372_v50 = vmul.f32 %v1353_v36, %v308_v14 }
  0xc5   : > { %721 = vmatprep.subr.bf16.mxu1 %v570_v49  ;;  %986 = vmatmul.mubr.msk.bf16.vlgmr.msra.gmra.mrb[0].mxu1 %vm588_vm12, %v1416_v0  ;;  %v535_v41 = vsel %vm455_vm7, %v415_v16, %v495_v55  ;;  %v1564_v30 = vunpack.c.h.bf16 %v1278_v63  ;;  %v1565_v43 = vunpack.c.h.bf16 %v1283_v4  ;;  %v312_v2 = vunpack.c.h.bf16 %v1296_v11 }
  0xc6   : > { %v567_v12 = vpack.c.bf16 %v535_v41, %v525_v38  ;;  %vm457_vm8 = vcmp.ge.f32.partialorder %v417_v58, 0.0  ;;  %v497_v25 = vmul.f32 0.01, %v417_v58  ;;  %v426_v14 = vadd.f32 %v1368_v46, %v362_v3  ;;  %753 = vmatprep.mubr.bf16.mxu1 %v1070_v22 }
  0xc7   : > { %v364_v48 = vmul.f32 %v1355_v23, %v1564_v30  ;;  %v374_v1 = vmul.f32 %v1353_v36, %v1565_v43  ;;  %v436_v27 = vadd.f32 %v1366_v29, %v372_v50  ;;  %v1566_v32 = vunpack.c.l.bf16 %v1265_v56 }
  0xc8   : > { %679 = vmatpush1.bf16.msra.mxu0 %v567_v12  ;;  %v537_v35 = vsel %vm457_vm8, %v417_v58, %v497_v25  ;;  %vm466_vm9 = vcmp.ge.f32.partialorder %v426_v14, 0.0  ;;  %v506_v24 = vmul.f32 0.01, %v426_v14  ;;  %v1567_v39 = vunpack.c.l.bf16 %v1275_v62 }
  0xc9   : > { %v428_v28 = vadd.f32 %v1368_v46, %v364_v48  ;;  %v438_v26 = vadd.f32 %v1366_v29, %v374_v1  ;;  %v361_v19 = vmul.f32 %v1355_v23, %v1566_v32  ;;  %v569_v59 = vpack.c.bf16 %v537_v35, %v527_v51 }
  0xca   : > { %v371_v40 = vmul.f32 %v1353_v36, %v1567_v39  ;;  %vm476_vm10 = vcmp.ge.f32.partialorder %v436_v27, 0.0  ;;  %v516_v60 = vmul.f32 0.01, %v436_v27  ;;  %v546_v47 = vsel %vm466_vm9, %v426_v14, %v506_v24 }
  0xcb   : > { %vm468_vm11 = vcmp.ge.f32.partialorder %v428_v28, 0.0  ;;  %vm478_vm13 = vcmp.ge.f32.partialorder %v438_v26, 0.0  ;;  %v508_v34 = vmul.f32 0.01, %v428_v28  ;;  %v518_v9 = vmul.f32 0.01, %v438_v26  ;;  %722 = vmatpush1.bf16.msra.mxu1 %v569_v59 }
  0xcc   : > { %v556_v56 = vsel %vm476_vm10, %v436_v27, %v516_v60  ;;  %v425_v6 = vadd.f32 %v1368_v46, %v361_v19  ;;  %v435_v7 = vadd.f32 %v1366_v29, %v371_v40  ;;  %v1568_v15 = vunpack.c.l.bf16 %v1278_v63 }
  0xcd   : > { %v578_v52 = vpack.c.bf16 %v556_v56, %v546_v47  ;;  %v548_v44 = vsel %vm468_vm11, %v428_v28, %v508_v34  ;;  %v558_v13 = vsel %vm478_vm13, %v438_v26, %v518_v9  ;;  %v1569_v17 = vunpack.c.l.bf16 %v1283_v4 }
  0xce   : > { %v363_v62 = vmul.f32 %v1355_v23, %v1568_v15  ;;  %v580_v37 = vpack.c.bf16 %v558_v13, %v548_v44  ;;  %vm465_vm14 = vcmp.ge.f32.partialorder %v425_v6, 0.0  ;;  %vm475_vm15 = vcmp.ge.f32.partialorder %v435_v7, 0.0 }
  0xcf   : > { %v373_v53 = vmul.f32 %v1353_v36, %v1569_v17  ;;  %v505_v54 = vmul.f32 0.01, %v425_v6  ;;  %680 = vmatprep.subr.bf16.mxu0 %v578_v52  ;;  %v515_v18 = vmul.f32 0.01, %v435_v7  ;;  %v1570_v63 = vunpack.c.h.bf16 %v1268_v57 }
  0xd0   : > { %v427_v16 = vadd.f32 %v1368_v46, %v363_v62  ;;  %723 = vmatprep.subr.bf16.mxu1 %v580_v37  ;;  %v1571_v4 = vunpack.c.h.bf16 %v1286_v5  ;;  %v1572_v49 = vunpack.c.l.bf16 %v1268_v57  ;;  %v1573_v38 = vunpack.c.l.bf16 %v1286_v5 }
  0xd1   : > { %v437_v45 = vadd.f32 %v1366_v29, %v373_v53  ;;  %v346_v61 = vmul.f32 %v1308_v21, %v1570_v63  ;;  %v545_v31 = vsel %vm465_vm14, %v425_v6, %v505_v54  ;;  %v555_v51 = vsel %vm475_vm15, %v435_v7, %v515_v18 }
  0xd2   : > { %v356_v33 = vmul.f32 %v1328_v42, %v1571_v4  ;;  %v345_v55 = vmul.f32 %v1308_v21, %v1572_v49  ;;  %v355_v58 = vmul.f32 %v1328_v42, %v1573_v38  ;;  %vm467_vm0 = vcmp.ge.f32.partialorder %v427_v16, 0.0 }
  0xd3   : > { %vm477_vm1 = vcmp.ge.f32.partialorder %v437_v45, 0.0  ;;  %v507_v3 = vmul.f32 0.01, %v427_v16  ;;  %v577_v50 = vpack.c.bf16 %v555_v51, %v545_v31  ;;  %v517_v41 = vmul.f32 0.01, %v437_v45 }
  0xd4   : > { %v410_v30 = vadd.f32 %v1306_v20, %v346_v61  ;;  %v420_v48 = vadd.f32 %v1326_v8, %v356_v33  ;;  %v409_v1 = vadd.f32 %v1306_v20, %v345_v55  ;;  %v419_v57 = vadd.f32 %v1326_v8, %v355_v58 }
  0xd5   : > { %v547_v43 = vsel %vm467_vm0, %v427_v16, %v507_v3  ;;  %v1574_v21 = vunpack.c.h.bf16 %v1293_v10  ;;  %681 = vmatpush1.bf16.msra.mxu0 %v577_v50  ;;  %v557_v42 = vsel %vm477_vm1, %v437_v45, %v517_v41  ;;  %v376_v8 = vmul.f32 %v1353_v36, %v312_v2 }
  0xd6   : > { %vm450_vm2 = vcmp.ge.f32.partialorder %v410_v30, 0.0  ;;  %vm460_vm3 = vcmp.ge.f32.partialorder %v420_v48, 0.0  ;;  %v490_v12 = vmul.f32 0.01, %v410_v30  ;;  %v579_v25 = vpack.c.bf16 %v557_v42, %v547_v43 }
  0xd7   : > { %v366_v5 = vmul.f32 %v1355_v23, %v1574_v21  ;;  %v500_v14 = vmul.f32 0.01, %v420_v48  ;;  %vm449_vm4 = vcmp.ge.f32.partialorder %v409_v1, 0.0  ;;  %vm459_vm5 = vcmp.ge.f32.partialorder %v419_v57, 0.0 }
  0xd8   : > { %v530_v27 = vsel %vm450_vm2, %v410_v30, %v490_v12  ;;  %v489_v28 = vmul.f32 0.01, %v409_v1  ;;  %v499_v26 = vmul.f32 0.01, %v419_v57  ;;  %724 = vmatpush1.bf16.msra.mxu1 %v579_v25  ;;  %987 = vmatmul.mubr.msk.bf16.vlgmr.msra.gmra.mrb[4].mxu0 %vm588_vm12, %v1416_v0  ;;  %v1575_v19 = vunpack.c.l.bf16 %v1293_v10 }
  0xd9   : > { %v540_v20 = vsel %vm460_vm3, %v420_v48, %v500_v14  ;;  %v430_v32 = vadd.f32 %v1368_v46, %v366_v5  ;;  %v440_v59 = vadd.f32 %v1366_v29, %v376_v8  ;;  %796 = vmatprep.mubr.bf16.mxu0 %v1070_v22  ;;  %v1576_v47 = vunpack.c.l.bf16 %v1296_v11 }
  0xda   : > { %v365_v35 = vmul.f32 %v1355_v23, %v1575_v19  ;;  %v572_v24 = vpack.c.bf16 %v540_v20, %v530_v27  ;;  %v529_v39 = vsel %vm449_vm4, %v409_v1, %v489_v28  ;;  %v539_v40 = vsel %vm459_vm5, %v419_v57, %v499_v26 }
  0xdb   : > { %v571_v60 = vpack.c.bf16 %v539_v40, %v529_v39  ;;  %vm470_vm6 = vcmp.ge.f32.partialorder %v430_v32, 0.0  ;;  %v510_v2 = vmul.f32 0.01, %v430_v32  ;;  %v375_v34 = vmul.f32 %v1353_v36, %v1576_v47  ;;  %988 = vmatmul.mubr.msk.bf16.vlgmr.msra.gmra.mrb[4].mxu1 %vm588_vm12, %v1416_v0 }
  0xdc   : > { %764 = vmatprep.subr.bf16.mxu0 %v572_v24  ;;  %vm480_vm7 = vcmp.ge.f32.partialorder %v440_v59, 0.0  ;;  %v520_v9 = vmul.f32 0.01, %v440_v59  ;;  %v429_v10 = vadd.f32 %v1368_v46, %v365_v35 }
  0xdd   : > { %765 = vmatpush1.bf16.msra.mxu0 %v571_v60  ;;  %v550_v23 = vsel %vm470_vm6, %v430_v32, %v510_v2  ;;  %v439_v22 = vadd.f32 %v1366_v29, %v375_v34 }
  0xde   : > { %v560_v56 = vsel %vm480_vm7, %v440_v59, %v520_v9  ;;  %vm469_vm8 = vcmp.ge.f32.partialorder %v429_v10, 0.0  ;;  %v509_v6 = vmul.f32 0.01, %v429_v10 }
  0xdf   : > { %v582_v7 = vpack.c.bf16 %v560_v56, %v550_v23  ;;  %vm479_vm9 = vcmp.ge.f32.partialorder %v439_v22, 0.0  ;;  %v519_v11 = vmul.f32 0.01, %v439_v22 }
  0xe0   : > { %v549_v36 = vsel %vm469_vm8, %v429_v10, %v509_v6 }
  0xe1   : > { %766 = vmatprep.subr.bf16.mxu0 %v582_v7  ;;  %v559_v15 = vsel %vm479_vm9, %v439_v22, %v519_v11 }
  0xe2   : > { %v581_v62 = vpack.c.bf16 %v559_v15, %v549_v36 }
  0xe4   : > { %767 = vmatpush1.bf16.msra.mxu0 %v581_v62 }
  0xe7   : > { %989 = vmatmul.mubr.msk.bf16.vlgmr.msra.gmra.mrb[8].mxu0 %vm588_vm12, %v1416_v0 }
 0x194   : > { %v626_v46 = vpop.f32.mrb[0].mxu0 }
 0x195   : > { %v628_v52 = vpop.f32.mrb[1].mxu0 }
 0x196   : > { %v1004_v44 = vpack.c.bf16 %v628_v52, %v626_v46  ;;  %v630_v29 = vpop.f32.mrb[2].mxu0 }
 0x197   : > { %v632_v13 = vpop.f32.mrb[3].mxu0 }
 0x198   : > { %867 = vst [vmem:[%s1519_s8] sm:$0xff] %v1004_v44  ;;  %v1009_v17 = vpack.c.bf16 %v632_v13, %v630_v29  ;;  %v669_v53 = vpop.f32.mrb[0].mxu1 }
 0x199   : > { %v671_v37 = vpop.f32.mrb[1].mxu1 }
 0x19a   : > { %872 = vst [vmem:[%s1519_s8 + $0x28] sm:$0x33] %v1009_v17  ;;  %v1005_v0 = vpack.c.bf16 %v671_v37, %v669_v53  ;;  %v673_v54 = vpop.f32.mrb[2].mxu1 }
 0x19b   : > { %v675_v18 = vpop.f32.mrb[3].mxu1 }
 0x19c   : > { %868 = vst [vmem:[%s1519_s8 + $0x8] sm:$0xff] %v1005_v0  ;;  %v1010_v16 = vpack.c.bf16 %v675_v18, %v673_v54 }
 0x19e   : > { %873 = vst [vmem:[%s1519_s8 + $0x30] sm:$0x33] %v1010_v16 }
 0x19f   : > { %v899_v57 = vld [vmem:[%s1519_s8] sm:$0xff] (%p1126_p5) }
 0x1a0   : > { %900 = vst [vmem:[%s886_s17] sm:$0xff] (%p1126_p5), %v899_v57 }
 0x1a1   : > { %v909_v25 = vld [vmem:[%s1519_s8 + $0x28] sm:$0xff] (%p1126_p5) }
 0x1a2   : > { %910 = vst [vmem:[%s886_s17 + $0x50] sm:$0xff] (%p1126_p5), %v909_v25 }
 0x1a3   : > { %v901_v21 = vld [vmem:[%s1519_s8 + $0x8] sm:$0xff] (%p1126_p5) }
 0x1a4   : > { %902 = vst [vmem:[%s886_s17 + $0x8] sm:$0xff] (%p1126_p5), %v901_v21 }
 0x1a5   : > { %v911_v14 = vld [vmem:[%s1519_s8 + $0x30] sm:$0xff] (%p1126_p5) }
 0x1a6   : > { %912 = vst [vmem:[%s886_s17 + $0x58] sm:$0xff] (%p1126_p5), %v911_v14 }
 0x1ab   : > { %v712_v45 = vpop.f32.mrb[4].mxu0 }
 0x1ac   : > { %v714_v63 = vpop.f32.mrb[5].mxu0 }
 0x1ad   : > { %v1006_v61 = vpack.c.bf16 %v714_v63, %v712_v45  ;;  %v716_v31 = vpop.f32.mrb[6].mxu0 }
 0x1ae   : > { %v718_v4 = vpop.f32.mrb[7].mxu0  ;;  %v755_v33 = vpop.f32.mrb[4].mxu1 }
 0x1af   : > { %869 = vst [vmem:[%s1519_s8 + $0x10] sm:$0xff] %v1006_v61  ;;  %v1011_v49 = vpack.c.bf16 %v718_v4, %v716_v31  ;;  %v757_v55 = vpop.f32.mrb[5].mxu1 }
 0x1b0   : > { %v1007_v38 = vpack.c.bf16 %v757_v55, %v755_v33  ;;  %v759_v58 = vpop.f32.mrb[6].mxu1 }
 0x1b1   : > { %874 = vst [vmem:[%s1519_s8 + $0x38] sm:$0x33] %v1011_v49  ;;  %v761_v51 = vpop.f32.mrb[7].mxu1 }
 0x1b2   : > { %870 = vst [vmem:[%s1519_s8 + $0x18] sm:$0xff] %v1007_v38  ;;  %v1012_v3 = vpack.c.bf16 %v761_v51, %v759_v58 }
 0x1b4   : > { %875 = vst [vmem:[%s1519_s8 + $0x40] sm:$0x33] %v1012_v3 }
 0x1b6   : > { %v903_v5 = vld [vmem:[%s1519_s8 + $0x10] sm:$0xff] (%p1126_p5) }
 0x1b7   : > { %904 = vst [vmem:[%s886_s17 + $0x10] sm:$0xff] (%p1126_p5), %v903_v5 }
 0x1b8   : > { %v913_v27 = vld [vmem:[%s1519_s8 + $0x38] sm:$0xff] (%p1126_p5) }
 0x1b9   : > { %v905_v42 = vld [vmem:[%s1519_s8 + $0x18] sm:$0xff] (%p1126_p5)  ;;  %914 = vst [vmem:[%s886_s17 + $0x60] sm:$0xff] (%p1126_p5), %v913_v27 }
 0x1ba   : > { %v798_v50 = vpop.f32.mrb[8].mxu0  ;;  %883 = sbr.rel (!%p1126_p5) target bundleno = 457 (0x1c9), region = 63  ;;  %906 = vst [vmem:[%s886_s17 + $0x18] sm:$0xff] (%p1126_p5), %v905_v42 }
 0x1bb   : > { %v800_v41 = vpop.f32.mrb[9].mxu0  ;;  %v915_v28 = vld [vmem:[%s1519_s8 + $0x40] sm:$0xff] (%p1126_p5) }
 0x1bc   : > { %v1008_v30 = vpack.c.bf16 %v800_v41, %v798_v50  ;;  %v802_v48 = vpop.f32.mrb[10].mxu0  ;;  %916 = vst [vmem:[%s886_s17 + $0x68] sm:$0xff] (%p1126_p5), %v915_v28 }
 0x1bd   : > { %v804_v43 = vpop.f32.mrb[11].mxu0 }
 0x1be   : > { %871 = vst [vmem:[%s1519_s8 + $0x20] sm:$0xff] %v1008_v30  ;;  %v1013_v1 = vpack.c.bf16 %v804_v43, %v802_v48 }
 0x1c0   : > { %876 = vst [vmem:[%s1519_s8 + $0x48] sm:$0x33] %v1013_v1 }
 0x1c5   : > { %v907_v12 = vld [vmem:[%s1519_s8 + $0x20] sm:$0xff] }
 0x1c6   : > { %908 = vst [vmem:[%s886_s17 + $0x20] sm:$0xff] %v907_v12 }
 0x1c7   : > { %v917_v26 = vld [vmem:[%s1519_s8 + $0x48] sm:$0xff] }
 0x1c8   : > { %918 = vst [vmem:[%s886_s17 + $0x70] sm:$0xff] %v917_v26 }
 0x1c9 PF: > { %p11_p10 = scmp.ge.s32.totalorder %s1113_s19, 4   ;;  %s1577_s15 = smov %s1064_s16 }
 0x1ca   : > { %s1578_s16 = smov %s1124_s22  ;;  %s1579_s17 = smov %s1113_s19 }
 0x1cb   :  { %13 = sbr.rel (!%p11_p10) target bundleno = 2 (0x2), region = 117 }

// kernel: densenet_forward.8
= control target key start
LH: loop header
LB: loop body
LE: loop exit
PB: predicated region body
PF: predicated region fallthrough
CT: control target
= control target key end

     0   :  { %s4075_s27 = smov 0   ;;  %s4077_s28 = smov 0   ;;  %s6945_s0 = inlined_call_operand.vmem [shape: bf16[32,2560], index: 0, kind: input, shape index: {}, may-alias: {0,8}]   ;;  %s6946_s1 = inlined_call_operand.vmem [shape: f32[1,1280], index: 1, kind: input, shape index: {}]   ;;  %s6947_s2 = inlined_call_operand.vmem [shape: f32[32,1], index: 2, kind: input, shape index: {}]   ;;  %s6948_s3 = inlined_call_operand.vmem [shape: f32[32,1], index: 3, kind: input, shape index: {}]   ;;  %s6949_s4 = inlined_call_operand.vmem [shape: bf16[32,32], index: 4, kind: input, shape index: {}]   ;;  %s6950_s5 = inlined_call_operand.vmem [shape: f32[32,1], index: 5, kind: input, shape index: {}]   ;;  %s6951_s6 = inlined_call_operand.vmem [shape: f32[32,1], index: 6, kind: input, shape index: {}]   ;;  %s6952_s7 = inlined_call_operand.vmem [shape: bf16[8,288], index: 7, kind: input, shape index: {}]   ;;  %s6953_s8 = inlined_call_operand.vmem [shape: bf16[32,2560], index: 8, kind: output, shape index: {}, may-alias: {0,8}]  }
   0x1   :  { %s4079_s29 = smov 0  }
   0x2 LB: > { %s3076_s30 = sadd.s32 4294967295, %s4018_s29   ;;  %s4092_s9 = sadd.s32 1, %s4018_s29   ;;  %s4018_s29 = sphi %s4079_s29, %s7488_s29   ;;  %s4014_s28 = sphi %s4077_s28, %s7487_s28   ;;  %s4010_s27 = sphi %s4075_s27, %s7486_s27  }
   0x3   : > { %s22_s10 = ssub.s32 %s4018_s29, %s4092_s9  ;;  %s25_s11 = sadd.s32 1, %s4014_s28 }
   0x4   : > { %p23_p0 = scmp.eq.s32.totalorder %s22_s10, 0  ;;  %p32_p1 = scmp.ne.s32.totalorder %s4014_s28, %s4010_s27 }
   0x5   : > { %p33_p2 = scmp.eq.s32.totalorder %s4018_s29, 0  ;;  %p209_p3 = scmp.eq.s32.totalorder %s3076_s30, 1 }
   0x6   : > { %s4103_s12 = scalar_select %p23_p0, %s4014_s28, %s25_s11  }
   0x7   : > { %p34_p4 = por %p33_p2, %p32_p1  ;;  %p4105_p5 = por %p209_p3, %p32_p1 }
   0x8   : > { %p3079_p6 = scmp.ge.s32.totalorder %s4018_s29, 2 }
   0xa   : > { %252 = sbr.rel (%p3079_p6) target bundleno = 32 (0x20), region = 44 }
  0x11   : > { %255 = sbr.rel (!%p34_p4) target bundleno = 32 (0x20), region = 48  ;;  %s257_s14 = sand.u32 (%p34_p4), 1, %s4014_s28  }
  0x12   : > { %s3125_s15 = smul.u32 (%p34_p4), 40, %s4018_s29 }
  0x13   : > { %s3156_s16 = smul.u32 (%p34_p4), 160, %s257_s14 }
  0x14   : > { %s4115_s19 = scalar_lea.vmem (%p34_p4), %s6945_s0, %s3125_s15 }
  0x15   : > { %v275_v0 = vld [vmem:[%s4115_s19] sm:$0xff] (%p34_p4)  ;;  %v277_v1 = vld [vmem:[%s4115_s19 + $0x8] sm:$0xff] (%p34_p4)  ;;  %v279_v2 = vld [vmem:[%s4115_s19 + $0x10] sm:$0xff] (%p34_p4)  ;;  %s4120_s20 = scalar_lea.vmem (%p34_p4), [#allocation2], %s3156_s16 }
  0x16   : > { %276 = vst [vmem:[%s4120_s20] sm:$0xff] (%p34_p4), %v275_v0  ;;  %278 = vst [vmem:[%s4120_s20 + $0x8] sm:$0xff] (%p34_p4), %v277_v1  ;;  %v281_v3 = vld [vmem:[%s4115_s19 + $0x18] sm:$0xff] (%p34_p4)  ;;  %v283_v4 = vld [vmem:[%s4115_s19 + $0x20] sm:$0xff] (%p34_p4) }
  0x17   : > { %280 = vst [vmem:[%s4120_s20 + $0x10] sm:$0xff] (%p34_p4), %v279_v2  ;;  %v285_v5 = vld [vmem:[%s4115_s19 + $0x50] sm:$0xff] (%p34_p4)  ;;  %282 = vst [vmem:[%s4120_s20 + $0x18] sm:$0xff] (%p34_p4), %v281_v3  ;;  %v287_v6 = vld [vmem:[%s4115_s19 + $0x58] sm:$0xff] (%p34_p4) }
  0x18   : > { %284 = vst [vmem:[%s4120_s20 + $0x20] sm:$0xff] %v283_v4  ;;  %286 = vst [vmem:[%s4120_s20 + $0x28] sm:$0xff] %v285_v5  ;;  %v289_v7 = vld [vmem:[%s4115_s19 + $0x60] sm:$0xff]  ;;  %v291_v8 = vld [vmem:[%s4115_s19 + $0x68] sm:$0xff] }
  0x19   : > { %288 = vst [vmem:[%s4120_s20 + $0x30] sm:$0xff] %v287_v6  ;;  %290 = vst [vmem:[%s4120_s20 + $0x38] sm:$0xff] %v289_v7  ;;  %v293_v9 = vld [vmem:[%s4115_s19 + $0x70] sm:$0xff]  ;;  %v295_v10 = vld [vmem:[%s4115_s19 + $0xa0] sm:$0xff] }
  0x1a   : > { %292 = vst [vmem:[%s4120_s20 + $0x40] sm:$0xff] %v291_v8  ;;  %v297_v11 = vld [vmem:[%s4115_s19 + $0xa8] sm:$0xff]  ;;  %294 = vst [vmem:[%s4120_s20 + $0x48] sm:$0xff] %v293_v9  ;;  %v299_v12 = vld [vmem:[%s4115_s19 + $0xb0] sm:$0xff] }
  0x1b   : > { %296 = vst [vmem:[%s4120_s20 + $0x50] sm:$0xff] %v295_v10  ;;  %298 = vst [vmem:[%s4120_s20 + $0x58] sm:$0xff] %v297_v11  ;;  %v301_v13 = vld [vmem:[%s4115_s19 + $0xb8] sm:$0xff]  ;;  %v303_v14 = vld [vmem:[%s4115_s19 + $0xc0] sm:$0xff] }
  0x1c   : > { %300 = vst [vmem:[%s4120_s20 + $0x60] sm:$0xff] %v299_v12  ;;  %302 = vst [vmem:[%s4120_s20 + $0x68] sm:$0xff] %v301_v13  ;;  %v305_v15 = vld [vmem:[%s4115_s19 + $0xf0] sm:$0xff]  ;;  %v307_v16 = vld [vmem:[%s4115_s19 + $0xf8] sm:$0xff] }
  0x1d   : > { %304 = vst [vmem:[%s4120_s20 + $0x70] sm:$0xff] %v303_v14  ;;  %v309_v17 = vld [vmem:[%s4115_s19 + $0x100] sm:$0xff]  ;;  %306 = vst [vmem:[%s4120_s20 + $0x78] sm:$0xff] %v305_v15  ;;  %v311_v18 = vld [vmem:[%s4115_s19 + $0x108] sm:$0xff] }
  0x1e   : > { %308 = vst [vmem:[%s4120_s20 + $0x80] sm:$0xff] %v307_v16  ;;  %310 = vst [vmem:[%s4120_s20 + $0x88] sm:$0xff] %v309_v17  ;;  %v313_v19 = vld [vmem:[%s4115_s19 + $0x110] sm:$0xff] }
  0x1f   : > { %312 = vst [vmem:[%s4120_s20 + $0x90] sm:$0xff] %v311_v18  ;;  %314 = vst [vmem:[%s4120_s20 + $0x98] sm:$0xff] %v313_v19 }
  0x20 PF: > { %p3081_p7 = scmp.ge.s32.totalorder %s4018_s29, 1  ;;  %p319_p8 = scmp.lt.s32.totalorder %s4018_s29, 3 }
  0x22   : > { %p320_p9 = pnand %p3081_p7, %p319_p8 }
  0x24   : > { %323 = sbr.rel (%p320_p9) target bundleno = 1097 (0x449), region = 71 }
  0x2b   : > { %v485_v20 = vld [vmem:[%s6948_s3] sm:$0xff]  ;;  %v6954_v22 = vmov 0   ;;  %v486_v23 = vld [vmem:[%s6948_s3 + $0x8] sm:$0xff]  ;;  %v424_v25 = vld [vmem:[%s6947_s2 + $0x18] sm:$0xff]  ;;  %s326_s23 = sand.u32 1, %s4010_s27   ;;  %vm703_vm7 = vcmask 261120  }
  0x2c   : > { %v421_v21 = vld [vmem:[%s6947_s2] sm:$0xff]  ;;  %3194 = vset.pattern.permute.xlu1 %v6954_v22  ;;  %3193 = vset.pattern.permute.xlu0 %v6954_v22  ;;  %v422_v24 = vld [vmem:[%s6947_s2 + $0x8] sm:$0xff]  ;;  %v423_v26 = vld [vmem:[%s6947_s2 + $0x10] sm:$0xff]  ;;  %s3157_s24 = smul.u32 160, %s326_s23  ;;  %s4021_s17 = smov 33  }
  0x2d   : > { %491 = vperm.xlu1 %3194, %v485_v20   ;;  %427 = vperm.xlu0 %3193, %v421_v21   ;;  %v488_v27 = vld [vmem:[%s6948_s3 + $0x18] sm:$0xff]  ;;  %v487_v28 = vld [vmem:[%s6948_s3 + $0x10] sm:$0xff]  ;;  %v976_v29 = vld [vmem:[%s6950_s5 + $0x8] sm:$0xff]  ;;  %s4022_s18 = smov 35   ;;  %s4023_s19 = smov 1  }
  0x2e   : > { %742 = vmatprep.mubr.bf16.mxu0 %v6954_v22  ;;  %v975_v30 = vld [vmem:[%s6950_s5] sm:$0xff]  ;;  %v978_v31 = vld [vmem:[%s6950_s5 + $0x18] sm:$0xff]  ;;  %v977_v32 = vld [vmem:[%s6950_s5 + $0x10] sm:$0xff]  ;;  %s4215_s25 = scalar_lea.vmem [#allocation2], %s3157_s24  ;;  %s4024_s20 = smov 34  }
  0x2f   : > { %v1040_v33 = vld [vmem:[%s6951_s6 + $0x8] sm:$0xff]  ;;  %v1039_v34 = vld [vmem:[%s6951_s6] sm:$0xff]  ;;  %v1042_v35 = vld [vmem:[%s6951_s6 + $0x18] sm:$0xff]  ;;  %s4025_s24 = smov 127   ;;  %s4027_s26 = smov 94  }
  0x30   : > { %v1041_v36 = vld [vmem:[%s6951_s6 + $0x10] sm:$0xff]  ;;  %v361_v37 = vld [vmem:[%s4215_s25] sm:$0xff]  ;;  %v366_v38 = vld [vmem:[%s4215_s25 + $0x28] sm:$0xff]  ;;  %s4028_s10 = smov 93  }
  0x31   : > { %496 = vperm.xlu1 %3194, %v486_v23   ;;  %432 = vperm.xlu0 %3193, %v422_v24   ;;  %v362_v39 = vld [vmem:[%s4215_s25 + $0x8] sm:$0xff]  ;;  %v4221_v40 = vld [vmem:[%s4215_s25 + $0x50] sm:$0xff]  ;;  %v4224_v41 = vld [vmem:[%s4215_s25 + $0x78] sm:$0xff]  ;;  %v382_v43 = vunpack.c.h.bf16 %v361_v37  ;;  %v392_v44 = vunpack.c.h.bf16 %v366_v38  ;;  %v381_v46 = vunpack.c.l.bf16 %v361_v37  ;;  %v391_v47 = vunpack.c.l.bf16 %v366_v38 }
  0x32   : > { %v4227_v42 = vld [vmem:[%s4215_s25 + $0x30] sm:$0xff]  ;;  %v383_v48 = vunpack.c.l.bf16 %v362_v39  ;;  %v384_v49 = vunpack.c.h.bf16 %v362_v39  ;;  %v4231_v50 = vld [vmem:[%s4215_s25 + $0x58] sm:$0xff]  ;;  %v402_v52 = vunpack.c.h.bf16 %v4221_v40  ;;  %v412_v53 = vunpack.c.h.bf16 %v4224_v41  ;;  %v4243_v58 = vld [vmem:[%s4215_s25 + $0x80] sm:$0xff] }
  0x33   : > { %v363_v45 = vld [vmem:[%s4215_s25 + $0x10] sm:$0xff]  ;;  %v4234_v51 = vld [vmem:[%s4215_s25 + $0x38] sm:$0xff]  ;;  %v393_v54 = vunpack.c.l.bf16 %v4227_v42  ;;  %v394_v55 = vunpack.c.h.bf16 %v4227_v42  ;;  %v401_v56 = vunpack.c.l.bf16 %v4221_v40  ;;  %v411_v57 = vunpack.c.l.bf16 %v4224_v41  ;;  %v4246_v61 = vld [vmem:[%s4215_s25 + $0x60] sm:$0xff] }
  0x34   : > { %v385_v59 = vunpack.c.l.bf16 %v363_v45  ;;  %v386_v60 = vunpack.c.h.bf16 %v363_v45  ;;  %v4249_v62 = vld [vmem:[%s4215_s25 + $0x40] sm:$0xff]  ;;  %v403_v1 = vunpack.c.l.bf16 %v4231_v50  ;;  %v404_v2 = vunpack.c.h.bf16 %v4231_v50  ;;  %v4264_v9 = vld [vmem:[%s4215_s25 + $0x88] sm:$0xff] }
  0x35   : > { %442 = vperm.xlu1 %3194, %v424_v25   ;;  %437 = vperm.xlu0 %3193, %v423_v26   ;;  %v395_v3 = vunpack.c.l.bf16 %v4234_v51  ;;  %v396_v4 = vunpack.c.h.bf16 %v4234_v51  ;;  %v413_v10 = vunpack.c.l.bf16 %v4243_v58  ;;  %v414_v11 = vunpack.c.h.bf16 %v4243_v58 }
  0x36   : > { %v405_v12 = vunpack.c.l.bf16 %v4246_v61  ;;  %v398_v13 = vunpack.c.h.bf16 %v4249_v62  ;;  %v406_v17 = vunpack.c.h.bf16 %v4246_v61  ;;  %v416_v24 = vunpack.c.h.bf16 %v4264_v9 }
  0x39   : > { %506 = vperm.xlu1 %3194, %v488_v27   ;;  %501 = vperm.xlu0 %3193, %v487_v28  }
  0x3d   : > { %986 = vperm.xlu1 %3194, %v976_v29   ;;  %981 = vperm.xlu0 %3193, %v975_v30  }
  0x41   : > { %996 = vperm.xlu1 %3194, %v978_v31   ;;  %991 = vperm.xlu0 %3193, %v977_v32  }
  0x45   : > { %1050 = vperm.xlu1 %3194, %v1040_v33   ;;  %1045 = vperm.xlu0 %3193, %v1039_v34  }
  0x49   : > { %1060 = vperm.xlu1 %3194, %v1042_v35   ;;  %1055 = vperm.xlu0 %3193, %v1041_v36  }
  0xac   : > { %v4251_v63 = vpop.permute.xlu1 %491  ;;  %v4253_v0 = vpop.permute.xlu0 %427 }
  0xad   : > { %v446_v5 = vmul.f32 %v4253_v0, %v382_v43  ;;  %v445_v6 = vmul.f32 %v4253_v0, %v381_v46  ;;  %v448_v7 = vmul.f32 %v4253_v0, %v384_v49  ;;  %v447_v8 = vmul.f32 %v4253_v0, %v383_v48 }
  0xae   : > { %v450_v21 = vmul.f32 %v4253_v0, %v386_v60  ;;  %v4283_v23 = vmul.f32 %v4253_v0, %v385_v59 }
  0xaf   : > { %v510_v14 = vadd.f32 %v4251_v63, %v446_v5  ;;  %v509_v15 = vadd.f32 %v4251_v63, %v445_v6  ;;  %v512_v16 = vadd.f32 %v4251_v63, %v448_v7  ;;  %v4279_v20 = vadd.f32 %v4251_v63, %v447_v8 }
  0xb0   : > { %v4274_v18 = vpop.permute.xlu1 %496  ;;  %v4276_v19 = vpop.permute.xlu0 %432 }
  0xb1   : > { %v456_v25 = vmul.f32 %v4276_v19, %v392_v44  ;;  %vm550_vm0 = vcmp.ge.f32.partialorder %v510_v14, 0.0  ;;  %v590_v26 = vmul.f32 0.01, %v510_v14  ;;  %v455_v27 = vmul.f32 %v4276_v19, %v391_v47 }
  0xb2   : > { %vm549_vm1 = vcmp.ge.f32.partialorder %v509_v15, 0.0  ;;  %v589_v28 = vmul.f32 0.01, %v509_v15  ;;  %v458_v29 = vmul.f32 %v4276_v19, %v394_v55  ;;  %vm552_vm2 = vcmp.ge.f32.partialorder %v512_v16, 0.0 }
  0xb3   : > { %v520_v30 = vadd.f32 %v4274_v18, %v456_v25  ;;  %v630_v31 = vsel %vm550_vm0, %v510_v14, %v590_v26  ;;  %v519_v32 = vadd.f32 %v4274_v18, %v455_v27  ;;  %v592_v33 = vmul.f32 0.01, %v512_v16 }
  0xb4   : > { %v4291_v34 = vpop.permute.xlu1 %442  ;;  %v4293_v35 = vpop.permute.xlu0 %437  ;;  %v629_v36 = vsel %vm549_vm1, %v509_v15, %v589_v28  ;;  %v522_v37 = vadd.f32 %v4274_v18, %v458_v29  ;;  %v457_v38 = vmul.f32 %v4276_v19, %v393_v54  ;;  %vm551_vm3 = vcmp.ge.f32.partialorder %v4279_v20, 0.0 }
  0xb5   : > { %vm560_vm4 = vcmp.ge.f32.partialorder %v520_v30, 0.0  ;;  %v600_v39 = vmul.f32 0.01, %v520_v30  ;;  %vm559_vm5 = vcmp.ge.f32.partialorder %v519_v32, 0.0  ;;  %v599_v40 = vmul.f32 0.01, %v519_v32 }
  0xb6   : > { %v466_v41 = vmul.f32 %v4293_v35, %v402_v52  ;;  %v476_v42 = vmul.f32 %v4291_v34, %v412_v53  ;;  %v465_v43 = vmul.f32 %v4293_v35, %v401_v56  ;;  %v475_v44 = vmul.f32 %v4291_v34, %v411_v57 }
  0xb7   : > { %v640_v45 = vsel %vm560_vm4, %v520_v30, %v600_v39  ;;  %v639_v46 = vsel %vm559_vm5, %v519_v32, %v599_v40  ;;  %vm562_vm6 = vcmp.ge.f32.partialorder %v522_v37, 0.0  ;;  %v602_v47 = vmul.f32 0.01, %v522_v37 }
  0xb8   : > { %v4302_v48 = vpop.permute.xlu1 %506  ;;  %v4304_v49 = vpop.permute.xlu0 %501  ;;  %v674_v54 = vpack.c.bf16 %v640_v45, %v630_v31  ;;  %v673_v55 = vpack.c.bf16 %v639_v46, %v629_v36  ;;  %v632_v59 = vsel %vm552_vm2, %v512_v16, %v592_v33  ;;  %v521_v52 = vadd.f32 %v4274_v18, %v457_v38 }
  0xb9   : > { %v530_v53 = vadd.f32 %v4304_v49, %v466_v41  ;;  %v540_v56 = vadd.f32 %v4302_v48, %v476_v42  ;;  %v529_v57 = vadd.f32 %v4304_v49, %v465_v43  ;;  %v539_v60 = vadd.f32 %v4302_v48, %v475_v44  ;;  %v4347_v43 = vld [vmem:[%s4215_s25 + $0x18] sm:$0xff] }
  0xba   : > { %710 = vmatprep.subr.bf16.mxu0 %v674_v54  ;;  %v642_v5 = vsel %vm562_vm6, %v522_v37, %v602_v47  ;;  %vm561_vm8 = vcmp.ge.f32.partialorder %v521_v52, 0.0  ;;  %v591_v6 = vmul.f32 0.01, %v4279_v20  ;;  %v601_v7 = vmul.f32 0.01, %v521_v52 }
  0xbb   : > { %711 = vmatpush1.bf16.msra.mxu0 %v673_v55  ;;  %vm570_vm9 = vcmp.ge.f32.partialorder %v530_v53, 0.0  ;;  %vm580_vm10 = vcmp.ge.f32.partialorder %v540_v56, 0.0  ;;  %v610_v8 = vmul.f32 0.01, %v530_v53  ;;  %v620_v14 = vmul.f32 0.01, %v540_v56 }
  0xbc   : > { %vm569_vm11 = vcmp.ge.f32.partialorder %v529_v57, 0.0  ;;  %vm579_vm12 = vcmp.ge.f32.partialorder %v539_v60, 0.0  ;;  %v609_v15 = vmul.f32 0.01, %v529_v57  ;;  %v619_v16 = vmul.f32 0.01, %v539_v60 }
  0xbd   : > { %v650_v25 = vsel %vm570_vm9, %v530_v53, %v610_v8  ;;  %v660_v26 = vsel %vm580_vm10, %v540_v56, %v620_v14  ;;  %v676_v27 = vpack.c.bf16 %v642_v5, %v632_v59  ;;  %v514_v28 = vadd.f32 %v4251_v63, %v450_v21  ;;  %v4327_v21 = vld [vmem:[%s6949_s4] sm:$0xff]  }
  0xbe   : > { %v684_v29 = vpack.c.bf16 %v660_v26, %v650_v25  ;;  %v649_v30 = vsel %vm569_vm11, %v529_v57, %v609_v15  ;;  %v659_v31 = vsel %vm579_vm12, %v539_v60, %v619_v16  ;;  %v641_v32 = vsel %vm561_vm8, %v521_v52, %v601_v7 }
  0xbf   : > { %v683_v33 = vpack.c.bf16 %v659_v31, %v649_v30  ;;  %v631_v36 = vsel %vm551_vm3, %v4279_v20, %v591_v6  ;;  %v468_v37 = vmul.f32 %v4293_v35, %v404_v2  ;;  %v478_v38 = vmul.f32 %v4291_v34, %v414_v11  ;;  %v4358_v6 = vld [vmem:[%s6949_s4 + $0x8] sm:$0xff]  }
  0xc0   : > { %712 = vmatprep.subr.bf16.mxu0 %v684_v29  ;;  %v675_v39 = vpack.c.bf16 %v641_v32, %v631_v36  ;;  %v467_v20 = vmul.f32 %v4293_v35, %v403_v1  ;;  %v477_v2 = vmul.f32 %v4291_v34, %v413_v10  ;;  %v460_v11 = vmul.f32 %v4276_v19, %v396_v4  ;;  %v374_v32 = vld [vmem:[%s4215_s25 + $0x68] sm:$0xff] }
  0xc1   : > { %713 = vmatpush1.bf16.msra.mxu0 %v683_v33  ;;  %v532_v40 = vadd.f32 %v4304_v49, %v468_v37  ;;  %v542_v41 = vadd.f32 %v4302_v48, %v478_v38  ;;  %vm554_vm13 = vcmp.ge.f32.partialorder %v514_v28, 0.0  ;;  %v594_v42 = vmul.f32 0.01, %v514_v28  ;;  %v379_v38 = vld [vmem:[%s4215_s25 + $0x90] sm:$0xff] }
  0xc2   : > { %763 = vmatprep.subr.bf16.mxu0 %v676_v27  ;;  %v531_v50 = vadd.f32 %v4304_v49, %v467_v20  ;;  %v541_v1 = vadd.f32 %v4302_v48, %v477_v2  ;;  %v524_v58 = vadd.f32 %v4274_v18, %v460_v11  ;;  %v459_v10 = vmul.f32 %v4276_v19, %v395_v3 }
  0xc3   : > { %vm572_vm14 = vcmp.ge.f32.partialorder %v532_v40, 0.0  ;;  %vm582_vm15 = vcmp.ge.f32.partialorder %v542_v41, 0.0  ;;  %v612_v4 = vmul.f32 0.01, %v532_v40  ;;  %v622_v44 = vmul.f32 0.01, %v542_v41 }
  0xc4   : > { %3084 = vmatmul.mubr.msk.bf16.vlgmr.msra.gmra.mrb[0].mxu0 %vm703_vm7, %v4327_v21  ;;  %vm571_vm0 = vcmp.ge.f32.partialorder %v531_v50, 0.0  ;;  %vm581_vm1 = vcmp.ge.f32.partialorder %v541_v1, 0.0  ;;  %v611_v45 = vmul.f32 0.01, %v531_v50  ;;  %v621_v46 = vmul.f32 0.01, %v541_v1 }
  0xc5   : > { %764 = vmatpush1.bf16.msra.mxu0 %v675_v39  ;;  %v652_v47 = vsel %vm572_vm14, %v532_v40, %v612_v4  ;;  %v662_v54 = vsel %vm582_vm15, %v542_v41, %v622_v44  ;;  %vm564_vm2 = vcmp.ge.f32.partialorder %v524_v58, 0.0  ;;  %v604_v51 = vmul.f32 0.01, %v524_v58  ;;  %752 = vmatprep.mubr.bf16.mxu0 %v6954_v22 }
  0xc6   : > { %v686_v3 = vpack.c.bf16 %v662_v54, %v652_v47  ;;  %v651_v55 = vsel %vm571_vm0, %v531_v50, %v611_v45  ;;  %v661_v59 = vsel %vm581_vm1, %v541_v1, %v621_v46  ;;  %v415_v52 = vunpack.c.l.bf16 %v4264_v9 }
  0xc7   : > { %v685_v53 = vpack.c.bf16 %v661_v59, %v651_v55  ;;  %v634_v56 = vsel %vm554_vm13, %v514_v28, %v594_v42  ;;  %v644_v57 = vsel %vm564_vm2, %v524_v58, %v604_v51  ;;  %v388_v60 = vunpack.c.h.bf16 %v4347_v43  ;;  %v4394_v58 = vld [vmem:[%s4215_s25 + $0x20] sm:$0xff] }
  0xc8   : > { %765 = vmatprep.subr.bf16.mxu0 %v686_v3  ;;  %v678_v5 = vpack.c.bf16 %v644_v57, %v634_v56  ;;  %v523_v7 = vadd.f32 %v4274_v18, %v459_v10  ;;  %v470_v8 = vmul.f32 %v4293_v35, %v406_v17  ;;  %v480_v14 = vmul.f32 %v4291_v34, %v416_v24 }
  0xc9   : > { %766 = vmatpush1.bf16.msra.mxu0 %v685_v53  ;;  %v513_v15 = vadd.f32 %v4251_v63, %v4283_v23  ;;  %v469_v16 = vmul.f32 %v4293_v35, %v405_v12  ;;  %v479_v27 = vmul.f32 %v4291_v34, %v415_v52  ;;  %v462_v9 = vmul.f32 %v4276_v19, %v398_v13 }
  0xca   : > { %816 = vmatprep.subr.bf16.mxu0 %v678_v5  ;;  %v534_v25 = vadd.f32 %v4304_v49, %v470_v8  ;;  %v544_v26 = vadd.f32 %v4302_v48, %v480_v14  ;;  %v452_v17 = vmul.f32 %v4253_v0, %v388_v60  ;;  %v603_v61 = vmul.f32 0.01, %v523_v7 }
  0xcb   : > { %v533_v12 = vadd.f32 %v4304_v49, %v469_v16  ;;  %v543_v23 = vadd.f32 %v4302_v48, %v479_v27  ;;  %vm563_vm3 = vcmp.ge.f32.partialorder %v523_v7, 0.0  ;;  %v593_v29 = vmul.f32 0.01, %v513_v15 }
  0xcc   : > { %3085 = vmatmul.mubr.msk.bf16.gmra.mrb[4].mxu0 %vm703_vm7, %v4358_v6  ;;  %v614_v24 = vmul.f32 0.01, %v534_v25  ;;  %v624_v28 = vmul.f32 0.01, %v544_v26  ;;  %vm574_vm4 = vcmp.ge.f32.partialorder %v534_v25, 0.0  ;;  %vm584_vm5 = vcmp.ge.f32.partialorder %v544_v26, 0.0 }
  0xcd   : > { %795 = vmatprep.mubr.bf16.mxu0 %v6954_v22  ;;  %v526_v13 = vadd.f32 %v4274_v18, %v462_v9  ;;  %vm553_vm6 = vcmp.ge.f32.partialorder %v513_v15, 0.0  ;;  %v397_v30 = vunpack.c.l.bf16 %v4249_v62  ;;  %v516_v31 = vadd.f32 %v4251_v63, %v452_v17  ;;  %v4391_v62 = vld [vmem:[%s4215_s25 + $0x48] sm:$0xff] }
  0xce   : > { %v643_v33 = vsel %vm563_vm3, %v523_v7, %v603_v61  ;;  %vm573_vm8 = vcmp.ge.f32.partialorder %v533_v12, 0.0  ;;  %v613_v36 = vmul.f32 0.01, %v533_v12  ;;  %v623_v37 = vmul.f32 0.01, %v543_v23 }
  0xcf   : > { %v654_v39 = vsel %vm574_vm4, %v534_v25, %v614_v24  ;;  %v664_v20 = vsel %vm584_vm5, %v544_v26, %v624_v28  ;;  %vm583_vm9 = vcmp.ge.f32.partialorder %v543_v23, 0.0  ;;  %v606_v2 = vmul.f32 0.01, %v526_v13  ;;  %v375_v28 = vld [vmem:[%s4215_s25 + $0x70] sm:$0xff] }
  0xd0   : > { %v633_v11 = vsel %vm553_vm6, %v513_v15, %v593_v29  ;;  %v387_v40 = vunpack.c.l.bf16 %v4347_v43  ;;  %vm566_vm10 = vcmp.ge.f32.partialorder %v526_v13, 0.0  ;;  %v408_v41 = vunpack.c.h.bf16 %v374_v32 }
  0xd1   : > { %v677_v42 = vpack.c.bf16 %v643_v33, %v633_v11  ;;  %vm556_vm11 = vcmp.ge.f32.partialorder %v516_v31, 0.0  ;;  %v596_v50 = vmul.f32 0.01, %v516_v31  ;;  %v418_v1 = vunpack.c.h.bf16 %v379_v38 }
  0xd2   : > { %v688_v10 = vpack.c.bf16 %v664_v20, %v654_v39  ;;  %v653_v4 = vsel %vm573_vm8, %v533_v12, %v613_v36  ;;  %v663_v44 = vsel %vm583_vm9, %v543_v23, %v623_v37  ;;  %v461_v45 = vmul.f32 %v4276_v19, %v397_v30 }
  0xd3   : > { %v646_v43 = vsel %vm566_vm10, %v526_v13, %v606_v2  ;;  %v407_v46 = vunpack.c.l.bf16 %v374_v32  ;;  %v400_v47 = vunpack.c.h.bf16 %v4391_v62  ;;  %v451_v54 = vmul.f32 %v4253_v0, %v387_v40 }
  0xd4   : > { %3086 = vmatmul.mubr.msk.bf16.vlgmr.msra.gmra.mrb[8].mxu0 %vm703_vm7, %v4327_v21  ;;  %v417_v51 = vunpack.c.l.bf16 %v379_v38  ;;  %v390_v3 = vunpack.c.h.bf16 %v4394_v58  ;;  %v687_v55 = vpack.c.bf16 %v663_v44, %v653_v4  ;;  %v636_v59 = vsel %vm556_vm11, %v516_v31, %v596_v50  ;;  %v380_v31 = vld [vmem:[%s4215_s25 + $0x98] sm:$0xff]  ;;  %s4026_s25 = smov 95  }
  0xd5   : > { %817 = vmatpush1.bf16.msra.mxu0 %v677_v42  ;;  %805 = vmatprep.mubr.bf16.mxu0 %v6954_v22  ;;  %v472_v52 = vmul.f32 %v4293_v35, %v408_v41  ;;  %v482_v53 = vmul.f32 %v4291_v34, %v418_v1  ;;  %v680_v56 = vpack.c.bf16 %v646_v43, %v636_v59  ;;  %v399_v30 = vunpack.c.l.bf16 %v4391_v62 }
  0xd6   : > { %818 = vmatprep.subr.bf16.mxu0 %v688_v10  ;;  %v525_v57 = vadd.f32 %v4274_v18, %v461_v45  ;;  %v471_v7 = vmul.f32 %v4293_v35, %v407_v46  ;;  %v464_v8 = vmul.f32 %v4276_v19, %v400_v47  ;;  %v515_v14 = vadd.f32 %v4251_v63, %v451_v54 }
  0xd7   : > { %v536_v60 = vadd.f32 %v4304_v49, %v472_v52  ;;  %v546_v5 = vadd.f32 %v4302_v48, %v482_v53  ;;  %v481_v15 = vmul.f32 %v4291_v34, %v417_v51  ;;  %v454_v25 = vmul.f32 %v4253_v0, %v390_v3 }
  0xd8   : > { %v535_v16 = vadd.f32 %v4304_v49, %v471_v7  ;;  %v605_v26 = vmul.f32 0.01, %v525_v57  ;;  %vm565_vm12 = vcmp.ge.f32.partialorder %v525_v57, 0.0  ;;  %v528_v61 = vadd.f32 %v4274_v18, %v464_v8 }
  0xd9   : > { %819 = vmatpush1.bf16.msra.mxu0 %v687_v55  ;;  %v545_v27 = vadd.f32 %v4302_v48, %v481_v15  ;;  %v616_v9 = vmul.f32 0.01, %v536_v60  ;;  %v626_v17 = vmul.f32 0.01, %v546_v5  ;;  %v595_v12 = vmul.f32 0.01, %v515_v14 }
  0xda   : > { %869 = vmatprep.subr.bf16.mxu0 %v680_v56  ;;  %vm576_vm13 = vcmp.ge.f32.partialorder %v536_v60, 0.0  ;;  %vm586_vm14 = vcmp.ge.f32.partialorder %v546_v5, 0.0  ;;  %vm555_vm15 = vcmp.ge.f32.partialorder %v515_v14, 0.0  ;;  %v615_v23 = vmul.f32 0.01, %v535_v16 }
  0xdb   : > { %v518_v24 = vadd.f32 %v4251_v63, %v454_v25  ;;  %v645_v29 = vsel %vm565_vm12, %v525_v57, %v605_v26  ;;  %vm575_vm0 = vcmp.ge.f32.partialorder %v535_v16, 0.0  ;;  %v625_v13 = vmul.f32 0.01, %v545_v27  ;;  %v4462_v26 = vld [vmem:[%s6946_s1] sm:$0xff] }
  0xdc   : > { %3087 = vmatmul.mubr.msk.bf16.gmra.mrb[12].mxu0 %vm703_vm7, %v4358_v6  ;;  %v656_v32 = vsel %vm576_vm13, %v536_v60, %v616_v9  ;;  %v666_v33 = vsel %vm586_vm14, %v546_v5, %v626_v17  ;;  %vm585_vm1 = vcmp.ge.f32.partialorder %v545_v27, 0.0  ;;  %v608_v36 = vmul.f32 0.01, %v528_v61  ;;  %v4473_v17 = vpop.permute.xlu1 %986 }
  0xdd   : > { %848 = vmatprep.mubr.bf16.mxu0 %v6954_v22  ;;  %v635_v37 = vsel %vm555_vm15, %v515_v14, %v595_v12  ;;  %v389_v38 = vunpack.c.l.bf16 %v4394_v58  ;;  %vm568_vm2 = vcmp.ge.f32.partialorder %v528_v61, 0.0  ;;  %v410_v39 = vunpack.c.h.bf16 %v375_v28 }
  0xde   : > { %v679_v20 = vpack.c.bf16 %v645_v29, %v635_v37  ;;  %v655_v2 = vsel %vm575_vm0, %v535_v16, %v615_v23  ;;  %v598_v11 = vmul.f32 0.01, %v518_v24  ;;  %v420_v40 = vunpack.c.h.bf16 %v380_v31 }
  0xdf   : > { %v690_v41 = vpack.c.bf16 %v666_v33, %v656_v32  ;;  %v665_v42 = vsel %vm585_vm1, %v545_v27, %v625_v13  ;;  %vm558_vm3 = vcmp.ge.f32.partialorder %v518_v24, 0.0  ;;  %v463_v62 = vmul.f32 %v4276_v19, %v399_v30 }
  0xe0   : > { %v648_v50 = vsel %vm568_vm2, %v528_v61, %v608_v36  ;;  %v453_v1 = vmul.f32 %v4253_v0, %v389_v38  ;;  %v409_v58 = vunpack.c.l.bf16 %v375_v28  ;;  %v419_v10 = vunpack.c.l.bf16 %v380_v31  ;;  %v4477_v12 = vpop.permute.xlu1 %996 }
  0xe1   : > { %v689_v4 = vpack.c.bf16 %v665_v42, %v655_v2  ;;  %v638_v44 = vsel %vm558_vm3, %v518_v24, %v598_v11  ;;  %v474_v45 = vmul.f32 %v4293_v35, %v410_v39  ;;  %v484_v43 = vmul.f32 %v4291_v34, %v420_v40 }
  0xe2   : > { %v682_v46 = vpack.c.bf16 %v648_v50, %v638_v44  ;;  %v527_v47 = vadd.f32 %v4274_v18, %v463_v62  ;;  %v517_v51 = vadd.f32 %v4251_v63, %v453_v1  ;;  %v473_v0 = vmul.f32 %v4293_v35, %v409_v58 }
  0xe3   : > { %v538_v19 = vadd.f32 %v4304_v49, %v474_v45  ;;  %v548_v54 = vadd.f32 %v4302_v48, %v484_v43  ;;  %v483_v3 = vmul.f32 %v4291_v34, %v419_v10  ;;  %v6956_v15 = vlaneseq }
  0xe4   : > { %3088 = vmatmul.mubr.msk.bf16.vlgmr.msra.gmra.mrb[16].mxu0 %vm703_vm7, %v4327_v21  ;;  %v607_v55 = vmul.f32 0.01, %v527_v47  ;;  %v537_v59 = vadd.f32 %v4304_v49, %v473_v0  ;;  %vm567_vm4 = vcmp.ge.f32.partialorder %v527_v47, 0.0  ;;  %v597_v56 = vmul.f32 0.01, %v517_v51  ;;  %v4486_v37 = vpop.permute.xlu1 %1050 }
  0xe5   : > { %870 = vmatpush1.bf16.msra.mxu0 %v679_v20  ;;  %858 = vmatprep.mubr.bf16.mxu0 %v6954_v22  ;;  %v547_v18 = vadd.f32 %v4302_v48, %v483_v3  ;;  %v618_v52 = vmul.f32 0.01, %v538_v19  ;;  %v628_v53 = vmul.f32 0.01, %v548_v54  ;;  %vm578_vm5 = vcmp.ge.f32.partialorder %v538_v19, 0.0 }
  0xe6   : > { %871 = vmatprep.subr.bf16.mxu0 %v690_v41  ;;  %vm588_vm6 = vcmp.ge.f32.partialorder %v548_v54, 0.0  ;;  %vm557_vm8 = vcmp.ge.f32.partialorder %v517_v51, 0.0  ;;  %v647_v63 = vsel %vm567_vm4, %v527_v47, %v607_v55  ;;  %v617_v35 = vmul.f32 0.01, %v537_v59 }
  0xe7   : > { %v627_v34 = vmul.f32 0.01, %v547_v18  ;;  %v658_v57 = vsel %vm578_vm5, %v538_v19, %v618_v52  ;;  %v668_v60 = vsel %vm588_vm6, %v548_v54, %v628_v53  ;;  %vm577_vm9 = vcmp.ge.f32.partialorder %v537_v59, 0.0 }
  0xe8   : > { %vm587_vm10 = vcmp.ge.f32.partialorder %v547_v18, 0.0  ;;  %v637_v5 = vsel %vm557_vm8, %v517_v51, %v597_v56  ;;  %v692_v48 = vpack.c.bf16 %v668_v60, %v658_v57  ;;  %v657_v7 = vsel %vm577_vm9, %v537_v59, %v617_v35  ;;  %v4510_v3 = vpop.permute.xlu1 %1060 }
  0xe9   : > { %872 = vmatpush1.bf16.msra.mxu0 %v689_v4  ;;  %v681_v49 = vpack.c.bf16 %v647_v63, %v637_v5  ;;  %v667_v8 = vsel %vm587_vm10, %v547_v18, %v627_v34  ;;  %v4456_v16 = vshrl.u32 %v6956_v15, 7 }
  0xea   : > { %922 = vmatprep.subr.bf16.mxu0 %v682_v46  ;;  %v691_v14 = vpack.c.bf16 %v667_v8, %v657_v7 }
  0xeb   : > { %v1253_v25 = vsub.s32 6, %v4456_v16  ;;  %v1257_v27 = vsub.s32 7, %v4456_v16  ;;  %v1229_v13 = vsub.s32 0, %v4456_v16  ;;  %v1233_v50 = vsub.s32 1, %v4456_v16 }
  0xec   : > { %3089 = vmatmul.mubr.msk.bf16.gmra.mrb[20].mxu0 %vm703_vm7, %v4358_v6  ;;  %v1237_v34 = vsub.s32 2, %v4456_v16  ;;  %v1241_v7 = vsub.s32 3, %v4456_v16 }
  0xed   : > { %901 = vmatprep.mubr.bf16.mxu0 %v6954_v22  ;;  %v4469_v9 = vrot.slane %v4462_v26, %v1257_v27  ;;  %v4493_v2 = vrot.slane %v4462_v26, %v1229_v13  ;;  %v4521_v63 = vrot.slane %v4462_v26, %v1233_v50 }
  0xef   : > { %7142 = vst [vmem:[#allocation5_spill] sm:$0xff] %v4469_v9  ;;  %7143 = vst [vmem:[#allocation6_spill] sm:$0xff] %v4493_v2 }
  0xf0   : > { %7144 = vst [vmem:[#allocation7_spill] sm:$0xff] %v4521_v63 }
  0xf4   : > { %3090 = vmatmul.mubr.msk.bf16.vlgmr.msra.gmra.mrb[24].mxu0 %vm703_vm7, %v4327_v21 }
  0xf5   : > { %923 = vmatpush1.bf16.msra.mxu0 %v681_v49  ;;  %911 = vmatprep.mubr.bf16.mxu0 %v6954_v22 }
  0xf6   : > { %924 = vmatprep.subr.bf16.mxu0 %v692_v48 }
  0xf9   : > { %925 = vmatpush1.bf16.msra.mxu0 %v691_v14 }
  0xfc   : > { %3091 = vmatmul.mubr.msk.bf16.gmra.mrb[28].mxu0 %vm703_vm7, %v4358_v6 }
  0xfd   : > { %954 = vmatprep.mubr.bf16.mxu0 %v6954_v22 }
 0x104   : > { %3092 = vmatmul.mubr.msk.bf16.vlgmr.msra.gmra.mrb[32].mxu0 %vm703_vm7, %v4327_v21  ;;  %v4466_v21 = vrot.slane %v4462_v26, %v1253_v25 }
 0x105   : > { %964 = vmatprep.mubr.bf16.mxu0 %v6954_v22 }
 0x106   : > { %7141 = vst [vmem:[#allocation4_spill] sm:$0xff] %v4466_v21 }
 0x10c   : > { %3093 = vmatmul.mubr.msk.bf16.gmra.mrb[36].mxu0 %vm703_vm7, %v4358_v6  ;;  %v4471_v6 = vpop.permute.xlu0 %981 }
 0x110   : > { %v4475_v61 = vpop.permute.xlu0 %991 }
 0x114   : > { %v4480_v29 = vpop.permute.xlu0 %1045 }
 0x118   : > { %v4499_v44 = vpop.permute.xlu0 %1055 }
 0x197   : > { %v744_v23 = vpop.f32.mrb[0].mxu0 }
 0x198   : > { %v999_v24 = vmul.f32 %v4471_v6, %v744_v23  ;;  %v746_v28 = vpop.f32.mrb[1].mxu0  ;;  %v1245_v23 = vsub.s32 4, %v4456_v16 }
 0x199   : > { %v1000_v30 = vmul.f32 %v4471_v6, %v746_v28  ;;  %v748_v31 = vpop.f32.mrb[2].mxu0 }
 0x19a   : > { %v1063_v32 = vadd.f32 %v4480_v29, %v999_v24  ;;  %v1009_v33 = vmul.f32 %v4473_v17, %v748_v31  ;;  %v750_v36 = vpop.f32.mrb[3].mxu0 }
 0x19b   : > { %v1010_v38 = vmul.f32 %v4473_v17, %v750_v36  ;;  %v1064_v11 = vadd.f32 %v4480_v29, %v1000_v30 }
 0x19c   : > { %vm1103_vm11 = vcmp.ge.f32.partialorder %v1063_v32, 0.0  ;;  %v1143_v39 = vmul.f32 0.01, %v1063_v32  ;;  %v1073_v20 = vadd.f32 %v4486_v37, %v1009_v33 }
 0x19d   : > { %v1074_v40 = vadd.f32 %v4486_v37, %v1010_v38  ;;  %v1144_v43 = vmul.f32 0.01, %v1064_v11  ;;  %vm1104_vm14 = vcmp.ge.f32.partialorder %v1064_v11, 0.0  ;;  %v1249_v38 = vsub.s32 5, %v4456_v16 }
 0x19e   : > { %v1183_v41 = vsel %vm1103_vm11, %v1063_v32, %v1143_v39  ;;  %vm1113_vm12 = vcmp.ge.f32.partialorder %v1073_v20, 0.0  ;;  %v1153_v42 = vmul.f32 0.01, %v1073_v20 }
 0x19f   : > { %v754_v62 = vpop.f32.mrb[4].mxu0  ;;  %v1154_v58 = vmul.f32 0.01, %v1074_v40  ;;  %v4502_v45 = vmul.f32 %v4493_v2, %v1183_v41  ;;  %vm1114_vm13 = vcmp.ge.f32.partialorder %v1074_v40, 0.0  ;;  %v1184_v56 = vsel %vm1104_vm14, %v1064_v11, %v1144_v43 }
 0x1a0   : > { %v1193_v1 = vsel %vm1113_vm12, %v1073_v20, %v1153_v42  ;;  %v1019_v10 = vmul.f32 %v4475_v61, %v754_v62  ;;  %v756_v4 = vpop.f32.mrb[5].mxu0  ;;  %v4537_v24 = vmul.f32 %v4521_v63, %v1184_v56  ;;  %v1224_v62 = vld [vmem:[%s6946_s1 + $0x8] sm:$0x3] }
 0x1a1   : > { %v4505_v46 = vmul.f32 %v4493_v2, %v1193_v1  ;;  %v758_v47 = vpop.f32.mrb[6].mxu0  ;;  %v1020_v54 = vmul.f32 %v4475_v61, %v756_v4  ;;  %v1194_v18 = vsel %vm1114_vm13, %v1074_v40, %v1154_v58  ;;  %v4566_v1 = vrot.slane %v4462_v26, %v1237_v34 }
 0x1a2   : > { %v1083_v19 = vadd.f32 %v4499_v44, %v1019_v10  ;;  %v1029_v51 = vmul.f32 %v4477_v12, %v758_v47  ;;  %v760_v0 = vpop.f32.mrb[7].mxu0  ;;  %v4531_v49 = vmul.f32 %v4521_v63, %v1194_v18  ;;  %v4569_v58 = vrot.slane %v4462_v26, %v1241_v7 }
 0x1a3   : > { %v1030_v55 = vmul.f32 %v4477_v12, %v760_v0  ;;  %v4515_v59 = vpack.i.bf16 %v4505_v46, %v4502_v45  ;;  %v1084_v60 = vadd.f32 %v4499_v44, %v1020_v54  ;;  %7147 = vst [vmem:[#allocation10_spill] sm:$0xff] %v4566_v1  ;;  %v4576_v10 = vrot.slane %v4462_v26, %v1245_v23 }
 0x1a4   : > { %vm1123_vm15 = vcmp.ge.f32.partialorder %v1083_v19, 0.0  ;;  %v1163_v52 = vmul.f32 0.01, %v1083_v19  ;;  %v1093_v53 = vadd.f32 %v4510_v3, %v1029_v51  ;;  %v4554_v20 = vpack.i.bf16 %v4531_v49, %v4537_v24  ;;  %7148 = vst [vmem:[#allocation11_spill] sm:$0xff] %v4569_v58 }
 0x1a5   : > { %v1094_v35 = vadd.f32 %v4510_v3, %v1030_v55  ;;  %3206 = vrot.lane.b32.xlu1 %v4515_v59, %s4021_s17  ;;  %3196 = vrot.lane.b32.xlu0 %v4515_v59, %s4022_s18  ;;  %v1164_v32 = vmul.f32 0.01, %v1084_v60  ;;  %vm1124_vm2 = vcmp.ge.f32.partialorder %v1084_v60, 0.0  ;;  %7149 = vst [vmem:[#allocation12_spill] sm:$0xff] %v4576_v10  ;;  %v4588_v0 = vrot.slane %v1224_v62, %v1229_v13 }
 0x1a6   : > { %v1203_v57 = vsel %vm1123_vm15, %v1083_v19, %v1163_v52  ;;  %vm1133_vm0 = vcmp.ge.f32.partialorder %v1093_v53, 0.0  ;;  %v1173_v5 = vmul.f32 0.01, %v1093_v53  ;;  %v4581_v19 = vrot.slane %v4462_v26, %v1249_v38 }
 0x1a7   : > { %v797_v48 = vpop.f32.mrb[8].mxu0  ;;  %v1174_v14 = vmul.f32 0.01, %v1094_v35  ;;  %v4540_v28 = vmul.f32 %v4493_v2, %v1203_v57  ;;  %vm1134_vm1 = vcmp.ge.f32.partialorder %v1094_v35, 0.0  ;;  %v1204_v4 = vsel %vm1124_vm2, %v1084_v60, %v1164_v32  ;;  %7151 = vst [vmem:[#allocation14_spill] sm:$0xff] %v4588_v0 }
 0x1a8   : > { %v1213_v8 = vsel %vm1133_vm0, %v1093_v53, %v1173_v5  ;;  %v1001_v25 = vmul.f32 %v4471_v6, %v797_v48  ;;  %v799_v27 = vpop.f32.mrb[9].mxu0  ;;  %7150 = vst [vmem:[#allocation13_spill] sm:$0xff] %v4581_v19  ;;  %v4594_v56 = vrot.slane %v1224_v62, %v1233_v50  ;;  %v4597_v26 = vmul.f32 %v4521_v63, %v1204_v4 }
 0x1a9   : > { %7145 = vst [vmem:[#allocation8_spill] sm:$0xff] %v4540_v28  ;;  %v4543_v30 = vmul.f32 %v4493_v2, %v1213_v8  ;;  %3211 = vrot.lane.b32.xlu1 %v4515_v59, %s4023_s19  ;;  %3201 = vrot.lane.b32.xlu0 %v4515_v59, %s4024_s20  ;;  %v801_v31 = vpop.f32.mrb[10].mxu0  ;;  %v1214_v40 = vsel %vm1134_vm1, %v1094_v35, %v1174_v14 }
 0x1aa   : > { %v1011_v33 = vmul.f32 %v4473_v17, %v801_v31  ;;  %v803_v36 = vpop.f32.mrb[11].mxu0  ;;  %v1065_v41 = vadd.f32 %v4480_v29, %v1001_v25  ;;  %v1002_v42 = vmul.f32 %v4471_v6, %v799_v27  ;;  %v4584_v54 = vmul.f32 %v4521_v63, %v1214_v40  ;;  %7152 = vst [vmem:[#allocation15_spill] sm:$0xff] %v4594_v56 }
 0x1ab   : > { %7146 = vst [vmem:[#allocation9_spill] sm:$0xff] %v4543_v30  ;;  %v1012_v39 = vmul.f32 %v4473_v17, %v803_v36  ;;  %v4558_v11 = vpack.i.bf16 %v4543_v30, %v4540_v28 }
 0x1ac   : > { %v1075_v43 = vadd.f32 %v4486_v37, %v1011_v33  ;;  %v1145_v55 = vmul.f32 0.01, %v1065_v41  ;;  %v1066_v18 = vadd.f32 %v4480_v29, %v1002_v42  ;;  %vm1105_vm3 = vcmp.ge.f32.partialorder %v1065_v41, 0.0 }
 0x1ad   : > { %3216 = vrot.lane.b32.xlu0 %v4554_v20, %s4022_s18  ;;  %3236 = vrot.lane.b32.xlu1 %v4558_v11, %s4022_s18  ;;  %v1076_v47 = vadd.f32 %v4486_v37, %v1012_v39  ;;  %v4609_v48 = vpack.i.bf16 %v4584_v54, %v4597_v26 }
 0x1ae   : > { %v1155_v34 = vmul.f32 0.01, %v1075_v43  ;;  %vm1115_vm4 = vcmp.ge.f32.partialorder %v1075_v43, 0.0  ;;  %v1185_v7 = vsel %vm1105_vm3, %v1065_v41, %v1145_v55  ;;  %v1146_v8 = vmul.f32 0.01, %v1066_v18 }
 0x1af   : > { %v807_v51 = vpop.f32.mrb[12].mxu0  ;;  %v1156_v57 = vmul.f32 0.01, %v1076_v47  ;;  %vm1116_vm5 = vcmp.ge.f32.partialorder %v1076_v47, 0.0  ;;  %vm1106_vm6 = vcmp.ge.f32.partialorder %v1066_v18, 0.0  ;;  %v4619_v36 = vmul.f32 %v4566_v1, %v1185_v7 }
 0x1b0   : > { %v1021_v52 = vmul.f32 %v4475_v61, %v807_v51  ;;  %v809_v53 = vpop.f32.mrb[13].mxu0  ;;  %v1195_v23 = vsel %vm1115_vm4, %v1075_v43, %v1155_v34  ;;  %v1186_v40 = vsel %vm1106_vm6, %v1066_v18, %v1146_v8 }
 0x1b1   : > { %v1022_v35 = vmul.f32 %v4475_v61, %v809_v53  ;;  %3221 = vrot.lane.b32.xlu0 %v4554_v20, %s4024_s20  ;;  %3241 = vrot.lane.b32.xlu1 %v4558_v11, %s4024_s20  ;;  %v811_v13 = vpop.f32.mrb[14].mxu0  ;;  %v1196_v31 = vsel %vm1116_vm5, %v1076_v47, %v1156_v57  ;;  %7153 = vst [vmem:[#allocation16_spill] sm:$0xff] %v4619_v36 }
 0x1b2   : > { %v1085_v60 = vadd.f32 %v4499_v44, %v1021_v52  ;;  %v1031_v16 = vmul.f32 %v4477_v12, %v811_v13  ;;  %v813_v50 = vpop.f32.mrb[15].mxu0  ;;  %v4623_v4 = vmul.f32 %v4566_v1, %v1195_v23  ;;  %v4626_v43 = vmul.f32 %v4569_v58, %v1196_v31 }
 0x1b3   : > { %v1032_v5 = vmul.f32 %v4477_v12, %v813_v50  ;;  %v1086_v14 = vadd.f32 %v4499_v44, %v1022_v35  ;;  %v4637_v57 = vmul.f32 %v4569_v58, %v1186_v40 }
 0x1b4   : > { %v1095_v25 = vadd.f32 %v4510_v3, %v1031_v16  ;;  %v1165_v32 = vmul.f32 0.01, %v1085_v60  ;;  %vm1125_vm8 = vcmp.ge.f32.partialorder %v1085_v60, 0.0  ;;  %7154 = vst [vmem:[#allocation17_spill] sm:$0xff] %v4623_v4  ;;  %7155 = vst [vmem:[#allocation18_spill] sm:$0xff] %v4626_v43 }
 0x1b5   : > { %v1096_v27 = vadd.f32 %v4510_v3, %v1032_v5  ;;  %3226 = vrot.lane.b32.xlu0 %v4554_v20, %s4021_s17  ;;  %3256 = vrot.lane.b32.xlu1 %v4609_v48, %s4022_s18  ;;  %v1166_v41 = vmul.f32 0.01, %v1086_v14  ;;  %vm1126_vm11 = vcmp.ge.f32.partialorder %v1086_v14, 0.0  ;;  %7156 = vst [vmem:[#allocation19_spill] sm:$0xff] %v4637_v57 }
 0x1b6   : > { %v1175_v33 = vmul.f32 0.01, %v1095_v25  ;;  %vm1135_vm9 = vcmp.ge.f32.partialorder %v1095_v25, 0.0  ;;  %v1205_v51 = vsel %vm1125_vm8, %v1085_v60, %v1165_v32  ;;  %v4649_v60 = vpack.i.bf16 %v4623_v4, %v4619_v36 }
 0x1b7   : > { %v1176_v38 = vmul.f32 0.01, %v1096_v27  ;;  %v850_v39 = vpop.f32.mrb[16].mxu0  ;;  %vm1136_vm10 = vcmp.ge.f32.partialorder %v1096_v27, 0.0  ;;  %v1206_v16 = vsel %vm1126_vm11, %v1086_v14, %v1166_v41  ;;  %v4652_v7 = vmul.f32 %v4566_v1, %v1205_v51 }
 0x1b8   : > { %v1003_v42 = vmul.f32 %v4471_v6, %v850_v39  ;;  %v852_v62 = vpop.f32.mrb[17].mxu0  ;;  %v1215_v55 = vsel %vm1135_vm9, %v1095_v25, %v1175_v33  ;;  %v4659_v14 = vpack.i.bf16 %v4626_v43, %v4637_v57  ;;  %v4662_v25 = vmul.f32 %v4569_v58, %v1206_v16 }
 0x1b9   : > { %3231 = vrot.lane.b32.xlu0 %v4554_v20, %s4023_s19  ;;  %3261 = vrot.lane.b32.xlu1 %v4609_v48, %s4024_s20  ;;  %v854_v47 = vpop.f32.mrb[18].mxu0  ;;  %v1216_v53 = vsel %vm1136_vm10, %v1096_v27, %v1176_v38  ;;  %v1004_v13 = vmul.f32 %v4471_v6, %v852_v62  ;;  %v4641_v5 = vmul.f32 %v4566_v1, %v1215_v55 }
 0x1ba   : > { %v1013_v18 = vmul.f32 %v4473_v17, %v854_v47  ;;  %v856_v52 = vpop.f32.mrb[19].mxu0  ;;  %v1067_v35 = vadd.f32 %v4480_v29, %v1003_v42  ;;  %7158 = vst [vmem:[#allocation21_spill] sm:$0xff] %v4652_v7  ;;  %v4655_v8 = vmul.f32 %v4569_v58, %v1216_v53  ;;  %7160 = vst [vmem:[#allocation23_spill] sm:$0xff] %v4662_v25 }
 0x1bb   : > { %v1014_v34 = vmul.f32 %v4473_v17, %v856_v52  ;;  %7157 = vst [vmem:[#allocation20_spill] sm:$0xff] %v4641_v5  ;;  %v4665_v23 = vadd.f32 %v4480_v29, %v1004_v13  ;;  %v4676_v42 = vpack.i.bf16 %v4641_v5, %v4652_v7 }
 0x1bc   : > { %v1077_v50 = vadd.f32 %v4486_v37, %v1013_v18  ;;  %7159 = vst [vmem:[#allocation22_spill] sm:$0xff] %v4655_v8  ;;  %v1147_v27 = vmul.f32 0.01, %v1067_v35  ;;  %vm1107_vm12 = vcmp.ge.f32.partialorder %v1067_v35, 0.0  ;;  %v4682_v55 = vpack.i.bf16 %v4655_v8, %v4662_v25 }
 0x1bd   : > { %3246 = vrot.lane.b32.xlu0 %v4558_v11, %s4021_s17  ;;  %3266 = vrot.lane.b32.xlu1 %v4609_v48, %s4021_s17  ;;  %v1078_v31 = vadd.f32 %v4486_v37, %v1014_v34  ;;  %vm1108_vm14 = vcmp.ge.f32.partialorder %v4665_v23, 0.0 }
 0x1be   : > { %v1157_v33 = vmul.f32 0.01, %v1077_v50  ;;  %vm1117_vm13 = vcmp.ge.f32.partialorder %v1077_v50, 0.0  ;;  %v1187_v18 = vsel %vm1107_vm12, %v1067_v35, %v1147_v27 }
 0x1bf   : > { %v860_v32 = vpop.f32.mrb[20].mxu0  ;;  %v1158_v52 = vmul.f32 0.01, %v1078_v31  ;;  %vm1118_vm0 = vcmp.ge.f32.partialorder %v1078_v31, 0.0  ;;  %v4694_v35 = vmul.f32 %v4576_v10, %v1187_v18  ;;  %v1148_v18 = vmul.f32 0.01, %v4665_v23 }
 0x1c0   : > { %v1023_v38 = vmul.f32 %v4475_v61, %v860_v32  ;;  %v862_v39 = vpop.f32.mrb[21].mxu0  ;;  %v1197_v34 = vsel %vm1117_vm13, %v1077_v50, %v1157_v33 }
 0x1c1   : > { %v1024_v40 = vmul.f32 %v4475_v61, %v862_v39  ;;  %3251 = vrot.lane.b32.xlu0 %v4558_v11, %s4023_s19  ;;  %3271 = vrot.lane.b32.xlu1 %v4609_v48, %s4023_s19  ;;  %v864_v41 = vpop.f32.mrb[22].mxu0  ;;  %7161 = vst [vmem:[#allocation24_spill] sm:$0xff] %v4694_v35  ;;  %v4697_v33 = vmul.f32 %v4576_v10, %v1197_v34 }
 0x1c2   : > { %v1087_v62 = vadd.f32 %v4499_v44, %v1023_v38  ;;  %v1033_v47 = vmul.f32 %v4477_v12, %v864_v41  ;;  %v866_v51 = vpop.f32.mrb[23].mxu0 }
 0x1c3   : > { %v1088_v53 = vadd.f32 %v4499_v44, %v1024_v40  ;;  %v1034_v13 = vmul.f32 %v4477_v12, %v866_v51  ;;  %7162 = vst [vmem:[#allocation25_spill] sm:$0xff] %v4697_v33  ;;  %v1198_v51 = vsel %vm1118_vm0, %v1078_v31, %v1158_v52 }
 0x1c4   : > { %vm1127_vm15 = vcmp.ge.f32.partialorder %v1087_v62, 0.0  ;;  %v1167_v16 = vmul.f32 0.01, %v1087_v62  ;;  %v1097_v32 = vadd.f32 %v4510_v3, %v1033_v47 }
 0x1c5   : > { %vm1128_vm1 = vcmp.ge.f32.partialorder %v1088_v53, 0.0  ;;  %v1168_v38 = vmul.f32 0.01, %v1088_v53  ;;  %v1098_v39 = vadd.f32 %v4510_v3, %v1034_v13  ;;  %3276 = vrot.lane.b32.xlu0 %v4649_v60, %s4022_s18  ;;  %3296 = vrot.lane.b32.xlu1 %v4676_v42, %s4022_s18 }
 0x1c6   : > { %v1207_v27 = vsel %vm1127_vm15, %v1087_v62, %v1167_v16  ;;  %vm1137_vm2 = vcmp.ge.f32.partialorder %v1097_v32, 0.0  ;;  %v1177_v50 = vmul.f32 0.01, %v1097_v32 }
 0x1c7   : > { %v1208_v40 = vsel %vm1128_vm1, %v1088_v53, %v1168_v38  ;;  %vm1138_vm3 = vcmp.ge.f32.partialorder %v1098_v39, 0.0  ;;  %v1178_v41 = vmul.f32 0.01, %v1098_v39  ;;  %v903_v47 = vpop.f32.mrb[24].mxu0  ;;  %v4700_v13 = vmul.f32 %v4576_v10, %v1207_v27 }
 0x1c8   : > { %v1217_v22 = vsel %vm1137_vm2, %v1097_v32, %v1177_v50  ;;  %v1005_v15 = vmul.f32 %v4471_v6, %v903_v47  ;;  %v905_v58 = vpop.f32.mrb[25].mxu0  ;;  %v4713_v52 = vmul.f32 %v4581_v19, %v1208_v40 }
 0x1c9   : > { %7163 = vst [vmem:[#allocation26_spill] sm:$0xff] %v4700_v13  ;;  %v4705_v62 = vmul.f32 %v4576_v10, %v1217_v22  ;;  %v1218_v16 = vsel %vm1138_vm3, %v1098_v39, %v1178_v41  ;;  %v1006_v34 = vmul.f32 %v4471_v6, %v905_v58  ;;  %3281 = vrot.lane.b32.xlu0 %v4649_v60, %s4024_s20  ;;  %v907_v31 = vpop.f32.mrb[26].mxu0 }
 0x1ca   : > { %3301 = vrot.lane.b32.xlu1 %v4676_v42, %s4024_s20  ;;  %7165 = vst [vmem:[#allocation28_spill] sm:$0xff] %v4713_v52  ;;  %v4716_v53 = vmul.f32 %v4581_v19, %v1218_v16  ;;  %v1069_v32 = vadd.f32 %v4480_v29, %v1005_v15  ;;  %v1015_v22 = vmul.f32 %v4473_v17, %v907_v31  ;;  %v909_v38 = vpop.f32.mrb[27].mxu0 }
 0x1cb   : > { %7164 = vst [vmem:[#allocation27_spill] sm:$0xff] %v4705_v62  ;;  %v1070_v58 = vadd.f32 %v4480_v29, %v1006_v34  ;;  %v1016_v39 = vmul.f32 %v4473_v17, %v909_v38  ;;  %v4724_v27 = vpack.i.bf16 %v4705_v62, %v4700_v13  ;;  %v1188_v16 = vsel %vm1108_vm14, %v4665_v23, %v1148_v18 }
 0x1cc   : > { %7166 = vst [vmem:[#allocation29_spill] sm:$0xff] %v4716_v53  ;;  %vm1109_vm4 = vcmp.ge.f32.partialorder %v1069_v32, 0.0  ;;  %v1149_v50 = vmul.f32 0.01, %v1069_v32  ;;  %v1079_v40 = vadd.f32 %v4486_v37, %v1015_v22  ;;  %v4729_v41 = vpack.i.bf16 %v4716_v53, %v4713_v52 }
 0x1cd   : > { %vm1110_vm5 = vcmp.ge.f32.partialorder %v1070_v58, 0.0  ;;  %v1150_v15 = vmul.f32 0.01, %v1070_v58  ;;  %v1080_v47 = vadd.f32 %v4486_v37, %v1016_v39  ;;  %3286 = vrot.lane.b32.xlu0 %v4659_v14, %s4022_s18  ;;  %v4740_v22 = vmul.f32 %v4581_v19, %v1198_v51 }
 0x1ce   : > { %3306 = vrot.lane.b32.xlu1 %v4682_v55, %s4022_s18  ;;  %v1189_v34 = vsel %vm1109_vm4, %v1069_v32, %v1149_v50  ;;  %vm1119_vm6 = vcmp.ge.f32.partialorder %v1079_v40, 0.0  ;;  %v1159_v31 = vmul.f32 0.01, %v1079_v40  ;;  %v4748_v23 = vpack.i.bf16 %v4697_v33, %v4694_v35 }
 0x1cf   : > { %7167 = vst [vmem:[#allocation30_spill] sm:$0xff] %v4740_v22  ;;  %v1190_v38 = vsel %vm1110_vm5, %v1070_v58, %v1150_v15  ;;  %vm1120_vm8 = vcmp.ge.f32.partialorder %v1080_v47, 0.0  ;;  %v1160_v10 = vmul.f32 0.01, %v1080_v47  ;;  %v913_v39 = vpop.f32.mrb[28].mxu0  ;;  %v4743_v1 = vmul.f32 %v4466_v21, %v1189_v34 }
 0x1d0   : > { %v1199_v63 = vsel %vm1119_vm6, %v1079_v40, %v1159_v31  ;;  %v1025_v2 = vmul.f32 %v4475_v61, %v913_v39  ;;  %v915_v5 = vpop.f32.mrb[29].mxu0  ;;  %v4759_v50 = vmul.f32 %v4469_v9, %v1190_v38 }
 0x1d1   : > { %7168 = vst [vmem:[#allocation31_spill] sm:$0xff] %v4743_v1  ;;  %v4751_v18 = vmul.f32 %v4466_v21, %v1199_v63  ;;  %v1200_v51 = vsel %vm1120_vm8, %v1080_v47, %v1160_v10  ;;  %v1026_v32 = vmul.f32 %v4475_v61, %v915_v5  ;;  %3291 = vrot.lane.b32.xlu0 %v4659_v14, %s4024_s20  ;;  %v917_v58 = vpop.f32.mrb[30].mxu0 }
 0x1d2   : > { %3311 = vrot.lane.b32.xlu1 %v4682_v55, %s4024_s20  ;;  %7170 = vst [vmem:[#allocation33_spill] sm:$0xff] %v4759_v50  ;;  %v4762_v40 = vmul.f32 %v4469_v9, %v1200_v51  ;;  %v1089_v15 = vadd.f32 %v4499_v44, %v1025_v2  ;;  %v1035_v63 = vmul.f32 %v4477_v12, %v917_v58  ;;  %v919_v10 = vpop.f32.mrb[31].mxu0 }
 0x1d3   : > { %7169 = vst [vmem:[#allocation32_spill] sm:$0xff] %v4751_v18  ;;  %v1090_v5 = vadd.f32 %v4499_v44, %v1026_v32  ;;  %v1036_v47 = vmul.f32 %v4477_v12, %v919_v10  ;;  %v4770_v34 = vpack.i.bf16 %v4751_v18, %v4743_v1  ;;  %v4783_v32 = vmul.f32 %v4581_v19, %v1188_v16 }
 0x1d4   : > { %7171 = vst [vmem:[#allocation34_spill] sm:$0xff] %v4762_v40  ;;  %vm1129_vm9 = vcmp.ge.f32.partialorder %v1089_v15, 0.0  ;;  %v1169_v31 = vmul.f32 0.01, %v1089_v15  ;;  %v1099_v38 = vadd.f32 %v4510_v3, %v1035_v63  ;;  %v4775_v39 = vpack.i.bf16 %v4762_v40, %v4759_v50 }
 0x1d5   : > { %vm1130_vm10 = vcmp.ge.f32.partialorder %v1090_v5, 0.0  ;;  %v1170_v2 = vmul.f32 0.01, %v1090_v5  ;;  %v1100_v51 = vadd.f32 %v4510_v3, %v1036_v47  ;;  %3316 = vrot.lane.b32.xlu0 %v4748_v23, %s4022_s18  ;;  %7173 = vst [vmem:[#allocation36_spill] sm:$0xff] %v4783_v32  ;;  %v4791_v4 = vpack.i.bf16 %v4740_v22, %v4783_v32 }
 0x1d6   : > { %7172 = vst [vmem:[#allocation35_spill] sm:$0xff] %v4775_v39  ;;  %3336 = vrot.lane.b32.xlu1 %v4724_v27, %s4022_s18  ;;  %v1209_v58 = vsel %vm1129_vm9, %v1089_v15, %v1169_v31  ;;  %vm1139_vm11 = vcmp.ge.f32.partialorder %v1099_v38, 0.0  ;;  %v1179_v63 = vmul.f32 0.01, %v1099_v38 }
 0x1d7   : > { %v1210_v10 = vsel %vm1130_vm10, %v1090_v5, %v1170_v2  ;;  %vm1140_vm12 = vcmp.ge.f32.partialorder %v1100_v51, 0.0  ;;  %v1180_v33 = vmul.f32 0.01, %v1100_v51  ;;  %v956_v35 = vpop.f32.mrb[32].mxu0  ;;  %v4786_v7 = vmul.f32 %v4466_v21, %v1209_v58 }
 0x1d8   : > { %v1219_v47 = vsel %vm1139_vm11, %v1099_v38, %v1179_v63  ;;  %v1007_v8 = vmul.f32 %v4471_v6, %v956_v35  ;;  %v958_v25 = vpop.f32.mrb[33].mxu0  ;;  %v4802_v35 = vmul.f32 %v4469_v9, %v1210_v10 }
 0x1d9   : > { %7174 = vst [vmem:[#allocation37_spill] sm:$0xff] %v4786_v7  ;;  %v4794_v16 = vmul.f32 %v4466_v21, %v1219_v47  ;;  %v1220_v15 = vsel %vm1140_vm12, %v1100_v51, %v1180_v33  ;;  %v1008_v5 = vmul.f32 %v4471_v6, %v958_v25  ;;  %3321 = vrot.lane.b32.xlu0 %v4748_v23, %s4024_s20  ;;  %v960_v31 = vpop.f32.mrb[34].mxu0 }
 0x1da   : > { %3341 = vrot.lane.b32.xlu1 %v4724_v27, %s4024_s20  ;;  %7176 = vst [vmem:[#allocation39_spill] sm:$0xff] %v4802_v35  ;;  %v4805_v38 = vmul.f32 %v4469_v9, %v1220_v15  ;;  %v1071_v2 = vadd.f32 %v4480_v29, %v1007_v8  ;;  %v1017_v58 = vmul.f32 %v4473_v17, %v960_v31  ;;  %v962_v33 = vpop.f32.mrb[35].mxu0 }
 0x1db   : > { %7175 = vst [vmem:[#allocation38_spill] sm:$0xff] %v4794_v16  ;;  %v1072_v6 = vadd.f32 %v4480_v29, %v1008_v5  ;;  %v1018_v25 = vmul.f32 %v4473_v17, %v962_v33  ;;  %v4813_v51 = vpack.i.bf16 %v4794_v16, %v4786_v7 }
 0x1dc   : > { %7177 = vst [vmem:[#allocation40_spill] sm:$0xff] %v4805_v38  ;;  %vm1111_vm13 = vcmp.ge.f32.partialorder %v1071_v2, 0.0  ;;  %v1151_v63 = vmul.f32 0.01, %v1071_v2  ;;  %v1081_v10 = vadd.f32 %v4486_v37, %v1017_v58  ;;  %v4818_v47 = vpack.i.bf16 %v4805_v38, %v4802_v35  ;;  %v5038_v35 = vld [vmem:[%s6952_s7] sm:$0xff] }
 0x1dd   : > { %vm1112_vm14 = vcmp.ge.f32.partialorder %v1072_v6, 0.0  ;;  %v1152_v8 = vmul.f32 0.01, %v1072_v6  ;;  %v1082_v15 = vadd.f32 %v4486_v37, %v1018_v25  ;;  %3326 = vrot.lane.b32.xlu0 %v4791_v4, %s4022_s18  ;;  %7192 = vst [vmem:[#allocation54_spill] sm:$0xff] %v5038_v35 }
 0x1de   : > { %7178 = vst [vmem:[#allocation41_spill] sm:$0xff] %v4818_v47  ;;  %3346 = vrot.lane.b32.xlu1 %v4729_v41, %s4022_s18  ;;  %v1191_v17 = vsel %vm1111_vm13, %v1071_v2, %v1151_v63  ;;  %vm1121_vm15 = vcmp.ge.f32.partialorder %v1081_v10, 0.0  ;;  %v1161_v29 = vmul.f32 0.01, %v1081_v10 }
 0x1df   : > { %v4826_v5 = vmul.f32 %v4588_v0, %v1191_v17  ;;  %v1192_v31 = vsel %vm1112_vm14, %v1072_v6, %v1152_v8  ;;  %vm1122_vm0 = vcmp.ge.f32.partialorder %v1082_v15, 0.0  ;;  %v1162_v58 = vmul.f32 0.01, %v1082_v15  ;;  %v966_v33 = vpop.f32.mrb[36].mxu0 }
 0x1e0   : > { %v4829_v9 = vmul.f32 %v4594_v56, %v1192_v31  ;;  %v1201_v37 = vsel %vm1121_vm15, %v1081_v10, %v1161_v29  ;;  %v968_v25 = vpop.f32.mrb[37].mxu0 }
 0x1e1   : > { %7179 = vst [vmem:[#allocation42_spill] sm:$0xff] %v4826_v5  ;;  %v4832_v21 = vmul.f32 %v4588_v0, %v1201_v37  ;;  %v1202_v19 = vsel %vm1122_vm0, %v1082_v15, %v1162_v58  ;;  %v1028_v2 = vmul.f32 %v4475_v61, %v968_v25  ;;  %3331 = vrot.lane.b32.xlu0 %v4791_v4, %s4024_s20  ;;  %v970_v6 = vpop.f32.mrb[38].mxu0 }
 0x1e2   : > { %7180 = vst [vmem:[#allocation43_spill] sm:$0xff] %v4829_v9  ;;  %3351 = vrot.lane.b32.xlu1 %v4729_v41, %s4024_s20  ;;  %v4840_v63 = vmul.f32 %v4594_v56, %v1202_v19  ;;  %v972_v8 = vpop.f32.mrb[39].mxu0  ;;  %v3395_v10 = vpack.i.bf16 %v4829_v9, %v4826_v5  ;;  %v1027_v37 = vmul.f32 %v4475_v61, %v966_v33 }
 0x1e3   : > { %7181 = vst [vmem:[#allocation44_spill] sm:$0xff] %v4832_v21  ;;  %v1092_v17 = vadd.f32 %v4499_v44, %v1028_v2  ;;  %v1038_v15 = vmul.f32 %v4477_v12, %v972_v8  ;;  %v4848_v29 = vpack.i.bf16 %v4832_v21, %v4826_v5  ;;  %v1037_v33 = vmul.f32 %v4477_v12, %v970_v6 }
 0x1e4   : > { %7182 = vst [vmem:[#allocation45_spill] sm:$0xff] %v4840_v63  ;;  %v4852_v31 = vpack.i.bf16 %v4840_v63, %v4829_v9 }
 0x1e5   : > { %7183 = vst [vmem:[#allocation46_spill] sm:$0xff] %v4848_v29  ;;  %vm1132_vm1 = vcmp.ge.f32.partialorder %v1092_v17, 0.0  ;;  %v1172_v58 = vmul.f32 0.01, %v1092_v17  ;;  %v1102_v19 = vadd.f32 %v4510_v3, %v1038_v15  ;;  %3356 = vrot.lane.b32.xlu0 %v4770_v34, %s4022_s18  ;;  %v1091_v15 = vadd.f32 %v4499_v44, %v1027_v37 }
 0x1e6   : > { %7184 = vst [vmem:[#allocation47_spill] sm:$0xff] %v4852_v31  ;;  %3376 = vrot.lane.b32.xlu1 %v4813_v51, %s4022_s18  ;;  %v1101_v44 = vadd.f32 %v4510_v3, %v1037_v33 }
 0x1e7   : > { %v1212_v25 = vsel %vm1132_vm1, %v1092_v17, %v1172_v58  ;;  %vm1142_vm2 = vcmp.ge.f32.partialorder %v1102_v19, 0.0  ;;  %v1182_v2 = vmul.f32 0.01, %v1102_v19  ;;  %v1171_v58 = vmul.f32 0.01, %v1091_v15 }
 0x1e8   : > { %v4861_v8 = vmul.f32 %v4594_v56, %v1212_v25  ;;  %vm1131_vm3 = vcmp.ge.f32.partialorder %v1091_v15, 0.0  ;;  %vm1141_vm4 = vcmp.ge.f32.partialorder %v1101_v44, 0.0 }
 0x1e9   : > { %v1222_v22 = vsel %vm1142_vm2, %v1102_v19, %v1182_v2  ;;  %3361 = vrot.lane.b32.xlu0 %v4770_v34, %s4024_s20  ;;  %v1211_v12 = vsel %vm1131_vm3, %v1091_v15, %v1171_v58 }
 0x1ea   : > { %7185 = vst [vmem:[#allocation48_spill] sm:$0xff] %v4861_v8  ;;  %3381 = vrot.lane.b32.xlu1 %v4813_v51, %s4024_s20  ;;  %v4869_v32 = vmul.f32 %v4594_v56, %v1222_v22  ;;  %v3420_v61 = vpack.i.bf16 %v4861_v8, %v4840_v63  ;;  %v1181_v22 = vmul.f32 0.01, %v1101_v44  ;;  %v4888_v6 = vmul.f32 %v4588_v0, %v1211_v12 }
 0x1eb   : > { %v7191_v12 = vlaneseq }
 0x1ec   : > { %7186 = vst [vmem:[#allocation49_spill] sm:$0xff] %v4869_v32  ;;  %v4876_v17 = vpack.i.bf16 %v4869_v32, %v4861_v8  ;;  %7188 = vst [vmem:[#allocation51_spill] sm:$0xff] %v4888_v6  ;;  %v1221_v19 = vsel %vm1141_vm4, %v1101_v44, %v1181_v22 }
 0x1ed   : > { %3366 = vrot.lane.b32.xlu0 %v4775_v39, %s4022_s18  ;;  %v4900_v37 = vmul.f32 %v4588_v0, %v1221_v19  ;;  %v4960_v44 = vand.u32 127, %v7191_v12 }
 0x1ee   : > { %7187 = vst [vmem:[#allocation50_spill] sm:$0xff] %v4876_v17  ;;  %3386 = vrot.lane.b32.xlu1 %v4818_v47, %s4022_s18 }
 0x1ef   : > { %7189 = vst [vmem:[#allocation52_spill] sm:$0xff] %v4900_v37  ;;  %vm1399_vm5 = vcmp.lt.s32.totalorder %v4960_v44, 35  ;;  %vm1520_vm6 = vcmp.lt.s32.totalorder %v4960_v44, 34  ;;  %vm1641_vm8 = vcmp.lt.s32.totalorder %v4960_v44, 33  ;;  %vm1762_vm9 = vcmp.lt.s32.totalorder %v4960_v44, 1 }
 0x1f0   : > { %vm1883_vm10 = vcmp.lt.s32.totalorder %v4960_v44, 127  ;;  %vm2004_vm11 = vcmp.lt.s32.totalorder %v4960_v44, 95  ;;  %vm2125_vm12 = vcmp.lt.s32.totalorder %v4960_v44, 94  ;;  %vm2246_vm13 = vcmp.lt.s32.totalorder %v4960_v44, 93  ;;  %v7477_v44 = vld [vmem:[#allocation7_spill] sm:$0xff] }
 0x1f1   : > { %3371 = vrot.lane.b32.xlu0 %v4775_v39, %s4024_s20 }
 0x1f2   : > { %3391 = vrot.lane.b32.xlu1 %v4818_v47, %s4024_s20 }
 0x1f5   : > { %3396 = vrot.lane.b32.xlu0 %v3395_v10, %s4024_s20  ;;  %v4907_v10 = vpack.i.bf16 %v4900_v37, %v4888_v6 }
 0x1f6   : > { %3411 = vrot.lane.b32.xlu1 %v4852_v31, %s4021_s17 }
 0x1f7   : > { %7190 = vst [vmem:[#allocation53_spill] sm:$0xff] %v4907_v10 }
 0x1f9   : > { %3401 = vrot.lane.b32.xlu0 %v4848_v29, %s4022_s18 }
 0x1fa   : > { %3416 = vrot.lane.b32.xlu1 %v4852_v31, %s4023_s19 }
 0x1fd   : > { %3406 = vrot.lane.b32.xlu0 %v4852_v31, %s4022_s18 }
 0x1fe   : > { %3421 = vrot.lane.b32.xlu1 %v3420_v61, %s4024_s20 }
 0x201   : > { %3441 = vrot.lane.b32.xlu0 %v4649_v60, %s4025_s24 }
 0x202   : > { %3426 = vrot.lane.b32.xlu1 %v4907_v10, %s4022_s18 }
 0x205   : > { %3451 = vrot.lane.b32.xlu0 %v4609_v48, %s4025_s24 }
 0x206   : > { %3431 = vrot.lane.b32.xlu1 %v4876_v17, %s4022_s18 }
 0x209   : > { %3461 = vrot.lane.b32.xlu0 %v4558_v11, %s4025_s24 }
 0x20a   : > { %3436 = vrot.lane.b32.xlu1 %v4554_v20, %s4025_s24 }
 0x20d   : > { %3471 = vrot.lane.b32.xlu0 %v4649_v60, %s4026_s25 }
 0x20e   : > { %3446 = vrot.lane.b32.xlu1 %v4515_v59, %s4025_s24 }
 0x211   : > { %1518 = vrot.lane.b32.xlu0 %v4869_v32, %s4024_s20 }
 0x212   : > { %3456 = vrot.lane.b32.xlu1 %v4676_v42, %s4025_s24 }
 0x215   : > { %3481 = vrot.lane.b32.xlu0 %v4609_v48, %s4026_s25 }
 0x216   : > { %3466 = vrot.lane.b32.xlu1 %v4554_v20, %s4026_s25 }
 0x217   : > { %v4951_v19 = vpop.permute.xlu1 %3206  ;;  %v4953_v22 = vpop.permute.xlu0 %3196 }
 0x218   : > { %v6980_v2 = vunpack.i.h.bf16 %v4953_v22  ;;  %v6979_v12 = vunpack.i.l.bf16 %v4953_v22 }
 0x219   : > { %3491 = vrot.lane.b32.xlu0 %v4876_v17, %s4021_s17 }
 0x21a   : > { %3476 = vrot.lane.b32.xlu1 %v4515_v59, %s4026_s25 }
 0x21b   : > { %v4962_v58 = vpop.permute.xlu1 %3211  ;;  %v4964_v33 = vpop.permute.xlu0 %3201 }
 0x21d   : > { %3496 = vrot.lane.b32.xlu0 %v4558_v11, %s4026_s25 }
 0x21e   : > { %3486 = vrot.lane.b32.xlu1 %v4676_v42, %s4026_s25 }
 0x21f   : > { %v3217_v61 = vpop.permute.xlu0 %3216  ;;  %v4971_v15 = vpop.permute.xlu1 %3236 }
 0x220   : > { %v3219_v25 = vunpack.i.h.bf16 %v3217_v61  ;;  %v3218_v3 = vunpack.i.l.bf16 %v3217_v61 }
 0x221   : > { %3506 = vrot.lane.b32.xlu0 %v4876_v17, %s4023_s19 }
 0x222   : > { %3501 = vrot.lane.b32.xlu1 %v4554_v20, %s4027_s26  ;;  %v1432_v56 = vsel %vm1399_vm5, %v6979_v12, %v3218_v3  ;;  %v1433_v0 = vsel %vm1399_vm5, %v6980_v2, %v3219_v25 }
 0x223   : > { %v4987_v8 = vpop.permute.xlu0 %3221  ;;  %v4989_v61 = vpop.permute.xlu1 %3241  ;;  %v2288_v32 = vpack.c.bf16 %v1433_v0, %v1432_v56 }
 0x224   : > { %v7019_v39 = vunpack.i.h.bf16 %v4987_v8 }
 0x225   : > { %2482 = vmatprep.subr.bf16.mxu1 %v2288_v32  ;;  %3511 = vrot.lane.b32.xlu0 %v4649_v60, %s4027_s26 }
 0x226   : > { %3516 = vrot.lane.b32.xlu1 %v4515_v59, %s4027_s26 }
 0x227   : > { %v4995_v5 = vpop.permute.xlu0 %3226  ;;  %v4997_v12 = vpop.permute.xlu1 %3256 }
 0x228   : > { %v7027_v53 = vunpack.i.h.bf16 %v4997_v12  ;;  %v7194_v57 = vunpack.i.l.bf16 %v4997_v12 }
 0x229   : > { %3521 = vrot.lane.b32.xlu0 %v4609_v48, %s4027_s26 }
 0x22a   : > { %3526 = vrot.lane.b32.xlu1 %v4676_v42, %s4027_s26 }
 0x22b   : > { %v5003_v2 = vpop.permute.xlu0 %3231  ;;  %v5005_v0 = vpop.permute.xlu1 %3261 }
 0x22d   : > { %3531 = vrot.lane.b32.xlu0 %v4558_v11, %s4027_s26 }
 0x22e   : > { %3536 = vrot.lane.b32.xlu1 %v4554_v20, %s4028_s10 }
 0x22f   : > { %v5011_v56 = vpop.permute.xlu0 %3246  ;;  %v5013_v32 = vpop.permute.xlu1 %3266 }
 0x231   : > { %3541 = vrot.lane.b32.xlu0 %v4649_v60, %s4028_s10 }
 0x232   : > { %3546 = vrot.lane.b32.xlu1 %v4515_v59, %s4028_s10 }
 0x233   : > { %v5019_v7 = vpop.permute.xlu0 %3251  ;;  %v5021_v16 = vpop.permute.xlu1 %3271 }
 0x235   : > { %3551 = vrot.lane.b32.xlu0 %v4609_v48, %s4028_s10 }
 0x236   : > { %3556 = vrot.lane.b32.xlu1 %v4676_v42, %s4028_s10 }
 0x237   : > { %v3277_v20 = vpop.permute.xlu0 %3276  ;;  %v3297_v9 = vpop.permute.xlu1 %3296 }
 0x238   : > { %v3279_v48 = vunpack.i.h.bf16 %v3277_v20  ;;  %v3278_v38 = vunpack.i.l.bf16 %v3277_v20  ;;  %v3299_v1 = vunpack.i.h.bf16 %v3297_v9  ;;  %v3298_v18 = vunpack.i.l.bf16 %v3297_v9 }
 0x239   : > { %3561 = vrot.lane.b32.xlu0 %v4558_v11, %s4028_s10  ;;  %v5044_v11 = vcombine.high %v5038_v35, %v5038_v35 }
 0x23a   : > { %3566 = vrot.lane.b32.xlu1 %v4649_v60, %s4021_s17  ;;  %v1429_v43 = vsel %vm1399_vm5, %v3219_v25, %v3279_v48  ;;  %v1428_v9 = vsel %vm1399_vm5, %v3218_v3, %v3278_v38  ;;  %v1431_v3 = vsel %vm1399_vm5, %v7027_v53, %v3299_v1 }
 0x23b   : > { %v5031_v63 = vpop.permute.xlu0 %3281  ;;  %7193 = vst [vmem:[#allocation55_spill] sm:$0xff] %v5044_v11  ;;  %2514 = vmatprep.mubr.bf16.mxu1 %v5044_v11  ;;  %2596 = vmatprep.mubr.bf16.mxu0 %v5044_v11  ;;  %v1430_v11 = vsel %vm1399_vm5, %v7194_v57, %v3298_v18  ;;  %v2289_v29 = vpack.c.bf16 %v1429_v43, %v1428_v9  ;;  %v7020_v57 = vunpack.i.l.bf16 %v4987_v8 }
 0x23c   : > { %v5033_v59 = vpop.permute.xlu1 %3301  ;;  %v3283_v35 = vunpack.i.l.bf16 %v5031_v63 }
 0x23d   : > { %3571 = vrot.lane.b32.xlu0 %v4659_v14, %s4021_s17 }
 0x23e   : > { %3576 = vrot.lane.b32.xlu1 %v4748_v23, %s4021_s17 }
 0x23f   : > { %v3287_v50 = vpop.permute.xlu0 %3286 }
 0x240   : > { %v3307_v40 = vpop.permute.xlu1 %3306  ;;  %v3289_v20 = vunpack.i.h.bf16 %v3287_v50  ;;  %v3288_v13 = vunpack.i.l.bf16 %v3287_v50 }
 0x241   : > { %v3309_v62 = vunpack.i.h.bf16 %v3307_v40  ;;  %v3308_v52 = vunpack.i.l.bf16 %v3307_v40  ;;  %3581 = vrot.lane.b32.xlu0 %v4791_v4, %s4021_s17 }
 0x242   : > { %3586 = vrot.lane.b32.xlu1 %v4676_v42, %s4021_s17  ;;  %v1424_v50 = vsel %vm1399_vm5, %v3278_v38, %v3288_v13  ;;  %v1425_v40 = vsel %vm1399_vm5, %v3279_v48, %v3289_v20  ;;  %v3284_v38 = vunpack.i.h.bf16 %v5031_v63 }
 0x243   : > { %v1426_v36 = vsel %vm1399_vm5, %v3298_v18, %v3308_v52  ;;  %v1427_v25 = vsel %vm1399_vm5, %v3299_v1, %v3309_v62  ;;  %v3292_v17 = vpop.permute.xlu0 %3291  ;;  %v2290_v31 = vpack.c.bf16 %v1425_v40, %v1424_v50 }
 0x244   : > { %v3312_v48 = vpop.permute.xlu1 %3311  ;;  %v3294_v10 = vunpack.i.h.bf16 %v3292_v17  ;;  %v3293_v47 = vunpack.i.l.bf16 %v3292_v17  ;;  %v2300_v1 = vpack.c.bf16 %v1427_v25, %v1426_v36  ;;  %v1550_v63 = vsel %vm1520_vm6, %v7019_v39, %v3284_v38 }
 0x245   : > { %v3314_v30 = vunpack.i.h.bf16 %v3312_v48  ;;  %v3313_v28 = vunpack.i.l.bf16 %v3312_v48  ;;  %2564 = vmatprep.subr.bf16.mxu0 %v2290_v31  ;;  %3591 = vrot.lane.b32.xlu0 %v4682_v55, %s4021_s17  ;;  %v3304_v31 = vunpack.i.h.bf16 %v5033_v59  ;;  %v3303_v36 = vunpack.i.l.bf16 %v5033_v59 }
 0x246   : > { %3596 = vrot.lane.b32.xlu1 %v4724_v27, %s4021_s17  ;;  %2565 = vmatpush1.bf16.msra.mxu0 %v2289_v29  ;;  %v1545_v18 = vsel %vm1520_vm6, %v3283_v35, %v3293_v47  ;;  %v1546_v43 = vsel %vm1520_vm6, %v3284_v38, %v3294_v10  ;;  %v2299_v29 = vpack.c.bf16 %v1431_v3, %v1430_v11 }
 0x247   : > { %2566 = vmatprep.subr.bf16.mxu0 %v2300_v1  ;;  %v5095_v17 = vpop.permute.xlu0 %3316  ;;  %v1549_v38 = vsel %vm1520_vm6, %v7020_v57, %v3283_v35  ;;  %v2310_v59 = vpack.c.bf16 %v1546_v43, %v1545_v18  ;;  %v1547_v11 = vsel %vm1520_vm6, %v3303_v36, %v3313_v28  ;;  %v1548_v3 = vsel %vm1520_vm6, %v3304_v31, %v3314_v30 }
 0x248   : > { %v5097_v9 = vpop.permute.xlu1 %3336  ;;  %v7015_v50 = vunpack.i.h.bf16 %v5095_v17  ;;  %v7016_v40 = vunpack.i.l.bf16 %v5095_v17 }
 0x249   : > { %v7017_v25 = vunpack.i.h.bf16 %v5097_v9  ;;  %v7018_v48 = vunpack.i.l.bf16 %v5097_v9  ;;  %3601 = vrot.lane.b32.xlu0 %v4729_v41, %s4021_s17 }
 0x24a   : > { %v5117_v1 = vsel %vm1399_vm5, %v3289_v20, %v7015_v50  ;;  %v5123_v35 = vsel %vm1399_vm5, %v3288_v13, %v7016_v40  ;;  %3606 = vrot.lane.b32.xlu1 %v4649_v60, %s4023_s19  ;;  %v7025_v20 = vunpack.i.h.bf16 %v5005_v0  ;;  %v7026_v13 = vunpack.i.l.bf16 %v5005_v0  ;;  %2567 = vmatpush1.bf16.msra.mxu0 %v2299_v29 }
 0x24b   : > { %v5129_v18 = vsel %vm1399_vm5, %v3309_v62, %v7017_v25  ;;  %v5135_v43 = vsel %vm1399_vm5, %v3308_v52, %v7018_v48  ;;  %v5141_v50 = vpop.permute.xlu0 %3321  ;;  %2568 = vmatprep.subr.bf16.mxu0 %v2310_v59  ;;  %v2309_v59 = vpack.c.bf16 %v1550_v63, %v1549_v38  ;;  %v2320_v25 = vpack.c.bf16 %v1548_v3, %v1547_v11 }
 0x24c   : > { %7195 = vst [vmem:[#allocation56_spill] sm:$0xff] %v5135_v43  ;;  %v5143_v40 = vpop.permute.xlu1 %3341  ;;  %v7023_v52 = vunpack.i.h.bf16 %v5141_v50  ;;  %v7024_v60 = vunpack.i.l.bf16 %v5141_v50  ;;  %v1552_v29 = vsel %vm1520_vm6, %v7025_v20, %v3304_v31  ;;  %v1551_v62 = vsel %vm1520_vm6, %v7026_v13, %v3303_v36 }
 0x24d   : > { %v7021_v48 = vunpack.i.h.bf16 %v5143_v40  ;;  %v7022_v39 = vunpack.i.l.bf16 %v5143_v40  ;;  %3611 = vrot.lane.b32.xlu0 %v4659_v14, %s4023_s19 }
 0x24e   : > { %v5167_v57 = vsel %vm1520_vm6, %v3294_v10, %v7023_v52  ;;  %v5173_v31 = vsel %vm1520_vm6, %v3293_v47, %v7024_v60  ;;  %3616 = vrot.lane.b32.xlu1 %v4748_v23, %s4023_s19  ;;  %2569 = vmatpush1.bf16.msra.mxu0 %v2309_v59 }
 0x24f   : > { %7196 = vst [vmem:[#allocation57_spill] sm:$0xff] %v5167_v57  ;;  %7197 = vst [vmem:[#allocation58_spill] sm:$0xff] %v5173_v31  ;;  %v5179_v36 = vsel %vm1520_vm6, %v3314_v30, %v7021_v48  ;;  %v5185_v63 = vsel %vm1520_vm6, %v3313_v28, %v7022_v39  ;;  %v5189_v10 = vpop.permute.xlu0 %3326  ;;  %2570 = vmatprep.subr.bf16.mxu0 %v2320_v25  ;;  %v2319_v28 = vpack.c.bf16 %v1552_v29, %v1551_v62 }
 0x250   : > { %7198 = vst [vmem:[#allocation59_spill] sm:$0xff] %v5179_v36  ;;  %7199 = vst [vmem:[#allocation60_spill] sm:$0xff] %v5185_v63  ;;  %v5191_v47 = vpop.permute.xlu1 %3346  ;;  %v7030_v25 = vunpack.i.h.bf16 %v5189_v10  ;;  %v7031_v59 = vunpack.i.l.bf16 %v5189_v10 }
 0x251   : > { %3621 = vrot.lane.b32.xlu0 %v4791_v4, %s4023_s19  ;;  %v7033_v62 = vunpack.i.h.bf16 %v5191_v47  ;;  %v7035_v29 = vunpack.i.l.bf16 %v5191_v47 }
 0x252   : > { %3626 = vrot.lane.b32.xlu1 %v4676_v42, %s4023_s19  ;;  %2571 = vmatpush1.bf16.msra.mxu0 %v2319_v28 }
 0x253   : > { %v5201_v11 = vpop.permute.xlu0 %3331 }
 0x254   : > { %v5203_v3 = vpop.permute.xlu1 %3351 }
 0x255   : > { %3631 = vrot.lane.b32.xlu0 %v4682_v55, %s4023_s19 }
 0x256   : > { %3636 = vrot.lane.b32.xlu1 %v4724_v27, %s4023_s19 }
 0x257   : > { %v5213_v42 = vpop.permute.xlu0 %3356 }
 0x258   : > { %7200 = vst [vmem:[#allocation61_spill] sm:$0xff] %v5213_v42  ;;  %v5215_v28 = vpop.permute.xlu1 %3376  ;;  %v7028_v30 = vunpack.i.h.bf16 %v5213_v42  ;;  %v7029_v38 = vunpack.i.l.bf16 %v5213_v42  ;;  %v7224_v42 = vunpack.i.l.bf16 %v4997_v12 }
 0x259   : > { %7201 = vst [vmem:[#allocation62_spill] sm:$0xff] %v5215_v28  ;;  %v7032_v48 = vunpack.i.h.bf16 %v5215_v28  ;;  %v7034_v39 = vunpack.i.l.bf16 %v5215_v28  ;;  %3641 = vrot.lane.b32.xlu0 %v4729_v41, %s4023_s19 }
 0x25a   : > { %v5231_v20 = vsel %vm1399_vm5, %v7030_v25, %v7028_v30  ;;  %v5239_v13 = vsel %vm1399_vm5, %v7031_v59, %v7029_v38  ;;  %3646 = vrot.lane.b32.xlu1 %v4659_v14, %s4025_s24  ;;  %v7208_v25 = vunpack.i.h.bf16 %v5201_v11 }
 0x25b   : > { %7202 = vst [vmem:[#allocation63_spill] sm:$0xff] %v5231_v20  ;;  %7203 = vst [vmem:[#allocation64_spill] sm:$0xff] %v5239_v13  ;;  %v5247_v53 = vsel %vm1399_vm5, %v7033_v62, %v7032_v48  ;;  %v5255_v30 = vsel %vm1399_vm5, %v7035_v29, %v7034_v39  ;;  %v5261_v59 = vpop.permute.xlu0 %3361  ;;  %v7210_v62 = vunpack.i.l.bf16 %v5201_v11 }
 0x25c   : > { %7204 = vst [vmem:[#allocation65_spill] sm:$0xff] %v5247_v53  ;;  %7205 = vst [vmem:[#allocation66_spill] sm:$0xff] %v5255_v30  ;;  %v5263_v60 = vpop.permute.xlu1 %3381  ;;  %v7039_v39 = vunpack.i.h.bf16 %v5261_v59  ;;  %v7040_v29 = vunpack.i.l.bf16 %v5261_v59  ;;  %v7213_v30 = vunpack.i.h.bf16 %v5203_v3 }
 0x25d   : > { %7206 = vst [vmem:[#allocation67_spill] sm:$0xff] %v5261_v59  ;;  %7207 = vst [vmem:[#allocation68_spill] sm:$0xff] %v5263_v60  ;;  %3651 = vrot.lane.b32.xlu0 %v4748_v23, %s4025_s24  ;;  %v7212_v38 = vunpack.i.h.bf16 %v5263_v60  ;;  %v7215_v13 = vunpack.i.l.bf16 %v5263_v60 }
 0x25e   : > { %v5281_v48 = vsel %vm1520_vm6, %v7208_v25, %v7039_v39  ;;  %v5289_v52 = vsel %vm1520_vm6, %v7210_v62, %v7040_v29  ;;  %v7216_v25 = vunpack.i.l.bf16 %v5203_v3  ;;  %3656 = vrot.lane.b32.xlu1 %v4791_v4, %s4025_s24 }
 0x25f   : > { %7209 = vst [vmem:[#allocation69_spill] sm:$0xff] %v5281_v48  ;;  %7211 = vst [vmem:[#allocation70_spill] sm:$0xff] %v5289_v52  ;;  %v5297_v53 = vsel %vm1520_vm6, %v7213_v30, %v7212_v38  ;;  %v5309_v62 = vpop.permute.xlu0 %3366  ;;  %v3238_v52 = vunpack.i.l.bf16 %v4971_v15 }
 0x260   : > { %7214 = vst [vmem:[#allocation71_spill] sm:$0xff] %v5297_v53  ;;  %v5305_v39 = vsel %vm1520_vm6, %v7216_v25, %v7215_v13  ;;  %7218 = vst [vmem:[#allocation73_spill] sm:$0xff] %v5309_v62  ;;  %v5311_v29 = vpop.permute.xlu1 %3386  ;;  %v3239_v53 = vunpack.i.h.bf16 %v4971_v15  ;;  %v7225_v62 = vunpack.i.h.bf16 %v4997_v12 }
 0x261   : > { %7217 = vst [vmem:[#allocation72_spill] sm:$0xff] %v5305_v39  ;;  %7219 = vst [vmem:[#allocation74_spill] sm:$0xff] %v5311_v29  ;;  %3661 = vrot.lane.b32.xlu0 %v4770_v34, %s4025_s24  ;;  %v1434_v29 = vsel %vm1399_vm5, %v3238_v52, %v7224_v42 }
 0x262   : > { %3666 = vrot.lane.b32.xlu1 %v4682_v55, %s4025_s24  ;;  %v1435_v15 = vsel %vm1399_vm5, %v3239_v53, %v7225_v62 }
 0x263   : > { %v5321_v13 = vpop.permute.xlu0 %3371 }
 0x264   : > { %7220 = vst [vmem:[#allocation75_spill] sm:$0xff] %v5321_v13  ;;  %v5323_v30 = vpop.permute.xlu1 %3391  ;;  %v7227_v13 = vunpack.i.h.bf16 %v4953_v22 }
 0x265   : > { %7221 = vst [vmem:[#allocation76_spill] sm:$0xff] %v5323_v30  ;;  %3671 = vrot.lane.b32.xlu0 %v4724_v27, %s4025_s24 }
 0x266   : > { %3676 = vrot.lane.b32.xlu1 %v4729_v41, %s4025_s24 }
 0x267   : > { %v5329_v25 = vpop.permute.xlu0 %3396 }
 0x268   : > { %v5331_v20 = vpop.permute.xlu1 %3411 }
 0x269   : > { %7222 = vst [vmem:[#allocation77_spill] sm:$0xff] %v5331_v20  ;;  %3681 = vrot.lane.b32.xlu0 %v4813_v51, %s4025_s24 }
 0x26a   : > { %3686 = vrot.lane.b32.xlu1 %v4659_v14, %s4026_s25 }
 0x26b   : > { %v5337_v38 = vpop.permute.xlu0 %3401 }
 0x26c   : > { %7223 = vst [vmem:[#allocation78_spill] sm:$0xff] %v5337_v38  ;;  %v5339_v39 = vpop.permute.xlu1 %3416  ;;  %v7229_v62 = vunpack.i.l.bf16 %v5337_v38  ;;  %v7231_v57 = vunpack.i.h.bf16 %v5337_v38 }
 0x26d   : > { %3691 = vrot.lane.b32.xlu0 %v4748_v23, %s4026_s25 }
 0x26e   : > { %3696 = vrot.lane.b32.xlu1 %v4791_v4, %s4026_s25 }
 0x26f   : > { %v3407_v48 = vpop.permute.xlu0 %3406 }
 0x270   : > { %v5347_v60 = vpop.permute.xlu1 %3421  ;;  %v3409_v59 = vunpack.i.h.bf16 %v3407_v48  ;;  %v3408_v28 = vunpack.i.l.bf16 %v3407_v48  ;;  %v7226_v48 = vunpack.i.l.bf16 %v4953_v22  ;;  %v2298_v22 = vpack.c.bf16 %v1435_v15, %v1434_v29 }
 0x271   : > { %3701 = vrot.lane.b32.xlu0 %v4770_v34, %s4026_s25  ;;  %v7072_v43 = vunpack.i.h.bf16 %v5347_v60 }
 0x272   : > { %3706 = vrot.lane.b32.xlu1 %v4682_v55, %s4026_s25  ;;  %v1436_v30 = vsel %vm1399_vm5, %v3408_v28, %v7226_v48  ;;  %v1437_v63 = vsel %vm1399_vm5, %v3409_v59, %v7227_v13  ;;  %v5379_v31 = vsel %vm1399_vm5, %v7229_v62, %v3408_v28  ;;  %v5385_v48 = vsel %vm1399_vm5, %v7231_v57, %v3409_v59 }
 0x273   : > { %v5371_v36 = vpop.permute.xlu0 %3441  ;;  %v2287_v12 = vpack.c.bf16 %v1437_v63, %v1436_v30  ;;  %7230 = vst [vmem:[#allocation80_spill] sm:$0xff] %v5379_v31  ;;  %7232 = vst [vmem:[#allocation81_spill] sm:$0xff] %v5385_v48  ;;  %v3204_v28 = vunpack.i.h.bf16 %v4964_v33  ;;  %v3203_v13 = vunpack.i.l.bf16 %v4964_v33  ;;  %v7234_v30 = vunpack.i.h.bf16 %v4987_v8 }
 0x274   : > { %v5373_v42 = vpop.permute.xlu1 %3426  ;;  %v3243_v48 = vunpack.i.l.bf16 %v4989_v61 }
 0x275   : > { %7228 = vst [vmem:[#allocation79_spill] sm:$0xff] %v5373_v42  ;;  %2483 = vmatpush1.bf16.msra.mxu1 %v2287_v12  ;;  %3711 = vrot.lane.b32.xlu0 %v4724_v27, %s4026_s25  ;;  %v7067_v15 = vunpack.i.l.bf16 %v5373_v42  ;;  %v1554_v31 = vsel %vm1520_vm6, %v3204_v28, %v7234_v30 }
 0x276   : > { %3716 = vrot.lane.b32.xlu1 %v4729_v41, %s4026_s25  ;;  %2484 = vmatprep.subr.bf16.mxu1 %v2298_v22  ;;  %v7233_v22 = vunpack.i.l.bf16 %v4987_v8  ;;  %v7236_v8 = vunpack.i.h.bf16 %v5373_v42 }
 0x277   : > { %v5396_v57 = vpop.permute.xlu0 %3451 }
 0x278   : > { %v3432_v59 = vpop.permute.xlu1 %3431  ;;  %v1553_v33 = vsel %vm1520_vm6, %v3203_v13, %v7233_v22  ;;  %v3244_v22 = vunpack.i.h.bf16 %v4989_v61  ;;  %v7240_v61 = vunpack.i.l.bf16 %v5005_v0 }
 0x279   : > { %v3434_v12 = vunpack.i.h.bf16 %v3432_v59  ;;  %v3433_v62 = vunpack.i.l.bf16 %v3432_v59  ;;  %3721 = vrot.lane.b32.xlu0 %v4813_v51, %s4026_s25 }
 0x27a   : > { %3726 = vrot.lane.b32.xlu1 %v4659_v14, %s4027_s26 }
 0x27b   : > { %v1438_v59 = vsel %vm1399_vm5, %v3433_v62, %v3238_v52  ;;  %v1439_v63 = vsel %vm1399_vm5, %v3434_v12, %v3239_v53  ;;  %v5421_v29 = vsel %vm1399_vm5, %v7067_v15, %v3433_v62  ;;  %v5427_v30 = vsel %vm1399_vm5, %v7236_v8, %v3434_v12  ;;  %v5431_v52 = vpop.permute.xlu0 %3461 }
 0x27c   : > { %7235 = vst [vmem:[#allocation82_spill] sm:$0xff] %v5421_v29  ;;  %7237 = vst [vmem:[#allocation83_spill] sm:$0xff] %v5427_v30  ;;  %v5433_v38 = vpop.permute.xlu1 %3436  ;;  %v2297_v53 = vpack.c.bf16 %v1439_v63, %v1438_v59  ;;  %v2308_v62 = vpack.c.bf16 %v1554_v31, %v1553_v33  ;;  %v7239_v15 = vunpack.i.l.bf16 %v5347_v60  ;;  %v1555_v12 = vsel %vm1520_vm6, %v3243_v48, %v7240_v61 }
 0x27d   : > { %7238 = vst [vmem:[#allocation84_spill] sm:$0xff] %v5431_v52  ;;  %3731 = vrot.lane.b32.xlu0 %v4748_v23, %s4027_s26  ;;  %v7241_v63 = vunpack.i.h.bf16 %v5005_v0  ;;  %v7070_v33 = vunpack.i.l.bf16 %v4995_v5  ;;  %v3209_v61 = vunpack.i.h.bf16 %v4951_v19 }
 0x27e   : > { %v1558_v42 = vsel %vm1520_vm6, %v7239_v15, %v3204_v28  ;;  %2485 = vmatpush1.bf16.msra.mxu1 %v2297_v53  ;;  %3736 = vrot.lane.b32.xlu1 %v4791_v4, %s4027_s26  ;;  %v7242_v28 = vunpack.i.h.bf16 %v5329_v25 }
 0x27f   : > { %v1556_v59 = vsel %vm1520_vm6, %v3244_v22, %v7241_v63  ;;  %2486 = vmatprep.subr.bf16.mxu1 %v2308_v62  ;;  %v5460_v8 = vpop.permute.xlu0 %3471  ;;  %v3208_v63 = vunpack.i.l.bf16 %v4951_v19  ;;  %v7074_v62 = vunpack.i.l.bf16 %v5331_v20 }
 0x280   : > { %v1557_v15 = vsel %vm1520_vm6, %v7242_v28, %v3203_v13  ;;  %v5462_v0 = vpop.permute.xlu1 %3446  ;;  %v2318_v31 = vpack.c.bf16 %v1556_v59, %v1555_v12  ;;  %v3249_v59 = vunpack.i.h.bf16 %v5011_v56  ;;  %v3248_v28 = vunpack.i.l.bf16 %v5011_v56 }
 0x281   : > { %7243 = vst [vmem:[#allocation85_spill] sm:$0xff] %v5462_v0  ;;  %v2307_v53 = vpack.c.bf16 %v1558_v42, %v1557_v15  ;;  %3741 = vrot.lane.b32.xlu0 %v4770_v34, %s4027_s26  ;;  %v1674_v19 = vsel %vm1641_vm8, %v3208_v63, %v7070_v33  ;;  %v7244_v42 = vunpack.i.h.bf16 %v4995_v5 }
 0x282   : > { %3746 = vrot.lane.b32.xlu1 %v4682_v55, %s4027_s26 }
 0x283   : > { %2487 = vmatpush1.bf16.msra.mxu1 %v2307_v53  ;;  %v1675_v12 = vsel %vm1641_vm8, %v3209_v61, %v7244_v42  ;;  %v5485_v13 = vpop.permute.xlu0 %1518  ;;  %v1559_v42 = vsel %vm1520_vm6, %v7072_v43, %v3243_v48  ;;  %v1678_v53 = vsel %vm1641_vm8, %v7074_v62, %v3208_v63  ;;  %v7075_v43 = vunpack.i.l.bf16 %v5003_v2 }
 0x284   : > { %2488 = vmatprep.subr.bf16.mxu1 %v2318_v31  ;;  %v5487_v31 = vpop.permute.xlu1 %3456  ;;  %v1560_v33 = vsel %vm1520_vm6, %v5485_v13, %v3244_v22  ;;  %v2328_v15 = vpack.c.bf16 %v1675_v12, %v1674_v19  ;;  %v7245_v22 = vunpack.i.h.bf16 %v5331_v20  ;;  %v7246_v19 = vunpack.i.l.bf16 %v5013_v32 }
 0x285   : > { %3751 = vrot.lane.b32.xlu0 %v4724_v27, %s4027_s26  ;;  %v2317_v56 = vpack.c.bf16 %v1560_v33, %v1559_v42  ;;  %v7247_v63 = vunpack.i.h.bf16 %v5013_v32 }
 0x286   : > { %3756 = vrot.lane.b32.xlu1 %v4729_v41, %s4027_s26  ;;  %v1679_v29 = vsel %vm1641_vm8, %v7245_v22, %v3209_v61  ;;  %v1676_v12 = vsel %vm1641_vm8, %v3248_v28, %v7246_v19  ;;  %v3214_v61 = vunpack.i.h.bf16 %v4962_v58  ;;  %v3213_v22 = vunpack.i.l.bf16 %v4962_v58 }
 0x287   : > { %v5510_v30 = vpop.permute.xlu0 %3481  ;;  %2489 = vmatpush1.bf16.msra.mxu1 %v2317_v56  ;;  %v1677_v42 = vsel %vm1641_vm8, %v3249_v59, %v7247_v63  ;;  %v2327_v56 = vpack.c.bf16 %v1679_v29, %v1678_v53  ;;  %v7249_v58 = vunpack.i.h.bf16 %v5003_v2 }
 0x288   : > { %v5512_v33 = vpop.permute.xlu1 %3466  ;;  %2490 = vmatprep.subr.bf16.mxu1 %v2328_v15  ;;  %v2338_v19 = vpack.c.bf16 %v1677_v42, %v1676_v12  ;;  %v1795_v15 = vsel %vm1762_vm9, %v3213_v22, %v7075_v43  ;;  %v3254_v42 = vunpack.i.h.bf16 %v5019_v7 }
 0x289   : > { %3761 = vrot.lane.b32.xlu0 %v4813_v51, %s4027_s26  ;;  %v1796_v63 = vsel %vm1762_vm9, %v3214_v61, %v7249_v58 }
 0x28a   : > { %3766 = vrot.lane.b32.xlu1 %v4659_v14, %s4028_s10  ;;  %v7078_v14 = vunpack.i.l.bf16 %v5339_v39  ;;  %v2348_v29 = vpack.c.bf16 %v1796_v63, %v1795_v15  ;;  %v7253_v15 = vunpack.i.h.bf16 %v5021_v16 }
 0x28b   : > { %v5529_v62 = vpop.permute.xlu0 %3491  ;;  %2491 = vmatpush1.bf16.msra.mxu1 %v2327_v56  ;;  %v3253_v56 = vunpack.i.l.bf16 %v5019_v7 }
 0x28c   : > { %v5531_v48 = vpop.permute.xlu1 %3476  ;;  %v7081_v53 = vunpack.i.h.bf16 %v5529_v62  ;;  %v7082_v12 = vunpack.i.l.bf16 %v5529_v62  ;;  %2492 = vmatprep.subr.bf16.mxu1 %v2338_v19  ;;  %v1798_v63 = vsel %vm1762_vm9, %v3254_v42, %v7253_v15 }
 0x28d   : > { %7248 = vst [vmem:[#allocation86_spill] sm:$0xff] %v5531_v48  ;;  %3771 = vrot.lane.b32.xlu0 %v4748_v23, %s4028_s10  ;;  %v7251_v23 = vunpack.i.h.bf16 %v5339_v39 }
 0x28e   : > { %3776 = vrot.lane.b32.xlu1 %v4791_v4, %s4028_s10  ;;  %v1680_v58 = vsel %vm1641_vm8, %v7082_v12, %v3248_v28  ;;  %v1681_v7 = vsel %vm1641_vm8, %v7081_v53, %v3249_v59  ;;  %v1799_v4 = vsel %vm1762_vm9, %v7078_v14, %v3213_v22  ;;  %v7252_v59 = vunpack.i.l.bf16 %v5021_v16 }
 0x28f   : > { %v5561_v19 = vpop.permute.xlu0 %3496  ;;  %v2337_v20 = vpack.c.bf16 %v1681_v7, %v1680_v58  ;;  %v1800_v28 = vsel %vm1762_vm9, %v7251_v23, %v3214_v61  ;;  %v3468_v53 = vunpack.i.l.bf16 %v5512_v33 }
 0x290   : > { %7250 = vst [vmem:[#allocation87_spill] sm:$0xff] %v5561_v19  ;;  %v5563_v43 = vpop.permute.xlu1 %3486  ;;  %v1797_v58 = vsel %vm1762_vm9, %v3253_v56, %v7252_v59  ;;  %v2347_v7 = vpack.c.bf16 %v1800_v28, %v1799_v4 }
 0x291   : > { %3781 = vrot.lane.b32.xlu0 %v4770_v34, %s4028_s10  ;;  %2493 = vmatpush1.bf16.msra.mxu1 %v2337_v20  ;;  %v2358_v14 = vpack.c.bf16 %v1798_v63, %v1797_v58  ;;  %v7087_v58 = vunpack.i.l.bf16 %v5462_v0  ;;  %v7085_v63 = vunpack.i.l.bf16 %v5431_v52 }
 0x292   : > { %3786 = vrot.lane.b32.xlu1 %v4682_v55, %s4028_s10  ;;  %2494 = vmatprep.subr.bf16.mxu1 %v2348_v29 }
 0x293   : > { %v5585_v22 = vpop.permute.xlu0 %3506 }
 0x294   : > { %v5587_v61 = vpop.permute.xlu1 %3501  ;;  %v7079_v20 = vunpack.i.h.bf16 %v5585_v22  ;;  %v7080_v23 = vunpack.i.l.bf16 %v5585_v22 }
 0x295   : > { %3791 = vrot.lane.b32.xlu0 %v4724_v27, %s4028_s10  ;;  %2495 = vmatpush1.bf16.msra.mxu1 %v2347_v7  ;;  %v2368_v27 = vpack.c.bf16 %v4531_v49, %v4537_v24  ;;  %v7084_v49 = vunpack.i.h.bf16 %v5371_v36  ;;  %v7083_v24 = vunpack.i.l.bf16 %v5371_v36 }
 0x296   : > { %3796 = vrot.lane.b32.xlu1 %v4729_v41, %s4028_s10  ;;  %2496 = vmatprep.subr.bf16.mxu1 %v2358_v14  ;;  %v1801_v55 = vsel %vm1762_vm9, %v7080_v23, %v3253_v56  ;;  %v1802_v29 = vsel %vm1762_vm9, %v7079_v20, %v3254_v42  ;;  %v3439_v41 = vunpack.i.h.bf16 %v5433_v38  ;;  %v3438_v14 = vunpack.i.l.bf16 %v5433_v38 }
 0x297   : > { %v5603_v4 = vpop.permute.xlu0 %3511  ;;  %v2357_v28 = vpack.c.bf16 %v1802_v29, %v1801_v55  ;;  %v7255_v42 = vpack.i.bf16 %v4888_v6, %v4832_v21  ;;  %v2367_v56 = vpack.c.bf16 %v4505_v46, %v4502_v45  ;;  %v7086_v38 = vunpack.i.h.bf16 %v5462_v0 }
 0x298   : > { %v5605_v59 = vpop.permute.xlu1 %3516  ;;  %v2378_v55 = vpack.c.bf16 %v4584_v54, %v4597_v26  ;;  %v7089_v29 = vunpack.i.h.bf16 %v5487_v31  ;;  %v7088_v45 = vunpack.i.l.bf16 %v5487_v31  ;;  %v1912_v46 = vsel %vm1883_vm10, %v3438_v14, %v7083_v24 }
 0x299   : > { %7254 = vst [vmem:[#allocation88_spill] sm:$0xff] %v5605_v59  ;;  %3801 = vrot.lane.b32.xlu0 %v4813_v51, %s4028_s10  ;;  %2497 = vmatpush1.bf16.msra.mxu1 %v2357_v28  ;;  %v1913_v28 = vsel %vm1883_vm10, %v3439_v41, %v7084_v49  ;;  %v3454_v54 = vunpack.i.h.bf16 %v5396_v57  ;;  %v3453_v26 = vunpack.i.l.bf16 %v5396_v57  ;;  %v3469_v23 = vunpack.i.h.bf16 %v5512_v33 }
 0x29a   : > { %3806 = vrot.lane.b32.xlu1 %v7255_v42, %s4024_s20  ;;  %2498 = vmatprep.subr.bf16.mxu1 %v2368_v27  ;;  %v7090_v27 = vunpack.i.h.bf16 %v5431_v52  ;;  %v7256_v42 = vld [vmem:[#allocation8_spill] sm:$0xff]  ;;  %v1916_v57 = vsel %vm1883_vm10, %v7087_v58, %v3438_v14  ;;  %v1917_v24 = vsel %vm1883_vm10, %v7086_v38, %v3439_v41  ;;  %v7091_v49 = vunpack.i.l.bf16 %v5460_v8  ;;  %v7258_v14 = vld [vmem:[#allocation35_spill] sm:$0xff]  ;;  %v7259_v38 = vld [vmem:[#allocation46_spill] sm:$0xff] }
 0x29b   : > { %v5624_v15 = vpop.permute.xlu0 %3521  ;;  %v1918_v33 = vsel %vm1883_vm10, %v7085_v63, %v3453_v26  ;;  %v1914_v41 = vsel %vm1883_vm10, %v3453_v26, %v7088_v45  ;;  %v7092_v63 = vunpack.i.l.bf16 %v5531_v48  ;;  %v2387_v58 = vpack.c.bf16 %v1917_v24, %v1916_v57  ;;  %v7261_v45 = vld [vmem:[#allocation41_spill] sm:$0xff] }
 0x29c   : > { %v5627_v7 = vpop.permute.xlu1 %3526  ;;  %v7265_v52 = vld [vmem:[#allocation53_spill] sm:$0xff]  ;;  %v7267_v21 = vunpack.i.l.bf16 %v5561_v19  ;;  %v7268_v0 = vunpack.i.h.bf16 %v5561_v19 }
 0x29d   : > { %1510 = vrot.lane.b32.xlu0 %v4900_v37, %s4024_s20  ;;  %2499 = vmatpush1.bf16.msra.mxu1 %v2367_v56  ;;  %v7257_v56 = vld [vmem:[#allocation9_spill] sm:$0xff] }
 0x29e   : > { %3811 = vrot.lane.b32.xlu1 %v4770_v34, %s4021_s17  ;;  %2500 = vmatprep.subr.bf16.mxu1 %v2378_v55  ;;  %v2377_v20 = vpack.c.bf16 %v7257_v56, %v7256_v42  ;;  %v2388_v42 = vpack.c.bf16 %v1913_v28, %v1912_v46  ;;  %v1915_v46 = vsel %vm1883_vm10, %v3454_v54, %v7089_v29  ;;  %v7260_v28 = vunpack.i.h.bf16 %v5460_v8 }
 0x29f   : > { %v5652_v12 = vpop.permute.xlu0 %3531  ;;  %v2033_v29 = vsel %vm2004_vm11, %v3468_v53, %v7091_v49 }
 0x2a0   : > { %v5663_v55 = vpop.permute.xlu1 %3536  ;;  %v2034_v24 = vsel %vm2004_vm11, %v3469_v23, %v7260_v28  ;;  %v2037_v28 = vsel %vm2004_vm11, %v7092_v63, %v3468_v53  ;;  %v7269_v63 = vunpack.i.l.bf16 %v5603_v4 }
 0x2a1   : > { %3816 = vrot.lane.b32.xlu0 %v7258_v14, %s4021_s17  ;;  %2501 = vmatpush1.bf16.msra.mxu1 %v2377_v20  ;;  %v1919_v20 = vsel %vm1883_vm10, %v7090_v27, %v3454_v54  ;;  %v3484_v54 = vunpack.i.h.bf16 %v5510_v30  ;;  %v3483_v27 = vunpack.i.l.bf16 %v5510_v30  ;;  %v2408_v49 = vpack.c.bf16 %v2034_v24, %v2033_v29 }
 0x2a2   : > { %3821 = vrot.lane.b32.xlu1 %v7259_v38, %s4021_s17  ;;  %2502 = vmatprep.subr.bf16.mxu1 %v2388_v42  ;;  %v2398_v42 = vpack.c.bf16 %v1915_v46, %v1914_v41  ;;  %v2397_v26 = vpack.c.bf16 %v1919_v20, %v1918_v33  ;;  %v7262_v41 = vunpack.i.h.bf16 %v5531_v48  ;;  %v7263_v20 = vunpack.i.l.bf16 %v5563_v43 }
 0x2a3   : > { %v5691_v56 = vpop.permute.xlu0 %3541  ;;  %v7264_v24 = vunpack.i.h.bf16 %v5563_v43  ;;  %v3539_v6 = vunpack.i.h.bf16 %v5663_v55 }
 0x2a4   : > { %v5701_v57 = vpop.permute.xlu1 %3546  ;;  %v2038_v30 = vsel %vm2004_vm11, %v7262_v41, %v3469_v23  ;;  %v2035_v29 = vsel %vm2004_vm11, %v3483_v27, %v7263_v20  ;;  %v3503_v20 = vunpack.i.l.bf16 %v5587_v61 }
 0x2a5   : > { %3826 = vrot.lane.b32.xlu0 %v4813_v51, %s4021_s17  ;;  %2503 = vmatpush1.bf16.msra.mxu1 %v2387_v58  ;;  %v2036_v53 = vsel %vm2004_vm11, %v3484_v54, %v7264_v24  ;;  %v3504_v58 = vunpack.i.h.bf16 %v5587_v61  ;;  %v3524_v24 = vunpack.i.h.bf16 %v5624_v15  ;;  %v2407_v48 = vpack.c.bf16 %v2038_v30, %v2037_v28 }
 0x2a6   : > { %3831 = vrot.lane.b32.xlu1 %v7261_v45, %s4021_s17  ;;  %2504 = vmatprep.subr.bf16.mxu1 %v2398_v42  ;;  %v3523_v42 = vunpack.i.l.bf16 %v5624_v15  ;;  %v2418_v61 = vpack.c.bf16 %v2036_v53, %v2035_v29  ;;  %v2040_v15 = vsel %vm2004_vm11, %v7268_v0, %v3484_v54  ;;  %v7271_v30 = vunpack.i.l.bf16 %v5605_v59 }
 0x2a7   : > { %v5719_v33 = vpop.permute.xlu0 %3551  ;;  %v7273_v53 = vunpack.i.l.bf16 %v5627_v7 }
 0x2a8   : > { %v5733_v46 = vpop.permute.xlu1 %3556 }
 0x2a9   : > { %3836 = vrot.lane.b32.xlu0 %v7265_v52, %s4021_s17  ;;  %2505 = vmatpush1.bf16.msra.mxu1 %v2397_v26  ;;  %v2039_v26 = vsel %vm2004_vm11, %v7267_v21, %v3483_v27  ;;  %v2158_v21 = vsel %vm2125_vm12, %v7271_v30, %v3503_v20  ;;  %v7272_v27 = vunpack.i.h.bf16 %v5605_v59  ;;  %v7109_v59 = vunpack.i.h.bf16 %v5691_v56  ;;  %s3158_s17 = smul.u32 80, %s326_s23 }
 0x2aa   : > { %3841 = vrot.lane.b32.xlu1 %v4770_v34, %s4023_s19  ;;  %2506 = vmatprep.subr.bf16.mxu1 %v2408_v49  ;;  %v2154_v34 = vsel %vm2125_vm12, %v3503_v20, %v7269_v63  ;;  %v7270_v49 = vunpack.i.h.bf16 %v5603_v4  ;;  %v2156_v20 = vsel %vm2125_vm12, %v3523_v42, %v7273_v53 }
 0x2ab   : > { %v5746_v23 = vpop.permute.xlu0 %3561  ;;  %v2159_v0 = vsel %vm2125_vm12, %v7272_v27, %v3504_v58  ;;  %s6628_s27 = scalar_lea.vmem [#allocation3], %s3158_s17 }
 0x2ac   : > { %7266 = vst [vmem:[#allocation8_spill] sm:$0xff] %v5746_v23  ;;  %v3567_v41 = vpop.permute.xlu1 %3566  ;;  %v2155_v28 = vsel %vm2125_vm12, %v3504_v58, %v7270_v49  ;;  %v7274_v58 = vunpack.i.h.bf16 %v5627_v7  ;;  %v2427_v54 = vpack.c.bf16 %v2159_v0, %v2158_v21  ;;  %v7277_v21 = vunpack.i.l.bf16 %v4995_v5 }
 0x2ad   : > { %v3569_v63 = vunpack.i.h.bf16 %v3567_v41  ;;  %3846 = vrot.lane.b32.xlu0 %v7258_v14, %s4023_s19  ;;  %2507 = vmatpush1.bf16.msra.mxu1 %v2407_v48  ;;  %v3568_v29 = vunpack.i.l.bf16 %v3567_v41  ;;  %v2417_v48 = vpack.c.bf16 %v2040_v15, %v2039_v26  ;;  %v2428_v41 = vpack.c.bf16 %v2155_v28, %v2154_v34 }
 0x2ae   : > { %3851 = vrot.lane.b32.xlu1 %v7259_v38, %s4023_s19  ;;  %2508 = vmatprep.subr.bf16.mxu1 %v2418_v61  ;;  %v2157_v49 = vsel %vm2125_vm12, %v3524_v24, %v7274_v58  ;;  %v7106_v61 = vunpack.i.l.bf16 %v5691_v56  ;;  %v7275_v58 = vunpack.i.h.bf16 %v4995_v5  ;;  %v7276_v15 = vunpack.i.l.bf16 %v5652_v12 }
 0x2af   : > { %v5787_v27 = vpop.permute.xlu0 %3571  ;;  %v2438_v26 = vpack.c.bf16 %v2157_v49, %v2156_v20  ;;  %v3538_v28 = vunpack.i.l.bf16 %v5663_v55  ;;  %v1670_v0 = vsel %vm1641_vm8, %v7277_v21, %v3568_v29  ;;  %v7110_v55 = vunpack.i.h.bf16 %v5701_v57 }
 0x2b0   : > { %v7108_v19 = vunpack.i.h.bf16 %v5787_v27  ;;  %v7107_v53 = vunpack.i.l.bf16 %v5787_v27  ;;  %v5793_v37 = vpop.permute.xlu1 %3576  ;;  %v1671_v30 = vsel %vm1641_vm8, %v7275_v58, %v3569_v63  ;;  %v2160_v34 = vsel %vm2125_vm12, %v7276_v15, %v3523_v42 }
 0x2b1   : > { %3856 = vrot.lane.b32.xlu0 %v4813_v51, %s4023_s19  ;;  %2509 = vmatpush1.bf16.msra.mxu1 %v2417_v48  ;;  %v7111_v5 = vunpack.i.l.bf16 %v5701_v57  ;;  %v7278_v48 = vunpack.i.h.bf16 %v5652_v12  ;;  %v3554_v58 = vunpack.i.h.bf16 %v5719_v33  ;;  %v2276_v21 = vsel %vm2246_vm13, %v3539_v6, %v7109_v59 }
 0x2b2   : > { %3861 = vrot.lane.b32.xlu1 %v7261_v45, %s4023_s19  ;;  %2510 = vmatprep.subr.bf16.mxu1 %v2428_v41  ;;  %v1666_v51 = vsel %vm1641_vm8, %v3568_v29, %v7107_v53  ;;  %v1667_v42 = vsel %vm1641_vm8, %v3569_v63, %v7108_v19  ;;  %v3553_v29 = vunpack.i.l.bf16 %v5719_v33  ;;  %v2275_v63 = vsel %vm2246_vm13, %v3538_v28, %v7106_v61  ;;  %v7279_v53 = vld [vmem:[#allocation54_spill] sm:$0xff] }
 0x2b3   : > { %v5823_v20 = vpop.permute.xlu0 %3581  ;;  %v2330_v49 = vpack.c.bf16 %v1667_v42, %v1666_v51  ;;  %v2161_v41 = vsel %vm2125_vm12, %v7278_v48, %v3524_v24  ;;  %v7112_v51 = vunpack.i.h.bf16 %v5733_v46  ;;  %v7113_v42 = vunpack.i.l.bf16 %v5733_v46 }
 0x2b4   : > { %v3587_v15 = vpop.permute.xlu1 %3586  ;;  %v2329_v24 = vpack.c.bf16 %v1671_v30, %v1670_v0  ;;  %v2437_v61 = vpack.c.bf16 %v2161_v41, %v2160_v34  ;;  %v5847_v19 = vcombine.low %v7279_v53, %v7279_v53  ;;  %v2279_v30 = vsel %vm2246_vm13, %v7111_v5, %v3538_v28 }
 0x2b5   : > { %v3589_v48 = vunpack.i.h.bf16 %v3587_v15  ;;  %3866 = vrot.lane.b32.xlu0 %v7265_v52, %s4023_s19  ;;  %2511 = vmatpush1.bf16.msra.mxu1 %v2427_v54  ;;  %v3588_v33 = vunpack.i.l.bf16 %v3587_v15  ;;  %v2280_v54 = vsel %vm2246_vm13, %v7110_v55, %v3539_v6  ;;  %v7115_v34 = vunpack.i.h.bf16 %v5746_v23  ;;  %s3112_s19 = smul.u32 (%p4105_p5), 40, %s3076_s30 }
 0x2b6   : > { %3871 = vrot.lane.b32.xlu1 %v7258_v14, %s4025_s24  ;;  %2572 = vmatprep.subr.bf16.mxu0 %v2330_v49  ;;  %v2448_v49 = vpack.c.bf16 %v2276_v21, %v2275_v63  ;;  %v7114_v53 = vunpack.i.l.bf16 %v5746_v23  ;;  %v7280_v28 = vunpack.i.h.bf16 %v5013_v32  ;;  %v2278_v63 = vsel %vm2246_vm13, %v3554_v58, %v7112_v51 }
 0x2b7   : > { %2512 = vmatprep.subr.bf16.mxu1 %v2438_v26  ;;  %2573 = vmatpush1.bf16.msra.mxu0 %v2329_v24  ;;  %v5857_v0 = vpop.permute.xlu0 %3591  ;;  %v2277_v26 = vsel %vm2246_vm13, %v3553_v29, %v7113_v42  ;;  %v7281_v21 = vunpack.i.l.bf16 %v5013_v32  ;;  %v2447_v5 = vpack.c.bf16 %v2280_v54, %v2279_v30  ;;  %v7283_v42 = vunpack.i.l.bf16 %v5189_v10  ;;  %s3044_s29 = scalar_lea.vmem (%p4105_p5), %s6953_s8, %s3112_s19 }
 0x2b8   : > { %v7123_v41 = vunpack.i.h.bf16 %v5857_v0  ;;  %v7122_v15 = vunpack.i.l.bf16 %v5857_v0  ;;  %v5863_v59 = vpop.permute.xlu1 %3596  ;;  %v1673_v6 = vsel %vm1641_vm8, %v7280_v28, %v3589_v48  ;;  %v7282_v28 = vld [vmem:[#allocation47_spill] sm:$0xff]  ;;  %v7285_v30 = vunpack.i.h.bf16 %v5189_v10 }
 0x2b9   : > { %3876 = vrot.lane.b32.xlu0 %v7259_v38, %s4025_s24  ;;  %2513 = vmatpush1.bf16.msra.mxu1 %v2437_v61  ;;  %v1672_v24 = vsel %vm1641_vm8, %v7281_v21, %v3588_v33  ;;  %v2281_v21 = vsel %vm2246_vm13, %v7114_v53, %v3553_v29  ;;  %v7286_v54 = vunpack.i.h.bf16 %v5095_v17 }
 0x2ba   : > { %3881 = vrot.lane.b32.xlu1 %v7282_v28, %s4025_s24  ;;  %2523 = vmatprep.subr.bf16.mxu1 %v2448_v49  ;;  %v1668_v61 = vsel %vm1641_vm8, %v3588_v33, %v7122_v15  ;;  %v1669_v55 = vsel %vm1641_vm8, %v3589_v48, %v7123_v41  ;;  %v2282_v49 = vsel %vm2246_vm13, %v7115_v34, %v3554_v58  ;;  %v7284_v48 = vunpack.i.l.bf16 %v5095_v17 }
 0x2bb   : > { %v5893_v51 = vpop.permute.xlu0 %3601  ;;  %v2340_v32 = vpack.c.bf16 %v1669_v55, %v1668_v61  ;;  %v1417_v29 = vsel %vm1399_vm5, %v7286_v54, %v7285_v30  ;;  %v2339_v61 = vpack.c.bf16 %v1673_v6, %v1672_v24  ;;  %v2458_v34 = vpack.c.bf16 %v2278_v63, %v2277_v26  ;;  %v5952_v54 = vld [vmem:[%s6952_s7 + $0x8] ss:$0 sps:$4 sm:$0xff]  }
 0x2bc   : > { %v3607_v33 = vpop.permute.xlu1 %3606  ;;  %2515 = vmatmul.mubr.bf16.vlgmr.msra.gmra.mrb[0].mxu1 %v5847_v19  ;;  %v1416_v55 = vsel %vm1399_vm5, %v7284_v48, %v7283_v42  ;;  %v2457_v42 = vpack.c.bf16 %v2282_v49, %v2281_v21  ;;  %v7287_v48 = vmov 0   ;;  %v7289_v63 = vunpack.i.l.bf16 %v5003_v2 }
 0x2bd   : > { %v3609_v53 = vunpack.i.h.bf16 %v3607_v33  ;;  %v3608_v58 = vunpack.i.l.bf16 %v3607_v33  ;;  %3886 = vrot.lane.b32.xlu0 %v7261_v45, %s4025_s24  ;;  %2524 = vmatpush1.bf16.msra.mxu1 %v2447_v5  ;;  %v2292_v33 = vpack.c.bf16 %v1417_v29, %v1416_v55  ;;  %v7288_v5 = vunpack.i.h.bf16 %v5003_v2 }
 0x2be   : > { %3891 = vrot.lane.b32.xlu1 %v7265_v52, %s4025_s24  ;;  %2574 = vmatprep.subr.bf16.mxu0 %v2340_v32  ;;  %v7318_v41 = vunpack.i.h.bf16 %v5787_v27 }
 0x2bf   : > { %2525 = vmatprep.subr.bf16.mxu1 %v2458_v34  ;;  %2575 = vmatpush1.bf16.msra.mxu0 %v2339_v61  ;;  %v5920_v10 = vpop.permute.xlu0 %3611  ;;  %v1792_v26 = vsel %vm1762_vm9, %v7288_v5, %v3609_v53  ;;  %v1791_v34 = vsel %vm1762_vm9, %v7289_v63, %v3608_v58  ;;  %v7290_v61 = vunpack.i.l.bf16 %v5191_v47 }
 0x2c0   : > { %v7119_v17 = vunpack.i.h.bf16 %v5920_v10  ;;  %v7118_v6 = vunpack.i.l.bf16 %v5920_v10  ;;  %v5924_v24 = vpop.permute.xlu1 %3616  ;;  %2555 = vmatprep.mubr.bf16.mxu1 %v7287_v48  ;;  %v2349_v55 = vpack.c.bf16 %v1792_v26, %v1791_v34 }
 0x2c1   : > { %3901 = vrot.lane.b32.xlu0 %v7259_v38, %s4026_s25  ;;  %2526 = vmatpush1.bf16.msra.mxu1 %v2457_v42  ;;  %v7292_v42 = vunpack.i.h.bf16 %v5191_v47  ;;  %v7294_v47 = vunpack.i.h.bf16 %v5021_v16 }
 0x2c2   : > { %3896 = vrot.lane.b32.xlu1 %v7258_v14, %s4026_s25  ;;  %2646 = vmatprep.subr.bf16.mxu1 %v2292_v33  ;;  %v1787_v32 = vsel %vm1762_vm9, %v3608_v58, %v7118_v6  ;;  %v1788_v2 = vsel %vm1762_vm9, %v3609_v53, %v7119_v17  ;;  %v7291_v58 = vunpack.i.l.bf16 %v5097_v9  ;;  %v7293_v33 = vunpack.i.h.bf16 %v5097_v9  ;;  %v7307_v6 = vld [vmem:[#allocation56_spill] sm:$0xff] }
 0x2c3   : > { %v5947_v21 = vpop.permute.xlu0 %3621  ;;  %v2350_v49 = vpack.c.bf16 %v1788_v2, %v1787_v32  ;;  %v7308_v17 = vpack.c.bf16 %v5129_v18, %v7307_v6  ;;  %v3598_v6 = vunpack.i.l.bf16 %v5863_v59 }
 0x2c4   : > { %v3627_v30 = vpop.permute.xlu1 %3626  ;;  %v1418_v53 = vsel %vm1399_vm5, %v7291_v58, %v7290_v61  ;;  %v1419_v5 = vsel %vm1399_vm5, %v7293_v33, %v7292_v42  ;;  %v7297_v61 = vunpack.i.l.bf16 %v5201_v11  ;;  %v7298_v58 = vunpack.i.l.bf16 %v5141_v50 }
 0x2c5   : > { %v3629_v29 = vunpack.i.h.bf16 %v3627_v30  ;;  %3911 = vrot.lane.b32.xlu0 %v7261_v45, %s4026_s25  ;;  %2576 = vmatprep.subr.bf16.mxu0 %v2350_v49  ;;  %v3628_v26 = vunpack.i.l.bf16 %v3627_v30  ;;  %v2302_v9 = vpack.c.bf16 %v1419_v5, %v1418_v53  ;;  %v7296_v30 = vld [vmem:[#allocation50_spill] sm:$0xff]  ;;  %v7299_v53 = vunpack.i.h.bf16 %v5201_v11 }
 0x2c6   : > { %3906 = vrot.lane.b32.xlu1 %v7282_v28, %s4026_s25  ;;  %2577 = vmatpush1.bf16.msra.mxu0 %v2349_v55  ;;  %v7295_v55 = vpack.c.bf16 %v5117_v1, %v5123_v35  ;;  %v1537_v42 = vsel %vm1520_vm6, %v7298_v58, %v7297_v61  ;;  %v7300_v33 = vunpack.i.h.bf16 %v5141_v50  ;;  %v7301_v1 = vunpack.i.l.bf16 %v5021_v16  ;;  %v7302_v58 = vld [vmem:[#allocation55_spill] sm:$0xff] }
 0x2c7   : > { %v5970_v63 = vpop.permute.xlu0 %3631  ;;  %v1794_v49 = vsel %vm1762_vm9, %v7294_v47, %v3629_v29  ;;  %v7121_v11 = vunpack.i.h.bf16 %v5823_v20  ;;  %v7120_v16 = vunpack.i.l.bf16 %v5823_v20 }
 0x2c8   : > { %v7117_v34 = vunpack.i.h.bf16 %v5970_v63  ;;  %v7116_v32 = vunpack.i.l.bf16 %v5970_v63  ;;  %v5974_v2 = vpop.permute.xlu1 %3636  ;;  %3097 = vmatmul.mubr.msk.bf16.vlgmr.msra.gmra.mrb[0].mxu1 %vm703_vm7, %v5952_v54  ;;  %v1538_v5 = vsel %vm1520_vm6, %v7300_v33, %v7299_v53  ;;  %v1793_v35 = vsel %vm1762_vm9, %v7301_v1, %v3628_v26 }
 0x2c9   : > { %2647 = vmatpush1.bf16.msra.mxu1 %v7295_v55  ;;  %3926 = vrot.lane.b32.xlu0 %v7296_v30, %s4025_s24  ;;  %v7303_v53 = vunpack.i.l.bf16 %v5203_v3  ;;  %v7304_v33 = vunpack.i.l.bf16 %v5143_v40  ;;  %v7305_v1 = vunpack.i.h.bf16 %v5203_v3  ;;  %v7310_v3 = vld [vmem:[#allocation18_spill] sm:$0xff] }
 0x2ca   : > { %3916 = vrot.lane.b32.xlu1 %v7265_v52, %s4026_s25  ;;  %2648 = vmatprep.subr.bf16.mxu1 %v2302_v9  ;;  %v1789_v47 = vsel %vm1762_vm9, %v3628_v26, %v7116_v32  ;;  %v1790_v50 = vsel %vm1762_vm9, %v3629_v29, %v7117_v34  ;;  %v7306_v29 = vunpack.i.h.bf16 %v5143_v40  ;;  %v3579_v34 = vunpack.i.h.bf16 %v5793_v37  ;;  %v7309_v40 = vld [vmem:[#allocation19_spill] sm:$0xff] }
 0x2cb   : > { %v6015_v55 = vpop.permute.xlu0 %3641  ;;  %v2360_v61 = vpack.c.bf16 %v1790_v50, %v1789_v47  ;;  %2678 = vmatprep.mubr.bf16.mxu1 %v7302_v58  ;;  %v1539_v26 = vsel %vm1520_vm6, %v7304_v33, %v7303_v53  ;;  %v3578_v47 = vunpack.i.l.bf16 %v5793_v37  ;;  %v2359_v50 = vpack.c.bf16 %v1794_v49, %v1793_v35 }
 0x2cc   : > { %v3647_v9 = vpop.permute.xlu1 %3646  ;;  %v1540_v32 = vsel %vm1520_vm6, %v7306_v29, %v7305_v1  ;;  %v2312_v53 = vpack.c.bf16 %v1538_v5, %v1537_v42  ;;  %v2370_v33 = vpack.c.bf16 %v7310_v3, %v7309_v40  ;;  %v7126_v49 = vunpack.i.l.bf16 %v5893_v51  ;;  %v7312_v29 = vld [vmem:[#allocation58_spill] sm:$0xff]  ;;  %v7315_v40 = vld [vmem:[#allocation17_spill] sm:$0xff] }
 0x2cd   : > { %2649 = vmatpush1.bf16.msra.mxu1 %v7308_v17  ;;  %3931 = vrot.lane.b32.xlu0 %v7259_v38, %s4027_s26  ;;  %v2322_v37 = vpack.c.bf16 %v1540_v32, %v1539_v26  ;;  %v1658_v18 = vsel %vm1641_vm8, %v3578_v47, %v7120_v16  ;;  %v1659_v17 = vsel %vm1641_vm8, %v3579_v34, %v7121_v11  ;;  %v3649_v32 = vunpack.i.h.bf16 %v3647_v9  ;;  %v7311_v26 = vld [vmem:[#allocation57_spill] sm:$0xff]  ;;  %v7316_v16 = vld [vmem:[#allocation23_spill] sm:$0xff]  ;;  %v7317_v11 = vld [vmem:[#allocation22_spill] sm:$0xff] }
 0x2ce   : > { %3921 = vrot.lane.b32.xlu1 %v7258_v14, %s4027_s26  ;;  %2578 = vmatprep.subr.bf16.mxu0 %v2360_v61  ;;  %v3648_v61 = vunpack.i.l.bf16 %v3647_v9  ;;  %v2380_v15 = vpack.c.bf16 %v7317_v11, %v7316_v16  ;;  %v3599_v9 = vunpack.i.h.bf16 %v5863_v59  ;;  %v2332_v16 = vpack.c.bf16 %v1659_v17, %v1658_v18 }
 0x2cf   : > { %2650 = vmatprep.subr.bf16.mxu1 %v2312_v53  ;;  %2579 = vmatpush1.bf16.msra.mxu0 %v2359_v50  ;;  %v6041_v1 = vpop.permute.xlu0 %3651  ;;  %v7313_v50 = vpack.c.bf16 %v7311_v26, %v7312_v29  ;;  %v7314_v53 = vld [vmem:[#allocation16_spill] sm:$0xff]  ;;  %v7319_v26 = vunpack.i.l.bf16 %v5787_v27  ;;  %v7320_v18 = vunpack.i.h.bf16 %v5893_v51  ;;  %v7327_v27 = vunpack.i.l.bf16 %v5371_v36 }
 0x2d0   : > { %v7125_v42 = vunpack.i.h.bf16 %v6041_v1  ;;  %v7124_v5 = vunpack.i.l.bf16 %v6041_v1  ;;  %v6055_v35 = vpop.permute.xlu1 %3656  ;;  %2580 = vmatprep.subr.bf16.mxu0 %v2370_v33  ;;  %v2369_v3 = vpack.c.bf16 %v7315_v40, %v7314_v53  ;;  %v1663_v33 = vsel %vm1641_vm8, %v7318_v41, %v3579_v34 }
 0x2d1   : > { %2651 = vmatpush1.bf16.msra.mxu1 %v7313_v50  ;;  %3941 = vrot.lane.b32.xlu0 %v7296_v30, %s4026_s25  ;;  %v1662_v29 = vsel %vm1641_vm8, %v7319_v26, %v3578_v47  ;;  %v1660_v47 = vsel %vm1641_vm8, %v3598_v6, %v7126_v49  ;;  %v1661_v17 = vsel %vm1641_vm8, %v3599_v9, %v7320_v18  ;;  %v3619_v50 = vunpack.i.h.bf16 %v5924_v24  ;;  %v7322_v26 = vld [vmem:[#allocation60_spill] sm:$0xff] }
 0x2d2   : > { %3936 = vrot.lane.b32.xlu1 %v7282_v28, %s4027_s26  ;;  %2652 = vmatprep.subr.bf16.mxu1 %v2322_v37  ;;  %v1904_v41 = vsel %vm1883_vm10, %v3648_v61, %v7124_v5  ;;  %v1905_v59 = vsel %vm1883_vm10, %v3649_v32, %v7125_v42  ;;  %v3618_v53 = vunpack.i.l.bf16 %v5924_v24  ;;  %v7325_v42 = vld [vmem:[#allocation20_spill] sm:$0xff]  ;;  %v7326_v34 = vunpack.i.h.bf16 %v5371_v36 }
 0x2d3   : > { %2581 = vmatpush1.bf16.msra.mxu0 %v2369_v3  ;;  %v6078_v11 = vpop.permute.xlu0 %3661  ;;  %v7321_v3 = vld [vmem:[#allocation59_spill] sm:$0xff]  ;;  %v1908_v24 = vsel %vm1883_vm10, %v7327_v27, %v3648_v61  ;;  %v2342_v61 = vpack.c.bf16 %v1661_v17, %v1660_v47  ;;  %v7332_v27 = vunpack.i.l.bf16 %v5487_v31  ;;  %v7333_v47 = vunpack.i.h.bf16 %v5487_v31 }
 0x2d4   : > { %v3667_v37 = vpop.permute.xlu1 %3666  ;;  %2582 = vmatprep.subr.bf16.mxu0 %v2380_v15  ;;  %v7323_v5 = vpack.c.bf16 %v7321_v3, %v7322_v26  ;;  %v7324_v15 = vld [vmem:[#allocation21_spill] sm:$0xff]  ;;  %v1909_v18 = vsel %vm1883_vm10, %v7326_v34, %v3649_v32  ;;  %v2331_v3 = vpack.c.bf16 %v1663_v33, %v1662_v29  ;;  %v7328_v26 = vunpack.i.h.bf16 %v5857_v0 }
 0x2d5   : > { %v3668_v40 = vunpack.i.l.bf16 %v3667_v37  ;;  %3946 = vrot.lane.b32.xlu0 %v7261_v45, %s4027_s26  ;;  %v2379_v49 = vpack.c.bf16 %v7325_v42, %v7324_v15  ;;  %v3669_v23 = vunpack.i.h.bf16 %v3667_v37  ;;  %v7329_v15 = vunpack.i.l.bf16 %v5857_v0 }
 0x2d6   : > { %2653 = vmatpush1.bf16.msra.mxu1 %v7323_v5  ;;  %3951 = vrot.lane.b32.xlu1 %v7265_v52, %s4027_s26  ;;  %v2390_v5 = vpack.c.bf16 %v1905_v59, %v1904_v41  ;;  %v1665_v42 = vsel %vm1641_vm8, %v7328_v26, %v3599_v9  ;;  %v7330_v33 = vunpack.i.l.bf16 %v5947_v21  ;;  %v7331_v0 = vunpack.i.h.bf16 %v5947_v21 }
 0x2d7   : > { %2654 = vmatprep.subr.bf16.mxu1 %v2332_v16  ;;  %v1664_v36 = vsel %vm1641_vm8, %v7329_v15, %v3598_v6  ;;  %2583 = vmatpush1.bf16.msra.mxu0 %v2379_v49  ;;  %v6125_v32 = vpop.permute.xlu0 %3671  ;;  %v3644_v49 = vunpack.i.h.bf16 %v6015_v55  ;;  %v3643_v29 = vunpack.i.l.bf16 %v6015_v55  ;;  %v2389_v59 = vpack.c.bf16 %v1909_v18, %v1908_v24 }
 0x2d8   : > { %v3674_v34 = vunpack.i.h.bf16 %v6125_v32  ;;  %v3673_v16 = vunpack.i.l.bf16 %v6125_v32  ;;  %v6129_v41 = vpop.permute.xlu1 %3676  ;;  %2584 = vmatprep.subr.bf16.mxu0 %v2390_v5  ;;  %v1779_v9 = vsel %vm1762_vm9, %v3618_v53, %v7330_v33  ;;  %v1780_v6 = vsel %vm1762_vm9, %v3619_v50, %v7331_v0 }
 0x2d9   : > { %v1910_v37 = vsel %vm1883_vm10, %v7332_v27, %v3668_v40  ;;  %3961 = vrot.lane.b32.xlu0 %v7296_v30, %s4027_s26  ;;  %v1911_v17 = vsel %vm1883_vm10, %v7333_v47, %v3669_v23  ;;  %v2341_v5 = vpack.c.bf16 %v1665_v42, %v1664_v36  ;;  %v3639_v31 = vunpack.i.h.bf16 %v5974_v2 }
 0x2da   : > { %2655 = vmatpush1.bf16.msra.mxu1 %v2331_v3  ;;  %3956 = vrot.lane.b32.xlu1 %v7258_v14, %s4028_s10  ;;  %v1906_v18 = vsel %vm1883_vm10, %v3668_v40, %v3673_v16  ;;  %v1907_v24 = vsel %vm1883_vm10, %v3669_v23, %v3674_v34  ;;  %v3638_v3 = vunpack.i.l.bf16 %v5974_v2  ;;  %v7334_v15 = vunpack.i.h.bf16 %v5920_v10 }
 0x2db   : > { %2656 = vmatprep.subr.bf16.mxu1 %v2342_v61  ;;  %2585 = vmatpush1.bf16.msra.mxu0 %v2389_v59  ;;  %v6163_v26 = vpop.permute.xlu0 %3681  ;;  %v2400_v14 = vpack.c.bf16 %v1907_v24, %v1906_v18  ;;  %v7335_v40 = vunpack.i.l.bf16 %v5920_v10  ;;  %v2352_v42 = vpack.c.bf16 %v1780_v6, %v1779_v9  ;;  %v2399_v36 = vpack.c.bf16 %v1911_v17, %v1910_v37 }
 0x2dc   : > { %v1784_v61 = vsel %vm1762_vm9, %v7334_v15, %v3619_v50  ;;  %v3687_v23 = vpop.permute.xlu1 %3686  ;;  %v1781_v2 = vsel %vm1762_vm9, %v3638_v3, %v3643_v29  ;;  %v1782_v10 = vsel %vm1762_vm9, %v3639_v31, %v3644_v49  ;;  %v7336_v9 = vunpack.i.h.bf16 %v5970_v63 }
 0x2dd   : > { %v1783_v33 = vsel %vm1762_vm9, %v7335_v40, %v3618_v53  ;;  %v3689_v0 = vunpack.i.h.bf16 %v3687_v23  ;;  %3966 = vrot.lane.b32.xlu0 %v7259_v38, %s4028_s10  ;;  %v3688_v50 = vunpack.i.l.bf16 %v3687_v23  ;;  %2586 = vmatprep.subr.bf16.mxu0 %v2400_v14  ;;  %v7337_v59 = vunpack.i.l.bf16 %v5970_v63  ;;  %v7340_v40 = vld [vmem:[#allocation36_spill] sm:$0xff] }
 0x2de   : > { %2657 = vmatpush1.bf16.msra.mxu1 %v2341_v5  ;;  %3971 = vrot.lane.b32.xlu1 %v7282_v28, %s4028_s10  ;;  %v2351_v53 = vpack.c.bf16 %v1784_v61, %v1783_v33  ;;  %v1786_v38 = vsel %vm1762_vm9, %v7336_v9, %v3639_v31  ;;  %v2362_v17 = vpack.c.bf16 %v1782_v10, %v1781_v2  ;;  %v7338_v18 = vunpack.i.h.bf16 %v5460_v8  ;;  %v7342_v10 = vld [vmem:[#allocation24_spill] sm:$0xff] }
 0x2df   : > { %2658 = vmatprep.subr.bf16.mxu1 %v2352_v42  ;;  %2587 = vmatpush1.bf16.msra.mxu0 %v2399_v36  ;;  %v6189_v6 = vpop.permute.xlu0 %3691  ;;  %v1785_v27 = vsel %vm1762_vm9, %v7337_v59, %v3638_v3  ;;  %v7339_v63 = vunpack.i.l.bf16 %v5460_v8  ;;  %v3664_v15 = vunpack.i.h.bf16 %v6078_v11  ;;  %v3663_v23 = vunpack.i.l.bf16 %v6078_v11 }
 0x2e0   : > { %v3694_v37 = vunpack.i.h.bf16 %v6189_v6  ;;  %v3693_v28 = vunpack.i.l.bf16 %v6189_v6  ;;  %v6197_v47 = vpop.permute.xlu1 %3696  ;;  %v2030_v24 = vsel %vm2004_vm11, %v7338_v18, %v3689_v0  ;;  %v3658_v9 = vunpack.i.l.bf16 %v6055_v35 }
 0x2e1   : > { %3976 = vrot.lane.b32.xlu0 %v7261_v45, %s4028_s10  ;;  %v2029_v5 = vsel %vm2004_vm11, %v7339_v63, %v3688_v50  ;;  %v2361_v45 = vpack.c.bf16 %v1786_v38, %v1785_v27  ;;  %v3684_v38 = vunpack.i.h.bf16 %v6163_v26  ;;  %v7344_v59 = vunpack.i.l.bf16 %v5563_v43 }
 0x2e2   : > { %2659 = vmatpush1.bf16.msra.mxu1 %v2351_v53  ;;  %3981 = vrot.lane.b32.xlu1 %v7265_v52, %s4028_s10  ;;  %v2025_v31 = vsel %vm2004_vm11, %v3688_v50, %v3693_v28  ;;  %v2026_v3 = vsel %vm2004_vm11, %v3689_v0, %v3694_v37  ;;  %v7341_v52 = vld [vmem:[#allocation30_spill] sm:$0xff]  ;;  %v2409_v42 = vpack.c.bf16 %v2030_v24, %v2029_v5  ;;  %v3659_v0 = vunpack.i.h.bf16 %v6055_v35  ;;  %v7343_v50 = vld [vmem:[#allocation25_spill] sm:$0xff] }
 0x2e3   : > { %2660 = vmatprep.subr.bf16.mxu1 %v2362_v17  ;;  %v6219_v14 = vpop.permute.xlu0 %3701  ;;  %v2410_v8 = vpack.c.bf16 %v2026_v3, %v2025_v31  ;;  %v2372_v33 = vpack.c.bf16 %v7341_v52, %v7340_v40  ;;  %v2371_v53 = vpack.c.bf16 %v7343_v50, %v7342_v10  ;;  %v7345_v17 = vunpack.i.h.bf16 %v5563_v43  ;;  %v7347_v40 = vld [vmem:[#allocation28_spill] sm:$0xff] }
 0x2e4   : > { %v3707_v61 = vpop.permute.xlu1 %3706  ;;  %v3683_v24 = vunpack.i.l.bf16 %v6163_v26  ;;  %v1896_v43 = vsel %vm1883_vm10, %v3658_v9, %v3663_v23  ;;  %v1897_v3 = vsel %vm1883_vm10, %v3659_v0, %v3664_v15  ;;  %v7349_v10 = vunpack.i.h.bf16 %v6041_v1 }
 0x2e5   : > { %v3709_v36 = vunpack.i.h.bf16 %v3707_v61  ;;  %v3708_v2 = vunpack.i.l.bf16 %v3707_v61  ;;  %3986 = vrot.lane.b32.xlu0 %v7296_v30, %s4028_s10  ;;  %2588 = vmatprep.subr.bf16.mxu0 %v2410_v8  ;;  %v3678_v8 = vunpack.i.l.bf16 %v6129_v41  ;;  %v7346_v61 = vld [vmem:[#allocation29_spill] sm:$0xff] }
 0x2e6   : > { %2661 = vmatpush1.bf16.msra.mxu1 %v2361_v45  ;;  %2589 = vmatpush1.bf16.msra.mxu0 %v2409_v42  ;;  %v3679_v45 = vunpack.i.h.bf16 %v6129_v41  ;;  %v7348_v52 = vpack.c.bf16 %v7346_v61, %v7347_v40  ;;  %v1901_v50 = vsel %vm1883_vm10, %v7349_v10, %v3659_v0  ;;  %v7350_v41 = vunpack.i.l.bf16 %v6041_v1 }
 0x2e7   : > { %2662 = vmatprep.subr.bf16.mxu1 %v2372_v33  ;;  %v2031_v27 = vsel %vm2004_vm11, %v7344_v59, %v3708_v2  ;;  %v2032_v30 = vsel %vm2004_vm11, %v7345_v17, %v3709_v36  ;;  %v6240_v18 = vpop.permute.xlu0 %3711  ;;  %v7139_v59 = vunpack.i.l.bf16 %v6219_v14  ;;  %v3704_v17 = vunpack.i.h.bf16 %v6219_v14 }
 0x2e8   : > { %v2419_v63 = vpack.c.bf16 %v2032_v30, %v2031_v27  ;;  %v3714_v35 = vunpack.i.h.bf16 %v6240_v18  ;;  %v3713_v5 = vunpack.i.l.bf16 %v6240_v18  ;;  %v6245_v31 = vpop.permute.xlu1 %3716  ;;  %v2392_v61 = vpack.c.bf16 %v1897_v3, %v1896_v43 }
 0x2e9   : > { %v1899_v1 = vsel %vm1883_vm10, %v3679_v45, %v3684_v38  ;;  %v3698_v0 = vunpack.i.l.bf16 %v6197_v47  ;;  %v1903_v43 = vsel %vm1883_vm10, %v3674_v34, %v3679_v45  ;;  %v1902_v3 = vsel %vm1883_vm10, %v3673_v16, %v3678_v8 }
 0x2ea   : > { %2663 = vmatpush1.bf16.msra.mxu1 %v2371_v53  ;;  %v2027_v33 = vsel %vm2004_vm11, %v3708_v2, %v3713_v5  ;;  %v2028_v42 = vsel %vm2004_vm11, %v3709_v36, %v3714_v35  ;;  %v1900_v53 = vsel %vm1883_vm10, %v7350_v41, %v3658_v9  ;;  %v1898_v36 = vsel %vm1883_vm10, %v3678_v8, %v3683_v24 }
 0x2eb   : > { %2664 = vmatprep.subr.bf16.mxu1 %v7348_v52  ;;  %v6277_v27 = vpop.permute.xlu0 %3721  ;;  %v2420_v2 = vpack.c.bf16 %v2028_v42, %v2027_v33  ;;  %v7351_v52 = vld [vmem:[#allocation27_spill] sm:$0xff]  ;;  %v7352_v33 = vld [vmem:[#allocation26_spill] sm:$0xff]  ;;  %v3699_v10 = vunpack.i.h.bf16 %v6197_v47  ;;  %v2391_v41 = vpack.c.bf16 %v1901_v50, %v1900_v53  ;;  %v2401_v47 = vpack.c.bf16 %v1903_v43, %v1902_v3 }
 0x2ec   : > { %v3727_v30 = vpop.permute.xlu1 %3726  ;;  %v7353_v42 = vpack.c.bf16 %v7351_v52, %v7352_v33  ;;  %v2402_v33 = vpack.c.bf16 %v1899_v1, %v1898_v36  ;;  %v7137_v34 = vunpack.i.h.bf16 %v6277_v27  ;;  %v7354_v8 = vunpack.i.h.bf16 %v5603_v4 }
 0x2ed   : > { %v3729_v9 = vunpack.i.h.bf16 %v3727_v30  ;;  %v3728_v40 = vunpack.i.l.bf16 %v3727_v30  ;;  %2590 = vmatprep.subr.bf16.mxu0 %v2420_v2  ;;  %v7138_v30 = vunpack.i.l.bf16 %v6277_v27  ;;  %v2017_v2 = vsel %vm2004_vm11, %v3698_v0, %v7139_v59 }
 0x2ee   : > { %2665 = vmatpush1.bf16.msra.mxu1 %v7353_v42  ;;  %2591 = vmatpush1.bf16.msra.mxu0 %v2419_v63  ;;  %v2018_v16 = vsel %vm2004_vm11, %v3699_v10, %v3704_v17  ;;  %v3718_v63 = vunpack.i.l.bf16 %v6245_v31  ;;  %v7355_v53 = vunpack.i.l.bf16 %v5603_v4  ;;  %v2022_v36 = vsel %vm2004_vm11, %v3694_v37, %v3699_v10 }
 0x2ef   : > { %2666 = vmatprep.subr.bf16.mxu1 %v2392_v61  ;;  %v3732_v52 = vpop.permute.xlu0 %3731  ;;  %v2151_v50 = vsel %vm2125_vm12, %v7354_v8, %v3729_v9  ;;  %v3719_v1 = vunpack.i.h.bf16 %v6245_v31  ;;  %v2021_v4 = vsel %vm2004_vm11, %v3693_v28, %v3698_v0  ;;  %v2412_v8 = vpack.c.bf16 %v2018_v16, %v2017_v2 }
 0x2f0   : > { %v3734_v32 = vunpack.i.h.bf16 %v3732_v52  ;;  %v3733_v45 = vunpack.i.l.bf16 %v3732_v52  ;;  %v3737_v42 = vpop.permute.xlu1 %3736  ;;  %v2150_v61 = vsel %vm2125_vm12, %v7355_v53, %v3728_v40  ;;  %v2019_v37 = vsel %vm2004_vm11, %v3718_v63, %v7138_v30 }
 0x2f1   : > { %v2429_v31 = vpack.c.bf16 %v2151_v50, %v2150_v61  ;;  %v2020_v6 = vsel %vm2004_vm11, %v3719_v1, %v7137_v34  ;;  %v3739_v28 = vunpack.i.h.bf16 %v3737_v42  ;;  %v3738_v0 = vunpack.i.l.bf16 %v3737_v42 }
 0x2f2   : > { %2667 = vmatpush1.bf16.msra.mxu1 %v2391_v41  ;;  %v2146_v43 = vsel %vm2125_vm12, %v3728_v40, %v3733_v45  ;;  %v2147_v3 = vsel %vm2125_vm12, %v3729_v9, %v3734_v32  ;;  %v2411_v16 = vpack.c.bf16 %v2022_v36, %v2021_v4  ;;  %v2024_v50 = vsel %vm2004_vm11, %v3714_v35, %v3719_v1 }
 0x2f3   : > { %2668 = vmatprep.subr.bf16.mxu1 %v2402_v33  ;;  %v6333_v41 = vpop.permute.xlu0 %3741  ;;  %v2430_v52 = vpack.c.bf16 %v2147_v3, %v2146_v43  ;;  %v2023_v53 = vsel %vm2004_vm11, %v3713_v5, %v3718_v63  ;;  %v2422_v43 = vpack.c.bf16 %v2020_v6, %v2019_v37  ;;  %v7356_v35 = vunpack.i.l.bf16 %v5627_v7 }
 0x2f4   : > { %v7136_v40 = vunpack.i.h.bf16 %v6333_v41  ;;  %v7135_v10 = vunpack.i.l.bf16 %v6333_v41  ;;  %v3747_v9 = vpop.permute.xlu1 %3746  ;;  %v7357_v36 = vunpack.i.h.bf16 %v5627_v7  ;;  %v2421_v4 = vpack.c.bf16 %v2024_v50, %v2023_v53 }
 0x2f5   : > { %v3749_v33 = vunpack.i.h.bf16 %v3747_v9  ;;  %v3748_v2 = vunpack.i.l.bf16 %v3747_v9  ;;  %2592 = vmatprep.subr.bf16.mxu0 %v2430_v52  ;;  %v2143_v52 = vsel %vm2125_vm12, %v3734_v32, %v3739_v28  ;;  %v2142_v7 = vsel %vm2125_vm12, %v3733_v45, %v3738_v0 }
 0x2f6   : > { %2669 = vmatpush1.bf16.msra.mxu1 %v2401_v47  ;;  %2593 = vmatpush1.bf16.msra.mxu0 %v2429_v31  ;;  %v2138_v42 = vsel %vm2125_vm12, %v3738_v0, %v7135_v10  ;;  %v2139_v47 = vsel %vm2125_vm12, %v3739_v28, %v7136_v40  ;;  %v7375_v40 = vld [vmem:[#allocation68_spill] sm:$0xff] }
 0x2f7   : > { %2670 = vmatprep.subr.bf16.mxu1 %v2412_v8  ;;  %v3752_v61 = vpop.permute.xlu0 %3751  ;;  %v2152_v18 = vsel %vm2125_vm12, %v7356_v35, %v3748_v2  ;;  %v2153_v5 = vsel %vm2125_vm12, %v7357_v36, %v3749_v33 }
 0x2f8   : > { %v3754_v63 = vunpack.i.h.bf16 %v3752_v61  ;;  %v3753_v1 = vunpack.i.l.bf16 %v3752_v61  ;;  %v3757_v3 = vpop.permute.xlu1 %3756  ;;  %v2439_v31 = vpack.c.bf16 %v2153_v5, %v2152_v18  ;;  %v2432_v61 = vpack.c.bf16 %v2139_v47, %v2138_v42 }
 0x2f9   : > { %v3758_v50 = vunpack.i.l.bf16 %v3757_v3 }
 0x2fa   : > { %2671 = vmatpush1.bf16.msra.mxu1 %v2411_v16  ;;  %v2148_v8 = vsel %vm2125_vm12, %v3748_v2, %v3753_v1  ;;  %v2149_v37 = vsel %vm2125_vm12, %v3749_v33, %v3754_v63  ;;  %v3759_v16 = vunpack.i.h.bf16 %v3757_v3  ;;  %v2431_v33 = vpack.c.bf16 %v2143_v52, %v2142_v7 }
 0x2fb   : > { %2672 = vmatprep.subr.bf16.mxu1 %v2422_v43  ;;  %v6377_v9 = vpop.permute.xlu0 %3761  ;;  %v2440_v6 = vpack.c.bf16 %v2149_v37, %v2148_v8  ;;  %v2144_v18 = vsel %vm2125_vm12, %v3753_v1, %v3758_v50  ;;  %v7359_v37 = vunpack.i.l.bf16 %v5691_v56 }
 0x2fc   : > { %v7131_v53 = vunpack.i.h.bf16 %v6377_v9  ;;  %v7132_v32 = vunpack.i.l.bf16 %v6377_v9  ;;  %v3767_v28 = vpop.permute.xlu1 %3766  ;;  %v2145_v35 = vsel %vm2125_vm12, %v3754_v63, %v3759_v16 }
 0x2fd   : > { %v3769_v43 = vunpack.i.h.bf16 %v3767_v28  ;;  %v3768_v2 = vunpack.i.l.bf16 %v3767_v28  ;;  %2594 = vmatprep.subr.bf16.mxu0 %v2440_v6  ;;  %v2441_v6 = vpack.c.bf16 %v2145_v35, %v2144_v18 }
 0x2fe   : > { %2673 = vmatpush1.bf16.msra.mxu1 %v2421_v4  ;;  %2595 = vmatpush1.bf16.msra.mxu0 %v2439_v31  ;;  %v2140_v45 = vsel %vm2125_vm12, %v3758_v50, %v7132_v32  ;;  %v2141_v0 = vsel %vm2125_vm12, %v3759_v16, %v7131_v53  ;;  %v7358_v4 = vunpack.i.h.bf16 %v5691_v56 }
 0x2ff   : > { %2674 = vmatprep.subr.bf16.mxu1 %v2432_v61  ;;  %v3772_v42 = vpop.permute.xlu0 %3771  ;;  %v2442_v47 = vpack.c.bf16 %v2141_v0, %v2140_v45  ;;  %v2271_v52 = vsel %vm2246_vm13, %v7359_v37, %v3768_v2 }
 0x300   : > { %v3774_v36 = vunpack.i.h.bf16 %v3772_v42  ;;  %v3773_v5 = vunpack.i.l.bf16 %v3772_v42  ;;  %v3777_v3 = vpop.permute.xlu1 %3776  ;;  %v2272_v8 = vsel %vm2246_vm13, %v7358_v4, %v3769_v43  ;;  %v7360_v42 = vld [vmem:[#allocation73_spill] sm:$0xff] }
 0x301   : > { %v3779_v7 = vunpack.i.h.bf16 %v3777_v3  ;;  %v3778_v31 = vunpack.i.l.bf16 %v3777_v3  ;;  %2597 = vmatmul.mubr.bf16.vlgmr.msra.gmra.mrb[40].mxu0 %v5847_v19  ;;  %v2449_v16 = vpack.c.bf16 %v2272_v8, %v2271_v52  ;;  %v3368_v35 = vunpack.i.l.bf16 %v7360_v42 }
 0x302   : > { %2675 = vmatpush1.bf16.msra.mxu1 %v2431_v33  ;;  %v2267_v63 = vsel %vm2246_vm13, %v3768_v2, %v3773_v5  ;;  %v2268_v1 = vsel %vm2246_vm13, %v3769_v43, %v3774_v36  ;;  %2637 = vmatprep.mubr.bf16.mxu0 %v7287_v48 }
 0x303   : > { %2676 = vmatprep.subr.bf16.mxu1 %v2442_v47  ;;  %v6407_v61 = vpop.permute.xlu0 %3781  ;;  %v2450_v56 = vpack.c.bf16 %v2268_v1, %v2267_v63  ;;  %v2264_v0 = vsel %vm2246_vm13, %v3774_v36, %v3779_v7  ;;  %v2263_v2 = vsel %vm2246_vm13, %v3773_v5, %v3778_v31  ;;  %v3369_v47 = vunpack.i.h.bf16 %v7360_v42  ;;  %v7361_v5 = vld [vmem:[#allocation74_spill] sm:$0xff] }
 0x304   : > { %v7130_v50 = vunpack.i.h.bf16 %v6407_v61  ;;  %v7129_v28 = vunpack.i.l.bf16 %v6407_v61  ;;  %v3787_v45 = vpop.permute.xlu1 %3786  ;;  %v3389_v3 = vunpack.i.h.bf16 %v7361_v5  ;;  %v3388_v37 = vunpack.i.l.bf16 %v7361_v5 }
 0x305   : > { %v3789_v33 = vunpack.i.h.bf16 %v3787_v45  ;;  %v3788_v43 = vunpack.i.l.bf16 %v3787_v45  ;;  %2605 = vmatprep.subr.bf16.mxu0 %v2450_v56  ;;  %v2451_v52 = vpack.c.bf16 %v2264_v0, %v2263_v2  ;;  %v7362_v56 = vunpack.i.l.bf16 %v5733_v46 }
 0x306   : > { %2677 = vmatpush1.bf16.msra.mxu1 %v2441_v6  ;;  %2606 = vmatpush1.bf16.msra.mxu0 %v2449_v16  ;;  %v2259_v18 = vsel %vm2246_vm13, %v3778_v31, %v7129_v28  ;;  %v2260_v36 = vsel %vm2246_vm13, %v3779_v7, %v7130_v50  ;;  %v7363_v16 = vunpack.i.h.bf16 %v5733_v46 }
 0x307   : > { %v3792_v4 = vpop.permute.xlu0 %3791  ;;  %v2452_v8 = vpack.c.bf16 %v2260_v36, %v2259_v18  ;;  %v2273_v31 = vsel %vm2246_vm13, %v7362_v56, %v3788_v43  ;;  %v7364_v18 = vld [vmem:[#allocation61_spill] sm:$0xff]  ;;  %v7368_v56 = vld [vmem:[#allocation76_spill] sm:$0xff] }
 0x308   : > { %v3794_v63 = vunpack.i.h.bf16 %v3792_v4  ;;  %v3793_v1 = vunpack.i.l.bf16 %v3792_v4  ;;  %v3797_v6 = vpop.permute.xlu1 %3796  ;;  %v2274_v7 = vsel %vm2246_vm13, %v7363_v16, %v3789_v33  ;;  %v7365_v36 = vunpack.i.l.bf16 %v7364_v18 }
 0x309   : > { %2679 = vmatmul.mubr.bf16.vlgmr.msra.gmra.mrb[4].mxu1 %v5847_v19  ;;  %v3799_v45 = vunpack.i.h.bf16 %v3797_v6  ;;  %v3798_v42 = vunpack.i.l.bf16 %v3797_v6  ;;  %2687 = vmatprep.subr.bf16.mxu1 %v2452_v8  ;;  %v7366_v5 = vunpack.i.h.bf16 %v7364_v18  ;;  %v7367_v8 = vld [vmem:[#allocation75_spill] sm:$0xff]  ;;  %v3394_v16 = vunpack.i.h.bf16 %v7368_v56 }
 0x30a   : > { %2719 = vmatprep.mubr.bf16.mxu1 %v7287_v48  ;;  %2688 = vmatpush1.bf16.msra.mxu1 %v2451_v52  ;;  %v2269_v0 = vsel %vm2246_vm13, %v3788_v43, %v3793_v1  ;;  %v2270_v2 = vsel %vm2246_vm13, %v3789_v33, %v3794_v63  ;;  %v1408_v46 = vsel %vm1399_vm5, %v7365_v36, %v3368_v35  ;;  %v3374_v6 = vunpack.i.h.bf16 %v7367_v8 }
 0x30b   : > { %v1409_v4 = vsel %vm1399_vm5, %v7366_v5, %v3369_v47  ;;  %v3373_v52 = vunpack.i.l.bf16 %v7367_v8  ;;  %v6452_v43 = vpop.permute.xlu0 %3801  ;;  %v2460_v28 = vpack.c.bf16 %v2270_v2, %v2269_v0  ;;  %v3393_v33 = vunpack.i.l.bf16 %v7368_v56 }
 0x30c   : > { %v2459_v50 = vpack.c.bf16 %v2274_v7, %v2273_v31  ;;  %v7133_v53 = vunpack.i.h.bf16 %v6452_v43  ;;  %v7134_v36 = vunpack.i.l.bf16 %v6452_v43  ;;  %v3807_v18 = vpop.permute.xlu1 %3806  ;;  %v2266_v5 = vsel %vm2246_vm13, %v3794_v63, %v3799_v45  ;;  %v7369_v7 = vld [vmem:[#allocation62_spill] sm:$0xff] }
 0x30d   : > { %v2265_v32 = vsel %vm2246_vm13, %v3793_v1, %v3798_v42  ;;  %2607 = vmatprep.subr.bf16.mxu0 %v2460_v28  ;;  %v2294_v8 = vpack.c.bf16 %v1409_v4, %v1408_v46  ;;  %v7370_v2 = vunpack.i.l.bf16 %v7369_v7  ;;  %v7371_v1 = vunpack.i.h.bf16 %v7369_v7  ;;  %v7372_v4 = vld [vmem:[#allocation67_spill] sm:$0xff] }
 0x30e   : > { %2608 = vmatpush1.bf16.msra.mxu0 %v2459_v50  ;;  %v2261_v0 = vsel %vm2246_vm13, %v3798_v42, %v7134_v36  ;;  %v2262_v31 = vsel %vm2246_vm13, %v3799_v45, %v7133_v53  ;;  %v3398_v28 = vunpack.i.l.bf16 %v5329_v25  ;;  %v7373_v56 = vunpack.i.l.bf16 %v7372_v4 }
 0x30f   : > { %v1410_v63 = vsel %vm1399_vm5, %v7370_v2, %v3388_v37  ;;  %v1411_v50 = vsel %vm1399_vm5, %v7371_v1, %v3389_v3  ;;  %v1511_v46 = vpop.permute.xlu0 %1510  ;;  %2728 = vmatprep.subr.bf16.mxu0 %v2294_v8  ;;  %v2462_v42 = vpack.c.bf16 %v2262_v31, %v2261_v0  ;;  %v7374_v53 = vunpack.i.h.bf16 %v7372_v4  ;;  %v7378_v31 = vld [vmem:[#allocation78_spill] sm:$0xff] }
 0x310   : > { %v1529_v45 = vsel %vm1520_vm6, %v7373_v56, %v3373_v52  ;;  %v2461_v36 = vpack.c.bf16 %v2266_v5, %v2265_v32  ;;  %v3808_v7 = vunpack.i.l.bf16 %v3807_v18  ;;  %v3812_v10 = vpop.permute.xlu1 %3811  ;;  %v7376_v1 = vunpack.i.l.bf16 %v7375_v40 }
 0x311   : > { %v1530_v2 = vsel %vm1520_vm6, %v7374_v53, %v3374_v6  ;;  %v7377_v8 = vunpack.i.h.bf16 %v7375_v40  ;;  %v7379_v56 = vunpack.i.h.bf16 %v7378_v31  ;;  %v7380_v53 = vunpack.i.l.bf16 %v7378_v31  ;;  %3098 = vmatmul.mubr.msk.bf16.vlgmr.msra.gmra.mrb[40].mxu0 %vm703_vm7, %v5952_v54  ;;  %2689 = vmatprep.subr.bf16.mxu1 %v2462_v42  ;;  %v7381_v40 = vld [vmem:[#allocation79_spill] sm:$0xff]  ;;  %v7388_v42 = vld [vmem:[#allocation80_spill] sm:$0xff] }
 0x312   : > { %v1531_v34 = vsel %vm1520_vm6, %v7376_v1, %v3393_v33  ;;  %v3809_v5 = vunpack.i.h.bf16 %v3807_v18  ;;  %v2304_v1 = vpack.c.bf16 %v1411_v50, %v1410_v63  ;;  %v7382_v30 = vunpack.i.h.bf16 %v7381_v40  ;;  %2690 = vmatpush1.bf16.msra.mxu1 %v2461_v36  ;;  %v7384_v31 = vld [vmem:[#allocation63_spill] sm:$0xff]  ;;  %v7387_v50 = vld [vmem:[#allocation81_spill] sm:$0xff]  ;;  %2760 = vmatprep.mubr.bf16.mxu0 %v7302_v58 }
 0x313   : > { %v1532_v0 = vsel %vm1520_vm6, %v7377_v8, %v3394_v16  ;;  %v1405_v4 = vsel %vm1399_vm5, %v3369_v47, %v7379_v56  ;;  %v1404_v32 = vsel %vm1399_vm5, %v3368_v35, %v7380_v53  ;;  %v7383_v59 = vunpack.i.l.bf16 %v7381_v40  ;;  %v7385_v56 = vld [vmem:[#allocation64_spill] sm:$0xff]  ;;  %v3817_v63 = vpop.permute.xlu0 %3816 }
 0x314   : > { %v1407_v8 = vsel %vm1399_vm5, %v3389_v3, %v7382_v30  ;;  %v7386_v35 = vpack.c.bf16 %v7384_v31, %v7385_v56  ;;  %v6517_v18 = vsel %vm1520_vm6, %v3373_v52, %v3398_v28  ;;  %v7389_v53 = vpack.c.bf16 %v7387_v50, %v7388_v42  ;;  %v3822_v40 = vpop.permute.xlu1 %3821 }
 0x315   : > { %v1406_v47 = vsel %vm1399_vm5, %v3388_v37, %v7383_v59  ;;  %v2314_v30 = vpack.c.bf16 %v1530_v2, %v1529_v45  ;;  %v2324_v3 = vpack.c.bf16 %v1532_v0, %v1531_v34  ;;  %v1526_v59 = vsel %vm1520_vm6, %v3374_v6, %v3808_v7  ;;  %3099 = vmatmul.mubr.msk.bf16.vlgmr.msra.gmra.mrb[4].mxu1 %vm703_vm7, %v5952_v54 }
 0x316   : > { %2729 = vmatpush1.bf16.msra.mxu0 %v7386_v35  ;;  %2810 = vmatprep.subr.bf16.mxu1 %v7389_v53  ;;  %v3814_v37 = vunpack.i.h.bf16 %v3812_v10  ;;  %v3813_v36 = vunpack.i.l.bf16 %v3812_v10  ;;  %v2295_v31 = vpack.c.bf16 %v1405_v4, %v1404_v32  ;;  %v7390_v52 = vunpack.i.h.bf16 %v5347_v60  ;;  %v7392_v4 = vld [vmem:[#allocation65_spill] sm:$0xff]  ;;  %v7393_v32 = vld [vmem:[#allocation66_spill] sm:$0xff] }
 0x317   : > { %2730 = vmatprep.subr.bf16.mxu0 %v2304_v1  ;;  %v6531_v56 = vsel %vm1520_vm6, %v3393_v33, %v3809_v5  ;;  %v2305_v34 = vpack.c.bf16 %v1407_v8, %v1406_v47  ;;  %v7391_v6 = vunpack.i.h.bf16 %v5329_v25  ;;  %v6541_v45 = vsel %vm1520_vm6, %v3394_v16, %v1511_v46  ;;  %v3827_v8 = vpop.permute.xlu0 %3826  ;;  %v7396_v47 = vld [vmem:[#allocation83_spill] sm:$0xff]  ;;  %2842 = vmatprep.mubr.bf16.mxu1 %v7302_v58 }
 0x318   : > { %v1523_v1 = vsel %vm1520_vm6, %v3809_v5, %v7390_v52  ;;  %v3819_v2 = vunpack.i.h.bf16 %v3817_v63  ;;  %v3818_v0 = vunpack.i.l.bf16 %v3817_v63  ;;  %v7394_v35 = vpack.c.bf16 %v7392_v4, %v7393_v32  ;;  %2811 = vmatpush1.bf16.msra.mxu1 %v2295_v31  ;;  %v7397_v63 = vld [vmem:[#allocation82_spill] sm:$0xff] }
 0x319   : > { %v1521_v10 = vsel %vm1520_vm6, %v3398_v28, %v7391_v6  ;;  %v7395_v33 = vunpack.i.l.bf16 %v5347_v60  ;;  %v2315_v25 = vpack.c.bf16 %v1526_v59, %v6517_v18  ;;  %v1524_v28 = vsel %vm1520_vm6, %v1511_v46, %v5485_v13  ;;  %v3832_v46 = vpop.permute.xlu1 %3831  ;;  %v7401_v6 = vld [vmem:[#allocation69_spill] sm:$0xff]  ;;  %v7402_v4 = vld [vmem:[#allocation70_spill] sm:$0xff] }
 0x31a   : > { %2731 = vmatpush1.bf16.msra.mxu0 %v7394_v35  ;;  %v3824_v16 = vunpack.i.h.bf16 %v3822_v40  ;;  %v3823_v5 = vunpack.i.l.bf16 %v3822_v40  ;;  %v7398_v50 = vpack.c.bf16 %v7396_v47, %v7397_v63  ;;  %v7399_v42 = vunpack.i.h.bf16 %v5823_v20 }
 0x31b   : > { %v1522_v54 = vsel %vm1520_vm6, %v3808_v7, %v7395_v33  ;;  %2732 = vmatprep.subr.bf16.mxu0 %v2314_v30  ;;  %v7400_v7 = vunpack.i.l.bf16 %v5823_v20  ;;  %v3829_v53 = vunpack.i.h.bf16 %v3827_v8  ;;  %v3828_v13 = vunpack.i.l.bf16 %v3827_v8  ;;  %v3837_v33 = vpop.permute.xlu0 %3836 }
 0x31c   : > { %2812 = vmatprep.subr.bf16.mxu1 %v7398_v50  ;;  %v1655_v60 = vsel %vm1641_vm8, %v7399_v42, %v3814_v37  ;;  %v2325_v30 = vpack.c.bf16 %v6541_v45, %v6531_v56  ;;  %v3834_v59 = vunpack.i.h.bf16 %v3832_v46  ;;  %v3833_v40 = vunpack.i.l.bf16 %v3832_v46  ;;  %v7404_v56 = vld [vmem:[#allocation77_spill] sm:$0xff] }
 0x31d   : > { %v1654_v18 = vsel %vm1641_vm8, %v7400_v7, %v3813_v36  ;;  %v2316_v31 = vpack.c.bf16 %v1522_v54, %v1521_v10  ;;  %v2326_v52 = vpack.c.bf16 %v1524_v28, %v1523_v1  ;;  %v7403_v32 = vpack.c.bf16 %v7401_v6, %v7402_v4  ;;  %2813 = vmatpush1.bf16.msra.mxu1 %v2305_v34  ;;  %v3842_v28 = vpop.permute.xlu1 %3841 }
 0x31e   : > { %v1650_v20 = vsel %vm1641_vm8, %v3813_v36, %v3818_v0  ;;  %v1651_v35 = vsel %vm1641_vm8, %v3814_v37, %v3819_v2  ;;  %v2333_v58 = vpack.c.bf16 %v1655_v60, %v1654_v18  ;;  %v7405_v45 = vunpack.i.l.bf16 %v7404_v56 }
 0x31f   : > { %2733 = vmatpush1.bf16.msra.mxu0 %v7403_v32  ;;  %2814 = vmatprep.subr.bf16.mxu1 %v2316_v31  ;;  %v7406_v10 = vunpack.i.h.bf16 %v7404_v56  ;;  %v3839_v54 = vunpack.i.h.bf16 %v3837_v33  ;;  %v3838_v36 = vunpack.i.l.bf16 %v3837_v33  ;;  %v1652_v37 = vsel %vm1641_vm8, %v3828_v13, %v3833_v40  ;;  %v7409_v31 = vld [vmem:[#allocation71_spill] sm:$0xff]  ;;  %v3847_v4 = vpop.permute.xlu0 %3846 }
 0x320   : > { %2734 = vmatprep.subr.bf16.mxu0 %v2324_v3  ;;  %v1642_v1 = vsel %vm1641_vm8, %v3823_v5, %v7405_v45  ;;  %v1653_v3 = vsel %vm1641_vm8, %v3829_v53, %v3834_v59  ;;  %v1647_v8 = vsel %vm1641_vm8, %v3819_v2, %v3824_v16  ;;  %v3844_v47 = vunpack.i.h.bf16 %v3842_v28  ;;  %v7410_v2 = vld [vmem:[#allocation72_spill] sm:$0xff] }
 0x321   : > { %v1643_v34 = vsel %vm1641_vm8, %v3824_v16, %v7406_v10  ;;  %v3843_v63 = vunpack.i.l.bf16 %v3842_v28  ;;  %v2334_v50 = vpack.c.bf16 %v1651_v35, %v1650_v20  ;;  %v1646_v42 = vsel %vm1641_vm8, %v3818_v0, %v3823_v5  ;;  %2815 = vmatpush1.bf16.msra.mxu1 %v2315_v25  ;;  %v3852_v20 = vpop.permute.xlu1 %3851 }
 0x322   : > { %v7407_v60 = vunpack.i.l.bf16 %v5893_v51  ;;  %v7408_v18 = vunpack.i.h.bf16 %v5893_v51  ;;  %v7411_v16 = vpack.c.bf16 %v7409_v31, %v7410_v2  ;;  %v1648_v6 = vsel %vm1641_vm8, %v3833_v40, %v3838_v36  ;;  %2816 = vmatprep.subr.bf16.mxu1 %v2326_v52 }
 0x323   : > { %v2344_v0 = vpack.c.bf16 %v1653_v3, %v1652_v37  ;;  %v2336_v5 = vpack.c.bf16 %v1643_v34, %v1642_v1  ;;  %v3849_v51 = vunpack.i.h.bf16 %v3847_v4  ;;  %v3848_v32 = vunpack.i.l.bf16 %v3847_v4 }
 0x324   : > { %v1656_v7 = vsel %vm1641_vm8, %v7407_v60, %v3828_v13  ;;  %v1657_v46 = vsel %vm1641_vm8, %v7408_v18, %v3829_v53  ;;  %2735 = vmatpush1.bf16.msra.mxu0 %v7411_v16  ;;  %v1649_v13 = vsel %vm1641_vm8, %v3834_v59, %v3839_v54  ;;  %v7412_v53 = vunpack.i.l.bf16 %v5529_v62 }
 0x325   : > { %2736 = vmatprep.subr.bf16.mxu0 %v2334_v50  ;;  %v7413_v25 = vunpack.i.h.bf16 %v5947_v21  ;;  %v7414_v52 = vunpack.i.l.bf16 %v5947_v21  ;;  %v7415_v59 = vunpack.i.h.bf16 %v5529_v62  ;;  %v3854_v45 = vunpack.i.h.bf16 %v3852_v20  ;;  %2817 = vmatpush1.bf16.msra.mxu1 %v2325_v30  ;;  %v3862_v3 = vpop.permute.xlu1 %3861 }
 0x326   : > { %v1644_v35 = vsel %vm1641_vm8, %v3838_v36, %v7412_v53  ;;  %v3853_v1 = vunpack.i.l.bf16 %v3852_v20  ;;  %v1771_v10 = vsel %vm1762_vm9, %v3843_v63, %v3848_v32  ;;  %v1772_v34 = vsel %vm1762_vm9, %v3844_v47, %v3849_v51  ;;  %2818 = vmatprep.subr.bf16.mxu1 %v2336_v5 }
 0x327   : > { %v1776_v40 = vsel %vm1762_vm9, %v7413_v25, %v3844_v47  ;;  %v1775_v33 = vsel %vm1762_vm9, %v7414_v52, %v3843_v63  ;;  %v1645_v56 = vsel %vm1641_vm8, %v3839_v54, %v7415_v59  ;;  %v4029_v62 = vmov 0.0|0.0  }
 0x328   : > { %2737 = vmatpush1.bf16.msra.mxu0 %v2333_v58  ;;  %2967 = vst [vmem:[%s6628_s27 + $0x28] sm:$0xff] %v4029_v62  ;;  %2968 = vst [vmem:[%s6628_s27 + $0x30] sm:$0xff] %v4029_v62  ;;  %v2335_v21 = vpack.c.bf16 %v1647_v8, %v1646_v42  ;;  %v2343_v30 = vpack.c.bf16 %v1657_v46, %v1656_v7  ;;  %v3857_v58 = vpop.permute.xlu0 %3856  ;;  %v2345_v54 = vpack.c.bf16 %v1649_v13, %v1648_v6 }
 0x329   : > { %2969 = vst [vmem:[%s6628_s27 + $0x38] sm:$0xff] %v4029_v62  ;;  %2970 = vst [vmem:[%s6628_s27 + $0x40] sm:$0xff] %v4029_v62  ;;  %2738 = vmatprep.subr.bf16.mxu0 %v2344_v0  ;;  %v2353_v36 = vpack.c.bf16 %v1776_v40, %v1775_v33  ;;  %v3859_v28 = vunpack.i.h.bf16 %v3857_v58  ;;  %v3858_v37 = vunpack.i.l.bf16 %v3857_v58  ;;  %v3864_v47 = vunpack.i.h.bf16 %v3862_v3  ;;  %v3872_v13 = vpop.permute.xlu1 %3871  ;;  %v7420_v58 = vld [vmem:[#allocation34_spill] sm:$0xff] }
 0x32a   : > { %2971 = vst [vmem:[%s6628_s27 + $0x48] sm:$0xff] %v4029_v62  ;;  %v3863_v63 = vunpack.i.l.bf16 %v3862_v3  ;;  %v2354_v50 = vpack.c.bf16 %v1772_v34, %v1771_v10  ;;  %v2346_v60 = vpack.c.bf16 %v1645_v56, %v1644_v35  ;;  %v1768_v18 = vsel %vm1762_vm9, %v3849_v51, %v3854_v45  ;;  %2819 = vmatpush1.bf16.msra.mxu1 %v2335_v21 }
 0x32b   : > { %v7416_v8 = vunpack.i.l.bf16 %v5339_v39  ;;  %v7417_v7 = vunpack.i.h.bf16 %v5339_v39  ;;  %v1767_v31 = vsel %vm1762_vm9, %v3848_v32, %v3853_v1  ;;  %v1774_v6 = vsel %vm1762_vm9, %v3859_v28, %v3864_v47 }
 0x32c   : > { %2739 = vmatpush1.bf16.msra.mxu0 %v2343_v30  ;;  %v3867_v2 = vpop.permute.xlu0 %3866  ;;  %2820 = vmatprep.subr.bf16.mxu1 %v2346_v60  ;;  %v1773_v16 = vsel %vm1762_vm9, %v3858_v37, %v3863_v63  ;;  %v1777_v39 = vsel %vm1762_vm9, %v3643_v29, %v3858_v37  ;;  %v1778_v4 = vsel %vm1762_vm9, %v3644_v49, %v3859_v28  ;;  %v7418_v20 = vunpack.i.l.bf16 %v5585_v22  ;;  %v7423_v60 = vld [vmem:[#allocation32_spill] sm:$0xff] }
 0x32d   : > { %v1763_v42 = vsel %vm1762_vm9, %v3853_v1, %v7416_v8  ;;  %v1764_v46 = vsel %vm1762_vm9, %v3854_v45, %v7417_v7  ;;  %2740 = vmatprep.subr.bf16.mxu0 %v2354_v50  ;;  %v3869_v0 = vunpack.i.h.bf16 %v3867_v2  ;;  %v3868_v5 = vunpack.i.l.bf16 %v3867_v2  ;;  %v3882_v33 = vpop.permute.xlu1 %3881  ;;  %v7427_v7 = vld [vmem:[#allocation52_spill] sm:$0xff] }
 0x32e   : > { %v2364_v51 = vpack.c.bf16 %v1774_v6, %v1773_v16  ;;  %v2356_v32 = vpack.c.bf16 %v1764_v46, %v1763_v42  ;;  %2821 = vmatpush1.bf16.msra.mxu1 %v2345_v54  ;;  %v2355_v35 = vpack.c.bf16 %v1768_v18, %v1767_v31  ;;  %v2363_v25 = vpack.c.bf16 %v1778_v4, %v1777_v39  ;;  %v7421_v54 = vld [vmem:[#allocation33_spill] sm:$0xff]  ;;  %v7424_v18 = vld [vmem:[#allocation31_spill] sm:$0xff]  ;;  %v7428_v6 = vld [vmem:[#allocation40_spill] sm:$0xff] }
 0x32f   : > { %v1765_v53 = vsel %vm1762_vm9, %v3868_v5, %v7418_v20  ;;  %v1769_v55 = vsel %vm1762_vm9, %v3863_v63, %v3868_v5  ;;  %v1770_v49 = vsel %vm1762_vm9, %v3864_v47, %v3869_v0  ;;  %v7419_v59 = vunpack.i.h.bf16 %v5585_v22  ;;  %v7426_v42 = vld [vmem:[#allocation51_spill] sm:$0xff]  ;;  %v7434_v20 = vld [vmem:[#allocation85_spill] sm:$0xff] }
 0x330   : > { %2741 = vmatpush1.bf16.msra.mxu0 %v2353_v36  ;;  %v3877_v29 = vpop.permute.xlu0 %3876  ;;  %2822 = vmatprep.subr.bf16.mxu1 %v2356_v32  ;;  %v3874_v1 = vunpack.i.h.bf16 %v3872_v13  ;;  %v3873_v10 = vunpack.i.l.bf16 %v3872_v13  ;;  %v2365_v34 = vpack.c.bf16 %v1770_v49, %v1769_v55  ;;  %v3884_v62 = vunpack.i.h.bf16 %v3882_v33  ;;  %v7429_v39 = vld [vmem:[#allocation39_spill] sm:$0xff] }
 0x331   : > { %2742 = vmatprep.subr.bf16.mxu0 %v2364_v51  ;;  %v3879_v40 = vunpack.i.h.bf16 %v3877_v29  ;;  %v3878_v52 = vunpack.i.l.bf16 %v3877_v29  ;;  %v1766_v56 = vsel %vm1762_vm9, %v3869_v0, %v7419_v59  ;;  %v3883_v21 = vunpack.i.l.bf16 %v3882_v33  ;;  %v6674_v22 = vpop.permute.xlu1 %3891  ;;  %v7431_v0 = vld [vmem:[#allocation45_spill] sm:$0xff]  ;;  %v7432_v5 = vld [vmem:[#allocation43_spill] sm:$0xff] }
 0x332   : > { %v2366_v45 = vpack.c.bf16 %v1766_v56, %v1765_v53  ;;  %2823 = vmatpush1.bf16.msra.mxu1 %v2355_v35  ;;  %v7422_v36 = vpack.c.bf16 %v7420_v58, %v7421_v54  ;;  %v3894_v63 = vunpack.i.h.bf16 %v6674_v22  ;;  %v3893_v50 = vunpack.i.l.bf16 %v6674_v22  ;;  %v7441_v58 = vld [vmem:[#allocation42_spill] sm:$0xff] }
 0x333   : > { %v1888_v3 = vsel %vm1883_vm10, %v3873_v10, %v3878_v52  ;;  %v1889_v47 = vsel %vm1883_vm10, %v3874_v1, %v3879_v40  ;;  %v7425_v8 = vpack.c.bf16 %v7423_v60, %v7424_v18  ;;  %v2385_v46 = vpack.c.bf16 %v7427_v7, %v7426_v42 }
 0x334   : > { %2743 = vmatpush1.bf16.msra.mxu0 %v2363_v25  ;;  %v3887_v30 = vpop.permute.xlu0 %3886  ;;  %2824 = vmatprep.subr.bf16.mxu1 %v2366_v45  ;;  %v1893_v31 = vsel %vm1883_vm10, %v3664_v15, %v3874_v1  ;;  %v1892_v2 = vsel %vm1883_vm10, %v3663_v23, %v3873_v10  ;;  %v7430_v4 = vpack.c.bf16 %v7428_v6, %v7429_v39  ;;  %v7435_v23 = vunpack.i.l.bf16 %v7434_v20  ;;  %v7437_v1 = vld [vmem:[#allocation38_spill] sm:$0xff]  ;;  %v7438_v10 = vld [vmem:[#allocation37_spill] sm:$0xff] }
 0x335   : > { %2744 = vmatprep.subr.bf16.mxu0 %v7422_v36  ;;  %v3889_v28 = vunpack.i.h.bf16 %v3887_v30  ;;  %v3888_v37 = vunpack.i.l.bf16 %v3887_v30  ;;  %v7433_v13 = vpack.c.bf16 %v7431_v0, %v7432_v5  ;;  %v2394_v51 = vpack.c.bf16 %v1889_v47, %v1888_v3  ;;  %v3897_v32 = vpop.permute.xlu1 %3896  ;;  %v7440_v30 = vld [vmem:[#allocation44_spill] sm:$0xff] }
 0x336   : > { %2825 = vmatpush1.bf16.msra.mxu1 %v2365_v34  ;;  %v1920_v53 = vsel %vm1883_vm10, %v3883_v21, %v7435_v23  ;;  %v7436_v35 = vunpack.i.h.bf16 %v7434_v20  ;;  %v3899_v49 = vunpack.i.h.bf16 %v3897_v32  ;;  %v3898_v33 = vunpack.i.l.bf16 %v3897_v32  ;;  %v7448_v32 = vld [vmem:[#allocation86_spill] sm:$0xff] }
 0x337   : > { %2826 = vmatprep.subr.bf16.mxu1 %v7433_v13  ;;  %v1890_v15 = vsel %vm1883_vm10, %v3888_v37, %v3893_v50  ;;  %v1891_v11 = vsel %vm1883_vm10, %v3889_v28, %v3894_v63  ;;  %v2393_v59 = vpack.c.bf16 %v1893_v31, %v1892_v2  ;;  %v1885_v56 = vsel %vm1883_vm10, %v3879_v40, %v3884_v62 }
 0x338   : > { %2745 = vmatpush1.bf16.msra.mxu0 %v7425_v8  ;;  %v6695_v16 = vpop.permute.xlu0 %3901  ;;  %v1921_v25 = vsel %vm1883_vm10, %v3884_v62, %v7436_v35  ;;  %v1884_v45 = vsel %vm1883_vm10, %v3878_v52, %v3883_v21  ;;  %v7439_v34 = vpack.c.bf16 %v7437_v1, %v7438_v10  ;;  %v7442_v54 = vpack.c.bf16 %v7440_v30, %v7441_v58  ;;  %v7443_v52 = vld [vmem:[#allocation49_spill] sm:$0xff]  ;;  %v7444_v21 = vld [vmem:[#allocation48_spill] sm:$0xff] }
 0x339   : > { %2746 = vmatprep.subr.bf16.mxu0 %v7430_v4  ;;  %v3904_v55 = vunpack.i.h.bf16 %v6695_v16  ;;  %v3903_v29 = vunpack.i.l.bf16 %v6695_v16  ;;  %v1894_v36 = vsel %vm1883_vm10, %v3683_v24, %v3888_v37  ;;  %v1895_v40 = vsel %vm1883_vm10, %v3684_v38, %v3889_v28  ;;  %v3907_v37 = vpop.permute.xlu1 %3906  ;;  %v7451_v35 = vld [vmem:[#allocation84_spill] sm:$0xff] }
 0x33a   : > { %2827 = vmatpush1.bf16.msra.mxu1 %v7442_v54  ;;  %v7445_v22 = vpack.c.bf16 %v7443_v52, %v7444_v21  ;;  %v2396_v3 = vpack.c.bf16 %v1921_v25, %v1920_v53  ;;  %v2014_v47 = vsel %vm2004_vm11, %v3704_v17, %v3899_v49  ;;  %v7446_v60 = vunpack.i.l.bf16 %v6219_v14 }
 0x33b   : > { %v2404_v38 = vpack.c.bf16 %v1891_v11, %v1890_v15  ;;  %v3909_v28 = vunpack.i.h.bf16 %v3907_v37  ;;  %v3908_v18 = vunpack.i.l.bf16 %v3907_v37  ;;  %v2009_v8 = vsel %vm2004_vm11, %v3898_v33, %v3903_v29 }
 0x33c   : > { %2747 = vmatpush1.bf16.msra.mxu0 %v7439_v34  ;;  %v3912_v62 = vpop.permute.xlu0 %3911  ;;  %2828 = vmatprep.subr.bf16.mxu1 %v7445_v22  ;;  %v2013_v26 = vsel %vm2004_vm11, %v7446_v60, %v3898_v33  ;;  %v2010_v42 = vsel %vm2004_vm11, %v3899_v49, %v3904_v55  ;;  %v2395_v7 = vpack.c.bf16 %v1885_v56, %v1884_v45  ;;  %v7447_v16 = vunpack.i.l.bf16 %v6277_v27 }
 0x33d   : > { %2748 = vmatprep.subr.bf16.mxu0 %v2394_v51  ;;  %v3913_v24 = vunpack.i.l.bf16 %v3912_v62  ;;  %v2403_v17 = vpack.c.bf16 %v1895_v40, %v1894_v36  ;;  %v2413_v31 = vpack.c.bf16 %v2014_v47, %v2013_v26  ;;  %v3914_v14 = vunpack.i.h.bf16 %v3912_v62  ;;  %v3917_v0 = vpop.permute.xlu1 %3916 }
 0x33e   : > { %2829 = vmatpush1.bf16.msra.mxu1 %v2385_v46  ;;  %v2414_v5 = vpack.c.bf16 %v2010_v42, %v2009_v8  ;;  %v3919_v13 = vunpack.i.h.bf16 %v3917_v0  ;;  %v3918_v51 = vunpack.i.l.bf16 %v3917_v0  ;;  %v7449_v46 = vunpack.i.l.bf16 %v7448_v32 }
 0x33f   : > { %2830 = vmatprep.subr.bf16.mxu1 %v2396_v3  ;;  %v2015_v6 = vsel %vm2004_vm11, %v7447_v16, %v3913_v24  ;;  %v7450_v11 = vunpack.i.h.bf16 %v7448_v32  ;;  %v7452_v25 = vunpack.i.l.bf16 %v7451_v35  ;;  %v7453_v56 = vunpack.i.h.bf16 %v7451_v35 }
 0x340   : > { %2749 = vmatpush1.bf16.msra.mxu0 %v2393_v59  ;;  %v3927_v2 = vpop.permute.xlu0 %3926  ;;  %v2041_v15 = vsel %vm2004_vm11, %v3908_v18, %v7449_v46  ;;  %v7454_v1 = vunpack.i.h.bf16 %v6277_v27  ;;  %v2006_v52 = vsel %vm2004_vm11, %v3904_v55, %v3909_v28  ;;  %v2005_v21 = vsel %vm2004_vm11, %v3903_v29, %v3908_v18 }
 0x341   : > { %2750 = vmatprep.subr.bf16.mxu0 %v2404_v38  ;;  %v3929_v39 = vunpack.i.h.bf16 %v3927_v2  ;;  %v3928_v4 = vunpack.i.l.bf16 %v3927_v2  ;;  %v2042_v20 = vsel %vm2004_vm11, %v3909_v28, %v7450_v11  ;;  %v3922_v58 = vpop.permute.xlu1 %3921  ;;  %v7455_v3 = vunpack.i.h.bf16 %v6333_v41 }
 0x342   : > { %2831 = vmatpush1.bf16.msra.mxu1 %v2395_v7  ;;  %v2016_v10 = vsel %vm2004_vm11, %v7454_v1, %v3914_v14  ;;  %v3924_v36 = vunpack.i.h.bf16 %v3922_v58  ;;  %v3923_v40 = vunpack.i.l.bf16 %v3922_v58  ;;  %v2416_v22 = vpack.c.bf16 %v2042_v20, %v2041_v15 }
 0x343   : > { %v1886_v23 = vsel %vm1883_vm10, %v3893_v50, %v3928_v4  ;;  %v1887_v53 = vsel %vm1883_vm10, %v3894_v63, %v3929_v39  ;;  %v1922_v49 = vsel %vm1883_vm10, %v3928_v4, %v7452_v25  ;;  %v1923_v45 = vsel %vm1883_vm10, %v3929_v39, %v7453_v56 }
 0x344   : > { %2751 = vmatpush1.bf16.msra.mxu0 %v2403_v17  ;;  %v2405_v33 = vpack.c.bf16 %v1887_v53, %v1886_v23  ;;  %v3932_v59 = vpop.permute.xlu0 %3931  ;;  %v2011_v50 = vsel %vm2004_vm11, %v3913_v24, %v3918_v51  ;;  %v2012_v63 = vsel %vm2004_vm11, %v3914_v14, %v3919_v13  ;;  %v2406_v54 = vpack.c.bf16 %v1923_v45, %v1922_v49  ;;  %v7460_v23 = vld [vmem:[#allocation88_spill] sm:$0xff] }
 0x345   : > { %2752 = vmatprep.subr.bf16.mxu0 %v2414_v5  ;;  %v3934_v34 = vunpack.i.h.bf16 %v3932_v59  ;;  %v3933_v30 = vunpack.i.l.bf16 %v3932_v59  ;;  %v2424_v62 = vpack.c.bf16 %v2012_v63, %v2011_v50  ;;  %v2423_v27 = vpack.c.bf16 %v2016_v10, %v2015_v6  ;;  %v3937_v38 = vpop.permute.xlu1 %3936 }
 0x346   : > { %2832 = vmatprep.subr.bf16.mxu1 %v2406_v54  ;;  %v2135_v47 = vsel %vm2125_vm12, %v7455_v3, %v3924_v36  ;;  %v7456_v55 = vunpack.i.l.bf16 %v6333_v41  ;;  %v2415_v18 = vpack.c.bf16 %v2006_v52, %v2005_v21  ;;  %v3939_v8 = vunpack.i.h.bf16 %v3937_v38 }
 0x347   : > { %2833 = vmatpush1.bf16.msra.mxu1 %v2405_v33  ;;  %v2130_v26 = vsel %vm2125_vm12, %v3923_v40, %v3933_v30  ;;  %v2131_v28 = vsel %vm2125_vm12, %v3924_v36, %v3934_v34  ;;  %v3938_v42 = vunpack.i.l.bf16 %v3937_v38  ;;  %v7461_v53 = vunpack.i.l.bf16 %v7460_v23 }
 0x348   : > { %2753 = vmatpush1.bf16.msra.mxu0 %v2413_v31  ;;  %v3942_v60 = vpop.permute.xlu0 %3941  ;;  %v2134_v29 = vsel %vm2125_vm12, %v7456_v55, %v3923_v40  ;;  %2834 = vmatprep.subr.bf16.mxu1 %v2416_v22  ;;  %v2434_v7 = vpack.c.bf16 %v2131_v28, %v2130_v26  ;;  %v7457_v31 = vld [vmem:[#allocation87_spill] sm:$0xff]  ;;  %v2127_v0 = vsel %vm2125_vm12, %v3934_v34, %v3939_v8  ;;  %v7462_v25 = vunpack.i.h.bf16 %v7460_v23 }
 0x349   : > { %2754 = vmatprep.subr.bf16.mxu0 %v2424_v62  ;;  %v3944_v24 = vunpack.i.h.bf16 %v3942_v60  ;;  %v3943_v37 = vunpack.i.l.bf16 %v3942_v60  ;;  %v7458_v14 = vunpack.i.l.bf16 %v7457_v31  ;;  %v7459_v16 = vunpack.i.h.bf16 %v7457_v31  ;;  %v3952_v46 = vpop.permute.xlu1 %3951 }
 0x34a   : > { %v2433_v39 = vpack.c.bf16 %v2135_v47, %v2134_v29  ;;  %v3954_v11 = vunpack.i.h.bf16 %v3952_v46  ;;  %v3953_v20 = vunpack.i.l.bf16 %v3952_v46  ;;  %v2162_v35 = vsel %vm2125_vm12, %v3938_v42, %v7461_v53 }
 0x34b   : > { %v2007_v17 = vsel %vm2004_vm11, %v3918_v51, %v3943_v37  ;;  %v2008_v41 = vsel %vm2004_vm11, %v3919_v13, %v3944_v24  ;;  %v2043_v2 = vsel %vm2004_vm11, %v3943_v37, %v7458_v14  ;;  %v2044_v6 = vsel %vm2004_vm11, %v3944_v24, %v7459_v16  ;;  %2835 = vmatpush1.bf16.msra.mxu1 %v2415_v18 }
 0x34c   : > { %2755 = vmatpush1.bf16.msra.mxu0 %v2423_v27  ;;  %v2425_v4 = vpack.c.bf16 %v2008_v41, %v2007_v17  ;;  %v3947_v5 = vpop.permute.xlu0 %3946  ;;  %v2126_v13 = vsel %vm2125_vm12, %v3933_v30, %v3938_v42  ;;  %v2426_v15 = vpack.c.bf16 %v2044_v6, %v2043_v2  ;;  %v2163_v49 = vsel %vm2125_vm12, %v3939_v8, %v7462_v25 }
 0x34d   : > { %2756 = vmatprep.subr.bf16.mxu0 %v2434_v7  ;;  %v3949_v51 = vunpack.i.h.bf16 %v3947_v5  ;;  %v3948_v32 = vunpack.i.l.bf16 %v3947_v5  ;;  %v7463_v33 = vunpack.i.l.bf16 %v6377_v9  ;;  %v7464_v56 = vunpack.i.h.bf16 %v6377_v9  ;;  %v3957_v54 = vpop.permute.xlu1 %3956 }
 0x34e   : > { %2836 = vmatprep.subr.bf16.mxu1 %v2426_v15  ;;  %v2436_v50 = vpack.c.bf16 %v2163_v49, %v2162_v35  ;;  %v2435_v36 = vpack.c.bf16 %v2127_v0, %v2126_v13  ;;  %v3959_v40 = vunpack.i.h.bf16 %v3957_v54  ;;  %v3958_v62 = vunpack.i.l.bf16 %v3957_v54  ;;  %v7476_v54 = vld [vmem:[#allocation6_spill] sm:$0xff] }
 0x34f   : > { %v2136_v59 = vsel %vm2125_vm12, %v7463_v33, %v3948_v32  ;;  %v2137_v45 = vsel %vm2125_vm12, %v7464_v56, %v3949_v51  ;;  %2837 = vmatpush1.bf16.msra.mxu1 %v2425_v4  ;;  %v2132_v10 = vsel %vm2125_vm12, %v3948_v32, %v3953_v20  ;;  %v2133_v34 = vsel %vm2125_vm12, %v3949_v51, %v3954_v11 }
 0x350   : > { %2757 = vmatpush1.bf16.msra.mxu0 %v2433_v39  ;;  %v2443_v63 = vpack.c.bf16 %v2137_v45, %v2136_v59  ;;  %v3962_v1 = vpop.permute.xlu0 %3961  ;;  %2838 = vmatprep.subr.bf16.mxu1 %v2436_v50  ;;  %v2444_v9 = vpack.c.bf16 %v2133_v34, %v2132_v10  ;;  %v7465_v22 = vunpack.i.l.bf16 %v5652_v12  ;;  %v7466_v3 = vunpack.i.h.bf16 %v5652_v12  ;;  %v7473_v45 = vld [vmem:[#allocation8_spill] sm:$0xff] }
 0x351   : > { %v3964_v30 = vunpack.i.h.bf16 %v3962_v1  ;;  %v3963_v58 = vunpack.i.l.bf16 %v3962_v1  ;;  %v7467_v26 = vunpack.i.h.bf16 %v6407_v61  ;;  %v7468_v29 = vunpack.i.l.bf16 %v6407_v61  ;;  %v3972_v12 = vpop.permute.xlu1 %3971 }
 0x352   : > { %2758 = vmatprep.subr.bf16.mxu0 %v2444_v9  ;;  %v3974_v8 = vunpack.i.h.bf16 %v3972_v12  ;;  %v3973_v42 = vunpack.i.l.bf16 %v3972_v12  ;;  %v7469_v16 = vunpack.i.l.bf16 %v5701_v57  ;;  %v7470_v13 = vunpack.i.h.bf16 %v5701_v57 }
 0x353   : > { %v2128_v52 = vsel %vm2125_vm12, %v3953_v20, %v3963_v58  ;;  %v2129_v21 = vsel %vm2125_vm12, %v3954_v11, %v3964_v30  ;;  %v2164_v27 = vsel %vm2125_vm12, %v3963_v58, %v7465_v22  ;;  %v2165_v47 = vsel %vm2125_vm12, %v3964_v30, %v7466_v3  ;;  %2839 = vmatpush1.bf16.msra.mxu1 %v2435_v36  ;;  %v3995_v30 = vld [vmem:[%s6952_s7 + $0x8] ss:$0 sps:$4 sm:$0xff]  }
 0x354   : > { %v2445_v60 = vpack.c.bf16 %v2129_v21, %v2128_v52  ;;  %v2256_v55 = vsel %vm2246_vm13, %v7467_v26, %v3959_v40  ;;  %v2255_v24 = vsel %vm2246_vm13, %v7468_v29, %v3958_v62  ;;  %2759 = vmatpush1.bf16.msra.mxu0 %v2443_v63  ;;  %v3967_v37 = vpop.permute.xlu0 %3966  ;;  %v2446_v18 = vpack.c.bf16 %v2165_v47, %v2164_v27  ;;  %v7478_v27 = vld [vmem:[#allocation10_spill] sm:$0xff] }
 0x355   : > { %v3969_v38 = vunpack.i.h.bf16 %v3967_v37  ;;  %v3968_v28 = vunpack.i.l.bf16 %v3967_v37  ;;  %v2453_v7 = vpack.c.bf16 %v2256_v55, %v2255_v24  ;;  %v2283_v6 = vsel %vm2246_vm13, %v3973_v42, %v7469_v16  ;;  %v3982_v5 = vpop.permute.xlu1 %3981 }
 0x356   : > { %2840 = vmatprep.subr.bf16.mxu1 %v2446_v18  ;;  %v2284_v51 = vsel %vm2246_vm13, %v3974_v8, %v7470_v13  ;;  %v3984_v32 = vunpack.i.h.bf16 %v3982_v5  ;;  %v3983_v46 = vunpack.i.l.bf16 %v3982_v5  ;;  %v7471_v11 = vunpack.i.l.bf16 %v6452_v43  ;;  %v7481_v18 = vld [vmem:[#allocation13_spill] sm:$0xff]  ;;  %v7484_v5 = vld [vmem:[#allocation14_spill] sm:$0xff] }
 0x357   : > { %2761 = vmatmul.mubr.bf16.vlgmr.msra.gmra.mrb[44].mxu0 %v5847_v19  ;;  %v2251_v17 = vsel %vm2246_vm13, %v3958_v62, %v3968_v28  ;;  %v2252_v61 = vsel %vm2246_vm13, %v3959_v40, %v3969_v38  ;;  %v2248_v41 = vsel %vm2246_vm13, %v3969_v38, %v3974_v8  ;;  %v2247_v31 = vsel %vm2246_vm13, %v3968_v28, %v3973_v42  ;;  %v7480_v38 = vld [vmem:[#allocation12_spill] sm:$0xff] }
 0x358   : > { %2841 = vmatpush1.bf16.msra.mxu1 %v2445_v60  ;;  %v3977_v14 = vpop.permute.xlu0 %3976  ;;  %v2454_v2 = vpack.c.bf16 %v2252_v61, %v2251_v17  ;;  %v2455_v39 = vpack.c.bf16 %v2248_v41, %v2247_v31  ;;  %2801 = vmatprep.mubr.bf16.mxu0 %v7287_v48  ;;  %v2456_v15 = vpack.c.bf16 %v2284_v51, %v2283_v6  ;;  %v7472_v23 = vunpack.i.h.bf16 %v6452_v43  ;;  %v7479_v60 = vld [vmem:[#allocation11_spill] sm:$0xff]  ;;  %v7482_v41 = vld [vmem:[#allocation4_spill] sm:$0xff] }
 0x359   : > { %v3979_v4 = vunpack.i.h.bf16 %v3977_v14  ;;  %v3978_v0 = vunpack.i.l.bf16 %v3977_v14  ;;  %v7474_v50 = vunpack.i.l.bf16 %v7473_v45  ;;  %v7475_v1 = vunpack.i.h.bf16 %v7473_v45 }
 0x35a   : > { %2769 = vmatprep.subr.bf16.mxu0 %v2454_v2  ;;  %2851 = vmatprep.subr.bf16.mxu1 %v2456_v15  ;;  %v7483_v2 = vld [vmem:[#allocation5_spill] sm:$0xff] }
 0x35b   : > { %v2257_v20 = vsel %vm2246_vm13, %v7471_v11, %v3978_v0  ;;  %v2258_v53 = vsel %vm2246_vm13, %v7472_v23, %v3979_v4  ;;  %2843 = vmatmul.mubr.bf16.vlgmr.msra.gmra.mrb[8].mxu1 %v5847_v19  ;;  %2770 = vmatpush1.bf16.msra.mxu0 %v2453_v7  ;;  %v2253_v25 = vsel %vm2246_vm13, %v3978_v0, %v3983_v46 }
 0x35c   : > { %v2463_v57 = vpack.c.bf16 %v2258_v53, %v2257_v20  ;;  %v3987_v35 = vpop.permute.xlu0 %3986  ;;  %v2254_v49 = vsel %vm2246_vm13, %v3979_v4, %v3984_v32  ;;  %2883 = vmatprep.mubr.bf16.mxu1 %v7287_v48  ;;  %2852 = vmatpush1.bf16.msra.mxu1 %v2455_v39 }
 0x35d   : > { %v3989_v33 = vunpack.i.h.bf16 %v3987_v35  ;;  %v3988_v43 = vunpack.i.l.bf16 %v3987_v35  ;;  %v2464_v59 = vpack.c.bf16 %v2254_v49, %v2253_v25  ;;  %v3005_v49 = vld [vmem:[%s6628_s27 + $0x28] sm:$0xff] (%p4105_p5) }
 0x35e   : > { %3118 = vst [vmem:[%s3044_s29 + $0xf0] sm:$0xff] (%p4105_p5), %v3005_v49 }
 0x35f   : > { %v2249_v56 = vsel %vm2246_vm13, %v3983_v46, %v3988_v43  ;;  %v2250_v19 = vsel %vm2246_vm13, %v3984_v32, %v3989_v33  ;;  %2771 = vmatprep.subr.bf16.mxu0 %v2464_v59  ;;  %v2285_v63 = vsel %vm2246_vm13, %v3988_v43, %v7474_v50  ;;  %v2286_v48 = vsel %vm2246_vm13, %v3989_v33, %v7475_v1  ;;  %v7485_v32 = vld [vmem:[#allocation15_spill] sm:$0xff]  ;;  %v3007_v33 = vld [vmem:[%s6628_s27 + $0x30] sm:$0xff] (%p4105_p5)  ;;  %v3011_v59 = vld [vmem:[%s6628_s27 + $0x40] sm:$0xff] (%p4105_p5) }
 0x360   : > { %v2465_v10 = vpack.c.bf16 %v2250_v19, %v2249_v56  ;;  %2772 = vmatpush1.bf16.msra.mxu0 %v2463_v57  ;;  %v2466_v34 = vpack.c.bf16 %v2286_v48, %v2285_v63  ;;  %v3009_v43 = vld [vmem:[%s6628_s27 + $0x38] sm:$0xff] (%p4105_p5)  ;;  %3119 = vst [vmem:[%s3044_s29 + $0xf8] sm:$0xff] (%p4105_p5), %v3007_v33  ;;  %3121 = vst [vmem:[%s3044_s29 + $0x108] sm:$0xff] (%p4105_p5), %v3011_v59  ;;  %v3013_v56 = vld [vmem:[%s6628_s27 + $0x48] sm:$0xff] (%p4105_p5) }
 0x361   : > { %3120 = vst [vmem:[%s3044_s29 + $0x100] sm:$0xff] (%p4105_p5), %v3009_v43  ;;  %3122 = vst [vmem:[%s3044_s29 + $0x110] sm:$0xff] (%p4105_p5), %v3013_v56 }
 0x362   : > { %2853 = vmatprep.subr.bf16.mxu1 %v2466_v34 }
 0x363   : > { %3100 = vmatmul.mubr.msk.bf16.vlgmr.msra.gmra.mrb[44].mxu0 %vm703_vm7, %v3995_v30  ;;  %2854 = vmatpush1.bf16.msra.mxu1 %v2465_v10 }
 0x367   : > { %3101 = vmatmul.mubr.msk.bf16.vlgmr.msra.gmra.mrb[8].mxu1 %vm703_vm7, %v3995_v30 }
 0x39b   : > { %v2557_v58 = vpop.f32.mrb[0].mxu1 }
 0x39c   : > { %v2892_v9 = vmul.f32 %v2557_v58, %v7476_v54  ;;  %v2559_v36 = vpop.f32.mrb[1].mxu1 }
 0x39d   : > { %v2893_v40 = vmul.f32 %v2559_v36, %v7477_v44  ;;  %v2561_v62 = vpop.f32.mrb[2].mxu1 }
 0x39e   : > { %v2562_v52 = vpop.f32.mrb[3].mxu1 }
 0x39f   : > { %v3126_v21 = vpack.c.bf16 %v2893_v40, %v2892_v9 }
 0x3a1   : > { %2962 = vst [vmem:[%s6628_s27] sm:$0xff] %v3126_v21 }
 0x3a8   : > { %v2995_v23 = vld [vmem:[%s6628_s27] sm:$0xff] (%p4105_p5) }
 0x3a9   : > { %3113 = vst [vmem:[%s3044_s29 + $0xa0] sm:$0xff] (%p4105_p5), %v2995_v23 }
 0x3e4   : > { %v2639_v22 = vpop.f32.mrb[40].mxu0 }
 0x3e5   : > { %v2894_v3 = vmul.f32 %v2639_v22, %v7478_v27  ;;  %v2641_v47 = vpop.f32.mrb[41].mxu0 }
 0x3e6   : > { %v2895_v26 = vmul.f32 %v2641_v47, %v7479_v60  ;;  %v2643_v55 = vpop.f32.mrb[42].mxu0 }
 0x3e7   : > { %v2644_v29 = vpop.f32.mrb[43].mxu0 }
 0x3e8   : > { %v3127_v24 = vpack.c.bf16 %v2895_v26, %v2894_v3  ;;  %v2721_v37 = vpop.f32.mrb[4].mxu1 }
 0x3e9   : > { %v2896_v28 = vmul.f32 %v2721_v37, %v7480_v38  ;;  %v2723_v12 = vpop.f32.mrb[5].mxu1 }
 0x3ea   : > { %2963 = vst [vmem:[%s6628_s27 + $0x8] sm:$0xff] %v3127_v24  ;;  %v2897_v8 = vmul.f32 %v2723_v12, %v7481_v18  ;;  %v2725_v42 = vpop.f32.mrb[6].mxu1 }
 0x3eb   : > { %v2726_v7 = vpop.f32.mrb[7].mxu1 }
 0x3ec   : > { %v3128_v17 = vpack.c.bf16 %v2897_v8, %v2896_v28 }
 0x3ee   : > { %2964 = vst [vmem:[%s6628_s27 + $0x10] sm:$0xff] %v3128_v17 }
 0x3f1   : > { %v2997_v53 = vld [vmem:[%s6628_s27 + $0x8] sm:$0xff] (%p4105_p5) }
 0x3f2   : > { %3114 = vst [vmem:[%s3044_s29 + $0xa8] sm:$0xff] (%p4105_p5), %v2997_v53 }
 0x3f5   : > { %v2999_v57 = vld [vmem:[%s6628_s27 + $0x10] sm:$0xff] (%p4105_p5) }
 0x3f6   : > { %3115 = vst [vmem:[%s3044_s29 + $0xb0] sm:$0xff] (%p4105_p5), %v2999_v57 }
 0x436   : > { %v2803_v61 = vpop.f32.mrb[44].mxu0 }
 0x437   : > { %v2898_v31 = vmul.f32 %v2803_v61, %v7482_v41  ;;  %v2805_v14 = vpop.f32.mrb[45].mxu0 }
 0x438   : > { %v2899_v16 = vmul.f32 %v2805_v14, %v7483_v2  ;;  %v2807_v6 = vpop.f32.mrb[46].mxu0 }
 0x439   : > { %v2808_v39 = vpop.f32.mrb[47].mxu0 }
 0x43a   : > { %v3129_v4 = vpack.c.bf16 %v2899_v16, %v2898_v31  ;;  %v2885_v0 = vpop.f32.mrb[8].mxu1  ;;  %2978 = sbr.rel (!%p4105_p5) target bundleno = 1097 (0x449), region = 79 }
 0x43b   : > { %v2900_v13 = vmul.f32 %v2885_v0, %v7484_v5  ;;  %v2887_v51 = vpop.f32.mrb[9].mxu1 }
 0x43c   : > { %2965 = vst [vmem:[%s6628_s27 + $0x18] sm:$0xff] %v3129_v4  ;;  %v2901_v46 = vmul.f32 %v2887_v51, %v7485_v32  ;;  %v2889_v15 = vpop.f32.mrb[10].mxu1 }
 0x43d   : > { %v2890_v11 = vpop.f32.mrb[11].mxu1 }
 0x43e   : > { %v3130_v20 = vpack.c.bf16 %v2901_v46, %v2900_v13 }
 0x440   : > { %2966 = vst [vmem:[%s6628_s27 + $0x20] sm:$0xff] %v3130_v20 }
 0x443   : > { %v3001_v35 = vld [vmem:[%s6628_s27 + $0x18] sm:$0xff] }
 0x444   : > { %3116 = vst [vmem:[%s3044_s29 + $0xb8] sm:$0xff] %v3001_v35 }
 0x447   : > { %v3003_v25 = vld [vmem:[%s6628_s27 + $0x20] sm:$0xff] }
 0x448   : > { %3117 = vst [vmem:[%s3044_s29 + $0xc0] sm:$0xff] %v3003_v25 }
 0x449 PF: > { %p15_p10 = scmp.ge.s32.totalorder %s4092_s9, 4   ;;  %s7486_s27 = smov %s4014_s28 }
 0x44a   : > { %s7487_s28 = smov %s4103_s12  ;;  %s7488_s29 = smov %s4092_s9 }
 0x44b   :  { %17 = sbr.rel (!%p15_p10) target bundleno = 2 (0x2), region = 133 }

// kernel: densenet_forward.11
= control target key start
LH: loop header
LB: loop body
LE: loop exit
PB: predicated region body
PF: predicated region fallthrough
CT: control target
= control target key end

     0   :  { %s727_s15 = smov 0   ;;  %s729_s16 = smov 0   ;;  %s824_s0 = inlined_call_operand.vmem [shape: bf16[32,768], index: 0, kind: input, shape index: {}]   ;;  %s825_s1 = inlined_call_operand.vmem [shape: f32[32,1], index: 1, kind: input, shape index: {}]   ;;  %s826_s2 = inlined_call_operand.vmem [shape: f32[32,1], index: 2, kind: input, shape index: {}]   ;;  %s827_s3 = inlined_call_operand.vmem [shape: bf16[10,32], index: 3, kind: input, shape index: {}]   ;;  %s828_s4 = inlined_call_operand.vmem [shape: bf16[10,768], index: 4, kind: output, shape index: {}]  }
   0x1   :  { %s731_s17 = smov 0  }
   0x2 LB: > { %s597_s18 = sadd.s32 4294967295, %s697_s17   ;;  %s744_s19 = sadd.s32 1, %s697_s17   ;;  %s697_s17 = sphi %s731_s17, %s832_s17   ;;  %s693_s16 = sphi %s729_s16, %s831_s16   ;;  %s689_s15 = sphi %s727_s15, %s830_s15  }
   0x3   : > { %s18_s20 = ssub.s32 %s697_s17, %s744_s19  ;;  %s21_s21 = sadd.s32 1, %s693_s16 }
   0x4   : > { %p19_p0 = scmp.eq.s32.totalorder %s18_s20, 0  ;;  %p28_p1 = scmp.ne.s32.totalorder %s693_s16, %s689_s15 }
   0x5   : > { %p29_p2 = scmp.eq.s32.totalorder %s697_s17, 0  ;;  %p121_p3 = scmp.eq.s32.totalorder %s597_s18, 1 }
   0x6   : > { %s755_s22 = scalar_select %p19_p0, %s693_s16, %s21_s21  }
   0x7   : > { %p30_p4 = por %p29_p2, %p28_p1  ;;  %p757_p5 = por %p121_p3, %p28_p1 }
   0x8   : > { %p600_p6 = scmp.ge.s32.totalorder %s697_s17, 2 }
   0xa   : > { %152 = sbr.rel (%p600_p6) target bundleno = 26 (0x1a), region = 28 }
  0x11   : > { %155 = sbr.rel (!%p30_p4) target bundleno = 26 (0x1a), region = 32  ;;  %s157_s24 = sand.u32 (%p30_p4), 1, %s693_s16  }
  0x12   : > { %s625_s25 = smul.u32 (%p30_p4), 12, %s697_s17 }
  0x13   : > { %s642_s26 = smul.u32 (%p30_p4), 48, %s157_s24 }
  0x14   : > { %s162_s29 = scalar_lea.vmem (%p30_p4), %s824_s0, %s625_s25 }
  0x15   : > { %v177_v0 = vld [vmem:[%s162_s29] sm:$0xff] (%p30_p4)  ;;  %v179_v1 = vld [vmem:[%s162_s29 + $0x18] sm:$0xff] (%p30_p4)  ;;  %v181_v2 = vld [vmem:[%s162_s29 + $0x30] sm:$0xff] (%p30_p4)  ;;  %s159_s30 = scalar_lea.vmem (%p30_p4), [#allocation2], %s642_s26 }
  0x16   : > { %178 = vst [vmem:[%s159_s30] sm:$0xff] (%p30_p4), %v177_v0  ;;  %180 = vst [vmem:[%s159_s30 + $0xc] sm:$0xff] (%p30_p4), %v179_v1  ;;  %v183_v3 = vld [vmem:[%s162_s29 + $0x48] sm:$0xff] (%p30_p4)  ;;  %v604_v5 = vld [vmem:[%s162_s29 + $0x20] sm:$0xf] (%p30_p4) }
  0x17   : > { %182 = vst [vmem:[%s159_s30 + $0x18] sm:$0xff] (%p30_p4), %v181_v2  ;;  %v602_v4 = vld [vmem:[%s162_s29 + $0x8] sm:$0xf] (%p30_p4)  ;;  %184 = vst [vmem:[%s159_s30 + $0x24] sm:$0xff] (%p30_p4), %v183_v3  ;;  %v606_v6 = vld [vmem:[%s162_s29 + $0x38] sm:$0xf] (%p30_p4) }
  0x18   : > { %603 = vst [vmem:[%s159_s30 + $0x8] sm:$0xf] %v602_v4  ;;  %605 = vst [vmem:[%s159_s30 + $0x14] sm:$0xf] %v604_v5  ;;  %v608_v7 = vld [vmem:[%s162_s29 + $0x50] sm:$0xf] }
  0x19   : > { %607 = vst [vmem:[%s159_s30 + $0x20] sm:$0xf] %v606_v6  ;;  %609 = vst [vmem:[%s159_s30 + $0x2c] sm:$0xf] %v608_v7 }
  0x1a PF: > { %p610_p7 = scmp.ge.s32.totalorder %s697_s17, 1  ;;  %p204_p8 = scmp.lt.s32.totalorder %s697_s17, 3 }
  0x1c   : > { %p205_p9 = pnand %p610_p7, %p204_p8 }
  0x1d   : > { %v294_v8 = vld [vmem:[%s826_s2] sm:$0xff] (!%p205_p9)  ;;  %v699_v10 = vmov (!%p205_p9), 0   ;;  %v295_v11 = vld [vmem:[%s826_s2 + $0x8] sm:$0xff] (!%p205_p9)  ;;  %v261_v13 = vld [vmem:[%s825_s1 + $0x18] sm:$0xff] (!%p205_p9)  ;;  %v700_v17 = vmov (!%p205_p9), 0.0   ;;  %vm701_vm0 = vmmov (!%p205_p9), 0  }
  0x1e   : > { %208 = sbr.rel (%p205_p9) target bundleno = 412 (0x19c), region = 58  ;;  %v258_v9 = vld [vmem:[%s825_s1] sm:$0xff] (!%p205_p9)  ;;  %673 = vset.pattern.permute.xlu1 (!%p205_p9), %v699_v10  ;;  %672 = vset.pattern.permute.xlu0 (!%p205_p9), %v699_v10  ;;  %v259_v12 = vld [vmem:[%s825_s1 + $0x8] sm:$0xff] (!%p205_p9)  ;;  %v260_v14 = vld [vmem:[%s825_s1 + $0x10] sm:$0xff] (!%p205_p9)  ;;  %s211_s28 = sand.u32 (!%p205_p9), 1, %s689_s15   ;;  %vm379_vm13 = vcmask (!%p205_p9), 261120  }
  0x1f   : > { %300 = vperm.xlu1 (!%p205_p9), %673, %v294_v8   ;;  %264 = vperm.xlu0 (!%p205_p9), %672, %v258_v9   ;;  %v297_v15 = vld [vmem:[%s826_s2 + $0x18] sm:$0xff] (!%p205_p9)  ;;  %v296_v16 = vld [vmem:[%s826_s2 + $0x10] sm:$0xff] (!%p205_p9)  ;;  %s643_s29 = smul.u32 (!%p205_p9), 48, %s211_s28 }
  0x20   : > { %415 = vmatprep.mubr.bf16.mxu0 (!%p205_p9), %v699_v10  ;;  %634 = vmatprep.subr.bf16.mxu1 (!%p205_p9), %v700_v17  ;;  %s644_s7 = smul.u32 (!%p205_p9), 24, %s211_s28 }
  0x21   : > { %638 = vmatprep.mubr.msk.bf16.mxu1 (!%p205_p9), %vm701_vm0, %v700_v17  ;;  %s213_s30 = scalar_lea.vmem (!%p205_p9), [#allocation2], %s643_s29 }
  0x22   : > { %v238_v18 = vld [vmem:[%s213_s30] sm:$0xff] (!%p205_p9)  ;;  %v239_v19 = vld [vmem:[%s213_s30 + $0x8] ss:$12 sps:$4 sm:$0xff] (!%p205_p9)   ;;  %v240_v23 = vld [vmem:[%s213_s30 + $0xc] sm:$0xff] (!%p205_p9)  ;;  %s234_s8 = scalar_lea.vmem (!%p205_p9), [#allocation3], %s644_s7 }
  0x23   : > { %305 = vperm.xlu1 (!%p205_p9), %673, %v295_v11   ;;  %269 = vperm.xlu0 (!%p205_p9), %672, %v259_v12   ;;  %v246_v20 = vunpack.c.l.bf16 (!%p205_p9), %v238_v18  ;;  %v247_v21 = vunpack.c.h.bf16 (!%p205_p9), %v238_v18  ;;  %v248_v22 = vunpack.c.l.bf16 (!%p205_p9), %v239_v19  ;;  %v249_v26 = vunpack.c.l.bf16 (!%p205_p9), %v240_v23  ;;  %v244_v32 = vld [vmem:[%s213_s30 + $0x24] sm:$0xff] (!%p205_p9)  ;;  %v245_v33 = vld [vmem:[%s213_s30 + $0x20] ss:$12 sps:$4 sm:$0xff] (!%p205_p9)   ;;  %v242_v34 = vld [vmem:[%s213_s30 + $0x18] sm:$0xff] (!%p205_p9) }
  0x24   : > { %v250_v27 = vunpack.c.h.bf16 (!%p205_p9), %v240_v23  ;;  %v251_v31 = vunpack.c.h.bf16 (!%p205_p9), %v239_v19  ;;  %v255_v40 = vunpack.c.l.bf16 (!%p205_p9), %v244_v32  ;;  %v256_v41 = vunpack.c.h.bf16 (!%p205_p9), %v244_v32 }
  0x25   : > { %v257_v42 = vunpack.c.h.bf16 %v245_v33  ;;  %v252_v46 = vunpack.c.l.bf16 %v242_v34  ;;  %v253_v50 = vunpack.c.h.bf16 %v242_v34  ;;  %v254_v51 = vunpack.c.l.bf16 %v245_v33  ;;  %s630_s15 = smul.u32 (%p757_p5), 12, %s597_s18 }
  0x27   : > { %279 = vperm.xlu1 %673, %v261_v13   ;;  %274 = vperm.xlu0 %672, %v260_v14   ;;  %s500_s11 = scalar_lea.vmem (%p757_p5), %s828_s4, %s630_s15 }
  0x2b   : > { %315 = vperm.xlu1 %673, %v297_v15   ;;  %310 = vperm.xlu0 %672, %v296_v16  }
  0x9e   : > { %v301_v24 = vpop.permute.xlu1 %300  ;;  %v265_v25 = vpop.permute.xlu0 %264 }
  0x9f   : > { %v282_v28 = vmul.f32 %v265_v25, %v246_v20  ;;  %v283_v29 = vmul.f32 %v265_v25, %v247_v21  ;;  %v284_v30 = vmul.f32 %v265_v25, %v248_v22 }
  0xa1   : > { %v320_v35 = vadd.f32 %v301_v24, %v284_v30  ;;  %v319_v36 = vadd.f32 %v301_v24, %v283_v29  ;;  %v318_v37 = vadd.f32 %v301_v24, %v282_v28 }
  0xa2   : > { %v306_v38 = vpop.permute.xlu1 %305  ;;  %v270_v39 = vpop.permute.xlu0 %269 }
  0xa3   : > { %v285_v43 = vmul.f32 %v270_v39, %v249_v26  ;;  %v286_v44 = vmul.f32 %v270_v39, %v250_v27  ;;  %v287_v45 = vmul.f32 %v270_v39, %v251_v31  ;;  %vm331_vm1 = vcmp.ge.f32.partialorder %v319_v36, 0.0 }
  0xa4   : > { %v343_v47 = vmul.f32 0.01, %v319_v36  ;;  %vm332_vm2 = vcmp.ge.f32.partialorder %v320_v35, 0.0  ;;  %v344_v48 = vmul.f32 0.01, %v320_v35  ;;  %vm330_vm3 = vcmp.ge.f32.partialorder %v318_v37, 0.0 }
  0xa5   : > { %v323_v49 = vadd.f32 %v306_v38, %v287_v45  ;;  %v322_v52 = vadd.f32 %v306_v38, %v286_v44  ;;  %v321_v53 = vadd.f32 %v306_v38, %v285_v43  ;;  %v342_v56 = vmul.f32 0.01, %v318_v37 }
  0xa6   : > { %v280_v54 = vpop.permute.xlu1 %279  ;;  %v275_v55 = vpop.permute.xlu0 %274  ;;  %v355_v59 = vsel %vm331_vm1, %v319_v36, %v343_v47  ;;  %v356_v60 = vsel %vm332_vm2, %v320_v35, %v344_v48  ;;  %v674_v35 = vld [vmem:[%s827_s3] sm:$0x1f]  }
  0xa7   : > { %v291_v57 = vmul.f32 %v280_v54, %v255_v40  ;;  %v292_v58 = vmul.f32 %v280_v54, %v256_v41  ;;  %v293_v61 = vmul.f32 %v280_v54, %v257_v42  ;;  %v288_v62 = vmul.f32 %v275_v55, %v252_v46 }
  0xa8   : > { %vm334_vm4 = vcmp.ge.f32.partialorder %v322_v52, 0.0  ;;  %v346_v63 = vmul.f32 0.01, %v322_v52  ;;  %v289_v0 = vmul.f32 %v275_v55, %v253_v50  ;;  %v290_v1 = vmul.f32 %v275_v55, %v254_v51 }
  0xa9   : > { %vm335_vm5 = vcmp.ge.f32.partialorder %v323_v49, 0.0  ;;  %v347_v2 = vmul.f32 0.01, %v323_v49  ;;  %vm333_vm6 = vcmp.ge.f32.partialorder %v321_v53, 0.0  ;;  %v345_v6 = vmul.f32 0.01, %v321_v53 }
  0xaa   : > { %v316_v3 = vpop.permute.xlu1 %315  ;;  %v311_v4 = vpop.permute.xlu0 %310  ;;  %v358_v5 = vsel %vm334_vm4, %v322_v52, %v346_v63  ;;  %v354_v7 = vsel %vm330_vm3, %v318_v37, %v342_v56 }
  0xab   : > { %v327_v8 = vadd.f32 %v316_v3, %v291_v57  ;;  %v328_v9 = vadd.f32 %v316_v3, %v292_v58  ;;  %v329_v10 = vadd.f32 %v316_v3, %v293_v61  ;;  %v324_v11 = vadd.f32 %v311_v4, %v288_v62 }
  0xac   : > { %v325_v12 = vadd.f32 %v311_v4, %v289_v0  ;;  %v326_v13 = vadd.f32 %v311_v4, %v290_v1  ;;  %v369_v14 = vpack.c.bf16 %v358_v5, %v355_v59  ;;  %v359_v15 = vsel %vm335_vm5, %v323_v49, %v347_v2 }
  0xad   : > { %vm339_vm7 = vcmp.ge.f32.partialorder %v327_v8, 0.0  ;;  %vm340_vm8 = vcmp.ge.f32.partialorder %v328_v9, 0.0  ;;  %vm341_vm9 = vcmp.ge.f32.partialorder %v329_v10, 0.0  ;;  %v351_v16 = vmul.f32 0.01, %v327_v8 }
  0xae   : > { %v352_v18 = vmul.f32 0.01, %v328_v9  ;;  %v353_v19 = vmul.f32 0.01, %v329_v10  ;;  %vm336_vm10 = vcmp.ge.f32.partialorder %v324_v11, 0.0  ;;  %vm337_vm11 = vcmp.ge.f32.partialorder %v325_v12, 0.0  ;;  %383 = vmatprep.subr.bf16.mxu0 %v369_v14 }
  0xaf   : > { %vm338_vm12 = vcmp.ge.f32.partialorder %v326_v13, 0.0  ;;  %v348_v20 = vmul.f32 0.01, %v324_v11  ;;  %v349_v21 = vmul.f32 0.01, %v325_v12  ;;  %v370_v22 = vpack.c.bf16 %v359_v15, %v356_v60 }
  0xb0   : > { %v350_v23 = vmul.f32 0.01, %v326_v13  ;;  %v357_v24 = vsel %vm333_vm6, %v321_v53, %v345_v6  ;;  %v364_v25 = vsel %vm340_vm8, %v328_v9, %v352_v18  ;;  %v365_v26 = vsel %vm341_vm9, %v329_v10, %v353_v19 }
  0xb1   : > { %635 = vmatpush3.bf16.msra.mxu1 %v370_v22  ;;  %v368_v27 = vpack.c.bf16 %v357_v24, %v354_v7  ;;  %v361_v28 = vsel %vm337_vm11, %v325_v12, %v349_v21  ;;  %v360_v29 = vsel %vm336_vm10, %v324_v11, %v348_v20  ;;  %v363_v30 = vsel %vm339_vm7, %v327_v8, %v351_v16 }
  0xb2   : > { %636 = vmatprep.subr.bf16.mxu1 %v700_v17  ;;  %v372_v31 = vpack.c.bf16 %v364_v25, %v361_v28  ;;  %v362_v32 = vsel %vm338_vm12, %v326_v13, %v350_v23  ;;  %v371_v34 = vpack.c.bf16 %v363_v30, %v360_v29 }
  0xb3   : > { %384 = vmatpush1.bf16.msra.mxu0 %v368_v27  ;;  %v373_v33 = vpack.c.bf16 %v365_v26, %v362_v32 }
  0xb4   : > { %385 = vmatprep.subr.bf16.mxu0 %v372_v31 }
  0xb5   : > { %637 = vmatpush3.bf16.msra.mxu1 %v373_v33 }
  0xb7   : > { %386 = vmatpush1.bf16.msra.mxu0 %v371_v34 }
  0xb8   : > { %639 = vmatmul.mubr.msk.bf16.vlgmr.msra.gmra.mrb[0].mxu1 %vm379_vm13, %v674_v35 }
  0xba   : > { %612 = vmatmul.mubr.msk.bf16.vlgmr.msra.gmra.mrb[0].mxu0 %vm379_vm13, %v674_v35 }
 0x18b   : > { %v460_v36 = vpop.f32.mrb[0].mxu1 }
 0x18c   : > { %v627_v37 = vpack.c.bf16 %v460_v36, %v460_v36  ;;  %v640_v17 = vpop.f32.mrb[1].mxu1 }
 0x18d   : > { %v417_v38 = vpop.f32.mrb[0].mxu0  ;;  %v463_v39 = vpop.f32.mrb[2].mxu1  ;;  %497 = sbr.rel (!%p757_p5) target bundleno = 412 (0x19c), region = 66 }
 0x18e   : > { %488 = vst [vmem:[%s234_s8 + $0x8] sm:$0xf] %v627_v37  ;;  %v419_v40 = vpop.f32.mrb[1].mxu0  ;;  %v629_v41 = vpack.c.bf16 %v463_v39, %v463_v39  ;;  %v641_v42 = vpop.f32.mrb[3].mxu1 }
 0x18f   : > { %v626_v43 = vpack.c.bf16 %v419_v40, %v417_v38  ;;  %v421_v44 = vpop.f32.mrb[2].mxu0 }
 0x190   : > { %490 = vst [vmem:[%s234_s8 + $0x14] sm:$0x1] %v629_v41  ;;  %v423_v45 = vpop.f32.mrb[3].mxu0 }
 0x191   : > { %487 = vst [vmem:[%s234_s8] sm:$0xff] %v626_v43  ;;  %v628_v46 = vpack.c.bf16 %v423_v45, %v421_v44 }
 0x193   : > { %489 = vst [vmem:[%s234_s8 + $0xc] sm:$0x11] %v628_v46 }
 0x195   : > { %v619_v49 = vld [vmem:[%s234_s8 + $0x8] sm:$0xf] }
 0x196   : > { %620 = vst [vmem:[%s500_s11 + $0x8] sm:$0xf] %v619_v49 }
 0x197   : > { %v621_v50 = vld [vmem:[%s234_s8 + $0x14] sm:$0xf] }
 0x198   : > { %v515_v47 = vld [vmem:[%s234_s8] sm:$0xff]  ;;  %622 = vst [vmem:[%s500_s11 + $0x20] sm:$0xf] %v621_v50 }
 0x199   : > { %516 = vst [vmem:[%s500_s11] sm:$0xff] %v515_v47 }
 0x19a   : > { %v517_v48 = vld [vmem:[%s234_s8 + $0xc] sm:$0xff] }
 0x19b   : > { %518 = vst [vmem:[%s500_s11 + $0x18] sm:$0xff] %v517_v48 }
 0x19c PF: > { %p11_p10 = scmp.ge.s32.totalorder %s744_s19, 4   ;;  %s830_s15 = smov %s693_s16 }
 0x19d   : > { %s831_s16 = smov %s755_s22  ;;  %s832_s17 = smov %s744_s19 }
 0x19e   :  { %13 = sbr.rel (!%p11_p10) target bundleno = 2 (0x2), region = 135 }

// kernel: densenet_forward.10
= control target key start
LH: loop header
LB: loop body
LE: loop exit
PB: predicated region body
PF: predicated region fallthrough
CT: control target
= control target key end

     0   :  { %s1865_s27 = smov 0   ;;  %s1867_s28 = smov 0   ;;  %s2570_s0 = inlined_call_operand.vmem [shape: bf16[32,768], index: 0, kind: input, shape index: {}, may-alias: {0,8}]   ;;  %s2571_s1 = inlined_call_operand.vmem [shape: f32[1,384], index: 1, kind: input, shape index: {}]   ;;  %s2572_s2 = inlined_call_operand.vmem [shape: f32[32,1], index: 2, kind: input, shape index: {}]   ;;  %s2573_s3 = inlined_call_operand.vmem [shape: f32[32,1], index: 3, kind: input, shape index: {}]   ;;  %s2574_s4 = inlined_call_operand.vmem [shape: bf16[32,32], index: 4, kind: input, shape index: {}]   ;;  %s2575_s5 = inlined_call_operand.vmem [shape: f32[32,1], index: 5, kind: input, shape index: {}]   ;;  %s2576_s6 = inlined_call_operand.vmem [shape: f32[32,1], index: 6, kind: input, shape index: {}]   ;;  %s2577_s7 = inlined_call_operand.vmem [shape: bf16[8,288], index: 7, kind: input, shape index: {}]   ;;  %s2578_s8 = inlined_call_operand.vmem [shape: bf16[32,768], index: 8, kind: output, shape index: {}, may-alias: {0,8}]  }
   0x1   :  { %s1869_s29 = smov 0  }
   0x2 LB: > { %s1406_s30 = sadd.s32 4294967295, %s1806_s29   ;;  %s1882_s9 = sadd.s32 1, %s1806_s29   ;;  %s1806_s29 = sphi %s1869_s29, %s2594_s29   ;;  %s1802_s28 = sphi %s1867_s28, %s2593_s28   ;;  %s1798_s27 = sphi %s1865_s27, %s2592_s27  }
   0x3   : > { %s22_s10 = ssub.s32 %s1806_s29, %s1882_s9  ;;  %s25_s11 = sadd.s32 1, %s1802_s28 }
   0x4   : > { %p23_p0 = scmp.eq.s32.totalorder %s22_s10, 0  ;;  %p32_p1 = scmp.ne.s32.totalorder %s1802_s28, %s1798_s27 }
   0x5   : > { %p33_p2 = scmp.eq.s32.totalorder %s1806_s29, 0  ;;  %p209_p3 = scmp.eq.s32.totalorder %s1406_s30, 1 }
   0x6   : > { %s1893_s12 = scalar_select %p23_p0, %s1802_s28, %s25_s11  }
   0x7   : > { %p34_p4 = por %p33_p2, %p32_p1  ;;  %p1895_p5 = por %p209_p3, %p32_p1 }
   0x8   : > { %p1409_p6 = scmp.ge.s32.totalorder %s1806_s29, 2 }
   0xa   : > { %252 = sbr.rel (%p1409_p6) target bundleno = 26 (0x1a), region = 44 }
  0x11   : > { %255 = sbr.rel (!%p34_p4) target bundleno = 26 (0x1a), region = 48  ;;  %s257_s14 = sand.u32 (%p34_p4), 1, %s1802_s28  }
  0x12   : > { %s1444_s15 = smul.u32 (%p34_p4), 12, %s1806_s29 }
  0x13   : > { %s1498_s16 = smul.u32 (%p34_p4), 48, %s257_s14 }
  0x14   : > { %s262_s19 = scalar_lea.vmem (%p34_p4), %s2570_s0, %s1444_s15 }
  0x15   : > { %v277_v0 = vld [vmem:[%s262_s19] sm:$0xff] (%p34_p4)  ;;  %v279_v1 = vld [vmem:[%s262_s19 + $0x18] sm:$0xff] (%p34_p4)  ;;  %v281_v2 = vld [vmem:[%s262_s19 + $0x30] sm:$0xff] (%p34_p4)  ;;  %s259_s20 = scalar_lea.vmem (%p34_p4), [#allocation2], %s1498_s16 }
  0x16   : > { %278 = vst [vmem:[%s259_s20] sm:$0xff] (%p34_p4), %v277_v0  ;;  %280 = vst [vmem:[%s259_s20 + $0xc] sm:$0xff] (%p34_p4), %v279_v1  ;;  %v283_v3 = vld [vmem:[%s262_s19 + $0x48] sm:$0xff] (%p34_p4)  ;;  %v1413_v5 = vld [vmem:[%s262_s19 + $0x20] sm:$0xf] (%p34_p4) }
  0x17   : > { %282 = vst [vmem:[%s259_s20 + $0x18] sm:$0xff] (%p34_p4), %v281_v2  ;;  %v1411_v4 = vld [vmem:[%s262_s19 + $0x8] sm:$0xf] (%p34_p4)  ;;  %284 = vst [vmem:[%s259_s20 + $0x24] sm:$0xff] (%p34_p4), %v283_v3  ;;  %v1415_v6 = vld [vmem:[%s262_s19 + $0x38] sm:$0xf] (%p34_p4) }
  0x18   : > { %1412 = vst [vmem:[%s259_s20 + $0x8] sm:$0xf] %v1411_v4  ;;  %1414 = vst [vmem:[%s259_s20 + $0x14] sm:$0xf] %v1413_v5  ;;  %v1417_v7 = vld [vmem:[%s262_s19 + $0x50] sm:$0xf] }
  0x19   : > { %1416 = vst [vmem:[%s259_s20 + $0x20] sm:$0xf] %v1415_v6  ;;  %1418 = vst [vmem:[%s259_s20 + $0x2c] sm:$0xf] %v1417_v7 }
  0x1a PF: > { %p1419_p7 = scmp.ge.s32.totalorder %s1806_s29, 1  ;;  %p304_p8 = scmp.lt.s32.totalorder %s1806_s29, 3 }
  0x1c   : > { %p305_p9 = pnand %p1419_p7, %p304_p8 }
  0x1d   : > { %v402_v8 = vld [vmem:[%s2573_s3] sm:$0xff] (!%p305_p9)  ;;  %v2579_v10 = vmov (!%p305_p9), 0   ;;  %v403_v11 = vld [vmem:[%s2573_s3 + $0x8] sm:$0xff] (!%p305_p9)  ;;  %v369_v13 = vld [vmem:[%s2572_s2 + $0x18] sm:$0xff] (!%p305_p9)  ;;  %s311_s23 = sand.u32 (!%p305_p9), 1, %s1798_s27   ;;  %vm494_vm12 = vcmask (!%p305_p9), 261120  }
  0x1e   : > { %308 = sbr.rel (%p305_p9) target bundleno = 851 (0x353), region = 74  ;;  %v366_v9 = vld [vmem:[%s2572_s2] sm:$0xff] (!%p305_p9)  ;;  %1538 = vset.pattern.permute.xlu1 (!%p305_p9), %v2579_v10  ;;  %1537 = vset.pattern.permute.xlu0 (!%p305_p9), %v2579_v10  ;;  %v367_v12 = vld [vmem:[%s2572_s2 + $0x8] sm:$0xff] (!%p305_p9)  ;;  %v368_v14 = vld [vmem:[%s2572_s2 + $0x10] sm:$0xff] (!%p305_p9)  ;;  %s1809_s17 = smov (!%p305_p9), 19  }
  0x1f   : > { %408 = vperm.xlu1 (!%p305_p9), %1538, %v402_v8   ;;  %372 = vperm.xlu0 (!%p305_p9), %1537, %v366_v9   ;;  %v405_v15 = vld [vmem:[%s2573_s3 + $0x18] sm:$0xff] (!%p305_p9)  ;;  %v404_v16 = vld [vmem:[%s2573_s3 + $0x10] sm:$0xff] (!%p305_p9)  ;;  %v604_v17 = vld [vmem:[%s2575_s5 + $0x8] sm:$0xff] (!%p305_p9)  ;;  %s1499_s24 = smul.u32 (!%p305_p9), 48, %s311_s23  ;;  %s1810_s18 = smov (!%p305_p9), 18  }
  0x20   : > { %533 = vmatprep.mubr.bf16.mxu1 (!%p305_p9), %v2579_v10  ;;  %v603_v18 = vld [vmem:[%s2575_s5] sm:$0xff] (!%p305_p9)  ;;  %v640_v19 = vld [vmem:[%s2576_s6 + $0x8] sm:$0xff] (!%p305_p9)  ;;  %v606_v21 = vld [vmem:[%s2575_s5 + $0x18] sm:$0xff] (!%p305_p9)  ;;  %s1811_s19 = smov (!%p305_p9), 17   ;;  %s1812_s20 = smov (!%p305_p9), 1  }
  0x21   : > { %v639_v20 = vld [vmem:[%s2576_s6] sm:$0xff] (!%p305_p9)  ;;  %v605_v22 = vld [vmem:[%s2575_s5 + $0x10] sm:$0xff] (!%p305_p9)  ;;  %v642_v23 = vld [vmem:[%s2576_s6 + $0x18] sm:$0xff] (!%p305_p9)  ;;  %s313_s25 = scalar_lea.vmem (!%p305_p9), [#allocation2], %s1499_s24  ;;  %s1813_s21 = smov (!%p305_p9), 127  }
  0x22   : > { %v641_v24 = vld [vmem:[%s2576_s6 + $0x10] sm:$0xff] (!%p305_p9)  ;;  %v350_v48 = vld [vmem:[%s313_s25 + $0x18] sm:$0xff] (!%p305_p9)  ;;  %s1814_s22 = smov (!%p305_p9), 111   ;;  %s1815_s24 = smov (!%p305_p9), 110  }
  0x23   : > { %413 = vperm.xlu1 (!%p305_p9), %1538, %v403_v11   ;;  %377 = vperm.xlu0 (!%p305_p9), %1537, %v367_v12   ;;  %v346_v25 = vld [vmem:[%s313_s25] sm:$0xff] (!%p305_p9)  ;;  %v347_v26 = vld [vmem:[%s313_s25 + $0x8] ss:$12 sps:$4 sm:$0xff] (!%p305_p9)   ;;  %v348_v30 = vld [vmem:[%s313_s25 + $0xc] sm:$0xff] (!%p305_p9)  ;;  %v360_v56 = vunpack.c.l.bf16 (!%p305_p9), %v350_v48  ;;  %v361_v57 = vunpack.c.h.bf16 (!%p305_p9), %v350_v48  ;;  %s1816_s10 = smov (!%p305_p9), 109   ;;  %s1500_s15 = smul.u32 (!%p305_p9), 24, %s311_s23 }
  0x24   : > { %v354_v27 = vunpack.c.l.bf16 (!%p305_p9), %v346_v25  ;;  %v355_v28 = vunpack.c.h.bf16 (!%p305_p9), %v346_v25  ;;  %v356_v29 = vunpack.c.l.bf16 (!%p305_p9), %v347_v26  ;;  %v357_v33 = vunpack.c.l.bf16 (!%p305_p9), %v348_v30  ;;  %v352_v39 = vld [vmem:[%s313_s25 + $0x24] sm:$0xff] (!%p305_p9)  ;;  %v353_v40 = vld [vmem:[%s313_s25 + $0x20] ss:$12 sps:$4 sm:$0xff] (!%p305_p9)  }
  0x25   : > { %v359_v34 = vunpack.c.h.bf16 %v347_v26  ;;  %v358_v38 = vunpack.c.h.bf16 %v348_v30  ;;  %v363_v45 = vunpack.c.l.bf16 %v352_v39  ;;  %v364_v46 = vunpack.c.h.bf16 %v352_v39  ;;  %v1779_v39 = vld [vmem:[%s2574_s4] sm:$0xff]   ;;  %s342_s16 = scalar_lea.vmem [#allocation3], %s1500_s15  ;;  %s1435_s27 = smul.u32 (%p1895_p5), 12, %s1406_s30 }
  0x26   : > { %v365_v47 = vunpack.c.h.bf16 %v353_v40  ;;  %v362_v62 = vunpack.c.l.bf16 %v353_v40 }
  0x27   : > { %387 = vperm.xlu1 %1538, %v369_v13   ;;  %382 = vperm.xlu0 %1537, %v368_v14  }
  0x2b   : > { %423 = vperm.xlu1 %1538, %v405_v15   ;;  %418 = vperm.xlu0 %1537, %v404_v16  }
  0x2f   : > { %614 = vperm.xlu1 %1538, %v604_v17   ;;  %609 = vperm.xlu0 %1537, %v603_v18  }
  0x33   : > { %650 = vperm.xlu1 %1538, %v640_v19   ;;  %645 = vperm.xlu0 %1537, %v639_v20  }
  0x37   : > { %624 = vperm.xlu1 %1538, %v606_v21   ;;  %619 = vperm.xlu0 %1537, %v605_v22  }
  0x3b   : > { %660 = vperm.xlu1 %1538, %v642_v23   ;;  %655 = vperm.xlu0 %1537, %v641_v24  }
  0x9e   : > { %v409_v31 = vpop.permute.xlu1 %408  ;;  %v373_v32 = vpop.permute.xlu0 %372 }
  0x9f   : > { %v390_v35 = vmul.f32 %v373_v32, %v354_v27  ;;  %v391_v36 = vmul.f32 %v373_v32, %v355_v28  ;;  %v392_v37 = vmul.f32 %v373_v32, %v356_v29 }
  0xa1   : > { %v426_v41 = vadd.f32 %v409_v31, %v390_v35  ;;  %v427_v42 = vadd.f32 %v409_v31, %v391_v36  ;;  %v1961_v49 = vadd.f32 %v409_v31, %v392_v37 }
  0xa2   : > { %v414_v43 = vpop.permute.xlu1 %413  ;;  %v378_v44 = vpop.permute.xlu0 %377 }
  0xa3   : > { %v393_v50 = vmul.f32 %v378_v44, %v357_v33  ;;  %v394_v51 = vmul.f32 %v378_v44, %v358_v38  ;;  %v395_v52 = vmul.f32 %v378_v44, %v359_v34  ;;  %vm439_vm0 = vcmp.ge.f32.partialorder %v427_v42, 0.0 }
  0xa4   : > { %v451_v53 = vmul.f32 0.01, %v427_v42  ;;  %vm438_vm1 = vcmp.ge.f32.partialorder %v426_v41, 0.0  ;;  %v450_v54 = vmul.f32 0.01, %v426_v41  ;;  %vm440_vm2 = vcmp.ge.f32.partialorder %v1961_v49, 0.0 }
  0xa5   : > { %v429_v55 = vadd.f32 %v414_v43, %v393_v50  ;;  %v430_v58 = vadd.f32 %v414_v43, %v394_v51  ;;  %v431_v59 = vadd.f32 %v414_v43, %v395_v52  ;;  %v452_v2 = vmul.f32 0.01, %v1961_v49  ;;  %v1780_v43 = vld [vmem:[%s2574_s4 + $0x8] sm:$0xff]  }
  0xa6   : > { %v388_v60 = vpop.permute.xlu1 %387  ;;  %v383_v61 = vpop.permute.xlu0 %382  ;;  %v463_v0 = vsel %vm439_vm0, %v427_v42, %v451_v53  ;;  %v462_v1 = vsel %vm438_vm1, %v426_v41, %v450_v54 }
  0xa7   : > { %v399_v63 = vmul.f32 %v388_v60, %v363_v45  ;;  %v400_v3 = vmul.f32 %v388_v60, %v364_v46  ;;  %v401_v4 = vmul.f32 %v388_v60, %v365_v47  ;;  %vm442_vm3 = vcmp.ge.f32.partialorder %v430_v58, 0.0 }
  0xa8   : > { %v454_v5 = vmul.f32 0.01, %v430_v58  ;;  %v396_v6 = vmul.f32 %v383_v61, %v360_v56  ;;  %v397_v7 = vmul.f32 %v383_v61, %v361_v57  ;;  %vm441_vm4 = vcmp.ge.f32.partialorder %v429_v55, 0.0  ;;  %v711_v57 = vld [vmem:[%s2571_s1] sm:$0x7] }
  0xa9   : > { %v453_v8 = vmul.f32 0.01, %v429_v55  ;;  %v398_v9 = vmul.f32 %v383_v61, %v362_v62  ;;  %vm443_vm5 = vcmp.ge.f32.partialorder %v431_v59, 0.0  ;;  %v455_v14 = vmul.f32 0.01, %v431_v59 }
  0xaa   : > { %v424_v11 = vpop.permute.xlu1 %423  ;;  %v419_v12 = vpop.permute.xlu0 %418  ;;  %v466_v13 = vsel %vm442_vm3, %v430_v58, %v454_v5  ;;  %v464_v37 = vsel %vm440_vm2, %v1961_v49, %v452_v2  ;;  %v713_v46 = vlaneseq }
  0xab   : > { %v435_v15 = vadd.f32 %v424_v11, %v399_v63  ;;  %v436_v16 = vadd.f32 %v424_v11, %v400_v3  ;;  %v437_v17 = vadd.f32 %v424_v11, %v401_v4  ;;  %v432_v18 = vadd.f32 %v419_v12, %v396_v6 }
  0xac   : > { %v433_v19 = vadd.f32 %v419_v12, %v397_v7  ;;  %v434_v20 = vadd.f32 %v419_v12, %v398_v9  ;;  %v479_v21 = vpack.c.bf16 %v466_v13, %v463_v0  ;;  %v465_v22 = vsel %vm441_vm4, %v429_v55, %v453_v8 }
  0xad   : > { %v459_v23 = vmul.f32 0.01, %v435_v15  ;;  %v460_v24 = vmul.f32 0.01, %v436_v16  ;;  %v461_v25 = vmul.f32 0.01, %v437_v17  ;;  %v478_v26 = vpack.c.bf16 %v465_v22, %v462_v1 }
  0xae   : > { %v456_v27 = vmul.f32 0.01, %v432_v18  ;;  %v457_v28 = vmul.f32 0.01, %v433_v19  ;;  %v458_v29 = vmul.f32 0.01, %v434_v20  ;;  %501 = vmatprep.subr.bf16.mxu1 %v479_v21  ;;  %v467_v30 = vsel %vm443_vm5, %v431_v59, %v455_v14  ;;  %v1980_v44 = vpop.permute.xlu0 %609  ;;  %v1982_v45 = vpop.permute.xlu1 %614 }
  0xaf   : > { %502 = vmatpush1.bf16.msra.mxu1 %v478_v26  ;;  %vm445_vm6 = vcmp.ge.f32.partialorder %v433_v19, 0.0  ;;  %vm448_vm7 = vcmp.ge.f32.partialorder %v436_v16, 0.0  ;;  %vm444_vm8 = vcmp.ge.f32.partialorder %v432_v18, 0.0  ;;  %vm447_vm9 = vcmp.ge.f32.partialorder %v435_v15, 0.0 }
  0xb0   : > { %v469_v31 = vsel %vm445_vm6, %v433_v19, %v457_v28  ;;  %v472_v32 = vsel %vm448_vm7, %v436_v16, %v460_v24  ;;  %v468_v33 = vsel %vm444_vm8, %v432_v18, %v456_v27  ;;  %v471_v34 = vsel %vm447_vm9, %v435_v15, %v459_v23 }
  0xb1   : > { %v482_v35 = vpack.c.bf16 %v472_v32, %v469_v31  ;;  %v481_v36 = vpack.c.bf16 %v471_v34, %v468_v33  ;;  %vm446_vm10 = vcmp.ge.f32.partialorder %v434_v20, 0.0  ;;  %vm449_vm11 = vcmp.ge.f32.partialorder %v437_v17, 0.0 }
  0xb2   : > { %v480_v38 = vpack.c.bf16 %v467_v30, %v464_v37  ;;  %v470_v40 = vsel %vm446_vm10, %v434_v20, %v458_v29  ;;  %v473_v41 = vsel %vm449_vm11, %v437_v17, %v461_v25  ;;  %v1984_v47 = vpop.permute.xlu0 %645  ;;  %v714_v48 = vshrl.u32 %v713_v46, 7  ;;  %v1987_v49 = vpop.permute.xlu1 %650 }
  0xb3   : > { %503 = vmatprep.subr.bf16.mxu1 %v482_v35  ;;  %v483_v42 = vpack.c.bf16 %v473_v41, %v470_v40 }
  0xb4   : > { %504 = vmatpush1.bf16.msra.mxu1 %v481_v36  ;;  %v715_v53 = vsub.s32 0, %v714_v48  ;;  %v719_v58 = vsub.s32 1, %v714_v48  ;;  %v723_v2 = vsub.s32 2, %v714_v48 }
  0xb5   : > { %1478 = vmatprep.subr.bf16.mxu1 %v480_v38 }
  0xb6   : > { %v620_v61 = vpop.permute.xlu0 %619  ;;  %v625_v3 = vpop.permute.xlu1 %624  ;;  %v1999_v4 = vrot.slane %v711_v57, %v715_v53  ;;  %v2002_v8 = vrot.slane %v711_v57, %v719_v58  ;;  %v2004_v17 = vrot.slane %v711_v57, %v723_v2 }
  0xb7   : > { %1422 = vmatmul.mubr.msk.bf16.vlgmr.msra.gmra.mrb[0].mxu1 %vm494_vm12, %v1779_v39 }
  0xb8   : > { %1479 = vmatpush3.bf16.msra.mxu1 %v480_v38  ;;  %543 = vmatprep.mubr.bf16.mxu1 %v2579_v10 }
  0xb9   : > { %1480 = vmatprep.subr.bf16.mxu1 %v483_v42 }
  0xba   : > { %v656_v18 = vpop.permute.xlu0 %655  ;;  %v661_v29 = vpop.permute.xlu1 %660 }
  0xbc   : > { %1481 = vmatpush3.bf16.msra.mxu1 %v483_v42 }
  0xbf   : > { %1423 = vmatmul.mubr.msk.bf16.gmra.mrb[4].mxu1 %vm494_vm12, %v1780_v43 }
  0xc0   : > { %1482 = vmatprep.mubr.msk.bf16.mxu1 %vm494_vm12, %v1779_v39 }
  0xc7   : > { %1483 = vmatmul.mubr.msk.bf16.vlgmr.msra.gmra.mrb[8].mxu1 %vm494_vm12, %v1780_v43 }
 0x18a   : > { %v535_v50 = vpop.f32.mrb[0].mxu1 }
 0x18b   : > { %v627_v51 = vmul.f32 %v1980_v44, %v535_v50  ;;  %v537_v52 = vpop.f32.mrb[1].mxu1 }
 0x18c   : > { %v628_v54 = vmul.f32 %v1980_v44, %v537_v52  ;;  %v539_v55 = vpop.f32.mrb[2].mxu1 }
 0x18d   : > { %v663_v56 = vadd.f32 %v1984_v47, %v627_v51  ;;  %v630_v59 = vmul.f32 %v1982_v45, %v539_v55  ;;  %v541_v60 = vpop.f32.mrb[3].mxu1 }
 0x18e   : > { %v664_v62 = vadd.f32 %v1984_v47, %v628_v54  ;;  %v631_v63 = vmul.f32 %v1982_v45, %v541_v60 }
 0x18f   : > { %vm675_vm13 = vcmp.ge.f32.partialorder %v663_v56, 0.0  ;;  %v687_v0 = vmul.f32 0.01, %v663_v56  ;;  %v666_v1 = vadd.f32 %v1987_v49, %v630_v59 }
 0x190   : > { %vm676_vm14 = vcmp.ge.f32.partialorder %v664_v62, 0.0  ;;  %v688_v5 = vmul.f32 0.01, %v664_v62  ;;  %v667_v6 = vadd.f32 %v1987_v49, %v631_v63 }
 0x191   : > { %v699_v7 = vsel %vm675_vm13, %v663_v56, %v687_v0  ;;  %vm678_vm15 = vcmp.ge.f32.partialorder %v666_v1, 0.0  ;;  %v690_v9 = vmul.f32 0.01, %v666_v1 }
 0x192   : > { %v700_v11 = vsel %vm676_vm14, %v664_v62, %v688_v5  ;;  %vm679_vm0 = vcmp.ge.f32.partialorder %v667_v6, 0.0  ;;  %v691_v12 = vmul.f32 0.01, %v667_v6  ;;  %v545_v13 = vpop.f32.mrb[4].mxu1  ;;  %v2007_v19 = vmul.f32 %v1999_v4, %v699_v7 }
 0x193   : > { %v702_v14 = vsel %vm678_vm15, %v666_v1, %v690_v9  ;;  %v633_v15 = vmul.f32 %v620_v61, %v545_v13  ;;  %v547_v16 = vpop.f32.mrb[5].mxu1  ;;  %v2013_v24 = vmul.f32 %v2002_v8, %v700_v11 }
 0x194   : > { %v2010_v20 = vmul.f32 %v1999_v4, %v702_v14  ;;  %v703_v21 = vsel %vm679_vm0, %v667_v6, %v691_v12  ;;  %v634_v22 = vmul.f32 %v620_v61, %v547_v16  ;;  %v549_v23 = vpop.f32.mrb[6].mxu1 }
 0x195   : > { %v2016_v25 = vmul.f32 %v2002_v8, %v703_v21  ;;  %v669_v26 = vadd.f32 %v656_v18, %v633_v15  ;;  %v636_v27 = vmul.f32 %v625_v3, %v549_v23  ;;  %v551_v28 = vpop.f32.mrb[7].mxu1 }
 0x196   : > { %v670_v30 = vadd.f32 %v656_v18, %v634_v22  ;;  %v637_v31 = vmul.f32 %v625_v3, %v551_v28  ;;  %v2020_v32 = vpack.i.bf16 %v2010_v20, %v2007_v19  ;;  %v1062_v22 = vpack.c.bf16 %v2010_v20, %v2007_v19 }
 0x197   : > { %vm681_vm1 = vcmp.ge.f32.partialorder %v669_v26, 0.0  ;;  %v693_v33 = vmul.f32 0.01, %v669_v26  ;;  %v672_v34 = vadd.f32 %v661_v29, %v636_v27  ;;  %v2024_v35 = vpack.i.bf16 %v2016_v25, %v2013_v24  ;;  %v2118_v27 = vld [vmem:[%s2577_s7] sm:$0xff] }
 0x198   : > { %vm682_vm2 = vcmp.ge.f32.partialorder %v670_v30, 0.0  ;;  %v694_v36 = vmul.f32 0.01, %v670_v30  ;;  %v673_v37 = vadd.f32 %v661_v29, %v637_v31  ;;  %1540 = vrot.lane.b32.xlu0 %v2020_v32, %s1809_s17  ;;  %v1063_v21 = vpack.c.bf16 %v2016_v25, %v2013_v24 }
 0x199   : > { %v705_v38 = vsel %vm681_vm1, %v669_v26, %v693_v33  ;;  %vm684_vm3 = vcmp.ge.f32.partialorder %v672_v34, 0.0  ;;  %v696_v39 = vmul.f32 0.01, %v672_v34  ;;  %1555 = vrot.lane.b32.xlu1 %v2024_v35, %s1809_s17  ;;  %v1427_v28 = vcombine.high %v2118_v27, %v2118_v27 }
 0x19a   : > { %v2031_v40 = vmul.f32 %v1999_v4, %v705_v38  ;;  %v706_v41 = vsel %vm682_vm2, %v670_v30, %v694_v36  ;;  %vm685_vm4 = vcmp.ge.f32.partialorder %v673_v37, 0.0  ;;  %v697_v42 = vmul.f32 0.01, %v673_v37  ;;  %v1484_v43 = vpop.f32.mrb[8].mxu1 }
 0x19b   : > { %v2034_v48 = vmul.f32 %v2002_v8, %v706_v41  ;;  %v708_v50 = vsel %vm684_vm3, %v672_v34, %v696_v39  ;;  %v635_v51 = vmul.f32 %v1484_v43, %v620_v61  ;;  %v588_v52 = vpop.f32.mrb[9].mxu1  ;;  %1139 = vmatprep.mubr.bf16.mxu0 %v1427_v28  ;;  %1221 = vmatprep.mubr.bf16.mxu1 %v1427_v28  ;;  %vm1818_vm2 = vmmov 0  }
 0x19c   : > { %v2037_v53 = vmul.f32 %v1999_v4, %v708_v50  ;;  %v709_v54 = vsel %vm685_vm4, %v673_v37, %v697_v42  ;;  %v629_v55 = vmul.f32 %v1980_v44, %v588_v52  ;;  %1545 = vrot.lane.b32.xlu0 %v2020_v32, %s1810_s18  ;;  %v1485_v56 = vpop.f32.mrb[10].mxu1 }
 0x19d   : > { %v2043_v57 = vmul.f32 %v2002_v8, %v709_v54  ;;  %v671_v58 = vadd.f32 %v656_v18, %v635_v51  ;;  %v638_v59 = vmul.f32 %v1485_v56, %v625_v3  ;;  %1560 = vrot.lane.b32.xlu1 %v2024_v35, %s1810_s18  ;;  %v591_v60 = vpop.f32.mrb[11].mxu1 }
 0x19e   : > { %v665_v61 = vadd.f32 %v1984_v47, %v629_v55  ;;  %v632_v62 = vmul.f32 %v1982_v45, %v591_v60  ;;  %v2051_v44 = vpack.i.bf16 %v2037_v53, %v2031_v40  ;;  %v1065_v26 = vpack.c.bf16 %v2037_v53, %v2031_v40 }
 0x19f   : > { %vm683_vm5 = vcmp.ge.f32.partialorder %v671_v58, 0.0  ;;  %v695_v63 = vmul.f32 0.01, %v671_v58  ;;  %v674_v0 = vadd.f32 %v661_v29, %v638_v59  ;;  %v2055_v1 = vpack.i.bf16 %v2043_v57, %v2034_v48 }
 0x1a0   : > { %vm677_vm6 = vcmp.ge.f32.partialorder %v665_v61, 0.0  ;;  %v689_v2 = vmul.f32 0.01, %v665_v61  ;;  %v668_v3 = vadd.f32 %v1987_v49, %v632_v62  ;;  %1550 = vrot.lane.b32.xlu0 %v2020_v32, %s1811_s19  ;;  %v1066_v23 = vpack.c.bf16 %v2043_v57, %v2034_v48 }
 0x1a1   : > { %v707_v45 = vsel %vm683_vm5, %v671_v58, %v695_v63  ;;  %vm686_vm7 = vcmp.ge.f32.partialorder %v674_v0, 0.0  ;;  %v698_v47 = vmul.f32 0.01, %v674_v0  ;;  %1565 = vrot.lane.b32.xlu1 %v2024_v35, %s1811_s19  ;;  %v2128_v29 = vand.u32 127, %v713_v46 }
 0x1a2   : > { %v2063_v5 = vmul.f32 %v2004_v17, %v707_v45  ;;  %v701_v6 = vsel %vm677_vm6, %v665_v61, %v689_v2  ;;  %vm680_vm8 = vcmp.ge.f32.partialorder %v668_v3, 0.0  ;;  %v692_v7 = vmul.f32 0.01, %v668_v3 }
 0x1a3   : > { %v730_v9 = vmul.f32 %v2004_v17, %v701_v6  ;;  %v710_v11 = vsel %vm686_vm7, %v674_v0, %v698_v47  ;;  %vm766_vm9 = vcmp.lt.s32.totalorder %v2128_v29, 19  ;;  %vm803_vm10 = vcmp.lt.s32.totalorder %v2128_v29, 18 }
 0x1a4   : > { %v2067_v49 = vmul.f32 %v2004_v17, %v710_v11  ;;  %v704_v12 = vsel %vm680_vm8, %v668_v3, %v692_v7  ;;  %1585 = vrot.lane.b32.xlu0 %v2055_v1, %s1809_s17  ;;  %vm840_vm11 = vcmp.lt.s32.totalorder %v2128_v29, 17  ;;  %vm877_vm13 = vcmp.lt.s32.totalorder %v2128_v29, 1 }
 0x1a5   : > { %v733_v13 = vmul.f32 %v2004_v17, %v704_v12  ;;  %1570 = vrot.lane.b32.xlu1 %v2051_v44, %s1809_s17  ;;  %vm914_vm14 = vcmp.lt.s32.totalorder %v2128_v29, 127  ;;  %vm951_vm15 = vcmp.lt.s32.totalorder %v2128_v29, 111  ;;  %vm988_vm0 = vcmp.lt.s32.totalorder %v2128_v29, 110 }
 0x1a6   : > { %v1594_v14 = vpack.i.bf16 %v2067_v49, %v2063_v5  ;;  %v1067_v18 = vpack.c.bf16 %v2067_v49, %v2063_v5  ;;  %vm1025_vm1 = vcmp.lt.s32.totalorder %v2128_v29, 109 }
 0x1a7   : > { %v1064_v15 = vpack.c.bf16 %v733_v13, %v730_v9  ;;  %v1604_v16 = vpack.i.bf16 %v733_v13, %v730_v9 }
 0x1a8   : > { %1590 = vrot.lane.b32.xlu0 %v2055_v1, %s1810_s18 }
 0x1a9   : > { %1575 = vrot.lane.b32.xlu1 %v2051_v44, %s1810_s18  ;;  %1453 = vmatprep.subr.bf16.mxu1 %v1064_v15 }
 0x1ac   : > { %1605 = vrot.lane.b32.xlu0 %v1604_v16, %s1809_s17 }
 0x1ad   : > { %1580 = vrot.lane.b32.xlu1 %v2051_v44, %s1811_s19 }
 0x1b0   : > { %1610 = vrot.lane.b32.xlu0 %v2055_v1, %s1811_s19 }
 0x1b1   : > { %1595 = vrot.lane.b32.xlu1 %v1594_v14, %s1809_s17 }
 0x1b4   : > { %1620 = vrot.lane.b32.xlu0 %v1604_v16, %s1810_s18 }
 0x1b5   : > { %1600 = vrot.lane.b32.xlu1 %v1594_v14, %s1810_s18  ;;  %s1365_s18 = scalar_lea.vmem (%p1895_p5), %s2578_s8, %s1435_s27 }
 0x1b8   : > { %1625 = vrot.lane.b32.xlu0 %v2020_v32, %s1812_s20 }
 0x1b9   : > { %1615 = vrot.lane.b32.xlu1 %v1594_v14, %s1811_s19 }
 0x1bc   : > { %1640 = vrot.lane.b32.xlu0 %v1604_v16, %s1811_s19 }
 0x1bd   : > { %1630 = vrot.lane.b32.xlu1 %v2024_v35, %s1812_s20 }
 0x1c0   : > { %1645 = vrot.lane.b32.xlu0 %v2055_v1, %s1812_s20 }
 0x1c1   : > { %1635 = vrot.lane.b32.xlu1 %v2051_v44, %s1812_s20 }
 0x1c4   : > { %1655 = vrot.lane.b32.xlu0 %v1604_v16, %s1812_s20 }
 0x1c5   : > { %1650 = vrot.lane.b32.xlu1 %v1594_v14, %s1812_s20 }
 0x1c8   : > { %1660 = vrot.lane.b32.xlu0 %v2024_v35, %s1813_s21 }
 0x1c9   : > { %1670 = vrot.lane.b32.xlu1 %v2055_v1, %s1813_s21 }
 0x1cc   : > { %1665 = vrot.lane.b32.xlu0 %v2020_v32, %s1813_s21 }
 0x1cd   : > { %1680 = vrot.lane.b32.xlu1 %v2051_v44, %s1813_s21 }
 0x1d0   : > { %1675 = vrot.lane.b32.xlu0 %v1594_v14, %s1813_s21 }
 0x1d1   : > { %1695 = vrot.lane.b32.xlu1 %v2055_v1, %s1814_s22 }
 0x1d4   : > { %1685 = vrot.lane.b32.xlu0 %v2024_v35, %s1814_s22 }
 0x1d5   : > { %1705 = vrot.lane.b32.xlu1 %v1604_v16, %s1813_s21 }
 0x1d8   : > { %1690 = vrot.lane.b32.xlu0 %v2020_v32, %s1814_s22 }
 0x1d9   : > { %1710 = vrot.lane.b32.xlu1 %v2051_v44, %s1814_s22 }
 0x1dc   : > { %1700 = vrot.lane.b32.xlu0 %v1594_v14, %s1814_s22 }
 0x1dd   : > { %1725 = vrot.lane.b32.xlu1 %v1604_v16, %s1814_s22 }
 0x1e0   : > { %1715 = vrot.lane.b32.xlu0 %v2024_v35, %s1815_s24 }
 0x1e1   : > { %1730 = vrot.lane.b32.xlu1 %v2055_v1, %s1815_s24 }
 0x1e4   : > { %1720 = vrot.lane.b32.xlu0 %v2020_v32, %s1815_s24 }
 0x1e5   : > { %1740 = vrot.lane.b32.xlu1 %v1604_v16, %s1815_s24 }
 0x1e8   : > { %1735 = vrot.lane.b32.xlu0 %v1594_v14, %s1815_s24 }
 0x1e9   : > { %1745 = vrot.lane.b32.xlu1 %v2051_v44, %s1815_s24 }
 0x1ec   : > { %1750 = vrot.lane.b32.xlu0 %v2020_v32, %s1816_s10 }
 0x1ed   : > { %1755 = vrot.lane.b32.xlu1 %v2024_v35, %s1816_s10 }
 0x1f0   : > { %1765 = vrot.lane.b32.xlu0 %v1604_v16, %s1816_s10 }
 0x1f1   : > { %1760 = vrot.lane.b32.xlu1 %v2051_v44, %s1816_s10 }
 0x1f4   : > { %1770 = vrot.lane.b32.xlu0 %v2055_v1, %s1816_s10 }
 0x1f5   : > { %1775 = vrot.lane.b32.xlu1 %v1594_v14, %s1816_s10 }
 0x20a   : > { %v1541_v30 = vpop.permute.xlu0 %1540 }
 0x20b   : > { %v1543_v31 = vunpack.i.h.bf16 %v1541_v30  ;;  %v1542_v33 = vunpack.i.l.bf16 %v1541_v30  ;;  %v1556_v34 = vpop.permute.xlu1 %1555 }
 0x20c   : > { %v1558_v36 = vunpack.i.h.bf16 %v1556_v34  ;;  %v1557_v37 = vunpack.i.l.bf16 %v1556_v34 }
 0x20e   : > { %v2131_v32 = vpop.permute.xlu0 %1545  ;;  %v771_v35 = vsel %vm766_vm9, %v1542_v33, %v1557_v37  ;;  %v772_v38 = vsel %vm766_vm9, %v1543_v31, %v1558_v36 }
 0x20f   : > { %v2137_v39 = vpop.permute.xlu1 %1560  ;;  %v1039_v46 = vpack.c.bf16 %v772_v38, %v771_v35  ;;  %v1547_v59 = vunpack.i.l.bf16 %v2131_v32  ;;  %v1548_v62 = vunpack.i.h.bf16 %v2131_v32 }
 0x210   : > { %v1562_v60 = vunpack.i.l.bf16 %v2137_v39  ;;  %v1563_v44 = vunpack.i.h.bf16 %v2137_v39 }
 0x211   : > { %1107 = vmatprep.subr.bf16.mxu0 %v1039_v46 }
 0x212   : > { %v2139_v41 = vpop.permute.xlu0 %1550  ;;  %v808_v13 = vsel %vm803_vm10, %v1547_v59, %v1562_v60  ;;  %v809_v30 = vsel %vm803_vm10, %v1548_v62, %v1563_v44 }
 0x213   : > { %v2141_v42 = vpop.permute.xlu1 %1565  ;;  %v1553_v14 = vunpack.i.h.bf16 %v2139_v41  ;;  %v1552_v15 = vunpack.i.l.bf16 %v2139_v41 }
 0x216   : > { %v1586_v43 = vpop.permute.xlu0 %1585 }
 0x217   : > { %v1571_v50 = vpop.permute.xlu1 %1570  ;;  %v1588_v54 = vunpack.i.h.bf16 %v1586_v43  ;;  %v1587_v55 = vunpack.i.l.bf16 %v1586_v43 }
 0x218   : > { %v1573_v56 = vunpack.i.h.bf16 %v1571_v50  ;;  %v1572_v58 = vunpack.i.l.bf16 %v1571_v50 }
 0x21a   : > { %v2143_v51 = vpop.permute.xlu0 %1590  ;;  %v773_v2 = vsel %vm766_vm9, %v1572_v58, %v1587_v55  ;;  %v774_v3 = vsel %vm766_vm9, %v1573_v56, %v1588_v54 }
 0x21b   : > { %v2145_v52 = vpop.permute.xlu1 %1575  ;;  %v1042_v28 = vpack.c.bf16 %v774_v3, %v773_v2  ;;  %v1592_v32 = vunpack.i.l.bf16 %v2143_v51  ;;  %v1045_v2 = vpack.c.bf16 %v809_v30, %v808_v13 }
 0x21c   : > { %v1578_v35 = vunpack.i.h.bf16 %v2145_v52  ;;  %v1577_v38 = vunpack.i.l.bf16 %v2145_v52 }
 0x21e   : > { %v1606_v61 = vpop.permute.xlu0 %1605 }
 0x21f   : > { %v1608_v63 = vunpack.i.h.bf16 %v1606_v61  ;;  %v1607_v0 = vunpack.i.l.bf16 %v1606_v61  ;;  %v2152_v1 = vpop.permute.xlu1 %1580 }
 0x221   : > { %v768_v45 = vsel %vm766_vm9, %v1558_v36, %v1608_v63  ;;  %v767_v47 = vsel %vm766_vm9, %v1557_v37, %v1607_v0  ;;  %v775_v6 = vsel %vm766_vm9, %v1607_v0, %v1542_v33  ;;  %v776_v7 = vsel %vm766_vm9, %v1608_v63, %v1543_v31 }
 0x222   : > { %v1040_v9 = vpack.c.bf16 %v768_v45, %v767_v47  ;;  %v2166_v11 = vpop.permute.xlu0 %1610  ;;  %v1038_v12 = vpack.c.bf16 %v776_v7, %v775_v6  ;;  %v1568_v31 = vunpack.i.h.bf16 %v2141_v42  ;;  %v1567_v33 = vunpack.i.l.bf16 %v2141_v42 }
 0x223   : > { %v1596_v16 = vpop.permute.xlu1 %1595  ;;  %v1593_v37 = vunpack.i.h.bf16 %v2143_v51  ;;  %v1612_v45 = vunpack.i.l.bf16 %v2166_v11 }
 0x224   : > { %v1598_v34 = vunpack.i.h.bf16 %v1596_v16  ;;  %v1597_v36 = vunpack.i.l.bf16 %v1596_v16  ;;  %1108 = vmatpush1.bf16.msra.mxu0 %v1038_v12  ;;  %1454 = vmatpush3.bf16.msra.mxu1 %v1040_v9  ;;  %v845_v12 = vsel %vm840_vm11, %v1552_v15, %v1567_v33  ;;  %v846_v13 = vsel %vm840_vm11, %v1553_v14, %v1568_v31 }
 0x225   : > { %1109 = vmatprep.subr.bf16.mxu0 %v1042_v28  ;;  %1455 = vmatprep.subr.bf16.mxu1 %v1067_v18  ;;  %v811_v3 = vsel %vm803_vm10, %v1578_v35, %v1593_v37 }
 0x226   : > { %v770_v46 = vsel %vm766_vm9, %v1588_v54, %v1598_v34  ;;  %v769_v43 = vsel %vm766_vm9, %v1587_v55, %v1597_v36  ;;  %v2191_v50 = vpop.permute.xlu0 %1620  ;;  %v777_v61 = vsel %vm766_vm9, %v1597_v36, %v1572_v58  ;;  %v778_v63 = vsel %vm766_vm9, %v1598_v34, %v1573_v56 }
 0x227   : > { %v1043_v52 = vpack.c.bf16 %v770_v46, %v769_v43  ;;  %v1623_v0 = vunpack.i.h.bf16 %v2191_v50  ;;  %v1622_v5 = vunpack.i.l.bf16 %v2191_v50  ;;  %v2199_v49 = vpop.permute.xlu1 %1600  ;;  %v1041_v18 = vpack.c.bf16 %v778_v63, %v777_v61 }
 0x228   : > { %v1603_v54 = vunpack.i.h.bf16 %v2199_v49  ;;  %v1602_v55 = vunpack.i.l.bf16 %v2199_v49  ;;  %v810_v58 = vsel %vm803_vm10, %v1577_v38, %v1592_v32  ;;  %v1583_v34 = vunpack.i.h.bf16 %v2152_v1 }
 0x229   : > { %1110 = vmatpush1.bf16.msra.mxu0 %v1041_v18  ;;  %1456 = vmatpush3.bf16.msra.mxu1 %v1043_v52  ;;  %v812_v56 = vsel %vm803_vm10, %v1622_v5, %v1547_v59  ;;  %v813_v6 = vsel %vm803_vm10, %v1623_v0, %v1548_v62  ;;  %v1613_v59 = vunpack.i.h.bf16 %v2166_v11  ;;  %v1582_v62 = vunpack.i.l.bf16 %v2152_v1 }
 0x22a   : > { %v1626_v47 = vpop.permute.xlu0 %1625  ;;  %1111 = vmatprep.subr.bf16.mxu0 %v1045_v2  ;;  %v1044_v9 = vpack.c.bf16 %v813_v6, %v812_v56  ;;  %v1048_v16 = vpack.c.bf16 %v811_v3, %v810_v58  ;;  %v814_v28 = vsel %vm803_vm10, %v1602_v55, %v1577_v38  ;;  %v815_v30 = vsel %vm803_vm10, %v1603_v54, %v1578_v35 }
 0x22b   : > { %v2222_v7 = vpop.permute.xlu1 %1615  ;;  %v1051_v46 = vpack.c.bf16 %v846_v13, %v845_v12  ;;  %v847_v43 = vsel %vm840_vm11, %v1582_v62, %v1612_v45  ;;  %v1047_v52 = vpack.c.bf16 %v815_v30, %v814_v28  ;;  %v848_v1 = vsel %vm840_vm11, %v1583_v34, %v1613_v59 }
 0x22c   : > { %v1618_v35 = vunpack.i.h.bf16 %v2222_v7  ;;  %v1617_v18 = vunpack.i.l.bf16 %v2222_v7  ;;  %v1628_v6 = vunpack.i.h.bf16 %v1626_v47  ;;  %v1054_v28 = vpack.c.bf16 %v848_v1, %v847_v43 }
 0x22d   : > { %1112 = vmatpush1.bf16.msra.mxu0 %v1044_v9  ;;  %v1627_v9 = vunpack.i.l.bf16 %v1626_v47  ;;  %v2350_v24 = vsel %vm803_vm10, %v1593_v37, %v1603_v54  ;;  %v2358_v25 = vsel %vm803_vm10, %v1592_v32, %v1602_v55 }
 0x22e   : > { %v2246_v36 = vpop.permute.xlu0 %1640  ;;  %1113 = vmatprep.subr.bf16.mxu0 %v1048_v16  ;;  %v851_v41 = vsel %vm840_vm11, %v1617_v18, %v1582_v62  ;;  %v1049_v51 = vpack.c.bf16 %v2350_v24, %v2358_v25 }
 0x22f   : > { %v1643_v61 = vunpack.i.h.bf16 %v2246_v36  ;;  %v1642_v38 = vunpack.i.l.bf16 %v2246_v36  ;;  %v2254_v63 = vpop.permute.xlu1 %1630 }
 0x230   : > { %v2581_v2 = vunpack.i.h.bf16 %v2254_v63  ;;  %v2580_v56 = vunpack.i.l.bf16 %v2254_v63 }
 0x231   : > { %1114 = vmatpush1.bf16.msra.mxu0 %v1047_v52  ;;  %v849_v58 = vsel %vm840_vm11, %v1642_v38, %v1552_v15  ;;  %v850_v3 = vsel %vm840_vm11, %v1643_v61, %v1553_v14  ;;  %v852_v14 = vsel %vm840_vm11, %v1618_v35, %v1583_v34  ;;  %v841_v11 = vsel %vm840_vm11, %v1567_v33, %v1642_v38 }
 0x232   : > { %v2277_v12 = vpop.permute.xlu0 %1645  ;;  %1115 = vmatprep.subr.bf16.mxu0 %v1051_v46  ;;  %v1050_v13 = vpack.c.bf16 %v850_v3, %v849_v58  ;;  %v882_v15 = vsel %vm877_vm13, %v1627_v9, %v2580_v56  ;;  %v883_v47 = vsel %vm877_vm13, %v1628_v6, %v2581_v2  ;;  %v1053_v3 = vpack.c.bf16 %v852_v14, %v851_v41 }
 0x233   : > { %v1636_v16 = vpop.permute.xlu1 %1635  ;;  %v2584_v30 = vunpack.i.h.bf16 %v2277_v12  ;;  %v2582_v46 = vunpack.i.l.bf16 %v2277_v12  ;;  %v1057_v2 = vpack.c.bf16 %v883_v47, %v882_v15 }
 0x234   : > { %v1638_v62 = vunpack.i.h.bf16 %v1636_v16  ;;  %v1637_v43 = vunpack.i.l.bf16 %v1636_v16 }
 0x235   : > { %1116 = vmatpush1.bf16.msra.mxu0 %v1050_v13 }
 0x236   : > { %v2297_v52 = vpop.permute.xlu0 %1655  ;;  %1117 = vmatprep.subr.bf16.mxu0 %v1054_v28  ;;  %v884_v28 = vsel %vm877_vm13, %v1637_v43, %v2582_v46  ;;  %v885_v41 = vsel %vm877_vm13, %v1638_v62, %v2584_v30 }
 0x237   : > { %v1658_v34 = vunpack.i.h.bf16 %v2297_v52  ;;  %v2583_v1 = vunpack.i.l.bf16 %v2297_v52  ;;  %v2301_v58 = vpop.permute.xlu1 %1650 }
 0x238   : > { %v1653_v10 = vunpack.i.h.bf16 %v2301_v58  ;;  %v1652_v56 = vunpack.i.l.bf16 %v2301_v58 }
 0x239   : > { %1118 = vmatpush1.bf16.msra.mxu0 %v1053_v3  ;;  %v886_v13 = vsel %vm877_vm13, %v2583_v1, %v1627_v9  ;;  %v887_v16 = vsel %vm877_vm13, %v1658_v34, %v1628_v6  ;;  %v1060_v9 = vpack.c.bf16 %v885_v41, %v884_v28 }
 0x23a   : > { %v1661_v14 = vpop.permute.xlu0 %1660  ;;  %1119 = vmatprep.subr.bf16.mxu0 %v1057_v2  ;;  %v1056_v15 = vpack.c.bf16 %v887_v16, %v886_v13  ;;  %v888_v6 = vsel %vm877_vm13, %v1652_v56, %v1637_v43  ;;  %v889_v3 = vsel %vm877_vm13, %v1653_v10, %v1638_v62  ;;  %v805_v43 = vsel %vm803_vm10, %v1563_v44, %v1623_v0 }
 0x23b   : > { %v1671_v47 = vpop.permute.xlu1 %1670  ;;  %v1059_v30 = vpack.c.bf16 %v889_v3, %v888_v6  ;;  %v804_v62 = vsel %vm803_vm10, %v1562_v60, %v1622_v5  ;;  %v1663_v0 = vunpack.i.h.bf16 %v1661_v14  ;;  %v1662_v5 = vunpack.i.l.bf16 %v1661_v14 }
 0x23c   : > { %v1046_v37 = vpack.c.bf16 %v805_v43, %v804_v62  ;;  %v1673_v49 = vunpack.i.h.bf16 %v1671_v47  ;;  %v1672_v54 = vunpack.i.l.bf16 %v1671_v47  ;;  %v2407_v6 = vsel %vm840_vm11, %v1612_v45, %v1617_v18 }
 0x23d   : > { %1120 = vmatpush1.bf16.msra.mxu0 %v1056_v15  ;;  %v2415_v3 = vsel %vm840_vm11, %v1613_v59, %v1618_v35 }
 0x23e   : > { %v1666_v46 = vpop.permute.xlu0 %1665  ;;  %1121 = vmatprep.subr.bf16.mxu0 %v1060_v9 }
 0x23f   : > { %v1681_v1 = vpop.permute.xlu1 %1680  ;;  %v1668_v39 = vunpack.i.h.bf16 %v1666_v46  ;;  %v1667_v60 = vunpack.i.l.bf16 %v1666_v46 }
 0x240   : > { %v1683_v19 = vunpack.i.h.bf16 %v1681_v1  ;;  %v1682_v20 = vunpack.i.l.bf16 %v1681_v1 }
 0x241   : > { %1122 = vmatpush1.bf16.msra.mxu0 %v1059_v30  ;;  %v919_v46 = vsel %vm914_vm14, %v1667_v60, %v1662_v5  ;;  %v920_v13 = vsel %vm914_vm14, %v1668_v39, %v1663_v0 }
 0x242   : > { %v1676_v2 = vpop.permute.xlu0 %1675  ;;  %1123 = vmatprep.subr.bf16.mxu0 %v1063_v21  ;;  %v921_v47 = vsel %vm914_vm14, %v1682_v20, %v1672_v54  ;;  %v922_v9 = vsel %vm914_vm14, %v1683_v19, %v1673_v49  ;;  %v1068_v43 = vpack.c.bf16 %v920_v13, %v919_v46 }
 0x243   : > { %v2360_v21 = vpop.permute.xlu1 %1695  ;;  %v1678_v44 = vunpack.i.h.bf16 %v1676_v2  ;;  %v1677_v50 = vunpack.i.l.bf16 %v1676_v2  ;;  %v842_v2 = vsel %vm840_vm11, %v1568_v31, %v1643_v61  ;;  %v1071_v31 = vpack.c.bf16 %v922_v9, %v921_v47 }
 0x244   : > { %v1698_v59 = vunpack.i.h.bf16 %v2360_v21  ;;  %v1697_v35 = vunpack.i.l.bf16 %v2360_v21  ;;  %v1052_v25 = vpack.c.bf16 %v842_v2, %v841_v11 }
 0x245   : > { %1124 = vmatpush1.bf16.msra.mxu0 %v1062_v22  ;;  %v917_v48 = vsel %vm914_vm14, %v1672_v54, %v1677_v50  ;;  %v918_v57 = vsel %vm914_vm14, %v1673_v49, %v1678_v44  ;;  %v926_v1 = vsel %vm914_vm14, %v1678_v44, %v1683_v19 }
 0x246   : > { %v2368_v32 = vpop.permute.xlu0 %1685  ;;  %1125 = vmatprep.subr.bf16.mxu0 %v1066_v23  ;;  %v925_v23 = vsel %vm914_vm14, %v1677_v50, %v1682_v20  ;;  %v1072_v45 = vpack.c.bf16 %v918_v57, %v917_v48 }
 0x247   : > { %v1706_v22 = vpop.permute.xlu1 %1705  ;;  %v1073_v7 = vpack.c.bf16 %v926_v1, %v925_v23  ;;  %v1688_v61 = vunpack.i.h.bf16 %v2368_v32  ;;  %v2587_v23 = vunpack.i.l.bf16 %v2297_v52  ;;  %v2588_v1 = vunpack.i.l.bf16 %v2254_v63 }
 0x248   : > { %v1708_v55 = vunpack.i.h.bf16 %v1706_v22  ;;  %v1707_v30 = vunpack.i.l.bf16 %v1706_v22 }
 0x249   : > { %1126 = vmatpush1.bf16.msra.mxu0 %v1065_v26 }
 0x24a   : > { %v1691_v16 = vpop.permute.xlu0 %1690  ;;  %v915_v28 = vsel %vm914_vm14, %v1662_v5, %v1707_v30  ;;  %v916_v40 = vsel %vm914_vm14, %v1663_v0, %v1708_v55  ;;  %v923_v53 = vsel %vm914_vm14, %v1707_v30, %v1667_v60  ;;  %v924_v26 = vsel %vm914_vm14, %v1708_v55, %v1668_v39 }
 0x24b   : > { %v1711_v41 = vpop.permute.xlu1 %1710  ;;  %v1069_v14 = vpack.c.bf16 %v916_v40, %v915_v28  ;;  %v1070_v15 = vpack.c.bf16 %v924_v26, %v923_v53  ;;  %v1693_v62 = vunpack.i.h.bf16 %v1691_v16  ;;  %v1692_v39 = vunpack.i.l.bf16 %v1691_v16 }
 0x24c   : > { %v1687_v60 = vunpack.i.l.bf16 %v2368_v32  ;;  %v1713_v42 = vunpack.i.h.bf16 %v1711_v41  ;;  %v1712_v0 = vunpack.i.l.bf16 %v1711_v41  ;;  %v878_v16 = vsel %vm877_vm13, %v2588_v1, %v2587_v23 }
 0x24d   : > { %1127 = vmatprep.subr.bf16.mxu0 %v1069_v14  ;;  %1457 = vmatprep.subr.bf16.mxu1 %v1070_v15 }
 0x24e   : > { %v1701_v18 = vpop.permute.xlu0 %1700  ;;  %1128 = vmatpush1.bf16.msra.mxu0 %v1068_v43  ;;  %1458 = vmatpush3.bf16.msra.mxu1 %v1046_v37  ;;  %v956_v21 = vsel %vm951_vm15, %v1692_v39, %v1687_v60  ;;  %v957_v37 = vsel %vm951_vm15, %v1693_v62, %v1688_v61  ;;  %v958_v40 = vsel %vm951_vm15, %v1712_v0, %v1697_v35 }
 0x24f   : > { %v1703_v44 = vunpack.i.h.bf16 %v1701_v18  ;;  %v1702_v50 = vunpack.i.l.bf16 %v1701_v18  ;;  %v1726_v36 = vpop.permute.xlu1 %1725  ;;  %1129 = vmatprep.subr.bf16.mxu0 %v1072_v45  ;;  %1459 = vmatprep.subr.bf16.mxu1 %v1073_v7  ;;  %v1074_v57 = vpack.c.bf16 %v957_v37, %v956_v21  ;;  %v959_v53 = vsel %vm951_vm15, %v1713_v42, %v1698_v59 }
 0x250   : > { %v1728_v33 = vunpack.i.h.bf16 %v1726_v36  ;;  %v1727_v38 = vunpack.i.l.bf16 %v1726_v36  ;;  %v2589_v36 = vunpack.i.l.bf16 %v2277_v12  ;;  %v2590_v21 = vunpack.i.h.bf16 %v2277_v12 }
 0x251   : > { %v954_v5 = vsel %vm951_vm15, %v1697_v35, %v1702_v50  ;;  %v955_v32 = vsel %vm951_vm15, %v1698_v59, %v1703_v44  ;;  %v962_v46 = vsel %vm951_vm15, %v1702_v50, %v1712_v0  ;;  %v963_v24 = vsel %vm951_vm15, %v1703_v44, %v1713_v42 }
 0x252   : > { %v1716_v49 = vpop.permute.xlu0 %1715  ;;  %1130 = vmatpush1.bf16.msra.mxu0 %v1071_v31  ;;  %1460 = vmatpush3.bf16.msra.mxu1 %v1049_v51  ;;  %v952_v54 = vsel %vm951_vm15, %v1687_v60, %v1727_v38  ;;  %v953_v19 = vsel %vm951_vm15, %v1688_v61, %v1728_v33  ;;  %v960_v20 = vsel %vm951_vm15, %v1727_v38, %v1692_v39  ;;  %v2586_v51 = vunpack.i.h.bf16 %v2254_v63 }
 0x253   : > { %v2450_v22 = vpop.permute.xlu1 %1730  ;;  %v1075_v55 = vpack.c.bf16 %v953_v19, %v952_v54  ;;  %v961_v30 = vsel %vm951_vm15, %v1728_v33, %v1693_v62  ;;  %v1078_v28 = vpack.c.bf16 %v955_v32, %v954_v5  ;;  %v1079_v52 = vpack.c.bf16 %v963_v24, %v962_v46 }
 0x254   : > { %v879_v13 = vsel %vm877_vm13, %v2586_v51, %v1658_v34  ;;  %v1076_v48 = vpack.c.bf16 %v961_v30, %v960_v20  ;;  %v1055_v34 = vpack.c.bf16 %v2415_v3, %v2407_v6  ;;  %v1718_v63 = vunpack.i.h.bf16 %v1716_v49 }
 0x255   : > { %1131 = vmatprep.subr.bf16.mxu0 %v1075_v55  ;;  %v1717_v41 = vunpack.i.l.bf16 %v1716_v49  ;;  %v1058_v9 = vpack.c.bf16 %v879_v13, %v878_v16  ;;  %v1077_v62 = vpack.c.bf16 %v959_v53, %v958_v40  ;;  %v1733_v6 = vunpack.i.h.bf16 %v2450_v22 }
 0x256   : > { %1461 = vmatprep.subr.bf16.mxu1 %v1076_v48  ;;  %v1721_v26 = vpop.permute.xlu0 %1720  ;;  %1132 = vmatpush1.bf16.msra.mxu0 %v1074_v57  ;;  %v1732_v3 = vunpack.i.l.bf16 %v2450_v22  ;;  %v880_v42 = vsel %vm877_vm13, %v2589_v36, %v1652_v56  ;;  %v881_v37 = vsel %vm877_vm13, %v2590_v21, %v1653_v10  ;;  %v1426_v51 = vcombine.low %v2118_v27, %v2118_v27 }
 0x257   : > { %v1723_v14 = vunpack.i.h.bf16 %v1721_v26  ;;  %v1722_v15 = vunpack.i.l.bf16 %v1721_v26  ;;  %1462 = vmatpush3.bf16.msra.mxu1 %v1052_v25  ;;  %v1741_v47 = vpop.permute.xlu1 %1740  ;;  %1133 = vmatprep.subr.bf16.mxu0 %v1078_v28  ;;  %v1061_v25 = vpack.c.bf16 %v881_v37, %v880_v42  ;;  %v1817_v28 = vmov 0.0  }
 0x258   : > { %v1743_v2 = vunpack.i.h.bf16 %v1741_v47  ;;  %v1742_v43 = vunpack.i.l.bf16 %v1741_v47  ;;  %1463 = vmatprep.subr.bf16.mxu1 %v1079_v52 }
 0x259   : > { %v993_v39 = vsel %vm988_vm0, %v1722_v15, %v1717_v41  ;;  %v994_v45 = vsel %vm988_vm0, %v1723_v14, %v1718_v63 }
 0x25a   : > { %v1736_v7 = vpop.permute.xlu0 %1735  ;;  %1134 = vmatpush1.bf16.msra.mxu0 %v1077_v62  ;;  %v989_v11 = vsel %vm988_vm0, %v1717_v41, %v1742_v43  ;;  %v990_v59 = vsel %vm988_vm0, %v1718_v63, %v1743_v2  ;;  %v997_v35 = vsel %vm988_vm0, %v1742_v43, %v1722_v15  ;;  %v998_v18 = vsel %vm988_vm0, %v1743_v2, %v1723_v14 }
 0x25b   : > { %v1738_v31 = vunpack.i.h.bf16 %v1736_v7  ;;  %v1737_v61 = vunpack.i.l.bf16 %v1736_v7  ;;  %1464 = vmatpush3.bf16.msra.mxu1 %v1055_v34  ;;  %v1746_v60 = vpop.permute.xlu1 %1745  ;;  %v1081_v44 = vpack.c.bf16 %v990_v59, %v989_v11  ;;  %v1082_v50 = vpack.c.bf16 %v998_v18, %v997_v35 }
 0x25c   : > { %v1748_v0 = vunpack.i.h.bf16 %v1746_v60  ;;  %v1747_v33 = vunpack.i.l.bf16 %v1746_v60  ;;  %v1080_v38 = vpack.c.bf16 %v994_v45, %v993_v39  ;;  %v2591_v41 = vmov 0  }
 0x25d   : > { %1135 = vmatprep.subr.bf16.mxu0 %v1081_v44  ;;  %1465 = vmatprep.subr.bf16.mxu1 %v1082_v50  ;;  %v991_v5 = vsel %vm988_vm0, %v1732_v3, %v1737_v61  ;;  %v992_v32 = vsel %vm988_vm0, %v1733_v6, %v1738_v31  ;;  %v1819_v60 = vmov 0.0|0.0  }
 0x25e   : > { %v1751_v49 = vpop.permute.xlu0 %1750  ;;  %1136 = vmatpush1.bf16.msra.mxu0 %v1080_v38  ;;  %v1084_v56 = vpack.c.bf16 %v992_v32, %v991_v5  ;;  %v999_v54 = vsel %vm988_vm0, %v1737_v61, %v1747_v33  ;;  %v1000_v12 = vsel %vm988_vm0, %v1738_v31, %v1748_v0  ;;  %v995_v10 = vsel %vm988_vm0, %v1747_v33, %v1732_v3  ;;  %v1783_v31 = vld [vmem:[%s2577_s7 + $0x8] ss:$0 sps:$4 sm:$0xff]  }
 0x25f   : > { %v1753_v58 = vunpack.i.h.bf16 %v1751_v49  ;;  %1466 = vmatpush3.bf16.msra.mxu1 %v1058_v9  ;;  %v1756_v19 = vpop.permute.xlu1 %1755  ;;  %v1085_v20 = vpack.c.bf16 %v1000_v12, %v999_v54  ;;  %v996_v22 = vsel %vm988_vm0, %v1748_v0, %v1733_v6  ;;  %v1752_v55 = vunpack.i.l.bf16 %v1751_v49  ;;  %1294 = vst [vmem:[%s342_s16 + $0xc] sm:$0xff] %v1819_v60  ;;  %1295 = vst [vmem:[%s342_s16 + $0x14] sm:$0xf] %v1819_v60 }
 0x260   : > { %v1758_v30 = vunpack.i.h.bf16 %v1756_v19  ;;  %v1757_v46 = vunpack.i.l.bf16 %v1756_v19  ;;  %1137 = vmatprep.subr.bf16.mxu0 %v1084_v56  ;;  %v1083_v24 = vpack.c.bf16 %v996_v22, %v995_v10 }
 0x261   : > { %1467 = vmatprep.subr.bf16.mxu1 %v1085_v20 }
 0x262   : > { %v1766_v13 = vpop.permute.xlu0 %1765  ;;  %1138 = vmatpush1.bf16.msra.mxu0 %v1083_v24  ;;  %v1030_v1 = vsel %vm1025_vm1, %v1752_v55, %v1757_v46  ;;  %v1031_v16 = vsel %vm1025_vm1, %v1753_v58, %v1758_v30 }
 0x263   : > { %v1768_v48 = vunpack.i.h.bf16 %v1766_v13  ;;  %v1767_v57 = vunpack.i.l.bf16 %v1766_v13  ;;  %1468 = vmatpush3.bf16.msra.mxu1 %v1061_v25  ;;  %v1761_v23 = vpop.permute.xlu1 %1760  ;;  %v1086_v14 = vpack.c.bf16 %v1031_v16, %v1030_v1 }
 0x264   : > { %1486 = vmatprep.subr.bf16.mxu1 %v1817_v28  ;;  %v1763_v15 = vunpack.i.h.bf16 %v1761_v23  ;;  %v1762_v43 = vunpack.i.l.bf16 %v1761_v23 }
 0x265   : > { %v1034_v40 = vsel %vm1025_vm1, %v1767_v57, %v1752_v55  ;;  %v1035_v27 = vsel %vm1025_vm1, %v1768_v48, %v1753_v58  ;;  %1140 = vmatmul.mubr.bf16.vlgmr.msra.gmra.mrb[0].mxu0 %v1426_v51  ;;  %v1026_v53 = vsel %vm1025_vm1, %v1757_v46, %v1767_v57  ;;  %v1027_v34 = vsel %vm1025_vm1, %v1758_v30, %v1768_v48 }
 0x266   : > { %v1088_v26 = vpack.c.bf16 %v1035_v27, %v1034_v40  ;;  %v1771_v52 = vpop.permute.xlu0 %1770  ;;  %v1087_v63 = vpack.c.bf16 %v1027_v34, %v1026_v53  ;;  %1222 = vmatmul.mubr.bf16.vlgmr.msra.gmra.mrb[12].mxu1 %v1426_v51  ;;  %1180 = vmatprep.mubr.bf16.mxu0 %v2591_v41 }
 0x267   : > { %v1773_v47 = vunpack.i.h.bf16 %v1771_v52  ;;  %v1772_v9 = vunpack.i.l.bf16 %v1771_v52  ;;  %v1776_v2 = vpop.permute.xlu1 %1775  ;;  %1490 = vmatprep.mubr.msk.bf16.mxu1 %vm1818_vm2, %v1817_v28 }
 0x268   : > { %v1778_v62 = vunpack.i.h.bf16 %v1776_v2  ;;  %v1777_v6 = vunpack.i.l.bf16 %v1776_v2  ;;  %1148 = vmatprep.subr.bf16.mxu0 %v1087_v63  ;;  %1487 = vmatpush3.bf16.msra.mxu1 %v1088_v26 }
 0x269   : > { %v1033_v3 = vsel %vm1025_vm1, %v1763_v15, %v1773_v47  ;;  %1149 = vmatpush1.bf16.msra.mxu0 %v1086_v14  ;;  %1488 = vmatprep.subr.bf16.mxu1 %v1817_v28  ;;  %v1032_v39 = vsel %vm1025_vm1, %v1762_v43, %v1772_v9 }
 0x26a   : > { %v1036_v45 = vsel %vm1025_vm1, %v1777_v6, %v1762_v43  ;;  %v1037_v7 = vsel %vm1025_vm1, %v1778_v62, %v1763_v15  ;;  %v1028_v11 = vsel %vm1025_vm1, %v1772_v9, %v1777_v6  ;;  %v1029_v35 = vsel %vm1025_vm1, %v1773_v47, %v1778_v62 }
 0x26b   : > { %v1091_v59 = vpack.c.bf16 %v1037_v7, %v1036_v45  ;;  %v1090_v18 = vpack.c.bf16 %v1029_v35, %v1028_v11  ;;  %v1089_v61 = vpack.c.bf16 %v1033_v3, %v1032_v39 }
 0x26d   : > { %1489 = vmatpush3.bf16.msra.mxu1 %v1091_v59  ;;  %1150 = vmatprep.subr.bf16.mxu0 %v1090_v18 }
 0x26e   : > { %1151 = vmatpush1.bf16.msra.mxu0 %v1089_v61 }
 0x270   : > { %1491 = vmatmul.mubr.msk.bf16.vlgmr.msra.gmra.mrb[16].mxu1 %vm494_vm12, %v1783_v31 }
 0x271   : > { %1429 = vmatmul.mubr.msk.bf16.vlgmr.msra.gmra.mrb[0].mxu0 %vm494_vm12, %v1783_v31 }
 0x339   : > { %v1469_v29 = vpop.f32.mrb[12].mxu1 }
 0x33a   : > { %v1470_v44 = vpop.f32.mrb[13].mxu1 }
 0x33b   : > { %v1471_v50 = vadd.f32 %v1470_v44, %v1469_v29  ;;  %v1472_v36 = vpop.f32.mrb[14].mxu1 }
 0x33c   : > { %v1473_v42 = vpop.f32.mrb[15].mxu1 }
 0x343   : > { %v1263_v0 = vpop.f32.mrb[16].mxu1 }
 0x344   : > { %v1264_v33 = vadd.f32 %v1471_v50, %v1263_v0  ;;  %v1492_v38 = vpop.f32.mrb[17].mxu1  ;;  %v1182_v21 = vpop.f32.mrb[0].mxu0  ;;  %1302 = sbr.rel (!%p1895_p5) target bundleno = 851 (0x353), region = 82 }
 0x345   : > { %v1266_v37 = vpop.f32.mrb[18].mxu1  ;;  %v1269_v32 = vmul.f32 %v1182_v21, %v1999_v4  ;;  %v1184_v49 = vpop.f32.mrb[1].mxu0  ;;  %v1440_v4 = vld [vmem:[%s342_s16 + $0x14] sm:$0xf] (%p1895_p5) }
 0x346   : > { %v1271_v5 = vmul.f32 %v1264_v33, %v2004_v17  ;;  %v1493_v56 = vpop.f32.mrb[19].mxu1  ;;  %v1270_v54 = vmul.f32 %v1184_v49, %v2002_v8  ;;  %v1186_v12 = vpop.f32.mrb[2].mxu0  ;;  %v1323_v17 = vld [vmem:[%s342_s16 + $0xc] sm:$0xff] (%p1895_p5)  ;;  %1441 = vst [vmem:[%s1365_s18 + $0x50] sm:$0xf] (%p1895_p5), %v1440_v4 }
 0x347   : > { %v1187_v58 = vpop.f32.mrb[3].mxu0  ;;  %1437 = vst [vmem:[%s1365_s18 + $0x48] sm:$0xff] (%p1895_p5), %v1323_v17 }
 0x348   : > { %v1446_v10 = vpack.c.bf16 %v1271_v5, %v1271_v5  ;;  %v1445_v19 = vpack.c.bf16 %v1270_v54, %v1269_v32 }
 0x34a   : > { %1293 = vst [vmem:[%s342_s16 + $0x8] sm:$0xf] %v1446_v10  ;;  %1292 = vst [vmem:[%s342_s16] sm:$0xff] %v1445_v19 }
 0x351   : > { %v1321_v20 = vld [vmem:[%s342_s16] sm:$0xff]  ;;  %v1438_v22 = vld [vmem:[%s342_s16 + $0x8] sm:$0xf] }
 0x352   : > { %1436 = vst [vmem:[%s1365_s18 + $0x30] sm:$0xff] %v1321_v20  ;;  %1439 = vst [vmem:[%s1365_s18 + $0x38] sm:$0xf] %v1438_v22 }
 0x353 PF: > { %p15_p10 = scmp.ge.s32.totalorder %s1882_s9, 4   ;;  %s2592_s27 = smov %s1802_s28 }
 0x354   : > { %s2593_s28 = smov %s1893_s12  ;;  %s2594_s29 = smov %s1882_s9 }
 0x355   :  { %17 = sbr.rel (!%p15_p10) target bundleno = 2 (0x2), region = 151 }

// kernel: densenet_forward.12
= control target key start
LH: loop header
LB: loop body
LE: loop exit
PB: predicated region body
PF: predicated region fallthrough
CT: control target
= control target key end

     0   :  { %s1167_s27 = smov 0   ;;  %s1169_s28 = smov 0   ;;  %s1314_s0 = inlined_call_operand.vmem [shape: bf16[32,256], index: 0, kind: input, shape index: {}, may-alias: {0,8}]   ;;  %s1315_s1 = inlined_call_operand.vmem [shape: f32[1,128], index: 1, kind: input, shape index: {}]   ;;  %s1316_s2 = inlined_call_operand.vmem [shape: f32[32,1], index: 2, kind: input, shape index: {}]   ;;  %s1317_s3 = inlined_call_operand.vmem [shape: f32[32,1], index: 3, kind: input, shape index: {}]   ;;  %s1318_s4 = inlined_call_operand.vmem [shape: bf16[32,32], index: 4, kind: input, shape index: {}]   ;;  %s1319_s5 = inlined_call_operand.vmem [shape: f32[32,1], index: 5, kind: input, shape index: {}]   ;;  %s1320_s6 = inlined_call_operand.vmem [shape: f32[32,1], index: 6, kind: input, shape index: {}]   ;;  %s1321_s7 = inlined_call_operand.vmem [shape: bf16[8,288], index: 7, kind: input, shape index: {}]   ;;  %s1322_s8 = inlined_call_operand.vmem [shape: bf16[32,256], index: 8, kind: output, shape index: {}, may-alias: {0,8}]  }
   0x1   :  { %s1171_s29 = smov 0  }
   0x2 LB: > { %s879_s30 = sadd.s32 4294967295, %s1109_s29   ;;  %s1184_s9 = sadd.s32 1, %s1109_s29   ;;  %s1109_s29 = sphi %s1171_s29, %s1326_s29   ;;  %s1105_s28 = sphi %s1169_s28, %s1325_s28   ;;  %s1101_s27 = sphi %s1167_s27, %s1324_s27  }
   0x3   : > { %s22_s10 = ssub.s32 %s1109_s29, %s1184_s9  ;;  %s25_s11 = sadd.s32 1, %s1105_s28 }
   0x4   : > { %p23_p0 = scmp.eq.s32.totalorder %s22_s10, 0  ;;  %p32_p1 = scmp.ne.s32.totalorder %s1105_s28, %s1101_s27 }
   0x5   : > { %p33_p2 = scmp.eq.s32.totalorder %s1109_s29, 0  ;;  %p209_p3 = scmp.eq.s32.totalorder %s879_s30, 1 }
   0x6   : > { %s1195_s12 = scalar_select %p23_p0, %s1105_s28, %s25_s11  }
   0x7   : > { %p34_p4 = por %p33_p2, %p32_p1  ;;  %p1197_p5 = por %p209_p3, %p32_p1 }
   0x8   : > { %p882_p6 = scmp.ge.s32.totalorder %s1109_s29, 2 }
   0xa   : > { %252 = sbr.rel (%p882_p6) target bundleno = 24 (0x18), region = 44 }
  0x11   : > { %255 = sbr.rel (!%p34_p4) target bundleno = 24 (0x18), region = 48  ;;  %s257_s14 = sand.u32 (%p34_p4), 1, %s1105_s28  }
  0x12   : > { %s884_s15 = sshll.u32 (%p34_p4), %s1109_s29, 2  ;;  %s883_s16 = sshll.u32 (%p34_p4), %s257_s14, 4 }
  0x13   : > { %s261_s19 = scalar_lea.vmem (%p34_p4), %s1314_s0, %s884_s15  ;;  %s259_s20 = scalar_lea.vmem (%p34_p4), [#allocation2], %s883_s16 }
  0x14   : > { %v277_v0 = vld [vmem:[%s261_s19] sm:$0xf] (%p34_p4)  ;;  %v279_v1 = vld [vmem:[%s261_s19 + $0x8] sm:$0xf] (%p34_p4)  ;;  %v281_v2 = vld [vmem:[%s261_s19 + $0x10] sm:$0xf] (%p34_p4) }
  0x15   : > { %278 = vst [vmem:[%s259_s20] sm:$0xf] (%p34_p4), %v277_v0  ;;  %280 = vst [vmem:[%s259_s20 + $0x4] sm:$0xf] (%p34_p4), %v279_v1  ;;  %v283_v3 = vld [vmem:[%s261_s19 + $0x18] sm:$0xf] (%p34_p4) }
  0x16   : > { %282 = vst [vmem:[%s259_s20 + $0x8] sm:$0xf] (%p34_p4), %v281_v2  ;;  %284 = vst [vmem:[%s259_s20 + $0xc] sm:$0xf] (%p34_p4), %v283_v3 }
  0x18 PF: > { %p885_p7 = scmp.ge.s32.totalorder %s1109_s29, 1  ;;  %p314_p8 = scmp.lt.s32.totalorder %s1109_s29, 3 }
  0x1a   : > { %p315_p9 = pnand %p885_p7, %p314_p8 }
  0x1b   : > { %v390_v4 = vld [vmem:[%s1317_s3] sm:$0xff] (!%p315_p9)  ;;  %v1111_v6 = vmov (!%p315_p9), 0   ;;  %v391_v7 = vld [vmem:[%s1317_s3 + $0x8] sm:$0xff] (!%p315_p9)  ;;  %v365_v9 = vld [vmem:[%s1316_s2 + $0x18] sm:$0xff] (!%p315_p9)  ;;  %vm446_vm0 = vcmask (!%p315_p9), 261120   ;;  %s321_s25 = sand.u32 (!%p315_p9), 1, %s1101_s27  }
  0x1c   : > { %318 = sbr.rel (%p315_p9) target bundleno = 786 (0x312), region = 89  ;;  %v362_v5 = vld [vmem:[%s1316_s2] sm:$0xff] (!%p315_p9)  ;;  %1001 = vset.pattern.permute.xlu1 (!%p315_p9), %v1111_v6  ;;  %1000 = vset.pattern.permute.xlu0 (!%p315_p9), %v1111_v6  ;;  %v363_v8 = vld [vmem:[%s1316_s2 + $0x8] sm:$0xff] (!%p315_p9)  ;;  %v364_v10 = vld [vmem:[%s1316_s2 + $0x10] sm:$0xff] (!%p315_p9)  ;;  %s886_s26 = sshll.u32 (!%p315_p9), %s321_s25, 4  ;;  %vm1120_vm9 = vmmov (!%p315_p9), 0  }
  0x1d   : > { %396 = vperm.xlu1 (!%p315_p9), %1001, %v390_v4   ;;  %368 = vperm.xlu0 (!%p315_p9), %1000, %v362_v5   ;;  %v393_v11 = vld [vmem:[%s1317_s3 + $0x18] sm:$0xff] (!%p315_p9)  ;;  %v392_v12 = vld [vmem:[%s1317_s3 + $0x10] sm:$0xff] (!%p315_p9)  ;;  %v503_v13 = vld [vmem:[%s1319_s5 + $0x8] sm:$0xff] (!%p315_p9)  ;;  %s323_s10 = scalar_lea.vmem (!%p315_p9), [#allocation2], %s886_s26  ;;  %s1112_s17 = smov (!%p315_p9), 11  }
  0x1e   : > { %v502_v14 = vld [vmem:[%s1319_s5] sm:$0xff] (!%p315_p9)  ;;  %v531_v15 = vld [vmem:[%s1320_s6 + $0x8] sm:$0xff] (!%p315_p9)  ;;  %v505_v18 = vld [vmem:[%s1319_s5 + $0x18] sm:$0xff] (!%p315_p9)  ;;  %s1113_s18 = smov (!%p315_p9), 10   ;;  %s1114_s19 = smov (!%p315_p9), 127  }
  0x1f   : > { %v530_v16 = vld [vmem:[%s1320_s6] sm:$0xff] (!%p315_p9)  ;;  %v504_v19 = vld [vmem:[%s1319_s5 + $0x10] sm:$0xff] (!%p315_p9)  ;;  %v533_v20 = vld [vmem:[%s1320_s6 + $0x18] sm:$0xff] (!%p315_p9)  ;;  %s1115_s20 = smov (!%p315_p9), 9   ;;  %s1116_s21 = smov (!%p315_p9), 119  }
  0x20   : > { %v1082_v17 = vld [vmem:[%s1318_s4] sm:$0xff] (!%p315_p9)   ;;  %v532_v21 = vld [vmem:[%s1320_s6 + $0x10] sm:$0xff] (!%p315_p9)  ;;  %v919_v31 = vld [vmem:[%s323_s10 + $0x8] sm:$0xff] (!%p315_p9)   ;;  %s1118_s22 = smov (!%p315_p9), 1   ;;  %s1119_s26 = smov (!%p315_p9), 118  }
  0x21   : > { %401 = vperm.xlu1 (!%p315_p9), %1001, %v391_v7   ;;  %373 = vperm.xlu0 (!%p315_p9), %1000, %v363_v8   ;;  %v908_v22 = vld [vmem:[%s323_s10] sm:$0xff] (!%p315_p9)   ;;  %v914_v34 = vunpack.c.h.bf16 (!%p315_p9), %v919_v31  ;;  %v913_v35 = vunpack.c.l.bf16 (!%p315_p9), %v919_v31  ;;  %v1083_v54 = vld [vmem:[%s1318_s4 + $0x8] sm:$0xff] (!%p315_p9)   ;;  %s1121_s10 = smov (!%p315_p9), 117   ;;  %s887_s15 = sshll.u32 (!%p315_p9), %s321_s25, 3 }
  0x22   : > { %953 = vmatprep.mubr.msk.bf16.mxu0 (!%p315_p9), %vm446_vm0, %v1082_v17  ;;  %v909_v23 = vunpack.c.l.bf16 (!%p315_p9), %v908_v22  ;;  %v910_v27 = vunpack.c.h.bf16 (!%p315_p9), %v908_v22  ;;  %s352_s16 = scalar_lea.vmem (!%p315_p9), [#allocation3], %s887_s15 }
  0x25   : > { %383 = vperm.xlu1 %1001, %v365_v9   ;;  %378 = vperm.xlu0 %1000, %v364_v10  }
  0x29   : > { %411 = vperm.xlu1 %1001, %v393_v11   ;;  %406 = vperm.xlu0 %1000, %v392_v12  }
  0x2d   : > { %513 = vperm.xlu1 %1001, %v503_v13   ;;  %508 = vperm.xlu0 %1000, %v502_v14   ;;  %v1271_v14 = vld [vmem:[%s1315_s1] ss:$0 sm:$0xff] }
  0x31   : > { %541 = vperm.xlu1 %1001, %v531_v15   ;;  %536 = vperm.xlu0 %1000, %v530_v16  }
  0x35   : > { %523 = vperm.xlu1 %1001, %v505_v18   ;;  %518 = vperm.xlu0 %1000, %v504_v19  }
  0x39   : > { %551 = vperm.xlu1 %1001, %v533_v20   ;;  %546 = vperm.xlu0 %1000, %v532_v21  }
  0x9c   : > { %v397_v24 = vpop.permute.xlu1 %396  ;;  %v369_v25 = vpop.permute.xlu0 %368 }
  0x9d   : > { %v386_v26 = vmul.f32 %v909_v23, %v369_v25 }
  0x9f   : > { %v414_v28 = vadd.f32 %v397_v24, %v386_v26 }
  0xa0   : > { %v402_v29 = vpop.permute.xlu1 %401  ;;  %v374_v30 = vpop.permute.xlu0 %373 }
  0xa1   : > { %v387_v32 = vmul.f32 %v910_v27, %v374_v30  ;;  %v422_v36 = vmul.f32 0.01, %v414_v28  ;;  %vm418_vm1 = vcmp.ge.f32.partialorder %v414_v28, 0.0 }
  0xa3   : > { %v415_v33 = vadd.f32 %v402_v29, %v387_v32  ;;  %v426_v42 = vsel %vm418_vm1, %v414_v28, %v422_v36  ;;  %v1117_v28 = vmov 0.0   ;;  %v1281_v29 = vld [vmem:[%s1321_s7] sm:$0xff] }
  0xa4   : > { %v384_v37 = vpop.permute.xlu1 %383  ;;  %v379_v38 = vpop.permute.xlu0 %378  ;;  %v894_v30 = vcombine.high %v1281_v29, %v1281_v29 }
  0xa5   : > { %vm419_vm2 = vcmp.ge.f32.partialorder %v415_v33, 0.0  ;;  %v423_v39 = vmul.f32 0.01, %v415_v33  ;;  %v389_v40 = vmul.f32 %v914_v34, %v384_v37  ;;  %v388_v41 = vmul.f32 %v913_v35, %v379_v38 }
  0xa6   : > { %710 = vmatprep.mubr.bf16.mxu1 %v894_v30 }
  0xa7   : > { %v427_v43 = vsel %vm419_vm2, %v415_v33, %v423_v39 }
  0xa8   : > { %v412_v44 = vpop.permute.xlu1 %411  ;;  %v407_v45 = vpop.permute.xlu0 %406  ;;  %v434_v46 = vpack.c.bf16 %v427_v43, %v426_v42 }
  0xa9   : > { %v417_v47 = vadd.f32 %v412_v44, %v389_v40  ;;  %v416_v48 = vadd.f32 %v407_v45, %v388_v41 }
  0xaa   : > { %949 = vmatprep.subr.bf16.mxu0 %v434_v46 }
  0xab   : > { %vm421_vm3 = vcmp.ge.f32.partialorder %v417_v47, 0.0  ;;  %v425_v49 = vmul.f32 0.01, %v417_v47  ;;  %vm420_vm4 = vcmp.ge.f32.partialorder %v416_v48, 0.0  ;;  %v424_v50 = vmul.f32 0.01, %v416_v48  ;;  %950 = vmatpush3.bf16.msra.mxu0 %v434_v46 }
  0xac   : > { %v509_v55 = vpop.permute.xlu0 %508  ;;  %v514_v56 = vpop.permute.xlu1 %513 }
  0xad   : > { %v428_v51 = vsel %vm420_vm4, %v416_v48, %v424_v50  ;;  %v429_v52 = vsel %vm421_vm3, %v417_v47, %v425_v49 }
  0xae   : > { %v435_v53 = vpack.c.bf16 %v429_v52, %v428_v51 }
  0xb0   : > { %951 = vmatprep.subr.bf16.mxu0 %v435_v53  ;;  %v537_v57 = vpop.permute.xlu0 %536  ;;  %v542_v58 = vpop.permute.xlu1 %541 }
  0xb1   : > { %952 = vmatpush3.bf16.msra.mxu0 %v435_v53 }
  0xb2   : > { %957 = vmatprep.subr.bf16.mxu0 %v1117_v28 }
  0xb4   : > { %954 = vmatmul.mubr.msk.bf16.vlgmr.msra.gmra.mrb[0].mxu0 %vm446_vm0, %v1083_v54  ;;  %v519_v59 = vpop.permute.xlu0 %518  ;;  %v524_v60 = vpop.permute.xlu1 %523 }
  0xb5   : > { %961 = vmatprep.mubr.msk.bf16.mxu0 %vm1120_vm9, %v1117_v28 }
  0xb8   : > { %v547_v0 = vpop.permute.xlu0 %546  ;;  %v552_v6 = vpop.permute.xlu1 %551 }
 0x187   : > { %v955_v61 = vpop.f32.mrb[0].mxu0 }
 0x188   : > { %v528_v62 = vmul.f32 %v955_v61, %v519_v59  ;;  %v487_v63 = vpop.f32.mrb[1].mxu0 }
 0x189   : > { %v526_v1 = vmul.f32 %v509_v55, %v487_v63  ;;  %v956_v2 = vpop.f32.mrb[2].mxu0 }
 0x18a   : > { %v556_v3 = vadd.f32 %v547_v0, %v528_v62  ;;  %v529_v4 = vmul.f32 %v956_v2, %v524_v60  ;;  %v490_v5 = vpop.f32.mrb[3].mxu0 }
 0x18b   : > { %v554_v7 = vadd.f32 %v537_v57, %v526_v1  ;;  %v527_v8 = vmul.f32 %v514_v56, %v490_v5 }
 0x18c   : > { %vm560_vm5 = vcmp.ge.f32.partialorder %v556_v3, 0.0  ;;  %v564_v9 = vmul.f32 0.01, %v556_v3  ;;  %v557_v10 = vadd.f32 %v552_v6, %v529_v4 }
 0x18d   : > { %vm558_vm6 = vcmp.ge.f32.partialorder %v554_v7, 0.0  ;;  %v562_v11 = vmul.f32 0.01, %v554_v7  ;;  %v555_v12 = vadd.f32 %v542_v58, %v527_v8 }
 0x18e   : > { %v568_v13 = vsel %vm560_vm5, %v556_v3, %v564_v9  ;;  %vm561_vm7 = vcmp.ge.f32.partialorder %v557_v10, 0.0  ;;  %v565_v15 = vmul.f32 0.01, %v557_v10 }
 0x18f   : > { %v566_v16 = vsel %vm558_vm6, %v554_v7, %v562_v11  ;;  %vm559_vm8 = vcmp.ge.f32.partialorder %v555_v12, 0.0  ;;  %v563_v17 = vmul.f32 0.01, %v555_v12  ;;  %v579_v19 = vmul.f32 %v1271_v14, %v568_v13 }
 0x190   : > { %v569_v18 = vsel %vm561_vm7, %v557_v10, %v565_v15  ;;  %v577_v22 = vmul.f32 %v1271_v14, %v566_v16 }
 0x191   : > { %v580_v20 = vmul.f32 %v1271_v14, %v569_v18  ;;  %v567_v21 = vsel %vm559_vm8, %v555_v12, %v563_v17 }
 0x192   : > { %v578_v23 = vmul.f32 %v1271_v14, %v567_v21 }
 0x193   : > { %v1002_v24 = vpack.i.bf16 %v580_v20, %v579_v19  ;;  %v654_v27 = vpack.c.bf16 %v580_v20, %v579_v19 }
 0x194   : > { %v1007_v25 = vpack.i.bf16 %v578_v23, %v577_v22  ;;  %v653_v26 = vpack.c.bf16 %v578_v23, %v577_v22 }
 0x195   : > { %1003 = vrot.lane.b32.xlu1 %v1002_v24, %s1112_s17 }
 0x196   : > { %1008 = vrot.lane.b32.xlu0 %v1007_v25, %s1112_s17  ;;  %924 = vmatprep.subr.bf16.mxu1 %v653_v26  ;;  %s900_s17 = sshll.u32 (%p1197_p5), %s879_s30, 2 }
 0x197   : > { %s847_s27 = scalar_lea.vmem (%p1197_p5), %s1322_s8, %s900_s17 }
 0x199   : > { %1023 = vrot.lane.b32.xlu1 %v1007_v25, %s1113_s18 }
 0x19a   : > { %1013 = vrot.lane.b32.xlu0 %v1007_v25, %s1114_s19 }
 0x19d   : > { %1028 = vrot.lane.b32.xlu1 %v1002_v24, %s1113_s18 }
 0x19e   : > { %1018 = vrot.lane.b32.xlu0 %v1002_v24, %s1114_s19 }
 0x1a1   : > { %1043 = vrot.lane.b32.xlu1 %v1007_v25, %s1115_s20 }
 0x1a2   : > { %1033 = vrot.lane.b32.xlu0 %v1007_v25, %s1116_s21 }
 0x1a5   : > { %1048 = vrot.lane.b32.xlu1 %v1002_v24, %s1115_s20 }
 0x1a6   : > { %1038 = vrot.lane.b32.xlu0 %v1002_v24, %s1116_s21 }
 0x1a9   : > { %1063 = vrot.lane.b32.xlu1 %v1007_v25, %s1118_s22 }
 0x1aa   : > { %1053 = vrot.lane.b32.xlu0 %v1007_v25, %s1119_s26 }
 0x1ad   : > { %1068 = vrot.lane.b32.xlu1 %v1007_v25, %s1121_s10 }
 0x1ae   : > { %1058 = vrot.lane.b32.xlu0 %v1002_v24, %s1119_s26 }
 0x1b1   : > { %1078 = vrot.lane.b32.xlu1 %v1002_v24, %s1121_s10 }
 0x1b2   : > { %1073 = vrot.lane.b32.xlu0 %v1002_v24, %s1118_s22 }
 0x207   : > { %v1004_v31 = vpop.permute.xlu1 %1003 }
 0x208   : > { %v1009_v32 = vpop.permute.xlu0 %1008  ;;  %v1006_v35 = vunpack.i.h.bf16 %v1004_v31  ;;  %v1005_v36 = vunpack.i.l.bf16 %v1004_v31 }
 0x209   : > { %v1011_v33 = vunpack.i.h.bf16 %v1009_v32  ;;  %v1010_v34 = vunpack.i.l.bf16 %v1009_v32 }
 0x20a   : > { %v646_v42 = vpack.c.bf16 %v1006_v35, %v1005_v36  ;;  %v893_v35 = vcombine.low %v1281_v29, %v1281_v29 }
 0x20b   : > { %v1024_v37 = vpop.permute.xlu1 %1023  ;;  %v645_v38 = vpack.c.bf16 %v1011_v33, %v1010_v34  ;;  %v1086_v34 = vld [vmem:[%s1321_s7 + $0x8] ss:$0 sps:$4 sm:$0xff]  }
 0x20c   : > { %v1014_v39 = vpop.permute.xlu0 %1013  ;;  %v1026_v43 = vunpack.i.h.bf16 %v1024_v37  ;;  %v1025_v44 = vunpack.i.l.bf16 %v1024_v37 }
 0x20d   : > { %v1016_v40 = vunpack.i.h.bf16 %v1014_v39  ;;  %v1015_v41 = vunpack.i.l.bf16 %v1014_v39  ;;  %925 = vmatpush3.bf16.msra.mxu1 %v645_v38 }
 0x20e   : > { %926 = vmatprep.subr.bf16.mxu1 %v654_v27  ;;  %v647_v50 = vpack.c.bf16 %v1026_v43, %v1025_v44 }
 0x20f   : > { %v655_v45 = vpack.c.bf16 %v1016_v40, %v1015_v41  ;;  %v1029_v46 = vpop.permute.xlu1 %1028 }
 0x210   : > { %v1019_v47 = vpop.permute.xlu0 %1018  ;;  %v1031_v51 = vunpack.i.h.bf16 %v1029_v46  ;;  %v1030_v52 = vunpack.i.l.bf16 %v1029_v46 }
 0x211   : > { %v1021_v48 = vunpack.i.h.bf16 %v1019_v47  ;;  %v1020_v49 = vunpack.i.l.bf16 %v1019_v47  ;;  %927 = vmatpush3.bf16.msra.mxu1 %v646_v42 }
 0x212   : > { %928 = vmatprep.subr.bf16.mxu1 %v655_v45  ;;  %v648_v58 = vpack.c.bf16 %v1031_v51, %v1030_v52 }
 0x213   : > { %v656_v53 = vpack.c.bf16 %v1021_v48, %v1020_v49  ;;  %v1044_v54 = vpop.permute.xlu1 %1043 }
 0x214   : > { %v1034_v55 = vpop.permute.xlu0 %1033  ;;  %v1046_v59 = vunpack.i.h.bf16 %v1044_v54  ;;  %v1045_v60 = vunpack.i.l.bf16 %v1044_v54 }
 0x215   : > { %v1036_v56 = vunpack.i.h.bf16 %v1034_v55  ;;  %v1035_v57 = vunpack.i.l.bf16 %v1034_v55  ;;  %929 = vmatpush3.bf16.msra.mxu1 %v647_v50 }
 0x216   : > { %930 = vmatprep.subr.bf16.mxu1 %v656_v53  ;;  %v649_v2 = vpack.c.bf16 %v1046_v59, %v1045_v60 }
 0x217   : > { %v657_v61 = vpack.c.bf16 %v1036_v56, %v1035_v57  ;;  %v1049_v62 = vpop.permute.xlu1 %1048 }
 0x218   : > { %v1039_v63 = vpop.permute.xlu0 %1038  ;;  %v1051_v3 = vunpack.i.h.bf16 %v1049_v62  ;;  %v1050_v4 = vunpack.i.l.bf16 %v1049_v62 }
 0x219   : > { %v1041_v0 = vunpack.i.h.bf16 %v1039_v63  ;;  %v1040_v1 = vunpack.i.l.bf16 %v1039_v63  ;;  %931 = vmatpush3.bf16.msra.mxu1 %v648_v58 }
 0x21a   : > { %932 = vmatprep.subr.bf16.mxu1 %v657_v61  ;;  %v650_v10 = vpack.c.bf16 %v1051_v3, %v1050_v4 }
 0x21b   : > { %v658_v5 = vpack.c.bf16 %v1041_v0, %v1040_v1  ;;  %v1064_v6 = vpop.permute.xlu1 %1063 }
 0x21c   : > { %v1054_v7 = vpop.permute.xlu0 %1053  ;;  %v1066_v11 = vunpack.i.h.bf16 %v1064_v6  ;;  %v1065_v12 = vunpack.i.l.bf16 %v1064_v6 }
 0x21d   : > { %v1056_v8 = vunpack.i.h.bf16 %v1054_v7  ;;  %v1055_v9 = vunpack.i.l.bf16 %v1054_v7  ;;  %933 = vmatpush3.bf16.msra.mxu1 %v649_v2 }
 0x21e   : > { %934 = vmatprep.subr.bf16.mxu1 %v658_v5  ;;  %v651_v22 = vpack.c.bf16 %v1066_v11, %v1065_v12 }
 0x21f   : > { %v659_v13 = vpack.c.bf16 %v1056_v8, %v1055_v9  ;;  %v1069_v15 = vpop.permute.xlu1 %1068 }
 0x220   : > { %v1071_v16 = vunpack.i.h.bf16 %v1069_v15  ;;  %v1070_v17 = vunpack.i.l.bf16 %v1069_v15  ;;  %v1059_v18 = vpop.permute.xlu0 %1058 }
 0x221   : > { %v1061_v19 = vunpack.i.h.bf16 %v1059_v18  ;;  %v1060_v20 = vunpack.i.l.bf16 %v1059_v18  ;;  %935 = vmatpush3.bf16.msra.mxu1 %v650_v10 }
 0x222   : > { %v661_v21 = vpack.c.bf16 %v1071_v16, %v1070_v17  ;;  %936 = vmatprep.subr.bf16.mxu1 %v659_v13 }
 0x223   : > { %v660_v23 = vpack.c.bf16 %v1061_v19, %v1060_v20  ;;  %v1079_v24 = vpop.permute.xlu1 %1078 }
 0x224   : > { %v1081_v25 = vunpack.i.h.bf16 %v1079_v24  ;;  %v1080_v26 = vunpack.i.l.bf16 %v1079_v24  ;;  %958 = vmatpush3.bf16.msra.mxu0 %v661_v21  ;;  %v1074_v27 = vpop.permute.xlu0 %1073 }
 0x225   : > { %v1076_v30 = vunpack.i.h.bf16 %v1074_v27  ;;  %v1075_v31 = vunpack.i.l.bf16 %v1074_v27  ;;  %937 = vmatpush3.bf16.msra.mxu1 %v651_v22  ;;  %959 = vmatprep.subr.bf16.mxu0 %v1117_v28 }
 0x226   : > { %v662_v32 = vpack.c.bf16 %v1081_v25, %v1080_v26  ;;  %938 = vmatprep.subr.bf16.mxu1 %v660_v23 }
 0x227   : > { %v652_v33 = vpack.c.bf16 %v1076_v30, %v1075_v31 }
 0x228   : > { %960 = vmatpush3.bf16.msra.mxu0 %v662_v32 }
 0x229   : > { %939 = vmatpush3.bf16.msra.mxu1 %v652_v33 }
 0x22b   : > { %962 = vmatmul.mubr.msk.bf16.vlgmr.msra.gmra.mrb[4].mxu0 %vm446_vm0, %v1086_v34 }
 0x22c   : > { %711 = vmatmul.mubr.bf16.vlgmr.msra.gmra.mrb[0].mxu1 %v893_v35 }
 0x2fe   : > { %v752_v36 = vpop.f32.mrb[4].mxu0 }
 0x2ff   : > { %v940_v37 = vpop.f32.mrb[0].mxu1  ;;  %v963_v38 = vpop.f32.mrb[5].mxu0 }
 0x300   : > { %v941_v39 = vpop.f32.mrb[1].mxu1  ;;  %v755_v40 = vpop.f32.mrb[6].mxu0 }
 0x301   : > { %v942_v41 = vadd.f32 %v941_v39, %v940_v37  ;;  %v943_v42 = vpop.f32.mrb[2].mxu1  ;;  %v964_v43 = vpop.f32.mrb[7].mxu0 }
 0x302   : > { %v944_v44 = vpop.f32.mrb[3].mxu1 }
 0x303   : > { %v753_v45 = vadd.f32 %v942_v41, %v752_v36  ;;  %775 = sbr.rel (!%p1197_p5) target bundleno = 786 (0x312), region = 97 }
 0x305   : > { %v758_v46 = vmul.f32 %v1271_v14, %v753_v45 }
 0x307   : > { %v917_v29 = vpack.c.bf16 %v1117_v28, %v758_v46 }
 0x309   : > { %918 = vst [vmem:[%s352_s16] sm:$0xff] %v917_v29  }
 0x310   : > { %v794_v47 = vld [vmem:[%s352_s16] sm:$0xf]  ;;  %v796_v48 = vld [vmem:[%s352_s16 + $0x4] sm:$0xf] }
 0x311   : > { %901 = vst [vmem:[%s847_s27 + $0x10] sm:$0xf] %v794_v47  ;;  %902 = vst [vmem:[%s847_s27 + $0x18] sm:$0xf] %v796_v48 }
 0x312 PF: > { %p15_p10 = scmp.ge.s32.totalorder %s1184_s9, 4   ;;  %s1324_s27 = smov %s1105_s28 }
 0x313   : > { %s1325_s28 = smov %s1195_s12  ;;  %s1326_s29 = smov %s1184_s9 }
 0x314   :  { %17 = sbr.rel (!%p15_p10) target bundleno = 2 (0x2), region = 169 }

// kernel: densenet_forward.13
= control target key start
LH: loop header
LB: loop body
LE: loop exit
PB: predicated region body
PF: predicated region fallthrough
CT: control target
= control target key end

     0   :  { %v1700_v0 = vmov 0   ;;  %vm951_vm4 = vcmask 1041408   ;;  %s2339_s2 = inlined_call_operand.vmem [shape: f32[32,1,1], index: 2, kind: input, shape index: {}]   ;;  %s2340_s3 = inlined_call_operand.vmem [shape: f32[32,1,1], index: 3, kind: input, shape index: {}]   ;;  %s2341_s0 = inlined_call_operand.vmem [shape: bf16[32,2,128], index: 0, kind: input, shape index: {}]   ;;  %s2342_s1 = inlined_call_operand.vmem [shape: f32[1,1,128], index: 1, kind: input, shape index: {}]   ;;  %s2343_s5 = inlined_call_operand.vmem [shape: f32[9,1], index: 5, kind: input, shape index: {}]   ;;  %s2344_s6 = inlined_call_operand.vmem [shape: f32[9,1], index: 6, kind: input, shape index: {}]   ;;  %s2345_s7 = inlined_call_operand.vmem [shape: f32[9,1], index: 7, kind: input, shape index: {}]   ;;  %s2346_s9 = inlined_call_operand.vmem [shape: f32[4,1], index: 9, kind: input, shape index: {}]   ;;  %s2347_s10 = inlined_call_operand.vmem [shape: f32[4,1], index: 10, kind: input, shape index: {}]   ;;  %s2348_s4 = inlined_call_operand.vmem [shape: bf16[9,32], index: 4, kind: input, shape index: {}]   ;;  %s2349_s11 = inlined_call_operand.vmem [shape: f32[4,1], index: 11, kind: input, shape index: {}]   ;;  %s2350_s13 = inlined_call_operand.vmem [shape: f32[10,1], index: 13, kind: input, shape index: {}]   ;;  %s2351_s8 = inlined_call_operand.vmem [shape: bf16[4,9], index: 8, kind: input, shape index: {}]   ;;  %s2352_s12 = inlined_call_operand.vmem [shape: bf16[10,4], index: 12, kind: input, shape index: {}]   ;;  %s2353_s14 = inlined_call_operand.vmem [shape: f32[10,2], index: 14, kind: output, shape index: {}]  }
   0x1   :  { %1697 = vset.pattern.permute.xlu1 %v1700_v0  ;;  %1696 = vset.pattern.permute.xlu0 %v1700_v0  ;;  %v1603_v1 = vld [vmem:[%s2339_s2 + $0x8] ss:$0 sm:$0xff]  ;;  %v1595_v2 = vld [vmem:[%s2339_s2] ss:$0 sm:$0xff]  ;;  %v1604_v3 = vld [vmem:[%s2339_s2 + $0x9] ss:$0 sm:$0xff] }
   0x2   :  { %337 = vperm.xlu1 %1697, %v1603_v1   ;;  %305 = vperm.xlu0 %1696, %v1595_v2   ;;  %v1596_v4 = vld [vmem:[%s2339_s2 + $0x1] ss:$0 sm:$0xff]  ;;  %v1605_v5 = vld [vmem:[%s2339_s2 + $0xa] ss:$0 sm:$0xff]  ;;  %v1597_v6 = vld [vmem:[%s2339_s2 + $0x2] ss:$0 sm:$0xff] }
   0x3   :  { %v1606_v7 = vld [vmem:[%s2339_s2 + $0xb] ss:$0 sm:$0xff]  ;;  %v1598_v8 = vld [vmem:[%s2339_s2 + $0x3] ss:$0 sm:$0xff]  ;;  %v1628_v9 = vld [vmem:[%s2340_s3 + $0x1] ss:$0 sm:$0xff] }
   0x4   :  { %v1627_v10 = vld [vmem:[%s2340_s3] ss:$0 sm:$0xff]  ;;  %v1636_v11 = vld [vmem:[%s2340_s3 + $0x9] ss:$0 sm:$0xff]  ;;  %v1635_v12 = vld [vmem:[%s2340_s3 + $0x8] ss:$0 sm:$0xff] }
   0x5   :  { %v1607_v13 = vld [vmem:[%s2339_s2 + $0xc] ss:$0 sm:$0xff]  ;;  %v1599_v14 = vld [vmem:[%s2339_s2 + $0x4] ss:$0 sm:$0xff]  ;;  %v1637_v15 = vld [vmem:[%s2340_s3 + $0xa] ss:$0 sm:$0xff] }
   0x6   :  { %341 = vperm.xlu1 %1697, %v1604_v3   ;;  %309 = vperm.xlu0 %1696, %v1596_v4   ;;  %v1629_v16 = vld [vmem:[%s2340_s3 + $0x2] ss:$0 sm:$0xff]  ;;  %v1608_v17 = vld [vmem:[%s2339_s2 + $0xd] ss:$0 sm:$0xff]  ;;  %v1600_v18 = vld [vmem:[%s2339_s2 + $0x5] ss:$0 sm:$0xff] }
   0x7   :  { %v1612_v19 = vld [vmem:[%s2339_s2 + $0x11] ss:$0 sm:$0xff]  ;;  %v1611_v20 = vld [vmem:[%s2339_s2 + $0x10] ss:$0 sm:$0xff]  ;;  %v1620_v21 = vld [vmem:[%s2339_s2 + $0x19] ss:$0 sm:$0xff] }
   0x8   :  { %v1619_v22 = vld [vmem:[%s2339_s2 + $0x18] ss:$0 sm:$0xff]  ;;  %v1638_v23 = vld [vmem:[%s2340_s3 + $0xb] ss:$0 sm:$0xff]  ;;  %v1630_v24 = vld [vmem:[%s2340_s3 + $0x3] ss:$0 sm:$0xff] }
   0x9   :  { %v1609_v25 = vld [vmem:[%s2339_s2 + $0xe] ss:$0 sm:$0xff]  ;;  %v1601_v26 = vld [vmem:[%s2339_s2 + $0x6] ss:$0 sm:$0xff]  ;;  %v1621_v27 = vld [vmem:[%s2339_s2 + $0x1a] ss:$0 sm:$0xff] }
   0xa   :  { %345 = vperm.xlu1 %1697, %v1605_v5   ;;  %313 = vperm.xlu0 %1696, %v1597_v6   ;;  %v1613_v28 = vld [vmem:[%s2339_s2 + $0x12] ss:$0 sm:$0xff]  ;;  %v1639_v29 = vld [vmem:[%s2340_s3 + $0xc] ss:$0 sm:$0xff]  ;;  %v1631_v30 = vld [vmem:[%s2340_s3 + $0x4] ss:$0 sm:$0xff] }
   0xb   :  { %v1610_v31 = vld [vmem:[%s2339_s2 + $0xf] ss:$0 sm:$0xff]  ;;  %v1602_v32 = vld [vmem:[%s2339_s2 + $0x7] ss:$0 sm:$0xff]  ;;  %v1622_v33 = vld [vmem:[%s2339_s2 + $0x1b] ss:$0 sm:$0xff] }
   0xc   :  { %v1614_v34 = vld [vmem:[%s2339_s2 + $0x13] ss:$0 sm:$0xff]  ;;  %v1640_v35 = vld [vmem:[%s2340_s3 + $0xd] ss:$0 sm:$0xff]  ;;  %v1632_v36 = vld [vmem:[%s2340_s3 + $0x5] ss:$0 sm:$0xff] }
   0xd   :  { %v1644_v37 = vld [vmem:[%s2340_s3 + $0x11] ss:$0 sm:$0xff]  ;;  %v1643_v38 = vld [vmem:[%s2340_s3 + $0x10] ss:$0 sm:$0xff]  ;;  %v1652_v39 = vld [vmem:[%s2340_s3 + $0x19] ss:$0 sm:$0xff] }
   0xe   :  { %349 = vperm.xlu1 %1697, %v1606_v7   ;;  %317 = vperm.xlu0 %1696, %v1598_v8   ;;  %v1651_v40 = vld [vmem:[%s2340_s3 + $0x18] ss:$0 sm:$0xff]  ;;  %v1623_v41 = vld [vmem:[%s2339_s2 + $0x1c] ss:$0 sm:$0xff]  ;;  %v1615_v42 = vld [vmem:[%s2339_s2 + $0x14] ss:$0 sm:$0xff] }
   0xf   :  { %v1641_v43 = vld [vmem:[%s2340_s3 + $0xe] ss:$0 sm:$0xff]  ;;  %v1633_v44 = vld [vmem:[%s2340_s3 + $0x6] ss:$0 sm:$0xff]  ;;  %v1653_v45 = vld [vmem:[%s2340_s3 + $0x1a] ss:$0 sm:$0xff] }
  0x10   :  { %v1645_v46 = vld [vmem:[%s2340_s3 + $0x12] ss:$0 sm:$0xff]  ;;  %v1624_v47 = vld [vmem:[%s2339_s2 + $0x1d] ss:$0 sm:$0xff]  ;;  %v1616_v48 = vld [vmem:[%s2339_s2 + $0x15] ss:$0 sm:$0xff] }
  0x11   :  { %v1642_v49 = vld [vmem:[%s2340_s3 + $0xf] ss:$0 sm:$0xff]  ;;  %v1634_v50 = vld [vmem:[%s2340_s3 + $0x7] ss:$0 sm:$0xff]  ;;  %v1654_v51 = vld [vmem:[%s2340_s3 + $0x1b] ss:$0 sm:$0xff] }
  0x12   :  { %661 = vperm.xlu1 %1697, %v1628_v9   ;;  %657 = vperm.xlu0 %1696, %v1627_v10   ;;  %v1646_v52 = vld [vmem:[%s2340_s3 + $0x13] ss:$0 sm:$0xff]  ;;  %v1625_v53 = vld [vmem:[%s2339_s2 + $0x1e] ss:$0 sm:$0xff]  ;;  %v1617_v54 = vld [vmem:[%s2339_s2 + $0x16] ss:$0 sm:$0xff] }
  0x13   :  { %v1655_v55 = vld [vmem:[%s2340_s3 + $0x1c] ss:$0 sm:$0xff]  ;;  %v1647_v56 = vld [vmem:[%s2340_s3 + $0x14] ss:$0 sm:$0xff]  ;;  %v1626_v57 = vld [vmem:[%s2339_s2 + $0x1f] ss:$0 sm:$0xff] }
  0x14   :  { %v1618_v58 = vld [vmem:[%s2339_s2 + $0x17] ss:$0 sm:$0xff]  ;;  %v1656_v59 = vld [vmem:[%s2340_s3 + $0x1d] ss:$0 sm:$0xff]  ;;  %v1648_v60 = vld [vmem:[%s2340_s3 + $0x15] ss:$0 sm:$0xff] }
  0x15   :  { %v1657_v61 = vld [vmem:[%s2340_s3 + $0x1e] ss:$0 sm:$0xff]  ;;  %v1649_v62 = vld [vmem:[%s2340_s3 + $0x16] ss:$0 sm:$0xff]  ;;  %v1658_v63 = vld [vmem:[%s2340_s3 + $0x1f] ss:$0 sm:$0xff] }
  0x16   :  { %693 = vperm.xlu1 %1697, %v1636_v11   ;;  %689 = vperm.xlu0 %1696, %v1635_v12   ;;  %v1650_v0 = vld [vmem:[%s2340_s3 + $0x17] ss:$0 sm:$0xff]  ;;  %v48_v5 = vld [vmem:[%s2341_s0] sm:$0x1]  ;;  %v49_v6 = vld [vmem:[%s2341_s0 + $0x1] sm:$0x1] }
  0x17   :  { %v80_v9 = vunpack.c.l.bf16 %v48_v5  ;;  %v81_v10 = vunpack.c.l.bf16 %v49_v6  ;;  %v56_v11 = vld [vmem:[%s2341_s0 + $0x8] sm:$0x1]  ;;  %v57_v12 = vld [vmem:[%s2341_s0 + $0x9] sm:$0x1] }
  0x1a   :  { %353 = vperm.xlu1 %1697, %v1607_v13   ;;  %321 = vperm.xlu0 %1696, %v1599_v14  }
  0x1e   :  { %697 = vperm.xlu1 %1697, %v1637_v15   ;;  %665 = vperm.xlu0 %1696, %v1629_v16   ;;  %v88_v15 = vunpack.c.l.bf16 %v56_v11 }
  0x22   :  { %357 = vperm.xlu1 %1697, %v1608_v17   ;;  %325 = vperm.xlu0 %1696, %v1600_v18   ;;  %v89_v17 = vunpack.c.l.bf16 %v57_v12 }
  0x26   :  { %373 = vperm.xlu1 %1697, %v1612_v19   ;;  %369 = vperm.xlu0 %1696, %v1611_v20  }
  0x2a   :  { %405 = vperm.xlu1 %1697, %v1620_v21   ;;  %401 = vperm.xlu0 %1696, %v1619_v22  }
  0x2e   :  { %701 = vperm.xlu1 %1697, %v1638_v23   ;;  %669 = vperm.xlu0 %1696, %v1630_v24   ;;  %v58_v23 = vld [vmem:[%s2341_s0 + $0xa] sm:$0x1] }
  0x32   :  { %361 = vperm.xlu1 %1697, %v1609_v25   ;;  %329 = vperm.xlu0 %1696, %v1601_v26   ;;  %v50_v26 = vld [vmem:[%s2341_s0 + $0x2] sm:$0x1] }
  0x36   :  { %409 = vperm.xlu1 %1697, %v1621_v27   ;;  %377 = vperm.xlu0 %1696, %v1613_v28  }
  0x3a   :  { %705 = vperm.xlu1 %1697, %v1639_v29   ;;  %673 = vperm.xlu0 %1696, %v1631_v30   ;;  %v1996_v30 = vld [vmem:[%s2342_s1] ss:$0 sm:$0xff] }
  0x3e   :  { %365 = vperm.xlu1 %1697, %v1610_v31   ;;  %333 = vperm.xlu0 %1696, %v1602_v32  }
  0x42   :  { %413 = vperm.xlu1 %1697, %v1622_v33   ;;  %381 = vperm.xlu0 %1696, %v1614_v34  }
  0x46   :  { %709 = vperm.xlu1 %1697, %v1640_v35   ;;  %677 = vperm.xlu0 %1696, %v1632_v36   ;;  %v90_v35 = vunpack.c.l.bf16 %v58_v23  ;;  %v82_v36 = vunpack.c.l.bf16 %v50_v26  ;;  %v52_v23 = vld [vmem:[%s2341_s0 + $0x4] sm:$0x1] }
  0x4a   :  { %725 = vperm.xlu1 %1697, %v1644_v37   ;;  %721 = vperm.xlu0 %1696, %v1643_v38  }
  0x4e   :  { %757 = vperm.xlu1 %1697, %v1652_v39   ;;  %753 = vperm.xlu0 %1696, %v1651_v40  }
  0x52   :  { %417 = vperm.xlu1 %1697, %v1623_v41   ;;  %385 = vperm.xlu0 %1696, %v1615_v42  }
  0x56   :  { %713 = vperm.xlu1 %1697, %v1641_v43   ;;  %681 = vperm.xlu0 %1696, %v1633_v44  }
  0x5a   :  { %761 = vperm.xlu1 %1697, %v1653_v45   ;;  %729 = vperm.xlu0 %1696, %v1645_v46  }
  0x5e   :  { %421 = vperm.xlu1 %1697, %v1624_v47   ;;  %389 = vperm.xlu0 %1696, %v1616_v48  }
  0x62   :  { %717 = vperm.xlu1 %1697, %v1642_v49   ;;  %685 = vperm.xlu0 %1696, %v1634_v50  }
  0x66   :  { %765 = vperm.xlu1 %1697, %v1654_v51   ;;  %733 = vperm.xlu0 %1696, %v1646_v52  }
  0x6a   :  { %425 = vperm.xlu1 %1697, %v1625_v53   ;;  %393 = vperm.xlu0 %1696, %v1617_v54  }
  0x6e   :  { %769 = vperm.xlu1 %1697, %v1655_v55   ;;  %737 = vperm.xlu0 %1696, %v1647_v56  }
  0x72   :  { %429 = vperm.xlu1 %1697, %v1626_v57   ;;  %397 = vperm.xlu0 %1696, %v1618_v58  }
  0x76   :  { %773 = vperm.xlu1 %1697, %v1656_v59   ;;  %741 = vperm.xlu0 %1696, %v1648_v60  }
  0x7a   :  { %777 = vperm.xlu1 %1697, %v1657_v61   ;;  %745 = vperm.xlu0 %1696, %v1649_v62  }
  0x7e   :  { %781 = vperm.xlu1 %1697, %v1658_v63   ;;  %749 = vperm.xlu0 %1696, %v1650_v0  }
  0x81   :  { %v338_v1 = vpop.permute.xlu1 %337  ;;  %v306_v2 = vpop.permute.xlu0 %305 }
  0x82   :  { %v432_v16 = vmul.f32 %v306_v2, %v80_v9  ;;  %v440_v24 = vmul.f32 %v338_v1, %v88_v15  ;;  %v59_v2 = vld [vmem:[%s2341_s0 + $0xb] sm:$0x1] }
  0x85   :  { %v342_v3 = vpop.permute.xlu1 %341  ;;  %v310_v4 = vpop.permute.xlu0 %309 }
  0x86   :  { %v433_v18 = vmul.f32 %v310_v4, %v81_v10  ;;  %v441_v25 = vmul.f32 %v342_v3, %v89_v17  ;;  %v51_v3 = vld [vmem:[%s2341_s0 + $0x3] sm:$0x1] }
  0x89   :  { %v346_v7 = vpop.permute.xlu1 %345  ;;  %v314_v8 = vpop.permute.xlu0 %313 }
  0x8a   :  { %v442_v45 = vmul.f32 %v346_v7, %v90_v35  ;;  %v434_v46 = vmul.f32 %v314_v8, %v82_v36  ;;  %v91_v7 = vunpack.c.l.bf16 %v59_v2  ;;  %v83_v8 = vunpack.c.l.bf16 %v51_v3  ;;  %v72_v2 = vld [vmem:[%s2341_s0 + $0x18] sm:$0x1] }
  0x8d   :  { %v1983_v13 = vpop.permute.xlu1 %349  ;;  %v1985_v14 = vpop.permute.xlu0 %317 }
  0x8e   :  { %v443_v12 = vmul.f32 %v1983_v13, %v91_v7  ;;  %v435_v15 = vmul.f32 %v1985_v14, %v83_v8 }
  0x91   :  { %v662_v19 = vpop.permute.xlu1 %661  ;;  %v658_v20 = vpop.permute.xlu0 %657 }
  0x92   :  { %v785_v21 = vadd.f32 %v662_v19, %v433_v18  ;;  %v784_v22 = vadd.f32 %v658_v20, %v432_v16 }
  0x94   :  { %v848_v27 = vmul.f32 0.01, %v784_v22  ;;  %vm816_vm0 = vcmp.ge.f32.partialorder %v784_v22, 0.0  ;;  %v849_v31 = vmul.f32 0.01, %v785_v21  ;;  %vm817_vm1 = vcmp.ge.f32.partialorder %v785_v21, 0.0 }
  0x95   :  { %v694_v28 = vpop.permute.xlu1 %693  ;;  %v690_v29 = vpop.permute.xlu0 %689 }
  0x96   :  { %v793_v32 = vadd.f32 %v694_v28, %v441_v25  ;;  %v792_v33 = vadd.f32 %v690_v29, %v440_v24  ;;  %v880_v34 = vsel %vm816_vm0, %v784_v22, %v848_v27  ;;  %v881_v43 = vsel %vm817_vm1, %v785_v21, %v849_v31  ;;  %v60_v22 = vld [vmem:[%s2341_s0 + $0xc] sm:$0x1] }
  0x97   :  { %v919_v39 = vmul.f32 %v1996_v30, %v880_v34  ;;  %v920_v51 = vmul.f32 %v1996_v30, %v881_v43  ;;  %v92_v28 = vunpack.c.l.bf16 %v60_v22  ;;  %v84_v29 = vunpack.c.l.bf16 %v52_v23 }
  0x98   :  { %v857_v37 = vmul.f32 0.01, %v793_v32  ;;  %vm824_vm2 = vcmp.ge.f32.partialorder %v792_v33, 0.0  ;;  %v856_v38 = vmul.f32 0.01, %v792_v33  ;;  %vm825_vm3 = vcmp.ge.f32.partialorder %v793_v32, 0.0 }
  0x99   :  { %v1999_v40 = vpop.permute.xlu1 %353  ;;  %v2001_v41 = vpop.permute.xlu0 %321  ;;  %v952_v47 = vsel %vm951_vm4, %v919_v39, 0.0  ;;  %v955_v60 = vsel %vm951_vm4, %v920_v51, 0.0 }
  0x9a   :  { %v888_v42 = vsel %vm824_vm2, %v792_v33, %v856_v38  ;;  %v889_v48 = vsel %vm825_vm3, %v793_v32, %v857_v37  ;;  %v444_v35 = vmul.f32 %v1999_v40, %v92_v28  ;;  %v436_v36 = vmul.f32 %v2001_v41, %v84_v29 }
  0x9b   :  { %v927_v44 = vmul.f32 %v1996_v30, %v888_v42  ;;  %v928_v55 = vmul.f32 %v1996_v30, %v889_v48 }
  0x9d   :  { %v698_v49 = vpop.permute.xlu1 %697  ;;  %v666_v50 = vpop.permute.xlu0 %665  ;;  %953 = vadd.xlane.f32.xlu0 %v952_v47  ;;  %v976_v54 = vsel %vm951_vm4, %v927_v44, 0.0  ;;  %v979_v0 = vsel %vm951_vm4, %v928_v55, 0.0 }
  0x9e   :  { %v794_v52 = vadd.f32 %v698_v49, %v442_v45  ;;  %v786_v53 = vadd.f32 %v666_v50, %v434_v46  ;;  %v61_v45 = vld [vmem:[%s2341_s0 + $0xd] sm:$0x1]  ;;  %v53_v46 = vld [vmem:[%s2341_s0 + $0x5] sm:$0x1] }
  0x9f   :  { %v93_v51 = vunpack.c.l.bf16 %v61_v45 }
  0xa0   :  { %vm826_vm5 = vcmp.ge.f32.partialorder %v794_v52, 0.0  ;;  %v858_v56 = vmul.f32 0.01, %v794_v52  ;;  %vm818_vm6 = vcmp.ge.f32.partialorder %v786_v53, 0.0  ;;  %v850_v57 = vmul.f32 0.01, %v786_v53 }
  0xa1   :  { %v2008_v58 = vpop.permute.xlu1 %357  ;;  %v2010_v59 = vpop.permute.xlu0 %325  ;;  %977 = vadd.xlane.f32.xlu0 %v976_v54  ;;  %v64_v54 = vld [vmem:[%s2341_s0 + $0x10] sm:$0x1] }
  0xa2   :  { %956 = vadd.xlane.f32.xlu1 %v955_v60  ;;  %v882_v61 = vsel %vm818_vm6, %v786_v53, %v850_v57  ;;  %v890_v62 = vsel %vm826_vm5, %v794_v52, %v858_v56  ;;  %v85_v52 = vunpack.c.l.bf16 %v53_v46  ;;  %v65_v53 = vld [vmem:[%s2341_s0 + $0x11] sm:$0x1] }
  0xa3   :  { %v921_v63 = vmul.f32 %v1996_v30, %v882_v61  ;;  %v929_v1 = vmul.f32 %v1996_v30, %v890_v62  ;;  %v97_v61 = vunpack.c.l.bf16 %v65_v53  ;;  %v96_v62 = vunpack.c.l.bf16 %v64_v54 }
  0xa5   :  { %v2022_v4 = vpop.permute.xlu1 %373  ;;  %v2024_v5 = vpop.permute.xlu0 %369  ;;  %980 = vadd.xlane.f32.xlu0 %v979_v0  ;;  %v958_v6 = vsel %vm951_vm4, %v921_v63, 0.0  ;;  %v982_v9 = vsel %vm951_vm4, %v929_v1, 0.0  ;;  %v445_v63 = vmul.f32 %v2008_v58, %v93_v51  ;;  %v437_v0 = vmul.f32 %v2010_v59, %v85_v52  ;;  %v73_v1 = vld [vmem:[%s2341_s0 + $0x19] sm:$0x1] }
  0xa6   :  { %959 = vadd.xlane.f32.xlu1 %v958_v6  ;;  %v104_v58 = vunpack.c.l.bf16 %v72_v2 }
  0xa9   :  { %v2028_v10 = vpop.permute.xlu1 %405  ;;  %v2030_v11 = vpop.permute.xlu0 %401  ;;  %983 = vadd.xlane.f32.xlu0 %v982_v9  ;;  %v449_v9 = vmul.f32 %v2022_v4, %v97_v61  ;;  %v62_v4 = vld [vmem:[%s2341_s0 + $0xe] sm:$0x1] }
  0xad   :  { %v702_v16 = vpop.permute.xlu1 %701  ;;  %v670_v17 = vpop.permute.xlu0 %669 }
  0xae   :  { %v795_v18 = vadd.f32 %v702_v16, %v443_v12  ;;  %v787_v19 = vadd.f32 %v670_v17, %v435_v15  ;;  %v448_v12 = vmul.f32 %v2024_v5, %v96_v62  ;;  %v105_v15 = vunpack.c.l.bf16 %v73_v1  ;;  %v54_v5 = vld [vmem:[%s2341_s0 + $0x6] sm:$0x1] }
  0xb0   :  { %vm827_vm7 = vcmp.ge.f32.partialorder %v795_v18, 0.0  ;;  %v859_v20 = vmul.f32 0.01, %v795_v18  ;;  %vm819_vm8 = vcmp.ge.f32.partialorder %v787_v19, 0.0  ;;  %v851_v21 = vmul.f32 0.01, %v787_v19 }
  0xb1   :  { %v2040_v24 = vpop.permute.xlu1 %361  ;;  %v2042_v13 = vpop.permute.xlu0 %329  ;;  %v457_v23 = vmul.f32 %v2028_v10, %v105_v15 }
  0xb2   :  { %v883_v14 = vsel %vm819_vm8, %v787_v19, %v851_v21  ;;  %v891_v25 = vsel %vm827_vm7, %v795_v18, %v859_v20 }
  0xb3   :  { %v922_v26 = vmul.f32 %v1996_v30, %v883_v14  ;;  %v930_v27 = vmul.f32 %v1996_v30, %v891_v25  ;;  %v456_v14 = vmul.f32 %v2030_v11, %v104_v58 }
  0xb5   :  { %v2046_v31 = vpop.permute.xlu1 %409  ;;  %v2048_v32 = vpop.permute.xlu0 %377  ;;  %v961_v33 = vsel %vm951_vm4, %v922_v26, 0.0  ;;  %v985_v34 = vsel %vm951_vm4, %v930_v27, 0.0 }
  0xb6   :  { %962 = vadd.xlane.f32.xlu1 %v961_v33  ;;  %986 = vadd.xlane.f32.xlu0 %v985_v34 }
  0xb9   :  { %v706_v37 = vpop.permute.xlu1 %705  ;;  %v674_v38 = vpop.permute.xlu0 %673 }
  0xba   :  { %v796_v39 = vadd.f32 %v706_v37, %v444_v35  ;;  %v788_v42 = vadd.f32 %v674_v38, %v436_v36  ;;  %v94_v37 = vunpack.c.l.bf16 %v62_v4  ;;  %v86_v38 = vunpack.c.l.bf16 %v54_v5 }
  0xbc   :  { %vm828_vm9 = vcmp.ge.f32.partialorder %v796_v39, 0.0  ;;  %v860_v43 = vmul.f32 0.01, %v796_v39  ;;  %vm820_vm10 = vcmp.ge.f32.partialorder %v788_v42, 0.0  ;;  %v852_v44 = vmul.f32 0.01, %v788_v42 }
  0xbd   :  { %v2060_v47 = vpop.permute.xlu1 %365  ;;  %v2062_v40 = vpop.permute.xlu0 %333  ;;  %v446_v62 = vmul.f32 %v2040_v24, %v94_v37  ;;  %v63_v24 = vld [vmem:[%s2341_s0 + $0xf] sm:$0x1] }
  0xbe   :  { %v884_v41 = vsel %vm820_vm10, %v788_v42, %v852_v44  ;;  %v892_v48 = vsel %vm828_vm9, %v796_v39, %v860_v43  ;;  %v74_v39 = vld [vmem:[%s2341_s0 + $0x1a] sm:$0x1]  ;;  %v66_v42 = vld [vmem:[%s2341_s0 + $0x12] sm:$0x1] }
  0xbf   :  { %v923_v49 = vmul.f32 %v1996_v30, %v884_v41  ;;  %v931_v50 = vmul.f32 %v1996_v30, %v892_v48  ;;  %v106_v51 = vunpack.c.l.bf16 %v74_v39  ;;  %v98_v54 = vunpack.c.l.bf16 %v66_v42 }
  0xc1   :  { %v2072_v55 = vpop.permute.xlu1 %413  ;;  %v2074_v56 = vpop.permute.xlu0 %381  ;;  %v964_v57 = vsel %vm951_vm4, %v923_v49, 0.0  ;;  %v988_v60 = vsel %vm951_vm4, %v931_v50, 0.0 }
  0xc2   :  { %965 = vadd.xlane.f32.xlu1 %v964_v57  ;;  %989 = vadd.xlane.f32.xlu0 %v988_v60 }
  0xc5   :  { %v710_v3 = vpop.permute.xlu1 %709  ;;  %v678_v6 = vpop.permute.xlu0 %677 }
  0xc6   :  { %v797_v7 = vadd.f32 %v710_v3, %v445_v63  ;;  %v789_v8 = vadd.f32 %v678_v6, %v437_v0  ;;  %v438_v63 = vmul.f32 %v2042_v13, %v86_v38  ;;  %v55_v13 = vld [vmem:[%s2341_s0 + $0x7] sm:$0x1] }
  0xc8   :  { %vm829_vm11 = vcmp.ge.f32.partialorder %v797_v7, 0.0  ;;  %v861_v59 = vmul.f32 0.01, %v797_v7  ;;  %vm821_vm12 = vcmp.ge.f32.partialorder %v789_v8, 0.0  ;;  %v853_v16 = vmul.f32 0.01, %v789_v8 }
  0xc9   :  { %v726_v17 = vpop.permute.xlu1 %725  ;;  %v722_v18 = vpop.permute.xlu0 %721 }
  0xca   :  { %v801_v19 = vadd.f32 %v726_v17, %v449_v9  ;;  %v800_v20 = vadd.f32 %v722_v18, %v448_v12  ;;  %v885_v21 = vsel %vm821_vm12, %v789_v8, %v853_v16  ;;  %v893_v22 = vsel %vm829_vm11, %v797_v7, %v861_v59 }
  0xcb   :  { %v924_v25 = vmul.f32 %v1996_v30, %v885_v21  ;;  %v932_v26 = vmul.f32 %v1996_v30, %v893_v22  ;;  %v458_v8 = vmul.f32 %v2046_v31, %v106_v51  ;;  %v450_v9 = vmul.f32 %v2048_v32, %v98_v54  ;;  %v67_v21 = vld [vmem:[%s2341_s0 + $0x13] sm:$0x1] }
  0xcc   :  { %vm833_vm13 = vcmp.ge.f32.partialorder %v801_v19, 0.0  ;;  %v865_v27 = vmul.f32 0.01, %v801_v19  ;;  %vm832_vm14 = vcmp.ge.f32.partialorder %v800_v20, 0.0  ;;  %v864_v28 = vmul.f32 0.01, %v800_v20 }
  0xcd   :  { %v758_v29 = vpop.permute.xlu1 %757  ;;  %v754_v10 = vpop.permute.xlu0 %753  ;;  %v967_v11 = vsel %vm951_vm4, %v924_v25, 0.0  ;;  %v991_v33 = vsel %vm951_vm4, %v932_v26, 0.0  ;;  %v95_v32 = vunpack.c.l.bf16 %v63_v24 }
  0xce   :  { %v809_v34 = vadd.f32 %v758_v29, %v457_v23  ;;  %v808_v35 = vadd.f32 %v754_v10, %v456_v14  ;;  %968 = vadd.xlane.f32.xlu1 %v967_v11  ;;  %992 = vadd.xlane.f32.xlu0 %v991_v33  ;;  %v896_v36 = vsel %vm832_vm14, %v800_v20, %v864_v28  ;;  %v75_v20 = vld [vmem:[%s2341_s0 + $0x1b] sm:$0x1]  ;;  %v99_v10 = vunpack.c.l.bf16 %v67_v21 }
  0xcf   :  { %v935_v43 = vmul.f32 %v1996_v30, %v896_v36  ;;  %v897_v44 = vsel %vm833_vm13, %v801_v19, %v865_v27  ;;  %v87_v19 = vunpack.c.l.bf16 %v55_v13  ;;  %v107_v29 = vunpack.c.l.bf16 %v75_v20  ;;  %v70_v20 = vld [vmem:[%s2341_s0 + $0x16] sm:$0x1] }
  0xd0   :  { %vm841_vm15 = vcmp.ge.f32.partialorder %v809_v34, 0.0  ;;  %v873_v45 = vmul.f32 0.01, %v809_v34  ;;  %vm840_vm0 = vcmp.ge.f32.partialorder %v808_v35, 0.0  ;;  %v872_v46 = vmul.f32 0.01, %v808_v35 }
  0xd1   :  { %v2108_v41 = vpop.permute.xlu1 %417  ;;  %v2110_v48 = vpop.permute.xlu0 %385  ;;  %v1000_v49 = vsel %vm951_vm4, %v935_v43, 0.0  ;;  %v936_v50 = vmul.f32 %v1996_v30, %v897_v44 }
  0xd2   :  { %1001 = vadd.xlane.f32.xlu1 %v1000_v49  ;;  %v904_v52 = vsel %vm840_vm0, %v808_v35, %v872_v46  ;;  %v905_v53 = vsel %vm841_vm15, %v809_v34, %v873_v45  ;;  %v447_v34 = vmul.f32 %v2060_v47, %v95_v32  ;;  %v439_v35 = vmul.f32 %v2062_v40, %v87_v19  ;;  %v76_v47 = vld [vmem:[%s2341_s0 + $0x1c] sm:$0x1]  ;;  %v68_v40 = vld [vmem:[%s2341_s0 + $0x14] sm:$0x1]  ;;  %v78_v19 = vld [vmem:[%s2341_s0 + $0x1e] sm:$0x1] }
  0xd3   :  { %v1003_v57 = vsel %vm951_vm4, %v936_v50, 0.0  ;;  %v943_v60 = vmul.f32 %v1996_v30, %v904_v52  ;;  %v944_v61 = vmul.f32 %v1996_v30, %v905_v53  ;;  %v459_v45 = vmul.f32 %v2072_v55, %v107_v29 }
  0xd4   :  { %1004 = vadd.xlane.f32.xlu0 %v1003_v57  ;;  %v451_v46 = vmul.f32 %v2074_v56, %v99_v10  ;;  %v108_v56 = vunpack.c.l.bf16 %v76_v47 }
  0xd5   :  { %v714_v0 = vpop.permute.xlu1 %713  ;;  %v682_v1 = vpop.permute.xlu0 %681  ;;  %v1024_v2 = vsel %vm951_vm4, %v943_v60, 0.0  ;;  %v1027_v3 = vsel %vm951_vm4, %v944_v61, 0.0  ;;  %v100_v60 = vunpack.c.l.bf16 %v68_v40 }
  0xd6   :  { %v798_v6 = vadd.f32 %v714_v0, %v446_v62  ;;  %v790_v7 = vadd.f32 %v682_v1, %v438_v63  ;;  %1025 = vadd.xlane.f32.xlu1 %v1024_v2  ;;  %v460_v24 = vmul.f32 %v2108_v41, %v108_v56 }
  0xd7   :  { %v452_v13 = vmul.f32 %v2110_v48, %v100_v60 }
  0xd8   :  { %vm830_vm1 = vcmp.ge.f32.partialorder %v798_v6, 0.0  ;;  %v862_v12 = vmul.f32 0.01, %v798_v6  ;;  %vm822_vm2 = vcmp.ge.f32.partialorder %v790_v7, 0.0  ;;  %v854_v15 = vmul.f32 0.01, %v790_v7  ;;  %1028 = vadd.xlane.f32.xlu0 %v1027_v3 }
  0xd9   :  { %v762_v58 = vpop.permute.xlu1 %761  ;;  %v730_v59 = vpop.permute.xlu0 %729 }
  0xda   :  { %v810_v16 = vadd.f32 %v762_v58, %v458_v8  ;;  %v802_v17 = vadd.f32 %v730_v59, %v450_v9  ;;  %v886_v31 = vsel %vm822_vm2, %v790_v7, %v854_v15  ;;  %v894_v18 = vsel %vm830_vm1, %v798_v6, %v862_v12  ;;  %v77_v12 = vld [vmem:[%s2341_s0 + $0x1d] sm:$0x1]  ;;  %v69_v15 = vld [vmem:[%s2341_s0 + $0x15] sm:$0x1] }
  0xdb   :  { %v925_v22 = vmul.f32 %v1996_v30, %v886_v31  ;;  %v933_v23 = vmul.f32 %v1996_v30, %v894_v18  ;;  %v109_v48 = vunpack.c.l.bf16 %v77_v12  ;;  %v101_v32 = vunpack.c.l.bf16 %v69_v15 }
  0xdc   :  { %vm842_vm3 = vcmp.ge.f32.partialorder %v810_v16, 0.0  ;;  %v874_v14 = vmul.f32 0.01, %v810_v16  ;;  %vm834_vm5 = vcmp.ge.f32.partialorder %v802_v17, 0.0  ;;  %v866_v4 = vmul.f32 0.01, %v802_v17 }
  0xdd   :  { %v2137_v5 = vpop.permute.xlu1 %421  ;;  %v2139_v25 = vpop.permute.xlu0 %389  ;;  %v970_v26 = vsel %vm951_vm4, %v925_v22, 0.0  ;;  %v994_v27 = vsel %vm951_vm4, %v933_v23, 0.0  ;;  %vm1702_vm2 = vmmov 0  }
  0xde   :  { %971 = vadd.xlane.f32.xlu1 %v970_v26  ;;  %995 = vadd.xlane.f32.xlu0 %v994_v27  ;;  %v898_v28 = vsel %vm834_vm5, %v802_v17, %v866_v4  ;;  %v906_v33 = vsel %vm842_vm3, %v810_v16, %v874_v14  ;;  %v110_v27 = vunpack.c.l.bf16 %v78_v19  ;;  %v1416_v19 = vld [vmem:[%s2344_s6 + $0x8] sm:$0x1]  ;;  %vm1325_vm3 = vcmask 1041409  }
  0xdf   :  { %v937_v11 = vmul.f32 %v1996_v30, %v898_v28  ;;  %v945_v36 = vmul.f32 %v1996_v30, %v906_v33  ;;  %v102_v28 = vunpack.c.l.bf16 %v70_v20  ;;  %v453_v33 = vmul.f32 %v2139_v25, %v101_v32  ;;  %v1115_v32 = vld [vmem:[%s2343_s5 + $0x8] sm:$0x1]  ;;  %v1429_v20 = vld [vmem:[%s2345_s7] sm:$0xff] }
  0xe0   :  { %vm1327_vm5 = vcmask 1042434  }
  0xe1   :  { %v718_v37 = vpop.permute.xlu1 %717  ;;  %v686_v38 = vpop.permute.xlu0 %685  ;;  %v1006_v39 = vsel %vm951_vm4, %v937_v11, 0.0  ;;  %v1030_v44 = vsel %vm951_vm4, %v945_v36, 0.0  ;;  %v461_v11 = vmul.f32 %v2137_v5, %v109_v48  ;;  %v1114_v48 = vld [vmem:[%s2343_s5] sm:$0xff] }
  0xe2   :  { %v799_v42 = vadd.f32 %v718_v37, %v447_v34  ;;  %v791_v43 = vadd.f32 %v686_v38, %v439_v35  ;;  %1007 = vadd.xlane.f32.xlu1 %v1006_v39  ;;  %1031 = vadd.xlane.f32.xlu0 %v1030_v44  ;;  %v79_v34 = vld [vmem:[%s2341_s0 + $0x1f] sm:$0x1]  ;;  %v71_v35 = vld [vmem:[%s2341_s0 + $0x17] sm:$0x1] }
  0xe3   :  { %v111_v44 = vunpack.c.l.bf16 %v79_v34 }
  0xe4   :  { %vm831_vm6 = vcmp.ge.f32.partialorder %v799_v42, 0.0  ;;  %v863_v49 = vmul.f32 0.01, %v799_v42  ;;  %vm823_vm7 = vcmp.ge.f32.partialorder %v791_v43, 0.0  ;;  %v855_v50 = vmul.f32 0.01, %v791_v43 }
  0xe5   :  { %v766_v51 = vpop.permute.xlu1 %765  ;;  %v734_v52 = vpop.permute.xlu0 %733 }
  0xe6   :  { %v811_v53 = vadd.f32 %v766_v51, %v459_v45  ;;  %v803_v54 = vadd.f32 %v734_v52, %v451_v46  ;;  %v887_v55 = vsel %vm823_vm7, %v791_v43, %v855_v50  ;;  %v895_v57 = vsel %vm831_vm6, %v799_v42, %v863_v49 }
  0xe7   :  { %v926_v61 = vmul.f32 %v1996_v30, %v887_v55  ;;  %v934_v62 = vmul.f32 %v1996_v30, %v895_v57  ;;  %v103_v45 = vunpack.c.l.bf16 %v71_v35  ;;  %vm1329_vm6 = vcmask 1043459  }
  0xe8   :  { %vm843_vm8 = vcmp.ge.f32.partialorder %v811_v53, 0.0  ;;  %v875_v63 = vmul.f32 0.01, %v811_v53  ;;  %vm835_vm9 = vcmp.ge.f32.partialorder %v803_v54, 0.0  ;;  %v867_v0 = vmul.f32 0.01, %v803_v54 }
  0xe9   :  { %v426_v1 = vpop.permute.xlu1 %425  ;;  %v394_v2 = vpop.permute.xlu0 %393  ;;  %v973_v3 = vsel %vm951_vm4, %v926_v61, 0.0  ;;  %v997_v6 = vsel %vm951_vm4, %v934_v62, 0.0  ;;  %vm1331_vm7 = vcmask 1044484  }
  0xea   :  { %974 = vadd.xlane.f32.xlu1 %v973_v3  ;;  %998 = vadd.xlane.f32.xlu0 %v997_v6  ;;  %v899_v7 = vsel %vm835_vm9, %v803_v54, %v867_v0  ;;  %v907_v9 = vsel %vm843_vm8, %v811_v53, %v875_v63  ;;  %v462_v5 = vmul.f32 %v426_v1, %v110_v27  ;;  %vm1333_vm8 = vcmask 1045509  }
  0xeb   :  { %v938_v8 = vmul.f32 %v1996_v30, %v899_v7  ;;  %v946_v58 = vmul.f32 %v1996_v30, %v907_v9  ;;  %v454_v25 = vmul.f32 %v394_v2, %v102_v28  ;;  %vm1335_vm9 = vcmask 1046534  }
  0xed   :  { %v770_v59 = vpop.permute.xlu1 %769  ;;  %v738_v16 = vpop.permute.xlu0 %737  ;;  %v1009_v17 = vsel %vm951_vm4, %v938_v8, 0.0  ;;  %v1033_v41 = vsel %vm951_vm4, %v946_v58, 0.0 }
  0xee   :  { %v812_v31 = vadd.f32 %v770_v59, %v460_v24  ;;  %v804_v18 = vadd.f32 %v738_v16, %v452_v13  ;;  %1010 = vadd.xlane.f32.xlu1 %v1009_v17  ;;  %1034 = vadd.xlane.f32.xlu0 %v1033_v41 }
  0xf0   :  { %vm844_vm10 = vcmp.ge.f32.partialorder %v812_v31, 0.0  ;;  %v876_v21 = vmul.f32 0.01, %v812_v31  ;;  %vm836_vm11 = vcmp.ge.f32.partialorder %v804_v18, 0.0  ;;  %v868_v22 = vmul.f32 0.01, %v804_v18 }
  0xf1   :  { %v430_v23 = vpop.permute.xlu1 %429  ;;  %v398_v14 = vpop.permute.xlu0 %397 }
  0xf2   :  { %v900_v4 = vsel %vm836_vm11, %v804_v18, %v868_v22  ;;  %v908_v26 = vsel %vm844_vm10, %v812_v31, %v876_v21  ;;  %v463_v54 = vmul.f32 %v430_v23, %v111_v44  ;;  %v455_v55 = vmul.f32 %v398_v14, %v103_v45  ;;  %v1430_v21 = vld [vmem:[%s2345_s7 + $0x8] sm:$0x1]  ;;  %v1445_v22 = vld [vmem:[%s2346_s9] sm:$0xf] }
  0xf3   :  { %v939_v29 = vmul.f32 %v1996_v30, %v900_v4  ;;  %v947_v10 = vmul.f32 %v1996_v30, %v908_v26  ;;  %v1701_v31 = vmov 0.0   ;;  %v1505_v23 = vld [vmem:[%s2347_s10] sm:$0xf]  ;;  %v1523_v26 = vld [vmem:[%s2350_s13 + $0x8] sm:$0x3]  ;;  %vm1337_vm10 = vcmask 1047559  }
  0xf4   :  { %1672 = vmatprep.subr.bf16.mxu0 %v1701_v31  ;;  %1680 = vmatprep.subr.bf16.mxu1 %v1701_v31  ;;  %v1512_v14 = vld [vmem:[%s2349_s11] sm:$0xf]  ;;  %vm1364_vm11 = vcmask 261120  }
  0xf5   :  { %v774_v36 = vpop.permute.xlu1 %773  ;;  %v742_v37 = vpop.permute.xlu0 %741  ;;  %v1012_v38 = vsel %vm951_vm4, %v939_v29, 0.0  ;;  %v1036_v39 = vsel %vm951_vm4, %v947_v10, 0.0  ;;  %1676 = vmatprep.mubr.msk.bf16.mxu0 %vm1702_vm2, %v1701_v31  ;;  %1682 = vmatprep.mubr.msk.bf16.mxu1 %vm1702_vm2, %v1701_v31  ;;  %v1522_v4 = vld [vmem:[%s2350_s13] sm:$0xff] }
  0xf6   :  { %v813_v42 = vadd.f32 %v774_v36, %v461_v11  ;;  %v805_v43 = vadd.f32 %v742_v37, %v453_v33  ;;  %1013 = vadd.xlane.f32.xlu1 %v1012_v38  ;;  %1037 = vadd.xlane.f32.xlu0 %v1036_v39 }
  0xf8   :  { %vm845_vm12 = vcmp.ge.f32.partialorder %v813_v42, 0.0  ;;  %v877_v46 = vmul.f32 0.01, %v813_v42  ;;  %vm837_vm13 = vcmp.ge.f32.partialorder %v805_v43, 0.0  ;;  %v869_v47 = vmul.f32 0.01, %v805_v43 }
  0xf9   :  { %v778_v40 = vpop.permute.xlu1 %777  ;;  %v746_v49 = vpop.permute.xlu0 %745 }
  0xfa   :  { %v814_v50 = vadd.f32 %v778_v40, %v462_v5  ;;  %v806_v51 = vadd.f32 %v746_v49, %v454_v25  ;;  %v901_v52 = vsel %vm837_vm13, %v805_v43, %v869_v47  ;;  %v909_v53 = vsel %vm845_vm12, %v813_v42, %v877_v46 }
  0xfb   :  { %v940_v57 = vmul.f32 %v1996_v30, %v901_v52  ;;  %v948_v56 = vmul.f32 %v1996_v30, %v909_v53  ;;  %v1195_v5 = vlaneseq  ;;  %vm1455_vm13 = vcmask 1043456  }
  0xfc   :  { %vm846_vm14 = vcmp.ge.f32.partialorder %v814_v50, 0.0  ;;  %v878_v60 = vmul.f32 0.01, %v814_v50  ;;  %vm838_vm15 = vcmp.ge.f32.partialorder %v806_v51, 0.0  ;;  %v870_v61 = vmul.f32 0.01, %v806_v51 }
  0xfd   :  { %v782_v62 = vpop.permute.xlu1 %781  ;;  %v750_v63 = vpop.permute.xlu0 %749  ;;  %v1015_v0 = vsel %vm951_vm4, %v940_v57, 0.0  ;;  %v1039_v1 = vsel %vm951_vm4, %v948_v56, 0.0  ;;  %v1196_v25 = vand.u32 127, %v1195_v5  ;;  %v1198_v44 = vshrl.u32 %v1195_v5, 7 }
  0xfe   :  { %v815_v2 = vadd.f32 %v782_v62, %v463_v54  ;;  %v807_v3 = vadd.f32 %v750_v63, %v455_v55  ;;  %1016 = vadd.xlane.f32.xlu1 %v1015_v0  ;;  %1040 = vadd.xlane.f32.xlu0 %v1039_v1  ;;  %v902_v6 = vsel %vm838_vm15, %v806_v51, %v870_v61  ;;  %vm1456_vm15 = vcmask 1044480  }
  0xff   :  { %v941_v7 = vmul.f32 %v1996_v30, %v902_v6  ;;  %v910_v8 = vsel %vm846_vm14, %v814_v50, %v878_v60  ;;  %v2250_v53 = vsub.s32 %v1196_v25, %v1198_v44 }
 0x100   :  { %vm847_vm0 = vcmp.ge.f32.partialorder %v815_v2, 0.0  ;;  %v879_v9 = vmul.f32 0.01, %v815_v2  ;;  %vm839_vm1 = vcmp.ge.f32.partialorder %v807_v3, 0.0  ;;  %v871_v24 = vmul.f32 0.01, %v807_v3 }
 0x101   :  { %v1018_v13 = vsel %vm951_vm4, %v941_v7, 0.0  ;;  %v949_v12 = vmul.f32 %v1996_v30, %v910_v8 }
 0x102   :  { %1019 = vadd.xlane.f32.xlu1 %v1018_v13  ;;  %v903_v15 = vsel %vm839_vm1, %v807_v3, %v871_v24  ;;  %v911_v58 = vsel %vm847_vm0, %v815_v2, %v879_v9  ;;  %vm1451_vm0 = vcmask 72704  }
 0x103   :  { %v1042_v59 = vsel %vm951_vm4, %v949_v12, 0.0  ;;  %v942_v16 = vmul.f32 %v1996_v30, %v903_v15  ;;  %v950_v17 = vmul.f32 %v1996_v30, %v911_v58  ;;  %v1415_v30 = vld [vmem:[%s2344_s6] sm:$0xff] }
 0x104   :  { %1043 = vadd.xlane.f32.xlu0 %v1042_v59 }
 0x105   :  { %v1021_v18 = vsel %vm951_vm4, %v942_v16, 0.0  ;;  %v1045_v41 = vsel %vm951_vm4, %v950_v17, 0.0 }
 0x106   :  { %1022 = vadd.xlane.f32.xlu1 %v1021_v18 }
 0x108   :  { %1046 = vadd.xlane.f32.xlu0 %v1045_v41 }
 0x117   :  { %1118 = vperm.xlu1 %1697, %v1114_v48  }
 0x11b   :  { %1419 = vperm.xlu1 %1697, %v1415_v30  }
 0x11e   :  { %1123 = vperm.xlu0 %1696, %v1115_v32  }
 0x11f   :  { %1424 = vperm.xlu1 %1697, %v1416_v19  }
 0x122   :  { %1433 = vperm.xlu0 %1696, %v1429_v20  }
 0x123   :  { %1438 = vperm.xlu1 %1697, %v1430_v21  }
 0x126   :  { %1448 = vperm.xlu0 %1696, %v1445_v22  }
 0x127   :  { %1508 = vperm.xlu1 %1697, %v1505_v23  }
 0x12a   :  { %1515 = vperm.xlu0 %1696, %v1512_v14   ;;  %v954_v27 = vpop.xlane.xlu0 %953 }
 0x12b   :  { %1526 = vperm.xlu1 %1697, %v1522_v4   ;;  %v1048_v49 = vmul.f32 0.015625, %v954_v27 }
 0x12d   :  { %v1082_v0 = vpack.c.bf16 %v1048_v49, %v1048_v49 }
 0x12e   :  { %1531 = vperm.xlu0 %1696, %v1523_v26   ;;  %v978_v28 = vpop.xlane.xlu0 %977 }
 0x12f   :  { %v957_v29 = vpop.xlane.xlu1 %956  ;;  %v1056_v50 = vmul.f32 0.015625, %v978_v28  ;;  %v1163_v16 = vunpack.c.l.b16 %v1082_v0 }
 0x130   :  { %v1049_v47 = vmul.f32 0.015625, %v957_v29 }
 0x131   :  { %v1090_v1 = vpack.c.bf16 %v1056_v50, %v1056_v50  ;;  %v1200_v28 = vrot.slane %v1163_v16, %v2250_v53 }
 0x132   :  { %v981_v10 = vpop.xlane.xlu0 %980  ;;  %v1083_v60 = vpack.c.bf16 %v1049_v47, %v1049_v47 }
 0x133   :  { %v960_v11 = vpop.xlane.xlu1 %959  ;;  %v1057_v40 = vmul.f32 0.015625, %v981_v10  ;;  %v1171_v17 = vunpack.c.l.b16 %v1090_v1 }
 0x134   :  { %v1050_v51 = vmul.f32 0.015625, %v960_v11  ;;  %v1164_v12 = vunpack.c.l.b16 %v1083_v60 }
 0x135   :  { %v1091_v61 = vpack.c.bf16 %v1057_v40, %v1057_v40  ;;  %v1232_v29 = vrot.slane %v1171_v17, %v2250_v53 }
 0x136   :  { %v984_v33 = vpop.xlane.xlu0 %983  ;;  %v1084_v6 = vpack.c.bf16 %v1050_v51, %v1050_v51  ;;  %v1204_v14 = vrot.slane %v1164_v12, %v2250_v53 }
 0x137   :  { %v1058_v52 = vmul.f32 0.015625, %v984_v33  ;;  %v1172_v15 = vunpack.c.l.b16 %v1091_v61 }
 0x138   :  { %v1165_v48 = vunpack.c.l.b16 %v1084_v6  ;;  %v1326_v47 = vsel %vm1325_vm3, %v1204_v14, %v1200_v28 }
 0x139   :  { %v1092_v7 = vpack.c.bf16 %v1058_v52, %v1058_v52  ;;  %v1236_v4 = vrot.slane %v1172_v15, %v2250_v53 }
 0x13a   :  { %v1208_v33 = vrot.slane %v1165_v48, %v2250_v53 }
 0x13b   :  { %v1173_v30 = vunpack.c.l.b16 %v1092_v7  ;;  %v1339_v40 = vsel %vm1325_vm3, %v1236_v4, %v1232_v29 }
 0x143   :  { %v963_v34 = vpop.xlane.xlu1 %962  ;;  %v987_v35 = vpop.xlane.xlu0 %986 }
 0x144   :  { %v1051_v54 = vmul.f32 0.015625, %v963_v34  ;;  %v1059_v55 = vmul.f32 0.015625, %v987_v35  ;;  %v1240_v34 = vrot.slane %v1173_v30, %v2250_v53 }
 0x146   :  { %v1085_v24 = vpack.c.bf16 %v1051_v54, %v1051_v54  ;;  %v1093_v13 = vpack.c.bf16 %v1059_v55, %v1059_v55 }
 0x148   :  { %v1166_v22 = vunpack.c.l.b16 %v1085_v24  ;;  %v1174_v23 = vunpack.c.l.b16 %v1093_v13 }
 0x14a   :  { %v1244_v5 = vrot.slane %v1174_v23, %v2250_v53 }
 0x14f   :  { %v966_v36 = vpop.xlane.xlu1 %965  ;;  %v990_v37 = vpop.xlane.xlu0 %989 }
 0x150   :  { %v1052_v62 = vmul.f32 0.015625, %v966_v36  ;;  %v1060_v63 = vmul.f32 0.015625, %v990_v37 }
 0x152   :  { %v1086_v58 = vpack.c.bf16 %v1052_v62, %v1052_v62  ;;  %v1094_v59 = vpack.c.bf16 %v1060_v63, %v1060_v63 }
 0x154   :  { %v1167_v26 = vunpack.c.l.b16 %v1086_v58  ;;  %v1175_v27 = vunpack.c.l.b16 %v1094_v59 }
 0x156   :  { %v1216_v49 = vrot.slane %v1167_v26, %v2250_v53  ;;  %v1248_v50 = vrot.slane %v1175_v27, %v2250_v53 }
 0x15b   :  { %v969_v38 = vpop.xlane.xlu1 %968  ;;  %v993_v39 = vpop.xlane.xlu0 %992 }
 0x15c   :  { %v1053_v2 = vmul.f32 0.015625, %v969_v38  ;;  %v1061_v3 = vmul.f32 0.015625, %v993_v39  ;;  %v1212_v39 = vrot.slane %v1166_v22, %v2250_v53 }
 0x15e   :  { %v1087_v18 = vpack.c.bf16 %v1053_v2, %v1053_v2  ;;  %v1095_v41 = vpack.c.bf16 %v1061_v3, %v1061_v3 }
 0x15f   :  { %v2242_v42 = vpop.xlane.xlu1 %1001 }
 0x160   :  { %v1168_v10 = vunpack.c.l.b16 %v1087_v18  ;;  %v1176_v11 = vunpack.c.l.b16 %v1095_v41  ;;  %v1064_v17 = vmul.f32 0.015625, %v2242_v42 }
 0x161   :  { %v2244_v43 = vpop.xlane.xlu0 %1004 }
 0x162   :  { %v1220_v51 = vrot.slane %v1168_v10, %v2250_v53  ;;  %v1252_v52 = vrot.slane %v1176_v11, %v2250_v53  ;;  %v1065_v18 = vmul.f32 0.015625, %v2244_v43  ;;  %v1098_v22 = vpack.c.bf16 %v1064_v17, %v1064_v17 }
 0x163   :  { %v2246_v45 = vpop.xlane.xlu1 %1025 }
 0x164   :  { %v1072_v41 = vmul.f32 0.015625, %v2246_v45  ;;  %v1099_v23 = vpack.c.bf16 %v1065_v18, %v1065_v18 }
 0x165   :  { %v2248_v46 = vpop.xlane.xlu0 %1028 }
 0x166   :  { %v1073_v48 = vmul.f32 0.015625, %v2248_v46  ;;  %v1106_v28 = vpack.c.bf16 %v1072_v41, %v1072_v41  ;;  %v1180_v46 = vunpack.c.l.b16 %v1099_v23 }
 0x168   :  { %v1107_v29 = vpack.c.bf16 %v1073_v48, %v1073_v48 }
 0x16b   :  { %v972_v57 = vpop.xlane.xlu1 %971  ;;  %v996_v56 = vpop.xlane.xlu0 %995 }
 0x16c   :  { %v1054_v8 = vmul.f32 0.015625, %v972_v57  ;;  %v1062_v9 = vmul.f32 0.015625, %v996_v56  ;;  %v1328_v57 = vsel %vm1327_vm5, %v1208_v33, %v1326_v47  ;;  %v1340_v56 = vsel %vm1327_vm5, %v1240_v34, %v1339_v40 }
 0x16d   :  { %v1330_v62 = vsel %vm1329_vm6, %v1212_v39, %v1328_v57  ;;  %v1341_v63 = vsel %vm1329_vm6, %v1244_v5, %v1340_v56  ;;  %v1179_v34 = vunpack.c.l.b16 %v1098_v22  ;;  %v1188_v39 = vunpack.c.l.b16 %v1107_v29 }
 0x16e   :  { %v1088_v32 = vpack.c.bf16 %v1054_v8, %v1054_v8  ;;  %v1096_v19 = vpack.c.bf16 %v1062_v9, %v1062_v9  ;;  %v1332_v2 = vsel %vm1331_vm7, %v1216_v49, %v1330_v62  ;;  %v1342_v3 = vsel %vm1331_vm7, %v1248_v50, %v1341_v63 }
 0x16f   :  { %v1008_v20 = vpop.xlane.xlu1 %1007  ;;  %v2252_v21 = vpop.xlane.xlu0 %1031  ;;  %v1334_v8 = vsel %vm1333_vm8, %v1220_v51, %v1332_v2  ;;  %v1343_v9 = vsel %vm1333_vm8, %v1252_v52, %v1342_v3  ;;  %v1264_v49 = vrot.slane %v1179_v34, %v2250_v53  ;;  %v1268_v50 = vrot.slane %v1180_v46, %v2250_v53 }
 0x170   :  { %v1169_v35 = vunpack.c.l.b16 %v1088_v32  ;;  %v1177_v36 = vunpack.c.l.b16 %v1096_v19  ;;  %v1066_v19 = vmul.f32 0.015625, %v1008_v20  ;;  %v1074_v14 = vmul.f32 0.015625, %v2252_v21 }
 0x171   :  { %v1300_v62 = vrot.slane %v1188_v39, %v2250_v53 }
 0x172   :  { %v1224_v60 = vrot.slane %v1169_v35, %v2250_v53  ;;  %v1256_v61 = vrot.slane %v1177_v36, %v2250_v53  ;;  %v1100_v43 = vpack.c.bf16 %v1066_v19, %v1066_v19  ;;  %v1108_v35 = vpack.c.bf16 %v1074_v14, %v1074_v14 }
 0x174   :  { %v1336_v24 = vsel %vm1335_vm9, %v1224_v60, %v1334_v8  ;;  %v1344_v13 = vsel %vm1335_vm9, %v1256_v61, %v1343_v9  ;;  %v1189_v51 = vunpack.c.l.b16 %v1108_v35  ;;  %v1346_v8 = vsel %vm1325_vm3, %v1268_v50, %v1264_v49 }
 0x176   :  { %v1304_v9 = vrot.slane %v1189_v51, %v2250_v53 }
 0x177   :  { %v975_v37 = vpop.xlane.xlu1 %974  ;;  %v999_v38 = vpop.xlane.xlu0 %998 }
 0x178   :  { %v1055_v25 = vmul.f32 0.015625, %v975_v37  ;;  %v1063_v44 = vmul.f32 0.015625, %v999_v38  ;;  %v1187_v38 = vunpack.c.l.b16 %v1106_v28 }
 0x17a   :  { %v1089_v54 = vpack.c.bf16 %v1055_v25, %v1055_v25  ;;  %v1097_v55 = vpack.c.bf16 %v1063_v44, %v1063_v44  ;;  %v1181_v44 = vunpack.c.l.b16 %v1100_v43  ;;  %v1296_v61 = vrot.slane %v1187_v38, %v2250_v53 }
 0x17b   :  { %v1011_v59 = vpop.xlane.xlu1 %1010  ;;  %v1035_v16 = vpop.xlane.xlu0 %1034 }
 0x17c   :  { %v1170_v0 = vunpack.c.l.b16 %v1089_v54  ;;  %v1178_v1 = vunpack.c.l.b16 %v1097_v55  ;;  %v1067_v4 = vmul.f32 0.015625, %v1011_v59  ;;  %v1075_v26 = vmul.f32 0.015625, %v1035_v16 }
 0x17d   :  { %v1272_v2 = vrot.slane %v1181_v44, %v2250_v53  ;;  %v1353_v17 = vsel %vm1325_vm3, %v1300_v62, %v1296_v61  ;;  %vm1587_vm3 = vcmask 15360  }
 0x17e   :  { %v1228_v6 = vrot.slane %v1170_v0, %v2250_v53  ;;  %v1260_v7 = vrot.slane %v1178_v1, %v2250_v53  ;;  %v1101_v36 = vpack.c.bf16 %v1067_v4, %v1067_v4  ;;  %v1109_v20 = vpack.c.bf16 %v1075_v26, %v1075_v26 }
 0x17f   :  { %v1354_v23 = vsel %vm1327_vm5, %v1304_v9, %v1353_v17 }
 0x180   :  { %v1338_v12 = vsel %vm1337_vm10, %v1228_v6, %v1336_v24  ;;  %v1345_v15 = vsel %vm1337_vm10, %v1260_v7, %v1344_v13  ;;  %v1182_v52 = vunpack.c.l.b16 %v1101_v36  ;;  %v1190_v55 = vunpack.c.l.b16 %v1109_v20  ;;  %v1698_v20 = vld [vmem:[%s2348_s4] sm:$0x1f]  }
 0x181   :  { %v1360_v58 = vpack.c.b16 %v1345_v15, %v1338_v12 }
 0x182   :  { %v1276_v24 = vrot.slane %v1182_v52, %v2250_v53  ;;  %v1308_v15 = vrot.slane %v1190_v55, %v2250_v53 }
 0x183   :  { %1673 = vmatpush3.bf16.msra.mxu0 %v1360_v58  ;;  %v1014_v30 = vpop.xlane.xlu1 %1013  ;;  %v1038_v32 = vpop.xlane.xlu0 %1037 }
 0x184   :  { %1674 = vmatprep.subr.bf16.mxu0 %v1701_v31  ;;  %v1068_v27 = vmul.f32 0.015625, %v1014_v30  ;;  %v1076_v10 = vmul.f32 0.015625, %v1038_v32  ;;  %v1347_v30 = vsel %vm1327_vm5, %v1272_v2, %v1346_v8  ;;  %vm1589_vm5 = vcmask 9216  }
 0x185   :  { %v1348_v14 = vsel %vm1329_vm6, %v1276_v24, %v1347_v30 }
 0x186   :  { %v1102_v37 = vpack.c.bf16 %v1068_v27, %v1068_v27  ;;  %v1110_v21 = vpack.c.bf16 %v1076_v10, %v1076_v10  ;;  %v1355_v27 = vsel %vm1329_vm6, %v1308_v15, %v1354_v23 }
 0x188   :  { %v1183_v57 = vunpack.c.l.b16 %v1102_v37  ;;  %v1191_v63 = vunpack.c.l.b16 %v1110_v21 }
 0x18a   :  { %v1280_v58 = vrot.slane %v1183_v57, %v2250_v53  ;;  %v1312_v18 = vrot.slane %v1191_v63, %v2250_v53  ;;  %v1703_v57 = vmov 65535  }
 0x18b   :  { %v1017_v42 = vpop.xlane.xlu1 %1016  ;;  %v1041_v11 = vpop.xlane.xlu0 %1040 }
 0x18c   :  { %v1069_v33 = vmul.f32 0.015625, %v1017_v42  ;;  %v1077_v45 = vmul.f32 0.015625, %v1041_v11  ;;  %v1349_v28 = vsel %vm1331_vm7, %v1280_v58, %v1348_v14  ;;  %v1356_v10 = vsel %vm1331_vm7, %v1312_v18, %v1355_v27 }
 0x18e   :  { %v1103_v5 = vpack.c.bf16 %v1069_v33, %v1069_v33  ;;  %v1111_v47 = vpack.c.bf16 %v1077_v45, %v1077_v45 }
 0x18f   :  { %v1020_v25 = vpop.xlane.xlu1 %1019 }
 0x190   :  { %v1070_v40 = vmul.f32 0.015625, %v1020_v25  ;;  %v1184_v0 = vunpack.c.l.b16 %v1103_v5  ;;  %v1192_v3 = vunpack.c.l.b16 %v1111_v47 }
 0x191   :  { %v1044_v54 = vpop.xlane.xlu0 %1043 }
 0x192   :  { %v1104_v56 = vpack.c.bf16 %v1070_v40, %v1070_v40  ;;  %v1078_v60 = vmul.f32 0.015625, %v1044_v54  ;;  %v1284_v41 = vrot.slane %v1184_v0, %v2250_v53  ;;  %v1316_v32 = vrot.slane %v1192_v3, %v2250_v53  ;;  %v1443_v3 = vld [vmem:[%s2351_s8] sm:$0x3] }
 0x193   :  { %v1023_v1 = vpop.xlane.xlu1 %1022 }
 0x194   :  { %v1185_v6 = vunpack.c.l.b16 %v1104_v56  ;;  %v1112_v7 = vpack.c.bf16 %v1078_v60, %v1078_v60  ;;  %v1071_v13 = vmul.f32 0.015625, %v1023_v1  ;;  %v1350_v42 = vsel %vm1333_vm8, %v1284_v41, %v1349_v28 }
 0x195   :  { %v1047_v12 = vpop.xlane.xlu0 %1046  ;;  %v1357_v43 = vsel %vm1333_vm8, %v1316_v32, %v1356_v10  ;;  %v1457_v56 = vsel %vm1455_vm13, 4294967295, %v1703_v57 }
 0x196   :  { %v1193_v59 = vunpack.c.l.b16 %v1112_v7  ;;  %v1079_v16 = vmul.f32 0.015625, %v1047_v12  ;;  %v1105_v48 = vpack.c.bf16 %v1071_v13, %v1071_v13  ;;  %v1288_v19 = vrot.slane %v1185_v6, %v2250_v53 }
 0x197   :  { %v1119_v37 = vpop.permute.xlu1 %1118  ;;  %v1458_v0 = vsel %vm1456_vm15, %v1457_v56, 0 }
 0x198   :  { %v1113_v22 = vpack.c.bf16 %v1079_v16, %v1079_v16  ;;  %v1320_v4 = vrot.slane %v1193_v59, %v2250_v53  ;;  %v1186_v26 = vunpack.c.l.b16 %v1105_v48  ;;  %v1351_v45 = vsel %vm1335_vm9, %v1288_v19, %v1350_v42 }
 0x19a   :  { %v1194_v29 = vunpack.c.l.b16 %v1113_v22  ;;  %v1292_v11 = vrot.slane %v1186_v26, %v2250_v53  ;;  %v1358_v46 = vsel %vm1335_vm9, %v1320_v4, %v1357_v43 }
 0x19b   :  { %v1420_v38 = vpop.permute.xlu1 %1419 }
 0x19c   :  { %v1324_v33 = vrot.slane %v1194_v29, %v2250_v53  ;;  %v1352_v34 = vsel %vm1337_vm10, %v1292_v11, %v1351_v45 }
 0x19d   :  { %v1124_v5 = vpop.permute.xlu0 %1123 }
 0x19e   :  { %v1359_v35 = vsel %vm1337_vm10, %v1324_v33, %v1358_v46 }
 0x19f   :  { %v1361_v36 = vpack.c.b16 %v1359_v35, %v1352_v34  ;;  %v1425_v44 = vpop.permute.xlu1 %1424 }
 0x1a1   :  { %1675 = vmatpush3.bf16.msra.mxu0 %v1361_v36  ;;  %v1434_v60 = vpop.permute.xlu0 %1433 }
 0x1a3   :  { %v1439_v61 = vpop.permute.xlu1 %1438 }
 0x1a4   :  { %1677 = vmatmul.mubr.msk.bf16.vlgmr.msra.gmra.mrb[0].mxu0 %vm1364_vm11, %v1698_v20 }
 0x1a5   :  { %v1449_v6 = vpop.permute.xlu0 %1448 }
 0x1a7   :  { %v1509_v15 = vpop.permute.xlu1 %1508 }
 0x1a9   :  { %v1516_v16 = vpop.permute.xlu0 %1515 }
 0x1ab   :  { %v1527_v48 = vpop.permute.xlu1 %1526 }
 0x1ad   :  { %v1532_v22 = vpop.permute.xlu0 %1531 }
 0x277   :  { %v1402_v39 = vpop.f32.mrb[0].mxu0 }
 0x278   :  { %v1403_v53 = vadd.f32 %v1402_v39, %v1119_v37  ;;  %v1678_v21 = vpop.f32.mrb[1].mxu0 }
 0x279   :  { %v1405_v25 = vpop.f32.mrb[2].mxu0 }
 0x27a   :  { %vm1409_vm12 = vcmp.ge.f32.partialorder %v1403_v53, 0.0  ;;  %v1411_v47 = vmul.f32 0.01, %v1403_v53  ;;  %v1406_v40 = vadd.f32 %v1405_v25, %v1124_v5  ;;  %v1679_v49 = vpop.f32.mrb[3].mxu0 }
 0x27c   :  { %v1413_v50 = vsel %vm1409_vm12, %v1403_v53, %v1411_v47  ;;  %vm1410_vm14 = vcmp.ge.f32.partialorder %v1406_v40, 0.0  ;;  %v1412_v51 = vmul.f32 0.01, %v1406_v40 }
 0x27d   :  { %v1427_v52 = vmul.f32 %v1420_v38, %v1413_v50 }
 0x27e   :  { %v1414_v54 = vsel %vm1410_vm14, %v1406_v40, %v1412_v51 }
 0x27f   :  { %v1428_v55 = vmul.f32 %v1425_v44, %v1414_v54  ;;  %v1441_v62 = vadd.f32 %v1434_v60, %v1427_v52 }
 0x281   :  { %v1442_v63 = vadd.f32 %v1439_v61, %v1428_v55 }
 0x283   :  { %v1444_v1 = vpack.c.bf16 %v1442_v63, %v1441_v62 }
 0x285   :  { %v1460_v2 = vand.u32 %v1458_v0, %v1444_v1 }
 0x287   :  { %1681 = vmatpush3.bf16.msra.mxu1 %v1460_v2 }
 0x288   :  { %1686 = vmatprep.subr.bf16.mxu1 %v1701_v31 }
 0x28a   :  { %1683 = vmatmul.mubr.msk.bf16.vlgmr.msra.gmra.mrb[0].mxu1 %vm1451_vm0, %v1443_v3 }
 0x28b   :  { %1688 = vmatprep.mubr.msk.bf16.mxu1 %vm1702_vm2, %v1701_v31  ;;  %v1699_v31 = vld [vmem:[%s2352_s12] sm:$0x1f]   ;;  %vm1539_vm2 = vcmask 31744  }
 0x35d   :  { %v1496_v7 = vpop.f32.mrb[0].mxu1 }
 0x35e   :  { %v1497_v8 = vadd.f32 %v1496_v7, %v1449_v6  ;;  %v1684_v9 = vpop.f32.mrb[1].mxu1 }
 0x35f   :  { %v1499_v24 = vpop.f32.mrb[2].mxu1 }
 0x360   :  { %vm1502_vm1 = vcmp.ge.f32.partialorder %v1497_v8, 0.0  ;;  %v1503_v13 = vmul.f32 0.01, %v1497_v8  ;;  %v1685_v12 = vpop.f32.mrb[3].mxu1 }
 0x362   :  { %v1504_v58 = vsel %vm1502_vm1, %v1497_v8, %v1503_v13 }
 0x363   :  { %v1511_v59 = vmul.f32 %v1509_v15, %v1504_v58 }
 0x365   :  { %v1518_v17 = vadd.f32 %v1516_v16, %v1511_v59 }
 0x367   :  { %v1521_v18 = vpack.c.bf16 %v1518_v17, %v1518_v17 }
 0x369   :  { %v1544_v41 = vsel %vm951_vm4, %v1521_v18, 0 }
 0x36a   :  { %1687 = vmatpush3.bf16.msra.mxu1 %v1544_v41 }
 0x36d   :  { %1689 = vmatmul.mubr.msk.bf16.vlgmr.msra.gmra.mrb[4].mxu1 %vm1539_vm2, %v1699_v31 }
 0x440   :  { %v1580_v30 = vpop.f32.mrb[4].mxu1 }
 0x441   :  { %v1581_v32 = vadd.f32 %v1580_v30, %v1527_v48  ;;  %v1690_v19 = vpop.f32.mrb[5].mxu1 }
 0x442   :  { %v1583_v23 = vpop.f32.mrb[6].mxu1 }
 0x443   :  { %1588 = vst.msk [vmem:[%s2353_s14] sm:$0xff] %vm1587_vm3, %v1581_v32  ;;  %v1584_v14 = vadd.f32 %v1583_v23, %v1532_v22  ;;  %v1691_v4 = vpop.f32.mrb[7].mxu1 }
 0x445   :  { %1590 = vst.msk [vmem:[%s2353_s14 + $0x8] sm:$0x3] %vm1589_vm5, %v1584_v14 }

</bundles_post_ra>
